<compile_context>
chip_gen: v5e
topology: v5e:2x2
jax: 0.10.0
libtpu: 0.0.40
codegen_flags: <defaults>
</compile_context>

<pallas_src>
import functools

import jax
import jax.numpy as jnp
from jax import lax
from jax.experimental import pallas as pl
from jax.experimental.pallas import tpu as pltpu

BN_EPS = 1e-5                       # PyTorch BatchNorm2d default
VMEM_CAP_BYTES = 48 * 1024 * 1024   # leave headroom on v7x's 64 MiB physical VMEM


def _round_up(v, m):
    return -(-v // m) * m


def _tile_padded_bytes(shape, dtype):
    """Approx VMEM footprint of a buffer after (8, 128) hardware tile padding."""
    itemsize = jnp.dtype(dtype).itemsize
    shape = tuple(int(d) for d in shape)
    if len(shape) == 1:
        shape = (1,) + shape
    lead = 1
    for d in shape[:-2]:
        lead *= d
    return lead * _round_up(shape[-2], 8) * _round_up(shape[-1], 128) * itemsize


def _vmem_limit(entries):
    """entries: iterable of (shape, dtype, copies). 1.5x slack, 48 MiB cap."""
    total = sum(n * _tile_padded_bytes(s, d) for s, d, n in entries)
    return int(min(VMEM_CAP_BYTES, max(int(1.5 * total) + (4 << 20), 8 << 20)))


def _im2col_3x3(xpad, h_out, w_out, stride):
    """(TB, Hp, Wp, C) zero-padded value -> (TB*h_out*w_out, 9*C) patch matrix.

    Tap order (kh, kw, c) matches weights reshaped from HWIO. Per-tile (batch
    tiled) row-blocked im2col: one deep-K matmul per conv, reduction dim kept
    at the REAL channel count (no lane padding of K)."""
    tb, _, _, c = xpad.shape
    span_h = (h_out - 1) * stride + 1
    span_w = (w_out - 1) * stride + 1
    taps = []
    for kh in range(3):
        for kw in range(3):
            taps.append(xpad[:, kh:kh + span_h:stride, kw:kw + span_w:stride, :])
    return jnp.concatenate(taps, axis=-1).reshape(tb * h_out * w_out, 9 * c)


def _channel_sums(y2d):
    """(R, C) f32 -> (1, 2, C) partial [sum ; sum-of-squares] BN statistics."""
    s = jnp.sum(y2d, axis=0, keepdims=True)
    sq = jnp.sum(y2d * y2d, axis=0, keepdims=True)
    return jnp.concatenate([s, sq], axis=0).reshape(1, 2, y2d.shape[-1])


# ---------------------------------------------------------------------------
# Kernel A: conv1 (+ projection-shortcut statistics)
# ---------------------------------------------------------------------------
def _conv1_kernel(*refs, H, W, Cin, Cout, Hout, Wout, stride, has_proj, cdt):
    if has_proj:
        x_ref, w1_ref, ws_ref, y1_ref, s1_ref, ss_ref, xpad_ref = refs
    else:
        x_ref, w1_ref, y1_ref, s1_ref, xpad_ref = refs
    tb = x_ref.shape[0]
    r = tb * Hout * Wout

    # Halo staged in-kernel: one vectorized full-buffer zero store + interior
    # write (no wrapper-side jnp.pad, no narrow masked halo-column stores).
    xpad_ref[...] = jnp.zeros_like(xpad_ref)
    xpad_ref[:, pl.ds(1, H), pl.ds(1, W), :] = x_ref[...].astype(cdt)

    p1 = _im2col_3x3(xpad_ref[...], Hout, Wout, stride)             # (r, 9*Cin)
    y1 = jnp.dot(p1, w1_ref[...], preferred_element_type=jnp.float32)
    y1_ref[...] = y1.reshape(tb, Hout, Wout, Cout).astype(y1_ref.dtype)
    s1_ref[...] = _channel_sums(y1)                                 # f32 partials

    if has_proj:
        # 1x1 projection conv: only its batch statistics are needed in this
        # pass; the (cheap) conv itself is recomputed in the finalize kernel.
        xs = x_ref[...][:, ::stride, ::stride, :]
        sc = jnp.dot(xs.reshape(r, Cin).astype(cdt), ws_ref[...],
                     preferred_element_type=jnp.float32)
        ss_ref[...] = _channel_sums(sc)


# ---------------------------------------------------------------------------
# Kernel B: apply bn1 (hoisted scale/shift FMA) + relu, conv2, bn2 statistics
# ---------------------------------------------------------------------------
def _conv2_kernel(y1_ref, sc1_ref, sh1_ref, w2_ref, y2_ref, s2_ref, mid_ref,
                  *, Hout, Wout, Cout, cdt):
    tb = y1_ref.shape[0]
    r = tb * Hout * Wout

    a1 = jnp.maximum(
        y1_ref[...].astype(jnp.float32).reshape(r, Cout) * sc1_ref[...]
        + sh1_ref[...], 0.0)

    mid_ref[...] = jnp.zeros_like(mid_ref)
    mid_ref[:, pl.ds(1, Hout), pl.ds(1, Wout), :] = (
        a1.reshape(tb, Hout, Wout, Cout).astype(cdt))

    p2 = _im2col_3x3(mid_ref[...], Hout, Wout, 1)           # (r, 9*Cout), K unpadded
    y2 = jnp.dot(p2, w2_ref[...], preferred_element_type=jnp.float32)
    y2_ref[...] = y2.reshape(tb, Hout, Wout, Cout).astype(y2_ref.dtype)
    s2_ref[...] = _channel_sums(y2)


# ---------------------------------------------------------------------------
# Kernel C: apply bn2, shortcut (identity or 1x1 conv + bn_s), add, relu
# ---------------------------------------------------------------------------
def _finalize_kernel(*refs, Hout, Wout, Cin, Cout, stride, has_proj, cdt):
    if has_proj:
        y2_ref, x_ref, sc2_ref, sh2_ref, ws_ref, scs_ref, shs_ref, out_ref = refs
    else:
        y2_ref, x_ref, sc2_ref, sh2_ref, out_ref = refs
    tb = y2_ref.shape[0]
    r = tb * Hout * Wout

    y2 = (y2_ref[...].astype(jnp.float32).reshape(r, Cout) * sc2_ref[...]
          + sh2_ref[...])

    if has_proj:
        xs = x_ref[...][:, ::stride, ::stride, :]
        sc = jnp.dot(xs.reshape(r, Cin).astype(cdt), ws_ref[...],
                     preferred_element_type=jnp.float32)
        sc = sc * scs_ref[...] + shs_ref[...]
    else:
        sc = x_ref[...].reshape(r, Cout)    # identity: stride == 1 and Cin == Cout

    out_ref[...] = jnp.maximum(y2 + sc, 0.0).reshape(
        tb, Hout, Wout, Cout).astype(out_ref.dtype)


# ---------------------------------------------------------------------------
# XLA glue: fold per-tile sum/sumsq into hoisted BN scale/shift
# ---------------------------------------------------------------------------
def _fold_bn_stats(stats, gamma, beta, count):
    s = jnp.sum(stats[:, 0, :], axis=0)
    sq = jnp.sum(stats[:, 1, :], axis=0)
    mu = s / count
    var = jnp.maximum(sq / count - mu * mu, 0.0)      # biased batch variance
    scale = gamma.astype(jnp.float32) * lax.rsqrt(var + BN_EPS)
    shift = beta.astype(jnp.float32) - mu * scale
    return scale.reshape(1, -1), shift.reshape(1, -1)


# ---------------------------------------------------------------------------
# Forward (NHWC end-to-end; no layout round trips, no wrapper padding)
# ---------------------------------------------------------------------------
@functools.partial(jax.jit, static_argnames=("stride", "compute_dtype"))
def basic_block_forward_nhwc(x_nhwc, params, stride=1, compute_dtype=jnp.bfloat16):
    N, H, W, Cin = x_nhwc.shape
    Cout = params["w1"].shape[-1]
    Hout = (H - 1) // stride + 1
    Wout = (W - 1) // stride + 1
    has_proj = (stride != 1) or (Cin != Cout)
    cdt = compute_dtype
    inter_dt = cdt                       # intermediate-activation storage dtype
    Rtot = N * Hout * Wout
    Rtile = Hout * Wout                  # rows per grid step (1 image / step)
    grid = (N,)

    x = x_nhwc.astype(jnp.float32)
    w1 = params["w1"].reshape(9 * Cin, Cout).astype(cdt)
    w2 = params["w2"].reshape(9 * Cout, Cout).astype(cdt)

    # -------------------- kernel A: conv1 (+ proj stats) --------------------
    a_inputs = [x, w1]
    a_in_specs = [
        pl.BlockSpec((1, H, W, Cin), lambda i: (i, 0, 0, 0)),
        pl.BlockSpec((9 * Cin, Cout), lambda i: (0, 0)),   # weights stay resident
    ]
    a_out_shape = [jax.ShapeDtypeStruct((N, Hout, Wout, Cout), inter_dt),
                   jax.ShapeDtypeStruct((N, 2, Cout), jnp.float32)]
    a_out_specs = [pl.BlockSpec((1, Hout, Wout, Cout), lambda i: (i, 0, 0, 0)),
                   pl.BlockSpec((1, 2, Cout), lambda i: (i, 0, 0))]
    a_bufs = [((1, H, W, Cin), jnp.float32, 2),
              ((9 * Cin, Cout), cdt, 2),
              ((1, Hout, Wout, Cout), inter_dt, 2),
              ((1, 2, Cout), jnp.float32, 2),
              ((1, H + 2, W + 2, Cin), cdt, 1),
              ((Rtile, 9 * Cin), cdt, 2)]
    if has_proj:
        ws = params["ws"].reshape(Cin, Cout).astype(cdt)
        a_inputs.append(ws)
        a_in_specs.append(pl.BlockSpec((Cin, Cout), lambda i: (0, 0)))
        a_out_shape.append(jax.ShapeDtypeStruct((N, 2, Cout), jnp.float32))
        a_out_specs.append(pl.BlockSpec((1, 2, Cout), lambda i: (i, 0, 0)))
        a_bufs += [((Cin, Cout), cdt, 2), ((1, 2, Cout), jnp.float32, 2),
                   ((Rtile, Cin), cdt, 1)]

    a_out = pl.pallas_call(
        functools.partial(_conv1_kernel, H=H, W=W, Cin=Cin, Cout=Cout,
                          Hout=Hout, Wout=Wout, stride=stride,
                          has_proj=has_proj, cdt=cdt),
        grid=grid,
        in_specs=a_in_specs,
        out_specs=tuple(a_out_specs),
        out_shape=tuple(a_out_shape),
        scratch_shapes=[pltpu.VMEM((1, H + 2, W + 2, Cin), cdt)],
        compiler_params=pltpu.CompilerParams(
            dimension_semantics=("parallel",),
            vmem_limit_bytes=_vmem_limit(a_bufs)),
    )(*a_inputs)
    if has_proj:
        y1_raw, stats1, stats_s = a_out
    else:
        y1_raw, stats1 = a_out

    scale1, shift1 = _fold_bn_stats(stats1, params["g1"], params["b1"], Rtot)

    # -------------------- kernel B: bn1 + relu + conv2 ----------------------
    b_in_specs = [
        pl.BlockSpec((1, Hout, Wout, Cout), lambda i: (i, 0, 0, 0)),
        pl.BlockSpec((1, Cout), lambda i: (0, 0)),
        pl.BlockSpec((1, Cout), lambda i: (0, 0)),
        pl.BlockSpec((9 * Cout, Cout), lambda i: (0, 0)),
    ]
    b_bufs = [((1, Hout, Wout, Cout), inter_dt, 4),
              ((1, Cout), jnp.float32, 4),
              ((9 * Cout, Cout), cdt, 2),
              ((1, 2, Cout), jnp.float32, 2),
              ((1, Hout + 2, Wout + 2, Cout), cdt, 1),
              ((Rtile, 9 * Cout), cdt, 2),
              ((Rtile, Cout), jnp.float32, 2)]
    y2_raw, stats2 = pl.pallas_call(
        functools.partial(_conv2_kernel, Hout=Hout, Wout=Wout, Cout=Cout, cdt=cdt),
        grid=grid,
        in_specs=b_in_specs,
        out_specs=(pl.BlockSpec((1, Hout, Wout, Cout), lambda i: (i, 0, 0, 0)),
                   pl.BlockSpec((1, 2, Cout), lambda i: (i, 0, 0))),
        out_shape=(jax.ShapeDtypeStruct((N, Hout, Wout, Cout), inter_dt),
                   jax.ShapeDtypeStruct((N, 2, Cout), jnp.float32)),
        scratch_shapes=[pltpu.VMEM((1, Hout + 2, Wout + 2, Cout), cdt)],
        compiler_params=pltpu.CompilerParams(
            dimension_semantics=("parallel",),
            vmem_limit_bytes=_vmem_limit(b_bufs)),
    )(y1_raw, scale1, shift1, w2)

    scale2, shift2 = _fold_bn_stats(stats2, params["g2"], params["b2"], Rtot)

    # -------------------- kernel C: bn2 + shortcut + relu -------------------
    c_inputs = [y2_raw, x, scale2, shift2]
    c_in_specs = [
        pl.BlockSpec((1, Hout, Wout, Cout), lambda i: (i, 0, 0, 0)),
        pl.BlockSpec((1, H, W, Cin), lambda i: (i, 0, 0, 0)),
        pl.BlockSpec((1, Cout), lambda i: (0, 0)),
        pl.BlockSpec((1, Cout), lambda i: (0, 0)),
    ]
    c_bufs = [((1, Hout, Wout, Cout), inter_dt, 2),
              ((1, H, W, Cin), jnp.float32, 2),
              ((1, Cout), jnp.float32, 4),
              ((1, Hout, Wout, Cout), jnp.float32, 2),
              ((Rtile, Cout), jnp.float32, 2)]
    if has_proj:
        scale_s, shift_s = _fold_bn_stats(stats_s, params["gs"], params["bs"], Rtot)
        c_inputs += [ws, scale_s, shift_s]
        c_in_specs += [pl.BlockSpec((Cin, Cout), lambda i: (0, 0)),
                       pl.BlockSpec((1, Cout), lambda i: (0, 0)),
                       pl.BlockSpec((1, Cout), lambda i: (0, 0))]
        c_bufs += [((Cin, Cout), cdt, 2), ((1, Cout), jnp.float32, 4),
                   ((Rtile, Cin), cdt, 1)]

    out = pl.pallas_call(
        functools.partial(_finalize_kernel, Hout=Hout, Wout=Wout, Cin=Cin,
                          Cout=Cout, stride=stride, has_proj=has_proj, cdt=cdt),
        grid=grid,
        in_specs=c_in_specs,
        out_specs=pl.BlockSpec((1, Hout, Wout, Cout), lambda i: (i, 0, 0, 0)),
        out_shape=jax.ShapeDtypeStruct((N, Hout, Wout, Cout), jnp.float32),
        compiler_params=pltpu.CompilerParams(
            dimension_semantics=("parallel",),
            vmem_limit_bytes=_vmem_limit(c_bufs)),
    )(*c_inputs)
    return out


def basic_block_forward(x_nchw, params, stride=1, compute_dtype=jnp.bfloat16):
    """NCHW boundary shim (PyTorch-module parity). A full ResNet should stay
    NHWC end-to-end and call basic_block_forward_nhwc directly, avoiding the
    two HBM transpose passes per block."""
    x = jnp.transpose(x_nchw, (0, 2, 3, 1))
    out = basic_block_forward_nhwc(x, params, stride=stride,
                                   compute_dtype=compute_dtype)
    return jnp.transpose(out, (0, 3, 1, 2))


# ---------------------------------------------------------------------------
# Parameters + pure-JAX reference (XLA convs) mirroring BasicBlock.forward
# ---------------------------------------------------------------------------
def init_params(key, in_planes, planes, stride):
    ks = jax.random.split(key, 9)

    def conv_w(k, kh, kw, cin, cout):  # HWIO layout
        fan_in = kh * kw * cin
        return jax.random.normal(k, (kh, kw, cin, cout), jnp.float32) * jnp.sqrt(2.0 / fan_in)

    p = {
        "w1": conv_w(ks[0], 3, 3, in_planes, planes),
        "g1": 1.0 + 0.1 * jax.random.normal(ks[1], (planes,), jnp.float32),
        "b1": 0.1 * jax.random.normal(ks[2], (planes,), jnp.float32),
        "w2": conv_w(ks[3], 3, 3, planes, planes),
        "g2": 1.0 + 0.1 * jax.random.normal(ks[4], (planes,), jnp.float32),
        "b2": 0.1 * jax.random.normal(ks[5], (planes,), jnp.float32),
    }
    if stride != 1 or in_planes != planes:
        p["ws"] = conv_w(ks[6], 1, 1, in_planes, planes)
        p["gs"] = 1.0 + 0.1 * jax.random.normal(ks[7], (planes,), jnp.float32)
        p["bs"] = 0.1 * jax.random.normal(ks[8], (planes,), jnp.float32)
    return p


def reference_forward(x_nchw, params, stride):
    x = jnp.transpose(x_nchw, (0, 2, 3, 1)).astype(jnp.float32)
    dn = ("NHWC", "HWIO", "NHWC")

    def bn(y, g, b):
        mu = jnp.mean(y, axis=(0, 1, 2), keepdims=True)
        var = jnp.mean((y - mu) ** 2, axis=(0, 1, 2), keepdims=True)
        return (y - mu) * lax.rsqrt(var + BN_EPS) * g + b

    y = lax.conv_general_dilated(x, params["w1"], (stride, stride),
                                 ((1, 1), (1, 1)), dimension_numbers=dn,
                                 precision=lax.Precision.HIGHEST)
    y = jnp.maximum(bn(y, params["g1"], params["b1"]), 0.0)
    y = lax.conv_general_dilated(y, params["w2"], (1, 1),
                                 ((1, 1), (1, 1)), dimension_numbers=dn,
                                 precision=lax.Precision.HIGHEST)
    y = bn(y, params["g2"], params["b2"])
    if "ws" in params:
        sc = lax.conv_general_dilated(x, params["ws"], (stride, stride),
                                      ((0, 0), (0, 0)), dimension_numbers=dn,
                                      precision=lax.Precision.HIGHEST)
        sc = bn(sc, params["gs"], params["bs"])
    else:
        sc = x
    out = jnp.maximum(y + sc, 0.0)
    return jnp.transpose(out, (0, 3, 1, 2))


if __name__ == "__main__":
    key = jax.random.PRNGKey(0)
    configs = [
        # (N, in_planes, planes, H, W, stride)
        (2, 4, 8, 16, 16, 1),   # projection shortcut (1x1 conv + BN)
        (2, 8, 8, 16, 16, 1),   # identity shortcut
    ]
    for idx, (N, cin, planes, H, W, stride) in enumerate(configs):
        kx, kp, key = jax.random.split(key, 3)
        x = jax.random.normal(kx, (N, cin, H, W), jnp.float32)
        params = init_params(kp, cin, planes, stride)
        ref = reference_forward(x, params, stride)

        # f32 compute path: bit-exact-ish vs the XLA reference.
        out_f32 = jax.block_until_ready(
            basic_block_forward(x, params, stride, compute_dtype=jnp.float32))
        assert out_f32.shape == ref.shape == (N, planes, H // stride, W // stride)
        err_f32 = float(jnp.max(jnp.abs(out_f32 - ref)))
        assert err_f32 < 1e-2, f"config {idx} (f32): max abs err {err_f32}"

        # bf16 MXU-operand path (f32 accumulation / f32 BN stats): expect
        # ~1e-2-scale absolute error on O(1) activations after two convs.
        out_bf16 = jax.block_until_ready(
            basic_block_forward(x, params, stride, compute_dtype=jnp.bfloat16))
        max_bf = float(jnp.max(jnp.abs(out_bf16 - ref)))
        mean_bf = float(jnp.mean(jnp.abs(out_bf16 - ref)))
        assert max_bf < 3e-1 and mean_bf < 4e-2, (
            f"config {idx} (bf16): max {max_bf} mean {mean_bf}")
    print("KERNEL_OK")
</pallas_src>

<mosaic_0001>
module attributes {stable_mosaic.version = 11 : i64} {
  func.func @_conv1_kernel(%arg0: i32, %arg1: memref<1x16x16x4xf32, #tpu.memory_space<vmem>>, %arg2: memref<36x8xf32, #tpu.memory_space<vmem>>, %arg3: memref<4x8xf32, #tpu.memory_space<vmem>>, %arg4: memref<1x16x16x8xf32, #tpu.memory_space<vmem>>, %arg5: memref<1x2x8xf32, #tpu.memory_space<vmem>>, %arg6: memref<1x2x8xf32, #tpu.memory_space<vmem>>, %arg7: memref<1x18x18x4xf32, #tpu.memory_space<vmem>>) attributes {dimension_semantics = [#tpu.dimension_semantics<parallel>], iteration_bounds = array<i64: 2>, scalar_prefetch = 0 : i64, scratch_operands = 1 : i64, tpu.core_type = #tpu.core_type<tc>, window_params = [{transform_indices = @transform_0, window_bounds = array<i64: 1, 16, 16, 4>}, {pipeline_mode = #tpu.pipeline_mode<synchronous>, transform_indices = @transform_1, window_bounds = array<i64: 36, 8>}, {pipeline_mode = #tpu.pipeline_mode<synchronous>, transform_indices = @transform_2, window_bounds = array<i64: 4, 8>}, {transform_indices = @transform_3, window_bounds = array<i64: 1, 16, 16, 8>}, {transform_indices = @transform_4, window_bounds = array<i64: 1, 2, 8>}, {transform_indices = @transform_5, window_bounds = array<i64: 1, 2, 8>}]} {
    %cst = arith.constant 0.000000e+00 : f32
    %0 = vector.broadcast %cst : f32 to vector<1x18x18x4xf32>
    %c0 = arith.constant 0 : index
    %c0_0 = arith.constant 0 : index
    %c0_1 = arith.constant 0 : index
    %c0_2 = arith.constant 0 : index
    %1 = vector.load %arg7[%c0, %c0_0, %c0_1, %c0_2] : memref<1x18x18x4xf32, #tpu.memory_space<vmem>>, vector<1x18x18x4xf32>
    tpu.vector_store %arg7[%c0, %c0_0, %c0_1, %c0_2], %0 {strides = array<i32>} : memref<1x18x18x4xf32, #tpu.memory_space<vmem>>, vector<1x18x18x4xf32>,
    %c0_3 = arith.constant 0 : index
    %c0_4 = arith.constant 0 : index
    %c0_5 = arith.constant 0 : index
    %c0_6 = arith.constant 0 : index
    %2 = vector.load %arg1[%c0_3, %c0_4, %c0_5, %c0_6] : memref<1x16x16x4xf32, #tpu.memory_space<vmem>>, vector<1x16x16x4xf32>
    %c0_7 = arith.constant 0 : index
    %c1 = arith.constant 1 : index
    %c1_8 = arith.constant 1 : index
    %c0_9 = arith.constant 0 : index
    %3 = vector.load %arg7[%c0_7, %c1, %c1_8, %c0_9] : memref<1x18x18x4xf32, #tpu.memory_space<vmem>>, vector<1x16x16x4xf32>
    tpu.vector_store %arg7[%c0_7, %c1, %c1_8, %c0_9], %2 {strides = array<i32>} : memref<1x18x18x4xf32, #tpu.memory_space<vmem>>, vector<1x16x16x4xf32>,
    %c0_10 = arith.constant 0 : index
    %c0_11 = arith.constant 0 : index
    %c0_12 = arith.constant 0 : index
    %c0_13 = arith.constant 0 : index
    %4 = vector.load %arg7[%c0_10, %c0_11, %c0_12, %c0_13] : memref<1x18x18x4xf32, #tpu.memory_space<vmem>>, vector<1x18x18x4xf32>
    %5 = vector.extract_strided_slice %4 {offsets = [0, 0, 0, 0], sizes = [1, 16, 16, 4], strides = [1, 1, 1, 1]} : vector<1x18x18x4xf32> to vector<1x16x16x4xf32>
    %6 = vector.extract_strided_slice %4 {offsets = [0, 0, 1, 0], sizes = [1, 16, 16, 4], strides = [1, 1, 1, 1]} : vector<1x18x18x4xf32> to vector<1x16x16x4xf32>
    %7 = vector.extract_strided_slice %4 {offsets = [0, 0, 2, 0], sizes = [1, 16, 16, 4], strides = [1, 1, 1, 1]} : vector<1x18x18x4xf32> to vector<1x16x16x4xf32>
    %8 = vector.extract_strided_slice %4 {offsets = [0, 1, 0, 0], sizes = [1, 16, 16, 4], strides = [1, 1, 1, 1]} : vector<1x18x18x4xf32> to vector<1x16x16x4xf32>
    %9 = vector.extract_strided_slice %4 {offsets = [0, 1, 1, 0], sizes = [1, 16, 16, 4], strides = [1, 1, 1, 1]} : vector<1x18x18x4xf32> to vector<1x16x16x4xf32>
    %10 = vector.extract_strided_slice %4 {offsets = [0, 1, 2, 0], sizes = [1, 16, 16, 4], strides = [1, 1, 1, 1]} : vector<1x18x18x4xf32> to vector<1x16x16x4xf32>
    %11 = vector.extract_strided_slice %4 {offsets = [0, 2, 0, 0], sizes = [1, 16, 16, 4], strides = [1, 1, 1, 1]} : vector<1x18x18x4xf32> to vector<1x16x16x4xf32>
    %12 = vector.extract_strided_slice %4 {offsets = [0, 2, 1, 0], sizes = [1, 16, 16, 4], strides = [1, 1, 1, 1]} : vector<1x18x18x4xf32> to vector<1x16x16x4xf32>
    %13 = vector.extract_strided_slice %4 {offsets = [0, 2, 2, 0], sizes = [1, 16, 16, 4], strides = [1, 1, 1, 1]} : vector<1x18x18x4xf32> to vector<1x16x16x4xf32>
    %14 = tpu.concatenate %5, %6, %7, %8, %9, %10, %11, %12, %13 in 3 : vector<1x16x16x4xf32>, vector<1x16x16x4xf32>, vector<1x16x16x4xf32>, vector<1x16x16x4xf32>, vector<1x16x16x4xf32>, vector<1x16x16x4xf32>, vector<1x16x16x4xf32>, vector<1x16x16x4xf32>, vector<1x16x16x4xf32> -> vector<1x16x16x36xf32>
    %15 = vector.shape_cast %14 : vector<1x16x16x36xf32> to vector<256x36xf32>
    %c0_14 = arith.constant 0 : index
    %c0_15 = arith.constant 0 : index
    %16 = vector.load %arg2[%c0_14, %c0_15] : memref<36x8xf32, #tpu.memory_space<vmem>>, vector<36x8xf32>
    %cst_16 = arith.constant dense<0.000000e+00> : vector<256x8xf32>
    %17 = tpu.matmul %15, %16, %cst_16 {dimension_numbers = #tpu.dot_dimension_numbers<[1], [0], [0], [1], [0, 0, 1, 1], [], []>} : vector<256x36xf32>, vector<36x8xf32>, vector<256x8xf32> -> vector<256x8xf32>
    %18 = vector.shape_cast %17 : vector<256x8xf32> to vector<1x16x16x8xf32>
    %c0_17 = arith.constant 0 : index
    %c0_18 = arith.constant 0 : index
    %c0_19 = arith.constant 0 : index
    %c0_20 = arith.constant 0 : index
    %19 = vector.load %arg4[%c0_17, %c0_18, %c0_19, %c0_20] : memref<1x16x16x8xf32, #tpu.memory_space<vmem>>, vector<1x16x16x8xf32>
    tpu.vector_store %arg4[%c0_17, %c0_18, %c0_19, %c0_20], %18 {strides = array<i32>} : memref<1x16x16x8xf32, #tpu.memory_space<vmem>>, vector<1x16x16x8xf32>,
    %cst_21 = arith.constant dense<0.000000e+00> : vector<8xf32>
    %20 = vector.multi_reduction <add>, %17, %cst_21 [0] : vector<256x8xf32> to vector<8xf32>
    %21 = vector.shape_cast %20 : vector<8xf32> to vector<1x8xf32>
    %22 = arith.mulf %17, %17 : vector<256x8xf32>
    %cst_22 = arith.constant dense<0.000000e+00> : vector<8xf32>
    %23 = vector.multi_reduction <add>, %22, %cst_22 [0] : vector<256x8xf32> to vector<8xf32>
    %24 = vector.shape_cast %23 : vector<8xf32> to vector<1x8xf32>
    %25 = tpu.concatenate %21, %24 in 0 : vector<1x8xf32>, vector<1x8xf32> -> vector<2x8xf32>
    %26 = vector.shape_cast %25 : vector<2x8xf32> to vector<1x2x8xf32>
    %c0_23 = arith.constant 0 : index
    %c0_24 = arith.constant 0 : index
    %c0_25 = arith.constant 0 : index
    %27 = vector.load %arg5[%c0_23, %c0_24, %c0_25] : memref<1x2x8xf32, #tpu.memory_space<vmem>>, vector<1x2x8xf32>
    tpu.vector_store %arg5[%c0_23, %c0_24, %c0_25], %26 {strides = array<i32>} : memref<1x2x8xf32, #tpu.memory_space<vmem>>, vector<1x2x8xf32>,
    %c0_26 = arith.constant 0 : index
    %c0_27 = arith.constant 0 : index
    %c0_28 = arith.constant 0 : index
    %c0_29 = arith.constant 0 : index
    %28 = vector.load %arg1[%c0_26, %c0_27, %c0_28, %c0_29] : memref<1x16x16x4xf32, #tpu.memory_space<vmem>>, vector<1x16x16x4xf32>
    %29 = vector.shape_cast %28 : vector<1x16x16x4xf32> to vector<256x4xf32>
    %c0_30 = arith.constant 0 : index
    %c0_31 = arith.constant 0 : index
    %30 = vector.load %arg3[%c0_30, %c0_31] : memref<4x8xf32, #tpu.memory_space<vmem>>, vector<4x8xf32>
    %cst_32 = arith.constant dense<0.000000e+00> : vector<256x8xf32>
    %31 = tpu.matmul %29, %30, %cst_32 {dimension_numbers = #tpu.dot_dimension_numbers<[1], [0], [0], [1], [0, 0, 1, 1], [], []>} : vector<256x4xf32>, vector<4x8xf32>, vector<256x8xf32> -> vector<256x8xf32>
    %cst_33 = arith.constant dense<0.000000e+00> : vector<8xf32>
    %32 = vector.multi_reduction <add>, %31, %cst_33 [0] : vector<256x8xf32> to vector<8xf32>
    %33 = vector.shape_cast %32 : vector<8xf32> to vector<1x8xf32>
    %34 = arith.mulf %31, %31 : vector<256x8xf32>
    %cst_34 = arith.constant dense<0.000000e+00> : vector<8xf32>
    %35 = vector.multi_reduction <add>, %34, %cst_34 [0] : vector<256x8xf32> to vector<8xf32>
    %36 = vector.shape_cast %35 : vector<8xf32> to vector<1x8xf32>
    %37 = tpu.concatenate %33, %36 in 0 : vector<1x8xf32>, vector<1x8xf32> -> vector<2x8xf32>
    %38 = vector.shape_cast %37 : vector<2x8xf32> to vector<1x2x8xf32>
    %c0_35 = arith.constant 0 : index
    %c0_36 = arith.constant 0 : index
    %c0_37 = arith.constant 0 : index
    %39 = vector.load %arg6[%c0_35, %c0_36, %c0_37] : memref<1x2x8xf32, #tpu.memory_space<vmem>>, vector<1x2x8xf32>
    tpu.vector_store %arg6[%c0_35, %c0_36, %c0_37], %38 {strides = array<i32>} : memref<1x2x8xf32, #tpu.memory_space<vmem>>, vector<1x2x8xf32>,
    return
  }
  func.func @transform_0(%arg0: i32) -> (i32, i32, i32, i32) {
    %c0_i32 = arith.constant 0 : i32
    %c0_i32_0 = arith.constant 0 : i32
    %c0_i32_1 = arith.constant 0 : i32
    %c0_i32_2 = arith.constant 0 : i32
    return %arg0, %c0_i32, %c0_i32_0, %c0_i32_1 : i32, i32, i32, i32
  }
  func.func @transform_1(%arg0: i32) -> (i32, i32) {
    %c0_i32 = arith.constant 0 : i32
    %c0_i32_0 = arith.constant 0 : i32
    %c0_i32_1 = arith.constant 0 : i32
    return %c0_i32, %c0_i32_0 : i32, i32
  }
  func.func @transform_2(%arg0: i32) -> (i32, i32) {
    %c0_i32 = arith.constant 0 : i32
    %c0_i32_0 = arith.constant 0 : i32
    %c0_i32_1 = arith.constant 0 : i32
    return %c0_i32, %c0_i32_0 : i32, i32
  }
  func.func @transform_3(%arg0: i32) -> (i32, i32, i32, i32) {
    %c0_i32 = arith.constant 0 : i32
    %c0_i32_0 = arith.constant 0 : i32
    %c0_i32_1 = arith.constant 0 : i32
    %c0_i32_2 = arith.constant 0 : i32
    return %arg0, %c0_i32, %c0_i32_0, %c0_i32_1 : i32, i32, i32, i32
  }
  func.func @transform_4(%arg0: i32) -> (i32, i32, i32) {
    %c0_i32 = arith.constant 0 : i32
    %c0_i32_0 = arith.constant 0 : i32
    %c0_i32_1 = arith.constant 0 : i32
    return %arg0, %c0_i32, %c0_i32_0 : i32, i32, i32
  }
  func.func @transform_5(%arg0: i32) -> (i32, i32, i32) {
    %c0_i32 = arith.constant 0 : i32
    %c0_i32_0 = arith.constant 0 : i32
    %c0_i32_1 = arith.constant 0 : i32
    return %arg0, %c0_i32, %c0_i32_0 : i32, i32, i32
  }
}

module attributes {stable_mosaic.version = 11 : i64} {
  func.func @_conv2_kernel(%arg0: i32, %arg1: memref<1x16x16x8xf32, #tpu.memory_space<vmem>>, %arg2: memref<1x8xf32, #tpu.memory_space<vmem>>, %arg3: memref<1x8xf32, #tpu.memory_space<vmem>>, %arg4: memref<72x8xf32, #tpu.memory_space<vmem>>, %arg5: memref<1x16x16x8xf32, #tpu.memory_space<vmem>>, %arg6: memref<1x2x8xf32, #tpu.memory_space<vmem>>, %arg7: memref<1x18x18x8xf32, #tpu.memory_space<vmem>>) attributes {dimension_semantics = [#tpu.dimension_semantics<parallel>], iteration_bounds = array<i64: 2>, scalar_prefetch = 0 : i64, scratch_operands = 1 : i64, tpu.core_type = #tpu.core_type<tc>, window_params = [{transform_indices = @transform_0, window_bounds = array<i64: 1, 16, 16, 8>}, {pipeline_mode = #tpu.pipeline_mode<synchronous>, transform_indices = @transform_1, window_bounds = array<i64: 1, 8>}, {pipeline_mode = #tpu.pipeline_mode<synchronous>, transform_indices = @transform_2, window_bounds = array<i64: 1, 8>}, {pipeline_mode = #tpu.pipeline_mode<synchronous>, transform_indices = @transform_3, window_bounds = array<i64: 72, 8>}, {transform_indices = @transform_4, window_bounds = array<i64: 1, 16, 16, 8>}, {transform_indices = @transform_5, window_bounds = array<i64: 1, 2, 8>}]} {
    %c0 = arith.constant 0 : index
    %c0_0 = arith.constant 0 : index
    %c0_1 = arith.constant 0 : index
    %c0_2 = arith.constant 0 : index
    %0 = vector.load %arg1[%c0, %c0_0, %c0_1, %c0_2] : memref<1x16x16x8xf32, #tpu.memory_space<vmem>>, vector<1x16x16x8xf32>
    %1 = vector.shape_cast %0 : vector<1x16x16x8xf32> to vector<256x8xf32>
    %c0_3 = arith.constant 0 : index
    %c0_4 = arith.constant 0 : index
    %2 = vector.load %arg2[%c0_3, %c0_4] : memref<1x8xf32, #tpu.memory_space<vmem>>, vector<1x8xf32>
    %3 = vector.broadcast %2 : vector<1x8xf32> to vector<256x8xf32>
    %4 = arith.mulf %1, %3 : vector<256x8xf32>
    %c0_5 = arith.constant 0 : index
    %c0_6 = arith.constant 0 : index
    %5 = vector.load %arg3[%c0_5, %c0_6] : memref<1x8xf32, #tpu.memory_space<vmem>>, vector<1x8xf32>
    %6 = vector.broadcast %5 : vector<1x8xf32> to vector<256x8xf32>
    %7 = arith.addf %4, %6 : vector<256x8xf32>
    %cst = arith.constant 0.000000e+00 : f32
    %8 = vector.broadcast %cst : f32 to vector<256x8xf32>
    %9 = arith.maximumf %7, %8 : vector<256x8xf32>
    %cst_7 = arith.constant 0.000000e+00 : f32
    %10 = vector.broadcast %cst_7 : f32 to vector<1x18x18x8xf32>
    %c0_8 = arith.constant 0 : index
    %c0_9 = arith.constant 0 : index
    %c0_10 = arith.constant 0 : index
    %c0_11 = arith.constant 0 : index
    %11 = vector.load %arg7[%c0_8, %c0_9, %c0_10, %c0_11] : memref<1x18x18x8xf32, #tpu.memory_space<vmem>>, vector<1x18x18x8xf32>
    tpu.vector_store %arg7[%c0_8, %c0_9, %c0_10, %c0_11], %10 {strides = array<i32>} : memref<1x18x18x8xf32, #tpu.memory_space<vmem>>, vector<1x18x18x8xf32>,
    %12 = vector.shape_cast %9 : vector<256x8xf32> to vector<1x16x16x8xf32>
    %c0_12 = arith.constant 0 : index
    %c1 = arith.constant 1 : index
    %c1_13 = arith.constant 1 : index
    %c0_14 = arith.constant 0 : index
    %13 = vector.load %arg7[%c0_12, %c1, %c1_13, %c0_14] : memref<1x18x18x8xf32, #tpu.memory_space<vmem>>, vector<1x16x16x8xf32>
    tpu.vector_store %arg7[%c0_12, %c1, %c1_13, %c0_14], %12 {strides = array<i32>} : memref<1x18x18x8xf32, #tpu.memory_space<vmem>>, vector<1x16x16x8xf32>,
    %c0_15 = arith.constant 0 : index
    %c0_16 = arith.constant 0 : index
    %c0_17 = arith.constant 0 : index
    %c0_18 = arith.constant 0 : index
    %14 = vector.load %arg7[%c0_15, %c0_16, %c0_17, %c0_18] : memref<1x18x18x8xf32, #tpu.memory_space<vmem>>, vector<1x18x18x8xf32>
    %15 = vector.extract_strided_slice %14 {offsets = [0, 0, 0, 0], sizes = [1, 16, 16, 8], strides = [1, 1, 1, 1]} : vector<1x18x18x8xf32> to vector<1x16x16x8xf32>
    %16 = vector.extract_strided_slice %14 {offsets = [0, 0, 1, 0], sizes = [1, 16, 16, 8], strides = [1, 1, 1, 1]} : vector<1x18x18x8xf32> to vector<1x16x16x8xf32>
    %17 = vector.extract_strided_slice %14 {offsets = [0, 0, 2, 0], sizes = [1, 16, 16, 8], strides = [1, 1, 1, 1]} : vector<1x18x18x8xf32> to vector<1x16x16x8xf32>
    %18 = vector.extract_strided_slice %14 {offsets = [0, 1, 0, 0], sizes = [1, 16, 16, 8], strides = [1, 1, 1, 1]} : vector<1x18x18x8xf32> to vector<1x16x16x8xf32>
    %19 = vector.extract_strided_slice %14 {offsets = [0, 1, 1, 0], sizes = [1, 16, 16, 8], strides = [1, 1, 1, 1]} : vector<1x18x18x8xf32> to vector<1x16x16x8xf32>
    %20 = vector.extract_strided_slice %14 {offsets = [0, 1, 2, 0], sizes = [1, 16, 16, 8], strides = [1, 1, 1, 1]} : vector<1x18x18x8xf32> to vector<1x16x16x8xf32>
    %21 = vector.extract_strided_slice %14 {offsets = [0, 2, 0, 0], sizes = [1, 16, 16, 8], strides = [1, 1, 1, 1]} : vector<1x18x18x8xf32> to vector<1x16x16x8xf32>
    %22 = vector.extract_strided_slice %14 {offsets = [0, 2, 1, 0], sizes = [1, 16, 16, 8], strides = [1, 1, 1, 1]} : vector<1x18x18x8xf32> to vector<1x16x16x8xf32>
    %23 = vector.extract_strided_slice %14 {offsets = [0, 2, 2, 0], sizes = [1, 16, 16, 8], strides = [1, 1, 1, 1]} : vector<1x18x18x8xf32> to vector<1x16x16x8xf32>
    %24 = tpu.concatenate %15, %16, %17, %18, %19, %20, %21, %22, %23 in 3 : vector<1x16x16x8xf32>, vector<1x16x16x8xf32>, vector<1x16x16x8xf32>, vector<1x16x16x8xf32>, vector<1x16x16x8xf32>, vector<1x16x16x8xf32>, vector<1x16x16x8xf32>, vector<1x16x16x8xf32>, vector<1x16x16x8xf32> -> vector<1x16x16x72xf32>
    %25 = vector.shape_cast %24 : vector<1x16x16x72xf32> to vector<256x72xf32>
    %c0_19 = arith.constant 0 : index
    %c0_20 = arith.constant 0 : index
    %26 = vector.load %arg4[%c0_19, %c0_20] : memref<72x8xf32, #tpu.memory_space<vmem>>, vector<72x8xf32>
    %cst_21 = arith.constant dense<0.000000e+00> : vector<256x8xf32>
    %27 = tpu.matmul %25, %26, %cst_21 {dimension_numbers = #tpu.dot_dimension_numbers<[1], [0], [0], [1], [0, 0, 1, 1], [], []>} : vector<256x72xf32>, vector<72x8xf32>, vector<256x8xf32> -> vector<256x8xf32>
    %28 = vector.shape_cast %27 : vector<256x8xf32> to vector<1x16x16x8xf32>
    %c0_22 = arith.constant 0 : index
    %c0_23 = arith.constant 0 : index
    %c0_24 = arith.constant 0 : index
    %c0_25 = arith.constant 0 : index
    %29 = vector.load %arg5[%c0_22, %c0_23, %c0_24, %c0_25] : memref<1x16x16x8xf32, #tpu.memory_space<vmem>>, vector<1x16x16x8xf32>
    tpu.vector_store %arg5[%c0_22, %c0_23, %c0_24, %c0_25], %28 {strides = array<i32>} : memref<1x16x16x8xf32, #tpu.memory_space<vmem>>, vector<1x16x16x8xf32>,
    %cst_26 = arith.constant dense<0.000000e+00> : vector<8xf32>
    %30 = vector.multi_reduction <add>, %27, %cst_26 [0] : vector<256x8xf32> to vector<8xf32>
    %31 = vector.shape_cast %30 : vector<8xf32> to vector<1x8xf32>
    %32 = arith.mulf %27, %27 : vector<256x8xf32>
    %cst_27 = arith.constant dense<0.000000e+00> : vector<8xf32>
    %33 = vector.multi_reduction <add>, %32, %cst_27 [0] : vector<256x8xf32> to vector<8xf32>
    %34 = vector.shape_cast %33 : vector<8xf32> to vector<1x8xf32>
    %35 = tpu.concatenate %31, %34 in 0 : vector<1x8xf32>, vector<1x8xf32> -> vector<2x8xf32>
    %36 = vector.shape_cast %35 : vector<2x8xf32> to vector<1x2x8xf32>
    %c0_28 = arith.constant 0 : index
    %c0_29 = arith.constant 0 : index
    %c0_30 = arith.constant 0 : index
    %37 = vector.load %arg6[%c0_28, %c0_29, %c0_30] : memref<1x2x8xf32, #tpu.memory_space<vmem>>, vector<1x2x8xf32>
    tpu.vector_store %arg6[%c0_28, %c0_29, %c0_30], %36 {strides = array<i32>} : memref<1x2x8xf32, #tpu.memory_space<vmem>>, vector<1x2x8xf32>,
    return
  }
  func.func @transform_0(%arg0: i32) -> (i32, i32, i32, i32) {
    %c0_i32 = arith.constant 0 : i32
    %c0_i32_0 = arith.constant 0 : i32
    %c0_i32_1 = arith.constant 0 : i32
    %c0_i32_2 = arith.constant 0 : i32
    return %arg0, %c0_i32, %c0_i32_0, %c0_i32_1 : i32, i32, i32, i32
  }
  func.func @transform_1(%arg0: i32) -> (i32, i32) {
    %c0_i32 = arith.constant 0 : i32
    %c0_i32_0 = arith.constant 0 : i32
    %c0_i32_1 = arith.constant 0 : i32
    return %c0_i32, %c0_i32_0 : i32, i32
  }
  func.func @transform_2(%arg0: i32) -> (i32, i32) {
    %c0_i32 = arith.constant 0 : i32
    %c0_i32_0 = arith.constant 0 : i32
    %c0_i32_1 = arith.constant 0 : i32
    return %c0_i32, %c0_i32_0 : i32, i32
  }
  func.func @transform_3(%arg0: i32) -> (i32, i32) {
    %c0_i32 = arith.constant 0 : i32
    %c0_i32_0 = arith.constant 0 : i32
    %c0_i32_1 = arith.constant 0 : i32
    return %c0_i32, %c0_i32_0 : i32, i32
  }
  func.func @transform_4(%arg0: i32) -> (i32, i32, i32, i32) {
    %c0_i32 = arith.constant 0 : i32
    %c0_i32_0 = arith.constant 0 : i32
    %c0_i32_1 = arith.constant 0 : i32
    %c0_i32_2 = arith.constant 0 : i32
    return %arg0, %c0_i32, %c0_i32_0, %c0_i32_1 : i32, i32, i32, i32
  }
  func.func @transform_5(%arg0: i32) -> (i32, i32, i32) {
    %c0_i32 = arith.constant 0 : i32
    %c0_i32_0 = arith.constant 0 : i32
    %c0_i32_1 = arith.constant 0 : i32
    return %arg0, %c0_i32, %c0_i32_0 : i32, i32, i32
  }
}

module attributes {stable_mosaic.version = 11 : i64} {
  func.func @_finalize_kernel(%arg0: i32, %arg1: memref<1x16x16x8xf32, #tpu.memory_space<vmem>>, %arg2: memref<1x16x16x4xf32, #tpu.memory_space<vmem>>, %arg3: memref<1x8xf32, #tpu.memory_space<vmem>>, %arg4: memref<1x8xf32, #tpu.memory_space<vmem>>, %arg5: memref<4x8xf32, #tpu.memory_space<vmem>>, %arg6: memref<1x8xf32, #tpu.memory_space<vmem>>, %arg7: memref<1x8xf32, #tpu.memory_space<vmem>>, %arg8: memref<1x16x16x8xf32, #tpu.memory_space<vmem>>) attributes {dimension_semantics = [#tpu.dimension_semantics<parallel>], iteration_bounds = array<i64: 2>, scalar_prefetch = 0 : i64, scratch_operands = 0 : i64, tpu.core_type = #tpu.core_type<tc>, window_params = [{transform_indices = @transform_0, window_bounds = array<i64: 1, 16, 16, 8>}, {transform_indices = @transform_1, window_bounds = array<i64: 1, 16, 16, 4>}, {pipeline_mode = #tpu.pipeline_mode<synchronous>, transform_indices = @transform_2, window_bounds = array<i64: 1, 8>}, {pipeline_mode = #tpu.pipeline_mode<synchronous>, transform_indices = @transform_3, window_bounds = array<i64: 1, 8>}, {pipeline_mode = #tpu.pipeline_mode<synchronous>, transform_indices = @transform_4, window_bounds = array<i64: 4, 8>}, {pipeline_mode = #tpu.pipeline_mode<synchronous>, transform_indices = @transform_5, window_bounds = array<i64: 1, 8>}, {pipeline_mode = #tpu.pipeline_mode<synchronous>, transform_indices = @transform_6, window_bounds = array<i64: 1, 8>}, {transform_indices = @transform_7, window_bounds = array<i64: 1, 16, 16, 8>}]} {
    %c0 = arith.constant 0 : index
    %c0_0 = arith.constant 0 : index
    %c0_1 = arith.constant 0 : index
    %c0_2 = arith.constant 0 : index
    %0 = vector.load %arg1[%c0, %c0_0, %c0_1, %c0_2] : memref<1x16x16x8xf32, #tpu.memory_space<vmem>>, vector<1x16x16x8xf32>
    %1 = vector.shape_cast %0 : vector<1x16x16x8xf32> to vector<256x8xf32>
    %c0_3 = arith.constant 0 : index
    %c0_4 = arith.constant 0 : index
    %2 = vector.load %arg3[%c0_3, %c0_4] : memref<1x8xf32, #tpu.memory_space<vmem>>, vector<1x8xf32>
    %3 = vector.broadcast %2 : vector<1x8xf32> to vector<256x8xf32>
    %4 = arith.mulf %1, %3 : vector<256x8xf32>
    %c0_5 = arith.constant 0 : index
    %c0_6 = arith.constant 0 : index
    %5 = vector.load %arg4[%c0_5, %c0_6] : memref<1x8xf32, #tpu.memory_space<vmem>>, vector<1x8xf32>
    %6 = vector.broadcast %5 : vector<1x8xf32> to vector<256x8xf32>
    %7 = arith.addf %4, %6 : vector<256x8xf32>
    %c0_7 = arith.constant 0 : index
    %c0_8 = arith.constant 0 : index
    %c0_9 = arith.constant 0 : index
    %c0_10 = arith.constant 0 : index
    %8 = vector.load %arg2[%c0_7, %c0_8, %c0_9, %c0_10] : memref<1x16x16x4xf32, #tpu.memory_space<vmem>>, vector<1x16x16x4xf32>
    %9 = vector.shape_cast %8 : vector<1x16x16x4xf32> to vector<256x4xf32>
    %c0_11 = arith.constant 0 : index
    %c0_12 = arith.constant 0 : index
    %10 = vector.load %arg5[%c0_11, %c0_12] : memref<4x8xf32, #tpu.memory_space<vmem>>, vector<4x8xf32>
    %cst = arith.constant dense<0.000000e+00> : vector<256x8xf32>
    %11 = tpu.matmul %9, %10, %cst {dimension_numbers = #tpu.dot_dimension_numbers<[1], [0], [0], [1], [0, 0, 1, 1], [], []>} : vector<256x4xf32>, vector<4x8xf32>, vector<256x8xf32> -> vector<256x8xf32>
    %c0_13 = arith.constant 0 : index
    %c0_14 = arith.constant 0 : index
    %12 = vector.load %arg6[%c0_13, %c0_14] : memref<1x8xf32, #tpu.memory_space<vmem>>, vector<1x8xf32>
    %13 = vector.broadcast %12 : vector<1x8xf32> to vector<256x8xf32>
    %14 = arith.mulf %11, %13 : vector<256x8xf32>
    %c0_15 = arith.constant 0 : index
    %c0_16 = arith.constant 0 : index
    %15 = vector.load %arg7[%c0_15, %c0_16] : memref<1x8xf32, #tpu.memory_space<vmem>>, vector<1x8xf32>
    %16 = vector.broadcast %15 : vector<1x8xf32> to vector<256x8xf32>
    %17 = arith.addf %14, %16 : vector<256x8xf32>
    %18 = arith.addf %7, %17 : vector<256x8xf32>
    %cst_17 = arith.constant 0.000000e+00 : f32
    %19 = vector.broadcast %cst_17 : f32 to vector<256x8xf32>
    %20 = arith.maximumf %18, %19 : vector<256x8xf32>
    %21 = vector.shape_cast %20 : vector<256x8xf32> to vector<1x16x16x8xf32>
    %c0_18 = arith.constant 0 : index
    %c0_19 = arith.constant 0 : index
    %c0_20 = arith.constant 0 : index
    %c0_21 = arith.constant 0 : index
    %22 = vector.load %arg8[%c0_18, %c0_19, %c0_20, %c0_21] : memref<1x16x16x8xf32, #tpu.memory_space<vmem>>, vector<1x16x16x8xf32>
    tpu.vector_store %arg8[%c0_18, %c0_19, %c0_20, %c0_21], %21 {strides = array<i32>} : memref<1x16x16x8xf32, #tpu.memory_space<vmem>>, vector<1x16x16x8xf32>,
    return
  }
  func.func @transform_0(%arg0: i32) -> (i32, i32, i32, i32) {
    %c0_i32 = arith.constant 0 : i32
    %c0_i32_0 = arith.constant 0 : i32
    %c0_i32_1 = arith.constant 0 : i32
    %c0_i32_2 = arith.constant 0 : i32
    return %arg0, %c0_i32, %c0_i32_0, %c0_i32_1 : i32, i32, i32, i32
  }
  func.func @transform_1(%arg0: i32) -> (i32, i32, i32, i32) {
    %c0_i32 = arith.constant 0 : i32
    %c0_i32_0 = arith.constant 0 : i32
    %c0_i32_1 = arith.constant 0 : i32
    %c0_i32_2 = arith.constant 0 : i32
    return %arg0, %c0_i32, %c0_i32_0, %c0_i32_1 : i32, i32, i32, i32
  }
  func.func @transform_2(%arg0: i32) -> (i32, i32) {
    %c0_i32 = arith.constant 0 : i32
    %c0_i32_0 = arith.constant 0 : i32
    %c0_i32_1 = arith.constant 0 : i32
    return %c0_i32, %c0_i32_0 : i32, i32
  }
  func.func @transform_3(%arg0: i32) -> (i32, i32) {
    %c0_i32 = arith.constant 0 : i32
    %c0_i32_0 = arith.constant 0 : i32
    %c0_i32_1 = arith.constant 0 : i32
    return %c0_i32, %c0_i32_0 : i32, i32
  }
  func.func @transform_4(%arg0: i32) -> (i32, i32) {
    %c0_i32 = arith.constant 0 : i32
    %c0_i32_0 = arith.constant 0 : i32
    %c0_i32_1 = arith.constant 0 : i32
    return %c0_i32, %c0_i32_0 : i32, i32
  }
  func.func @transform_5(%arg0: i32) -> (i32, i32) {
    %c0_i32 = arith.constant 0 : i32
    %c0_i32_0 = arith.constant 0 : i32
    %c0_i32_1 = arith.constant 0 : i32
    return %c0_i32, %c0_i32_0 : i32, i32
  }
  func.func @transform_6(%arg0: i32) -> (i32, i32) {
    %c0_i32 = arith.constant 0 : i32
    %c0_i32_0 = arith.constant 0 : i32
    %c0_i32_1 = arith.constant 0 : i32
    return %c0_i32, %c0_i32_0 : i32, i32
  }
  func.func @transform_7(%arg0: i32) -> (i32, i32, i32, i32) {
    %c0_i32 = arith.constant 0 : i32
    %c0_i32_0 = arith.constant 0 : i32
    %c0_i32_1 = arith.constant 0 : i32
    %c0_i32_2 = arith.constant 0 : i32
    return %arg0, %c0_i32, %c0_i32_0, %c0_i32_1 : i32, i32, i32, i32
  }
}

</mosaic_0001>

<bundles_post_ra>
// kernel: basic_block_forward_nhwc.5
= control target key start
LH: loop header
LB: loop body
LE: loop exit
PB: predicated region body
PF: predicated region fallthrough
CT: control target
= control target key end

     0   :  { %s998_s24 = smov 0   ;;  %s1340_s0 = inlined_call_operand.vmem [shape: f32[2,16,16,8], index: 0, kind: input, shape index: {}]   ;;  %s1341_s1 = inlined_call_operand.vmem [shape: f32[2,16,16,4], index: 1, kind: input, shape index: {}]   ;;  %s1342_s2 = inlined_call_operand.vmem [shape: f32[1,8], index: 2, kind: input, shape index: {}]   ;;  %s1343_s3 = inlined_call_operand.vmem [shape: f32[1,8], index: 3, kind: input, shape index: {}]   ;;  %s1344_s4 = inlined_call_operand.vmem [shape: f32[4,8], index: 4, kind: input, shape index: {}]   ;;  %s1345_s5 = inlined_call_operand.vmem [shape: f32[1,8], index: 5, kind: input, shape index: {}]   ;;  %s1346_s6 = inlined_call_operand.vmem [shape: f32[1,8], index: 6, kind: input, shape index: {}]   ;;  %s1347_s7 = inlined_call_operand.vmem [shape: f32[2,16,16,8], index: 7, kind: output, shape index: {}]  }
   0x1 LB: > { %s886_s25 = sadd.s32 4294967295, %s956_s24   ;;  %p890_p0 = scmp.ge.s32.totalorder %s956_s24, 1  ;;  %s956_s24 = sphi %s998_s24, %s17_s24  }
   0x2   : > { %p247_p1 = scmp.lt.s32.totalorder %s956_s24, 3 }
   0x4   : > { %p248_p2 = pnand %p890_p0, %p247_p1 }
   0x5   : > { %p284_p3 = scmp.lt.s32.totalorder (!%p248_p2), %s886_s25, 1 }
   0x6   : > { %251 = sbr.rel (%p248_p2) target bundleno = 213 (0xd5), region = 48 }
   0xb   : > { %v435_v0 = vld [vmem:[%s1344_s4] sm:$0xf]  ;;  %vm533_vm0 = vcmask 1043456   ;;  %s1349_s25 = smov (!%p284_p3, %s886_s25), 1  ;;  %vm436_vm1 = vcmask 31744   ;;  %vm786_vm2 = vcmask 64512  }
   0xc   : > { %936 = vmatpush.msk.msra.mxu2 %vm533_vm0, %v435_v0  ;;  %937 = vmatpush.msk.msra.mxu3 %vm533_vm0, %v435_v0  ;;  %s1009_s28 = sshll.u32 %s1349_s25, 8  ;;  %v1090_v33 = vld [vmem:[%s1342_s2] ss:$0 sm:$0xff] }
   0xd   : > { %897 = vmatpush.msk.msra.mxu0 %vm533_vm0, %v435_v0  ;;  %935 = vmatpush.msk.msra.mxu1 %vm533_vm0, %v435_v0  ;;  %s1015_s8 = scalar_lea.vmem %s1341_s1, %s1009_s28  ;;  %s1085_s11 = scalar_lea.vmem %s1340_s0, %s1009_s28  ;;  %v1098_v37 = vld [vmem:[%s1343_s3] ss:$0 sm:$0xff] }
   0xe   : > { %v419_v1 = vld [vmem:[%s1015_s8 + $0x80] sm:$0xff]  ;;  %v420_v5 = vld [vmem:[%s1015_s8 + $0x88] sm:$0xff]  ;;  %v421_v9 = vld [vmem:[%s1015_s8 + $0x90] sm:$0xff]  ;;  %s1129_s22 = scalar_lea.vmem %s1347_s7, %s1009_s28 }
   0xf   : > { %v427_v2 = vld [vmem:[%s1015_s8 + $0xc0] sm:$0xff]  ;;  %914 = vmatmul.msk.f32.vlgmr.msra.gmra.mxu2 %vm436_vm1, %v419_v1  ;;  %v428_v6 = vld [vmem:[%s1015_s8 + $0xc8] sm:$0xff]  ;;  %v429_v10 = vld [vmem:[%s1015_s8 + $0xd0] sm:$0xff] }
  0x10   : > { %v403_v3 = vld [vmem:[%s1015_s8] sm:$0xff]  ;;  %922 = vmatmul.msk.f32.vlgmr.msra.gmra.mxu3 %vm436_vm1, %v427_v2  ;;  %v404_v7 = vld [vmem:[%s1015_s8 + $0x8] sm:$0xff]  ;;  %v405_v11 = vld [vmem:[%s1015_s8 + $0x10] sm:$0xff] }
  0x11   : > { %v411_v4 = vld [vmem:[%s1015_s8 + $0x40] sm:$0xff]  ;;  %898 = vmatmul.msk.f32.vlgmr.msra.gmra.mxu0 %vm436_vm1, %v403_v3  ;;  %v412_v8 = vld [vmem:[%s1015_s8 + $0x48] sm:$0xff]  ;;  %v413_v12 = vld [vmem:[%s1015_s8 + $0x50] sm:$0xff] }
  0x12   : > { %906 = vmatmul.msk.f32.vlgmr.msra.gmra.mxu1 %vm436_vm1, %v411_v4  ;;  %v422_v13 = vld [vmem:[%s1015_s8 + $0x98] sm:$0xff]  ;;  %v423_v17 = vld [vmem:[%s1015_s8 + $0xa0] sm:$0xff]  ;;  %v424_v21 = vld [vmem:[%s1015_s8 + $0xa8] sm:$0xff] }
  0x13   : > { %v430_v14 = vld [vmem:[%s1015_s8 + $0xd8] sm:$0xff]  ;;  %v431_v18 = vld [vmem:[%s1015_s8 + $0xe0] sm:$0xff]  ;;  %v432_v22 = vld [vmem:[%s1015_s8 + $0xe8] sm:$0xff] }
  0x14   : > { %v406_v15 = vld [vmem:[%s1015_s8 + $0x18] sm:$0xff]  ;;  %v407_v19 = vld [vmem:[%s1015_s8 + $0x20] sm:$0xff]  ;;  %v408_v23 = vld [vmem:[%s1015_s8 + $0x28] sm:$0xff] }
  0x15   : > { %v414_v16 = vld [vmem:[%s1015_s8 + $0x58] sm:$0xff]  ;;  %v415_v20 = vld [vmem:[%s1015_s8 + $0x60] sm:$0xff]  ;;  %v416_v24 = vld [vmem:[%s1015_s8 + $0x68] sm:$0xff] }
  0x16   : > { %v425_v25 = vld [vmem:[%s1015_s8 + $0xb0] sm:$0xff]  ;;  %v426_v29 = vld [vmem:[%s1015_s8 + $0xb8] sm:$0xff]  ;;  %v299_v34 = vld [vmem:[%s1085_s11] sm:$0xff] }
  0x17   : > { %915 = vmatmul.msk.f32.gmra.mxu2 %vm436_vm1, %v420_v5  ;;  %v433_v26 = vld [vmem:[%s1015_s8 + $0xf0] sm:$0xff]  ;;  %v434_v30 = vld [vmem:[%s1015_s8 + $0xf8] sm:$0xff]  ;;  %v307_v35 = vld [vmem:[%s1085_s11 + $0x40] sm:$0xff]  ;;  %v335_v36 = vmul.f32 %v1090_v33, %v299_v34 }
  0x18   : > { %923 = vmatmul.msk.f32.gmra.mxu3 %vm436_vm1, %v428_v6  ;;  %v409_v27 = vld [vmem:[%s1015_s8 + $0x30] sm:$0xff]  ;;  %v410_v31 = vld [vmem:[%s1015_s8 + $0x38] sm:$0xff]  ;;  %v1103_v38 = vld [vmem:[%s1345_s5] ss:$0 sm:$0xff]  ;;  %v343_v39 = vmul.f32 %v1090_v33, %v307_v35 }
  0x19   : > { %899 = vmatmul.msk.f32.gmra.mxu0 %vm436_vm1, %v404_v7  ;;  %v417_v28 = vld [vmem:[%s1015_s8 + $0x70] sm:$0xff]  ;;  %v418_v32 = vld [vmem:[%s1015_s8 + $0x78] sm:$0xff]  ;;  %v1109_v40 = vld [vmem:[%s1346_s6] ss:$0 sm:$0xff]  ;;  %v371_v45 = vadd.f32 %v1098_v37, %v335_v36 }
  0x1a   : > { %907 = vmatmul.msk.f32.gmra.mxu1 %vm436_vm1, %v412_v8  ;;  %v315_v41 = vld [vmem:[%s1085_s11 + $0x80] sm:$0xff]  ;;  %v379_v47 = vadd.f32 %v1098_v37, %v343_v39  ;;  %v300_v51 = vld [vmem:[%s1085_s11 + $0x8] sm:$0xff]  ;;  %v317_v36 = vld [vmem:[%s1085_s11 + $0x90] sm:$0xff] }
  0x1b   : > { %v323_v42 = vld [vmem:[%s1085_s11 + $0xc0] sm:$0xff]  ;;  %v351_v49 = vmul.f32 %v1090_v33, %v315_v41  ;;  %v308_v52 = vld [vmem:[%s1085_s11 + $0x48] sm:$0xff]  ;;  %v336_v59 = vmul.f32 %v1090_v33, %v300_v51  ;;  %v325_v39 = vld [vmem:[%s1085_s11 + $0xd0] sm:$0xff]  ;;  %v353_v51 = vmul.f32 %v1090_v33, %v317_v36 }
  0x1c   : > { %v359_v50 = vmul.f32 %v1090_v33, %v323_v42  ;;  %v344_v60 = vmul.f32 %v1090_v33, %v308_v52  ;;  %v316_v3 = vld [vmem:[%s1085_s11 + $0x88] sm:$0xff]  ;;  %v361_v52 = vmul.f32 %v1090_v33, %v325_v39 }
  0x1d   : > { %v387_v61 = vadd.f32 %v1098_v37, %v351_v49  ;;  %v324_v4 = vld [vmem:[%s1085_s11 + $0xc8] sm:$0xff] }
  0x1e   : > { %v395_v63 = vadd.f32 %v1098_v37, %v359_v50 }
  0x1f   : > { %916 = vmatmul.msk.f32.gmra.mxu2 %vm436_vm1, %v421_v9  ;;  %v372_v9 = vadd.f32 %v1098_v37, %v336_v59 }
  0x20   : > { %924 = vmatmul.msk.f32.gmra.mxu3 %vm436_vm1, %v429_v10 }
  0x21   : > { %900 = vmatmul.msk.f32.gmra.mxu0 %vm436_vm1, %v405_v11  ;;  %v380_v11 = vadd.f32 %v1098_v37, %v344_v60 }
  0x22   : > { %908 = vmatmul.msk.f32.gmra.mxu1 %vm436_vm1, %v413_v12 }
  0x27   : > { %917 = vmatmul.msk.f32.gmra.mxu2 %vm436_vm1, %v422_v13 }
  0x28   : > { %925 = vmatmul.msk.f32.gmra.mxu3 %vm436_vm1, %v430_v14 }
  0x29   : > { %901 = vmatmul.msk.f32.gmra.mxu0 %vm436_vm1, %v406_v15  ;;  %v352_v15 = vmul.f32 %v1090_v33, %v316_v3  ;;  %v397_v3 = vadd.f32 %v1098_v37, %v361_v52 }
  0x2a   : > { %909 = vmatmul.msk.f32.gmra.mxu1 %vm436_vm1, %v414_v16  ;;  %v360_v16 = vmul.f32 %v1090_v33, %v324_v4 }
  0x2f   : > { %918 = vmatmul.msk.f32.gmra.mxu2 %vm436_vm1, %v423_v17  ;;  %v301_v17 = vld [vmem:[%s1085_s11 + $0x10] sm:$0xff] }
  0x30   : > { %926 = vmatmul.msk.f32.gmra.mxu3 %vm436_vm1, %v431_v18  ;;  %v309_v18 = vld [vmem:[%s1085_s11 + $0x50] sm:$0xff] }
  0x31   : > { %902 = vmatmul.msk.f32.gmra.mxu0 %vm436_vm1, %v407_v19 }
  0x32   : > { %910 = vmatmul.msk.f32.gmra.mxu1 %vm436_vm1, %v415_v20 }
  0x37   : > { %919 = vmatmul.msk.f32.gmra.mxu2 %vm436_vm1, %v424_v21 }
  0x38   : > { %927 = vmatmul.msk.f32.gmra.mxu3 %vm436_vm1, %v432_v22 }
  0x39   : > { %903 = vmatmul.msk.f32.gmra.mxu0 %vm436_vm1, %v408_v23 }
  0x3a   : > { %911 = vmatmul.msk.f32.gmra.mxu1 %vm436_vm1, %v416_v24 }
  0x3f   : > { %920 = vmatmul.msk.f32.gmra.mxu2 %vm436_vm1, %v425_v25 }
  0x40   : > { %928 = vmatmul.msk.f32.gmra.mxu3 %vm436_vm1, %v433_v26 }
  0x41   : > { %904 = vmatmul.msk.f32.gmra.mxu0 %vm436_vm1, %v409_v27  ;;  %v337_v27 = vmul.f32 %v1090_v33, %v301_v17 }
  0x42   : > { %912 = vmatmul.msk.f32.gmra.mxu1 %vm436_vm1, %v417_v28  ;;  %v345_v28 = vmul.f32 %v1090_v33, %v309_v18 }
  0x47   : > { %921 = vmatmul.msk.f32.gmra.mxu2 %vm436_vm1, %v426_v29  ;;  %v388_v29 = vadd.f32 %v1098_v37, %v352_v15 }
  0x48   : > { %929 = vmatmul.msk.f32.gmra.mxu3 %vm436_vm1, %v434_v30 }
  0x49   : > { %905 = vmatmul.msk.f32.gmra.mxu0 %vm436_vm1, %v410_v31  ;;  %v396_v31 = vadd.f32 %v1098_v37, %v360_v16 }
  0x4a   : > { %913 = vmatmul.msk.f32.gmra.mxu1 %vm436_vm1, %v418_v32 }
  0x8e   : > { %v554_v43 = vpop.f32.mrf.mxu0 }
  0x8f   : > { %v578_v44 = vpop.f32.mrf.mxu1  ;;  %v654_v46 = vmul.f32 %v1103_v38, %v554_v43 }
  0x90   : > { %v662_v48 = vmul.f32 %v1103_v38, %v578_v44 }
  0x91   : > { %v690_v53 = vadd.f32 %v1109_v40, %v654_v46 }
  0x92   : > { %v698_v54 = vadd.f32 %v1109_v40, %v662_v48  ;;  %v602_v57 = vpop.f32.mrf.mxu2 }
  0x93   : > { %v722_v55 = vadd.f32 %v690_v53, %v371_v45  ;;  %v626_v58 = vpop.f32.mrf.mxu3  ;;  %v670_v62 = vmul.f32 %v1103_v38, %v602_v57  ;;  %v373_v45 = vadd.f32 %v1098_v37, %v337_v27  ;;  %v302_v53 = vld [vmem:[%s1085_s11 + $0x18] sm:$0xff] }
  0x94   : > { %v730_v56 = vadd.f32 %v698_v54, %v379_v47  ;;  %v678_v0 = vmul.f32 %v1103_v38, %v626_v58  ;;  %v381_v47 = vadd.f32 %v1098_v37, %v345_v28  ;;  %v310_v54 = vld [vmem:[%s1085_s11 + $0x58] sm:$0xff] }
  0x95   : > { %v754_v1 = vmax.f32 %v722_v55, 0.0  ;;  %v706_v5 = vadd.f32 %v1109_v40, %v670_v62 }
  0x96   : > { %v762_v2 = vmax.f32 %v730_v56, 0.0  ;;  %v714_v6 = vadd.f32 %v1109_v40, %v678_v0  ;;  %v557_v7 = vpop.f32.mrf.mxu0  ;;  %v346_v0 = vmul.f32 %v1090_v33, %v310_v54 }
  0x97   : > { %v581_v8 = vpop.f32.mrf.mxu1  ;;  %787 = vst.msk [vmem:[%s1129_s22] sm:$0xff] %vm786_vm2, %v754_v1  ;;  %v655_v10 = vmul.f32 %v1103_v38, %v557_v7  ;;  %v738_v13 = vadd.f32 %v706_v5, %v387_v61  ;;  %v389_v1 = vadd.f32 %v1098_v37, %v353_v51  ;;  %v318_v7 = vld [vmem:[%s1085_s11 + $0x98] sm:$0xff] }
  0x98   : > { %v663_v12 = vmul.f32 %v1103_v38, %v581_v8  ;;  %795 = vst.msk [vmem:[%s1129_s22 + $0x40] sm:$0xff] %vm786_vm2, %v762_v2  ;;  %v746_v14 = vadd.f32 %v714_v6, %v395_v63  ;;  %v338_v63 = vmul.f32 %v1090_v33, %v302_v53  ;;  %v326_v8 = vld [vmem:[%s1085_s11 + $0xd8] sm:$0xff]  ;;  %v382_v15 = vadd.f32 %v1098_v37, %v346_v0 }
  0x99   : > { %v691_v19 = vadd.f32 %v1109_v40, %v655_v10  ;;  %v770_v21 = vmax.f32 %v738_v13, 0.0 }
  0x9a   : > { %v699_v20 = vadd.f32 %v1109_v40, %v663_v12  ;;  %v778_v22 = vmax.f32 %v746_v14, 0.0  ;;  %v605_v25 = vpop.f32.mrf.mxu2  ;;  %v374_v13 = vadd.f32 %v1098_v37, %v338_v63 }
  0x9b   : > { %v723_v23 = vadd.f32 %v691_v19, %v372_v9  ;;  %v629_v26 = vpop.f32.mrf.mxu3  ;;  %803 = vst.msk [vmem:[%s1129_s22 + $0x80] sm:$0xff] %vm786_vm2, %v770_v21  ;;  %v671_v30 = vmul.f32 %v1103_v38, %v605_v25  ;;  %v354_v19 = vmul.f32 %v1090_v33, %v318_v7  ;;  %v303_v21 = vld [vmem:[%s1085_s11 + $0x20] sm:$0xff] }
  0x9c   : > { %v731_v24 = vadd.f32 %v699_v20, %v380_v11  ;;  %v679_v32 = vmul.f32 %v1103_v38, %v629_v26  ;;  %811 = vst.msk [vmem:[%s1129_s22 + $0xc0] sm:$0xff] %vm786_vm2, %v778_v22  ;;  %v362_v20 = vmul.f32 %v1090_v33, %v326_v8  ;;  %v311_v22 = vld [vmem:[%s1085_s11 + $0x60] sm:$0xff] }
  0x9d   : > { %v755_v34 = vmax.f32 %v723_v23, 0.0  ;;  %v707_v41 = vadd.f32 %v1109_v40, %v671_v30 }
  0x9e   : > { %v763_v35 = vmax.f32 %v731_v24, 0.0  ;;  %v715_v42 = vadd.f32 %v1109_v40, %v679_v32  ;;  %v560_v43 = vpop.f32.mrf.mxu0  ;;  %v347_v32 = vmul.f32 %v1090_v33, %v311_v22  ;;  %v398_v36 = vadd.f32 %v1098_v37, %v362_v20 }
  0x9f   : > { %v584_v44 = vpop.f32.mrf.mxu1  ;;  %788 = vst.msk [vmem:[%s1129_s22 + $0x8] sm:$0xff] %vm786_vm2, %v755_v34  ;;  %v656_v46 = vmul.f32 %v1103_v38, %v560_v43  ;;  %v739_v49 = vadd.f32 %v707_v41, %v388_v29  ;;  %v390_v34 = vadd.f32 %v1098_v37, %v354_v19  ;;  %v319_v43 = vld [vmem:[%s1085_s11 + $0xa0] sm:$0xff] }
  0xa0   : > { %v664_v48 = vmul.f32 %v1103_v38, %v584_v44  ;;  %796 = vst.msk [vmem:[%s1129_s22 + $0x48] sm:$0xff] %vm786_vm2, %v763_v35  ;;  %v747_v50 = vadd.f32 %v715_v42, %v396_v31  ;;  %v339_v31 = vmul.f32 %v1090_v33, %v303_v21  ;;  %v327_v44 = vld [vmem:[%s1085_s11 + $0xe0] sm:$0xff]  ;;  %v383_v51 = vadd.f32 %v1098_v37, %v347_v32 }
  0xa1   : > { %v692_v55 = vadd.f32 %v1109_v40, %v656_v46  ;;  %v771_v57 = vmax.f32 %v739_v49, 0.0 }
  0xa2   : > { %v700_v56 = vadd.f32 %v1109_v40, %v664_v48  ;;  %v779_v58 = vmax.f32 %v747_v50, 0.0  ;;  %v608_v61 = vpop.f32.mrf.mxu2  ;;  %v375_v49 = vadd.f32 %v1098_v37, %v339_v31 }
  0xa3   : > { %v724_v59 = vadd.f32 %v692_v55, %v373_v45  ;;  %v632_v62 = vpop.f32.mrf.mxu3  ;;  %804 = vst.msk [vmem:[%s1129_s22 + $0x88] sm:$0xff] %vm786_vm2, %v771_v57  ;;  %v672_v2 = vmul.f32 %v1103_v38, %v608_v61  ;;  %v355_v55 = vmul.f32 %v1090_v33, %v319_v43  ;;  %v304_v57 = vld [vmem:[%s1085_s11 + $0x28] sm:$0xff] }
  0xa4   : > { %v732_v60 = vadd.f32 %v700_v56, %v381_v47  ;;  %v680_v4 = vmul.f32 %v1103_v38, %v632_v62  ;;  %812 = vst.msk [vmem:[%s1129_s22 + $0xc8] sm:$0xff] %vm786_vm2, %v779_v58  ;;  %v363_v56 = vmul.f32 %v1090_v33, %v327_v44  ;;  %v312_v58 = vld [vmem:[%s1085_s11 + $0x68] sm:$0xff] }
  0xa5   : > { %v756_v5 = vmax.f32 %v724_v59, 0.0  ;;  %v708_v9 = vadd.f32 %v1109_v40, %v672_v2 }
  0xa6   : > { %v764_v6 = vmax.f32 %v732_v60, 0.0  ;;  %v716_v10 = vadd.f32 %v1109_v40, %v680_v4  ;;  %v563_v11 = vpop.f32.mrf.mxu0  ;;  %v348_v4 = vmul.f32 %v1090_v33, %v312_v58  ;;  %v399_v7 = vadd.f32 %v1098_v37, %v363_v56 }
  0xa7   : > { %v587_v12 = vpop.f32.mrf.mxu1  ;;  %789 = vst.msk [vmem:[%s1129_s22 + $0x10] sm:$0xff] %vm786_vm2, %v756_v5  ;;  %v657_v14 = vmul.f32 %v1103_v38, %v563_v11  ;;  %v740_v17 = vadd.f32 %v708_v9, %v389_v1  ;;  %v391_v5 = vadd.f32 %v1098_v37, %v355_v55  ;;  %v320_v11 = vld [vmem:[%s1085_s11 + $0xa8] sm:$0xff] }
  0xa8   : > { %v665_v16 = vmul.f32 %v1103_v38, %v587_v12  ;;  %797 = vst.msk [vmem:[%s1129_s22 + $0x50] sm:$0xff] %vm786_vm2, %v764_v6  ;;  %v748_v18 = vadd.f32 %v716_v10, %v397_v3  ;;  %v340_v3 = vmul.f32 %v1090_v33, %v304_v57  ;;  %v328_v12 = vld [vmem:[%s1085_s11 + $0xe8] sm:$0xff]  ;;  %v384_v19 = vadd.f32 %v1098_v37, %v348_v4 }
  0xa9   : > { %v693_v23 = vadd.f32 %v1109_v40, %v657_v14  ;;  %v772_v25 = vmax.f32 %v740_v17, 0.0 }
  0xaa   : > { %v701_v24 = vadd.f32 %v1109_v40, %v665_v16  ;;  %v780_v26 = vmax.f32 %v748_v18, 0.0  ;;  %v611_v29 = vpop.f32.mrf.mxu2  ;;  %v376_v17 = vadd.f32 %v1098_v37, %v340_v3 }
  0xab   : > { %v725_v27 = vadd.f32 %v693_v23, %v374_v13  ;;  %v635_v30 = vpop.f32.mrf.mxu3  ;;  %805 = vst.msk [vmem:[%s1129_s22 + $0x90] sm:$0xff] %vm786_vm2, %v772_v25  ;;  %v673_v35 = vmul.f32 %v1103_v38, %v611_v29  ;;  %v356_v23 = vmul.f32 %v1090_v33, %v320_v11  ;;  %v305_v25 = vld [vmem:[%s1085_s11 + $0x30] sm:$0xff] }
  0xac   : > { %v733_v28 = vadd.f32 %v701_v24, %v382_v15  ;;  %v681_v39 = vmul.f32 %v1103_v38, %v635_v30  ;;  %813 = vst.msk [vmem:[%s1129_s22 + $0xd0] sm:$0xff] %vm786_vm2, %v780_v26  ;;  %v364_v24 = vmul.f32 %v1090_v33, %v328_v12  ;;  %v313_v26 = vld [vmem:[%s1085_s11 + $0x70] sm:$0xff] }
  0xad   : > { %v757_v41 = vmax.f32 %v725_v27, 0.0  ;;  %v709_v45 = vadd.f32 %v1109_v40, %v673_v35 }
  0xae   : > { %v765_v42 = vmax.f32 %v733_v28, 0.0  ;;  %v717_v46 = vadd.f32 %v1109_v40, %v681_v39  ;;  %v566_v47 = vpop.f32.mrf.mxu0  ;;  %v349_v39 = vmul.f32 %v1090_v33, %v313_v26  ;;  %v400_v43 = vadd.f32 %v1098_v37, %v364_v24 }
  0xaf   : > { %v590_v48 = vpop.f32.mrf.mxu1  ;;  %790 = vst.msk [vmem:[%s1129_s22 + $0x18] sm:$0xff] %vm786_vm2, %v757_v41  ;;  %v658_v50 = vmul.f32 %v1103_v38, %v566_v47  ;;  %v741_v53 = vadd.f32 %v709_v45, %v390_v34  ;;  %v392_v41 = vadd.f32 %v1098_v37, %v356_v23  ;;  %v321_v47 = vld [vmem:[%s1085_s11 + $0xb0] sm:$0xff] }
  0xb0   : > { %v666_v52 = vmul.f32 %v1103_v38, %v590_v48  ;;  %798 = vst.msk [vmem:[%s1129_s22 + $0x58] sm:$0xff] %vm786_vm2, %v765_v42  ;;  %v749_v54 = vadd.f32 %v717_v46, %v398_v36  ;;  %v341_v36 = vmul.f32 %v1090_v33, %v305_v25  ;;  %v329_v48 = vld [vmem:[%s1085_s11 + $0xf0] sm:$0xff]  ;;  %v385_v55 = vadd.f32 %v1098_v37, %v349_v39 }
  0xb1   : > { %v694_v59 = vadd.f32 %v1109_v40, %v658_v50  ;;  %v773_v61 = vmax.f32 %v741_v53, 0.0 }
  0xb2   : > { %v702_v60 = vadd.f32 %v1109_v40, %v666_v52  ;;  %v781_v62 = vmax.f32 %v749_v54, 0.0  ;;  %v614_v1 = vpop.f32.mrf.mxu2  ;;  %v377_v53 = vadd.f32 %v1098_v37, %v341_v36 }
  0xb3   : > { %v726_v63 = vadd.f32 %v694_v59, %v375_v49  ;;  %v638_v2 = vpop.f32.mrf.mxu3  ;;  %806 = vst.msk [vmem:[%s1129_s22 + $0x98] sm:$0xff] %vm786_vm2, %v773_v61  ;;  %v674_v6 = vmul.f32 %v1103_v38, %v614_v1  ;;  %v357_v59 = vmul.f32 %v1090_v33, %v321_v47  ;;  %v306_v61 = vld [vmem:[%s1085_s11 + $0x38] sm:$0xff] }
  0xb4   : > { %v734_v0 = vadd.f32 %v702_v60, %v383_v51  ;;  %v682_v8 = vmul.f32 %v1103_v38, %v638_v2  ;;  %814 = vst.msk [vmem:[%s1129_s22 + $0xd8] sm:$0xff] %vm786_vm2, %v781_v62  ;;  %v365_v60 = vmul.f32 %v1090_v33, %v329_v48  ;;  %v314_v62 = vld [vmem:[%s1085_s11 + $0x78] sm:$0xff] }
  0xb5   : > { %v758_v9 = vmax.f32 %v726_v63, 0.0  ;;  %v710_v13 = vadd.f32 %v1109_v40, %v674_v6 }
  0xb6   : > { %v766_v10 = vmax.f32 %v734_v0, 0.0  ;;  %v718_v14 = vadd.f32 %v1109_v40, %v682_v8  ;;  %v569_v15 = vpop.f32.mrf.mxu0  ;;  %v350_v8 = vmul.f32 %v1090_v33, %v314_v62  ;;  %v401_v11 = vadd.f32 %v1098_v37, %v365_v60 }
  0xb7   : > { %v593_v16 = vpop.f32.mrf.mxu1  ;;  %791 = vst.msk [vmem:[%s1129_s22 + $0x20] sm:$0xff] %vm786_vm2, %v758_v9  ;;  %v659_v18 = vmul.f32 %v1103_v38, %v569_v15  ;;  %v742_v21 = vadd.f32 %v710_v13, %v391_v5  ;;  %v393_v9 = vadd.f32 %v1098_v37, %v357_v59  ;;  %v322_v15 = vld [vmem:[%s1085_s11 + $0xb8] sm:$0xff] }
  0xb8   : > { %v667_v20 = vmul.f32 %v1103_v38, %v593_v16  ;;  %799 = vst.msk [vmem:[%s1129_s22 + $0x60] sm:$0xff] %vm786_vm2, %v766_v10  ;;  %v750_v22 = vadd.f32 %v718_v14, %v399_v7  ;;  %v342_v7 = vmul.f32 %v1090_v33, %v306_v61  ;;  %v330_v16 = vld [vmem:[%s1085_s11 + $0xf8] sm:$0xff]  ;;  %v386_v23 = vadd.f32 %v1098_v37, %v350_v8 }
  0xb9   : > { %v695_v27 = vadd.f32 %v1109_v40, %v659_v18  ;;  %v774_v29 = vmax.f32 %v742_v21, 0.0 }
  0xba   : > { %v703_v28 = vadd.f32 %v1109_v40, %v667_v20  ;;  %v782_v30 = vmax.f32 %v750_v22, 0.0  ;;  %v617_v34 = vpop.f32.mrf.mxu2  ;;  %v378_v21 = vadd.f32 %v1098_v37, %v342_v7 }
  0xbb   : > { %v727_v31 = vadd.f32 %v695_v27, %v376_v17  ;;  %v641_v35 = vpop.f32.mrf.mxu3  ;;  %807 = vst.msk [vmem:[%s1129_s22 + $0xa0] sm:$0xff] %vm786_vm2, %v774_v29  ;;  %v675_v42 = vmul.f32 %v1103_v38, %v617_v34  ;;  %v358_v27 = vmul.f32 %v1090_v33, %v322_v15 }
  0xbc   : > { %v735_v32 = vadd.f32 %v703_v28, %v384_v19  ;;  %v683_v44 = vmul.f32 %v1103_v38, %v641_v35  ;;  %815 = vst.msk [vmem:[%s1129_s22 + $0xe0] sm:$0xff] %vm786_vm2, %v782_v30  ;;  %v366_v28 = vmul.f32 %v1090_v33, %v330_v16 }
  0xbd   : > { %v759_v45 = vmax.f32 %v727_v31, 0.0  ;;  %v711_v49 = vadd.f32 %v1109_v40, %v675_v42 }
  0xbe   : > { %v767_v46 = vmax.f32 %v735_v32, 0.0  ;;  %v719_v50 = vadd.f32 %v1109_v40, %v683_v44  ;;  %v572_v51 = vpop.f32.mrf.mxu0  ;;  %v402_v42 = vadd.f32 %v1098_v37, %v366_v28 }
  0xbf   : > { %v596_v52 = vpop.f32.mrf.mxu1  ;;  %792 = vst.msk [vmem:[%s1129_s22 + $0x28] sm:$0xff] %vm786_vm2, %v759_v45  ;;  %v660_v54 = vmul.f32 %v1103_v38, %v572_v51  ;;  %v743_v57 = vadd.f32 %v711_v49, %v392_v41  ;;  %v394_v41 = vadd.f32 %v1098_v37, %v358_v27 }
  0xc0   : > { %v668_v56 = vmul.f32 %v1103_v38, %v596_v52  ;;  %800 = vst.msk [vmem:[%s1129_s22 + $0x68] sm:$0xff] %vm786_vm2, %v767_v46  ;;  %v751_v58 = vadd.f32 %v719_v50, %v400_v43 }
  0xc1   : > { %v696_v63 = vadd.f32 %v1109_v40, %v660_v54  ;;  %v775_v1 = vmax.f32 %v743_v57, 0.0 }
  0xc2   : > { %v704_v0 = vadd.f32 %v1109_v40, %v668_v56  ;;  %v783_v2 = vmax.f32 %v751_v58, 0.0  ;;  %v620_v5 = vpop.f32.mrf.mxu2 }
  0xc3   : > { %v728_v3 = vadd.f32 %v696_v63, %v377_v53  ;;  %v644_v6 = vpop.f32.mrf.mxu3  ;;  %808 = vst.msk [vmem:[%s1129_s22 + $0xa8] sm:$0xff] %vm786_vm2, %v775_v1  ;;  %v676_v10 = vmul.f32 %v1103_v38, %v620_v5 }
  0xc4   : > { %v736_v4 = vadd.f32 %v704_v0, %v385_v55  ;;  %v684_v12 = vmul.f32 %v1103_v38, %v644_v6  ;;  %816 = vst.msk [vmem:[%s1129_s22 + $0xe8] sm:$0xff] %vm786_vm2, %v783_v2 }
  0xc5   : > { %v760_v13 = vmax.f32 %v728_v3, 0.0  ;;  %v712_v17 = vadd.f32 %v1109_v40, %v676_v10 }
  0xc6   : > { %v768_v14 = vmax.f32 %v736_v4, 0.0  ;;  %v720_v18 = vadd.f32 %v1109_v40, %v684_v12  ;;  %v575_v19 = vpop.f32.mrf.mxu0 }
  0xc7   : > { %v599_v20 = vpop.f32.mrf.mxu1  ;;  %793 = vst.msk [vmem:[%s1129_s22 + $0x30] sm:$0xff] %vm786_vm2, %v760_v13  ;;  %v661_v22 = vmul.f32 %v1103_v38, %v575_v19  ;;  %v744_v25 = vadd.f32 %v712_v17, %v393_v9 }
  0xc8   : > { %v669_v24 = vmul.f32 %v1103_v38, %v599_v20  ;;  %801 = vst.msk [vmem:[%s1129_s22 + $0x70] sm:$0xff] %vm786_vm2, %v768_v14  ;;  %v752_v26 = vadd.f32 %v720_v18, %v401_v11 }
  0xc9   : > { %v697_v29 = vadd.f32 %v1109_v40, %v661_v22  ;;  %v776_v31 = vmax.f32 %v744_v25, 0.0 }
  0xca   : > { %v705_v30 = vadd.f32 %v1109_v40, %v669_v24  ;;  %v784_v32 = vmax.f32 %v752_v26, 0.0  ;;  %v623_v36 = vpop.f32.mrf.mxu2 }
  0xcb   : > { %v729_v34 = vadd.f32 %v697_v29, %v378_v21  ;;  %v647_v39 = vpop.f32.mrf.mxu3  ;;  %809 = vst.msk [vmem:[%s1129_s22 + $0xb0] sm:$0xff] %vm786_vm2, %v776_v31  ;;  %v677_v33 = vmul.f32 %v1103_v38, %v623_v36 }
  0xcc   : > { %v737_v35 = vadd.f32 %v705_v30, %v386_v23  ;;  %v685_v43 = vmul.f32 %v1103_v38, %v647_v39  ;;  %817 = vst.msk [vmem:[%s1129_s22 + $0xf0] sm:$0xff] %vm786_vm2, %v784_v32 }
  0xcd   : > { %v761_v44 = vmax.f32 %v729_v34, 0.0  ;;  %v713_v46 = vadd.f32 %v1109_v40, %v677_v33 }
  0xce   : > { %v769_v45 = vmax.f32 %v737_v35, 0.0  ;;  %v721_v47 = vadd.f32 %v1109_v40, %v685_v43 }
  0xcf   : > { %794 = vst.msk [vmem:[%s1129_s22 + $0x38] sm:$0xff] %vm786_vm2, %v761_v44  ;;  %v745_v48 = vadd.f32 %v713_v46, %v394_v41 }
  0xd0   : > { %802 = vst.msk [vmem:[%s1129_s22 + $0x78] sm:$0xff] %vm786_vm2, %v769_v45  ;;  %v753_v49 = vadd.f32 %v721_v47, %v402_v42 }
  0xd1   : > { %v777_v50 = vmax.f32 %v745_v48, 0.0 }
  0xd2   : > { %v785_v51 = vmax.f32 %v753_v49, 0.0 }
  0xd3   : > { %810 = vst.msk [vmem:[%s1129_s22 + $0xb8] sm:$0xff] %vm786_vm2, %v777_v50 }
  0xd4   : > { %818 = vst.msk [vmem:[%s1129_s22 + $0xf8] sm:$0xff] %vm786_vm2, %v785_v51 }
  0xd5 PF: > { %s17_s24 = sadd.s32 1, %s956_s24  }
  0xd6   : > { %p14_p4 = scmp.ge.s32.totalorder %s17_s24, 4  }
  0xd8   :  { %16 = sbr.rel (!%p14_p4) target bundleno = 1 (0x1), region = 81 }

// kernel: basic_block_forward_nhwc.4
= control target key start
LH: loop header
LB: loop body
LE: loop exit
PB: predicated region body
PF: predicated region fallthrough
CT: control target
= control target key end

     0   :  { %s2464_s18 = smov 0   ;;  %s4725_s0 = inlined_call_operand.vmem [shape: f32[2,16,16,8], index: 0, kind: input, shape index: {}]   ;;  %s4726_s1 = inlined_call_operand.vmem [shape: f32[1,8], index: 1, kind: input, shape index: {}]   ;;  %s4727_s2 = inlined_call_operand.vmem [shape: f32[1,8], index: 2, kind: input, shape index: {}]   ;;  %s4728_s3 = inlined_call_operand.vmem [shape: f32[72,8], index: 3, kind: input, shape index: {}]   ;;  %s4729_s4 = inlined_call_operand.vmem [shape: f32[2,16,16,8], index: 4, kind: output, shape index: {0}]   ;;  %s4730_s5 = inlined_call_operand.vmem [shape: f32[2,2,8], index: 5, kind: output, shape index: {1}]  }
   0x1 LB: > { %s2292_s19 = sadd.s32 4294967295, %s2423_s18   ;;  %p2296_p0 = scmp.ge.s32.totalorder %s2423_s18, 1  ;;  %s2423_s18 = sphi %s2464_s18, %s16_s18  }
   0x2   : > { %p190_p1 = scmp.lt.s32.totalorder %s2423_s18, 3 }
   0x4   : > { %p191_p2 = pnand %p2296_p0, %p190_p1 }
   0x6   : > { %194 = sbr.rel (%p191_p2) target bundleno = 1021 (0x3fd), region = 36 }
   0xb   : > { %vm372_vm0 = vcmask 64512   ;;  %v2425_v0 = vmov 0.0   ;;  %vm563_vm1 = vcmask 1046528   ;;  %s2426_s20 = smov 8   ;;  %p222_p3 = scmp.lt.s32.totalorder %s2292_s19, 1  ;;  %vm375_vm2 = vcmask 58368  }
   0xc   : > { %373 = vst.msk [vmem:[#allocation2] sm:$0xff] %vm372_vm0, %v2425_v0  ;;  %v2575_v6 = vld [vmem:[%s4726_s1] ss:$0 sm:$0xff]  ;;  %vm740_vm3 = vcmask 1045504   ;;  %s2427_s29 = smov 16   ;;  %s2428_s30 = smov 24  }
   0xd   : > { %374 = vst.msk [vmem:[#allocation2 + $0x8] sm:$0xff] %vm372_vm0, %v2425_v0  ;;  %s5162_s19 = smov (!%p222_p3, %s2292_s19), 1  ;;  %v2592_v11 = vld [vmem:[%s4727_s2] ss:$0 sm:$0xff]  ;;  %s2429_s6 = smov 32   ;;  %vm1551_vm4 = vcmask 130048  }
   0xe   : > { %377 = vst.msk [vmem:[#allocation2 + $0x18] sm:$0xff] %vm372_vm0, %v2425_v0  ;;  %s2336_s21 = sshll.u32 %s5162_s19, 8  ;;  %s2430_s7 = smov 40   ;;  %vm1584_vm5 = vcmask 195584   ;;  %vm1617_vm6 = vcmask 261120   ;;  %vm1650_vm7 = vcmask 326656  }
   0xf   : > { %378 = vst.msk [vmem:[#allocation2 + $0x20] sm:$0xff] %vm372_vm0, %v2425_v0  ;;  %s2566_s24 = scalar_lea.vmem %s4725_s0, %s2336_s21  ;;  %s2431_s8 = smov 64   ;;  %vm1716_vm8 = vcmask 457728   ;;  %vm1683_vm9 = vcmask 392192   ;;  %vm1749_vm10 = vcmask 523264   ;;  %vm1791_vm11 = vcmask 588800  }
  0x10   : > { %380 = vst.msk [vmem:[#allocation2 + $0x30] sm:$0xff] %vm372_vm0, %v2425_v0  ;;  %v238_v7 = vld [vmem:[%s2566_s24 + $0x10] sm:$0xff]  ;;  %v239_v8 = vld [vmem:[%s2566_s24 + $0x18] sm:$0xff]  ;;  %v236_v9 = vld [vmem:[%s2566_s24] sm:$0xff]  ;;  %s2432_s9 = smov 56   ;;  %s2433_s10 = smov 48  }
  0x11   : > { %381 = vst.msk [vmem:[#allocation2 + $0x38] sm:$0xff] %vm372_vm0, %v2425_v0  ;;  %v274_v10 = vmul.f32 %v2575_v6, %v238_v7  ;;  %v237_v12 = vld [vmem:[%s2566_s24 + $0x8] sm:$0xff]  ;;  %v275_v14 = vmul.f32 %v2575_v6, %v239_v8  ;;  %v240_v15 = vld [vmem:[%s2566_s24 + $0x20] sm:$0xff]  ;;  %v272_v17 = vmul.f32 %v2575_v6, %v236_v9  ;;  %v242_v20 = vld [vmem:[%s2566_s24 + $0x30] sm:$0xff]  ;;  %s4416_s12 = scalar_lea.vmem %s4729_s4, %s2336_s21  ;;  %s2301_s21 = sshll.u32 %s5162_s19, 1  ;;  %vm2203_vm12 = vcmask 1040384  }
  0x12   : > { %383 = vst.msk [vmem:[#allocation2 + $0x48] sm:$0xff] %vm372_vm0, %v2425_v0  ;;  %v241_v18 = vld [vmem:[%s2566_s24 + $0x28] sm:$0xff]  ;;  %v273_v19 = vmul.f32 %v2575_v6, %v237_v12  ;;  %v276_v23 = vmul.f32 %v2575_v6, %v240_v15  ;;  %v243_v24 = vld [vmem:[%s2566_s24 + $0x38] sm:$0xff]  ;;  %v246_v27 = vld [vmem:[%s2566_s24 + $0x50] sm:$0xff]  ;;  %v278_v30 = vmul.f32 %v2575_v6, %v242_v20 }
  0x13   : > { %v2486_v1 = vld [vmem:[#allocation2] sm:$0xff]  ;;  %384 = vst.msk [vmem:[#allocation2 + $0x50] sm:$0xff] %vm372_vm0, %v2425_v0  ;;  %v310_v22 = vadd.f32 %v2592_v11, %v274_v10  ;;  %v311_v25 = vadd.f32 %v2592_v11, %v275_v14  ;;  %v277_v26 = vmul.f32 %v2575_v6, %v241_v18  ;;  %v247_v28 = vld [vmem:[%s2566_s24 + $0x58] sm:$0xff]  ;;  %v308_v29 = vadd.f32 %v2592_v11, %v272_v17  ;;  %v245_v38 = vld [vmem:[%s2566_s24 + $0x48] sm:$0xff] }
  0x14   : > { %v2490_v2 = vld [vmem:[#allocation2 + $0x8] sm:$0xff]  ;;  %v564_v3 = vrot.slane %v2486_v1, 1  ;;  %386 = vst.msk [vmem:[#allocation2 + $0x60] sm:$0xff] %vm372_vm0, %v2425_v0  ;;  %v309_v31 = vadd.f32 %v2592_v11, %v273_v19  ;;  %v279_v32 = vmul.f32 %v2575_v6, %v243_v24  ;;  %v244_v33 = vld [vmem:[%s2566_s24 + $0x40] sm:$0xff]  ;;  %v312_v35 = vadd.f32 %v2592_v11, %v276_v23 }
  0x15   : > { %v565_v4 = vrot.slane %v2490_v2, 1  ;;  %387 = vst.msk [vmem:[#allocation2 + $0x68] sm:$0xff] %vm372_vm0, %v2425_v0  ;;  %v342_v34 = vmax.f32 %v310_v22, 0.0  ;;  %v282_v36 = vmul.f32 %v2575_v6, %v246_v27  ;;  %v283_v37 = vmul.f32 %v2575_v6, %v247_v28  ;;  %v248_v41 = vld [vmem:[%s2566_s24 + $0x60] sm:$0xff]  ;;  %v249_v45 = vld [vmem:[%s2566_s24 + $0x68] sm:$0xff] }
  0x16   : > { %389 = vst.msk [vmem:[#allocation2 + $0x78] sm:$0xff] %vm372_vm0, %v2425_v0  ;;  %v343_v39 = vmax.f32 %v311_v25, 0.0  ;;  %v313_v40 = vadd.f32 %v2592_v11, %v277_v26  ;;  %v340_v42 = vmax.f32 %v308_v29, 0.0  ;;  %v314_v43 = vadd.f32 %v2592_v11, %v278_v30  ;;  %v252_v53 = vld [vmem:[%s2566_s24 + $0x80] sm:$0xff]  ;;  %v253_v54 = vld [vmem:[%s2566_s24 + $0x88] sm:$0xff]  ;;  %v255_v30 = vld [vmem:[%s2566_s24 + $0x98] sm:$0xff] }
  0x17   : > { %v566_v5 = vsel %vm563_vm1, %v564_v3, %v565_v4  ;;  %390 = vst.msk [vmem:[#allocation2 + $0x80] sm:$0xff] %vm372_vm0, %v2425_v0  ;;  %v280_v44 = vmul.f32 %v2575_v6, %v244_v33  ;;  %v341_v46 = vmax.f32 %v309_v31, 0.0  ;;  %v315_v47 = vadd.f32 %v2592_v11, %v279_v32 }
  0x18   : > { %644 = vrot.lane.b32.xlu0 %v566_v5, %s2426_s20  ;;  %392 = vst.msk [vmem:[#allocation2 + $0x90] sm:$0xff] %vm372_vm0, %v2425_v0  ;;  %v281_v48 = vmul.f32 %v2575_v6, %v245_v38  ;;  %v344_v49 = vmax.f32 %v312_v35, 0.0  ;;  %v318_v50 = vadd.f32 %v2592_v11, %v282_v36  ;;  %v319_v51 = vadd.f32 %v2592_v11, %v283_v37  ;;  %v251_v5 = vld [vmem:[%s2566_s24 + $0x78] sm:$0xff] }
  0x19   : > { %393 = vst.msk [vmem:[#allocation2 + $0x98] sm:$0xff] %vm372_vm0, %v2425_v0  ;;  %v284_v52 = vmul.f32 %v2575_v6, %v248_v41  ;;  %v345_v55 = vmax.f32 %v313_v40, 0.0  ;;  %v285_v56 = vmul.f32 %v2575_v6, %v249_v45  ;;  %v288_v57 = vmul.f32 %v2575_v6, %v252_v53 }
  0x1a   : > { %395 = vst.msk [vmem:[#allocation2 + $0xa8] sm:$0xff] %vm372_vm0, %v2425_v0  ;;  %v346_v58 = vmax.f32 %v314_v43, 0.0  ;;  %v316_v59 = vadd.f32 %v2592_v11, %v280_v44  ;;  %v347_v60 = vmax.f32 %v315_v47, 0.0  ;;  %v317_v61 = vadd.f32 %v2592_v11, %v281_v48 }
  0x1b   : > { %396 = vst.msk [vmem:[#allocation2 + $0xb0] sm:$0xff] %vm372_vm0, %v2425_v0  ;;  %v289_v62 = vmul.f32 %v2575_v6, %v253_v54  ;;  %v350_v63 = vmax.f32 %v318_v50, 0.0  ;;  %v320_v3 = vadd.f32 %v2592_v11, %v284_v52  ;;  %v321_v7 = vadd.f32 %v2592_v11, %v285_v56  ;;  %v258_v56 = vld [vmem:[%s2566_s24 + $0xb0] sm:$0xff] }
  0x1c   : > { %398 = vst.msk [vmem:[#allocation2 + $0xc0] sm:$0xff] %vm372_vm0, %v2425_v0  ;;  %v324_v8 = vadd.f32 %v2592_v11, %v288_v57  ;;  %v287_v10 = vmul.f32 %v2575_v6, %v251_v5  ;;  %v348_v12 = vmax.f32 %v316_v59, 0.0  ;;  %v349_v15 = vmax.f32 %v317_v61, 0.0  ;;  %v259_v57 = vld [vmem:[%s2566_s24 + $0xb8] sm:$0xff] }
  0x1d   : > { %399 = vst.msk [vmem:[#allocation2 + $0xc8] sm:$0xff] %vm372_vm0, %v2425_v0  ;;  %v352_v19 = vmax.f32 %v320_v3, 0.0  ;;  %v353_v24 = vmax.f32 %v321_v7, 0.0  ;;  %v291_v40 = vmul.f32 %v2575_v6, %v255_v30  ;;  %v294_v59 = vmul.f32 %v2575_v6, %v258_v56  ;;  %v256_v3 = vld [vmem:[%s2566_s24 + $0xa0] sm:$0xff]  ;;  %v257_v7 = vld [vmem:[%s2566_s24 + $0xa8] sm:$0xff] }
  0x1e   : > { %401 = vst.msk [vmem:[#allocation2 + $0xd8] sm:$0xff] %vm372_vm0, %v2425_v0  ;;  %v356_v25 = vmax.f32 %v324_v8, 0.0  ;;  %v323_v26 = vadd.f32 %v2592_v11, %v287_v10 }
  0x1f   : > { %402 = vst.msk [vmem:[#allocation2 + $0xe0] sm:$0xff] %vm372_vm0, %v2425_v0  ;;  %v327_v48 = vadd.f32 %v2592_v11, %v291_v40 }
  0x20   : > { %404 = vst.msk [vmem:[#allocation2 + $0xf0] sm:$0xff] %vm372_vm0, %v2425_v0  ;;  %v355_v45 = vmax.f32 %v323_v26, 0.0  ;;  %v261_v26 = vld [vmem:[%s2566_s24 + $0xc8] sm:$0xff] }
  0x21   : > { %405 = vst.msk [vmem:[#allocation2 + $0xf8] sm:$0xff] %vm372_vm0, %v2425_v0  ;;  %v359_v52 = vmax.f32 %v327_v48, 0.0 }
  0x22   : > { %407 = vst.msk [vmem:[#allocation2 + $0x108] sm:$0xff] %vm372_vm0, %v2425_v0 }
  0x23   : > { %408 = vst.msk [vmem:[#allocation2 + $0x110] sm:$0xff] %vm372_vm0, %v2425_v0 }
  0x24   : > { %410 = vst.msk [vmem:[#allocation2 + $0x120] sm:$0xff] %vm372_vm0, %v2425_v0 }
  0x25   : > { %411 = vst.msk [vmem:[#allocation2 + $0x128] sm:$0xff] %vm372_vm0, %v2425_v0 }
  0x26   : > { %413 = vst.msk [vmem:[#allocation2 + $0x138] sm:$0xff] %vm372_vm0, %v2425_v0 }
  0x27   : > { %414 = vst.msk [vmem:[#allocation2 + $0x140] sm:$0xff] %vm372_vm0, %v2425_v0 }
  0x28   : > { %416 = vst.msk [vmem:[#allocation2 + $0x150] sm:$0xff] %vm372_vm0, %v2425_v0 }
  0x29   : > { %417 = vst.msk [vmem:[#allocation2 + $0x158] sm:$0xff] %vm372_vm0, %v2425_v0 }
  0x2a   : > { %419 = vst.msk [vmem:[#allocation2 + $0x168] sm:$0xff] %vm372_vm0, %v2425_v0 }
  0x2b   : > { %420 = vst.msk [vmem:[#allocation2 + $0x170] sm:$0xff] %vm372_vm0, %v2425_v0 }
  0x2c   : > { %422 = vst.msk [vmem:[#allocation2 + $0x180] sm:$0xff] %vm372_vm0, %v2425_v0 }
  0x2d   : > { %423 = vst.msk [vmem:[#allocation2 + $0x188] sm:$0xff] %vm372_vm0, %v2425_v0 }
  0x2e   : > { %425 = vst.msk [vmem:[#allocation2 + $0x198] sm:$0xff] %vm372_vm0, %v2425_v0 }
  0x2f   : > { %426 = vst.msk [vmem:[#allocation2 + $0x1a0] sm:$0xff] %vm372_vm0, %v2425_v0 }
  0x30   : > { %376 = vst.msk [vmem:[#allocation2 + $0x10] sm:$0x3] %vm375_vm2, %v2425_v0 }
  0x31   : > { %379 = vst.msk [vmem:[#allocation2 + $0x28] sm:$0x3] %vm375_vm2, %v2425_v0 }
  0x32   : > { %382 = vst.msk [vmem:[#allocation2 + $0x40] sm:$0x3] %vm375_vm2, %v2425_v0 }
  0x33   : > { %385 = vst.msk [vmem:[#allocation2 + $0x58] sm:$0x3] %vm375_vm2, %v2425_v0 }
  0x34   : > { %388 = vst.msk [vmem:[#allocation2 + $0x70] sm:$0x3] %vm375_vm2, %v2425_v0 }
  0x35   : > { %391 = vst.msk [vmem:[#allocation2 + $0x88] sm:$0x3] %vm375_vm2, %v2425_v0 }
  0x36   : > { %394 = vst.msk [vmem:[#allocation2 + $0xa0] sm:$0x3] %vm375_vm2, %v2425_v0 }
  0x37   : > { %v2595_v13 = vld [vmem:[#allocation2 + $0x10] sm:$0x3]  ;;  %397 = vst.msk [vmem:[#allocation2 + $0xb8] sm:$0x3] %vm375_vm2, %v2425_v0 }
  0x38   : > { %v567_v16 = vrot.slane %v2595_v13, 1  ;;  %400 = vst.msk [vmem:[#allocation2 + $0xd0] sm:$0x3] %vm375_vm2, %v2425_v0 }
  0x39   : > { %403 = vst.msk [vmem:[#allocation2 + $0xe8] sm:$0x3] %vm375_vm2, %v2425_v0 }
  0x3a   : > { %v568_v21 = vsel %vm563_vm1, %v565_v4, %v567_v16  ;;  %406 = vst.msk [vmem:[#allocation2 + $0x100] sm:$0x3] %vm375_vm2, %v2425_v0  ;;  %v250_v4 = vld [vmem:[%s2566_s24 + $0x70] sm:$0xff]  ;;  %v325_v16 = vadd.f32 %v2592_v11, %v289_v62 }
  0x3b   : > { %646 = vrot.lane.b32.xlu0 %v568_v21, %s2426_s20  ;;  %409 = vst.msk [vmem:[#allocation2 + $0x118] sm:$0x3] %vm375_vm2, %v2425_v0  ;;  %v286_v9 = vmul.f32 %v2575_v6, %v250_v4  ;;  %v254_v21 = vld [vmem:[%s2566_s24 + $0x90] sm:$0xff] }
  0x3c   : > { %412 = vst.msk [vmem:[#allocation2 + $0x130] sm:$0x3] %vm375_vm2, %v2425_v0  ;;  %v290_v31 = vmul.f32 %v2575_v6, %v254_v21  ;;  %v357_v35 = vmax.f32 %v325_v16, 0.0 }
  0x3d   : > { %415 = vst.msk [vmem:[#allocation2 + $0x148] sm:$0x3] %vm375_vm2, %v2425_v0  ;;  %v322_v20 = vadd.f32 %v2592_v11, %v286_v9 }
  0x3e   : > { %418 = vst.msk [vmem:[#allocation2 + $0x160] sm:$0x3] %vm375_vm2, %v2425_v0  ;;  %v326_v41 = vadd.f32 %v2592_v11, %v290_v31 }
  0x3f   : > { %421 = vst.msk [vmem:[#allocation2 + $0x178] sm:$0x3] %vm375_vm2, %v2425_v0 }
  0x40   : > { %424 = vst.msk [vmem:[#allocation2 + $0x190] sm:$0x3] %vm375_vm2, %v2425_v0 }
  0x41   : > { %427 = vst.msk [vmem:[#allocation2 + $0x1a8] sm:$0x3] %vm375_vm2, %v2425_v0  ;;  %v351_v0 = vmax.f32 %v319_v51, 0.0 }
  0x42   : > { %431 = vst.msk [vmem:[#allocation2 + $0x31] sm:$0xff] %vm372_vm0, %v342_v34 }
  0x43   : > { %432 = vst.msk [vmem:[#allocation2 + $0x39] sm:$0xff] %vm372_vm0, %v343_v39  ;;  %v354_v39 = vmax.f32 %v322_v20, 0.0  ;;  %v260_v20 = vld [vmem:[%s2566_s24 + $0xc0] sm:$0xff] }
  0x44   : > { %429 = vst.msk [vmem:[#allocation2 + $0x19] sm:$0xff] %vm372_vm0, %v340_v42  ;;  %v296_v31 = vmul.f32 %v2575_v6, %v260_v20  ;;  %v263_v20 = vld [vmem:[%s2566_s24 + $0xd8] sm:$0xff] }
  0x45   : > { %430 = vst.msk [vmem:[#allocation2 + $0x21] sm:$0xff] %vm372_vm0, %v341_v46 }
  0x46   : > { %433 = vst.msk [vmem:[#allocation2 + $0x49] sm:$0xff] %vm372_vm0, %v344_v49  ;;  %v358_v49 = vmax.f32 %v326_v41, 0.0  ;;  %v332_v41 = vadd.f32 %v2592_v11, %v296_v31  ;;  %v299_v31 = vmul.f32 %v2575_v6, %v263_v20 }
  0x47   : > { %434 = vst.msk [vmem:[#allocation2 + $0x51] sm:$0xff] %vm372_vm0, %v345_v55 }
  0x48   : > { %435 = vst.msk [vmem:[#allocation2 + $0x61] sm:$0xff] %vm372_vm0, %v346_v58 }
  0x49   : > { %v2675_v14 = vld [vmem:[#allocation2 + $0x30] sm:$0xff]  ;;  %436 = vst.msk [vmem:[#allocation2 + $0x69] sm:$0xff] %vm372_vm0, %v347_v60  ;;  %v295_v60 = vmul.f32 %v2575_v6, %v259_v57 }
  0x4a   : > { %v2679_v17 = vld [vmem:[#allocation2 + $0x38] sm:$0xff]  ;;  %v574_v18 = vrot.slane %v2675_v14, 1  ;;  %439 = vst.msk [vmem:[#allocation2 + $0x91] sm:$0xff] %vm372_vm0, %v350_v63  ;;  %v2693_v29 = vld [vmem:[#allocation2 + $0x40] sm:$0x3]  ;;  %v330_v63 = vadd.f32 %v2592_v11, %v294_v59 }
  0x4b   : > { %v575_v22 = vrot.slane %v2679_v17, 1  ;;  %v2686_v23 = vld [vmem:[#allocation2 + $0x18] sm:$0xff]  ;;  %440 = vst.msk [vmem:[#allocation2 + $0x99] sm:$0xff] %vm372_vm0, %v351_v0  ;;  %v577_v44 = vrot.slane %v2693_v29, 1  ;;  %v331_v0 = vadd.f32 %v2592_v11, %v295_v60  ;;  %v264_v59 = vld [vmem:[%s2566_s24 + $0xe0] sm:$0xff]  ;;  %v265_v60 = vld [vmem:[%s2566_s24 + $0xe8] sm:$0xff] }
  0x4c   : > { %v2690_v27 = vld [vmem:[#allocation2 + $0x20] sm:$0xff]  ;;  %v569_v28 = vrot.slane %v2686_v23, 1  ;;  %437 = vst.msk [vmem:[#allocation2 + $0x79] sm:$0xff] %vm372_vm0, %v348_v12  ;;  %v2710_v38 = vld [vmem:[#allocation2 + $0x28] sm:$0x3]  ;;  %v362_v10 = vmax.f32 %v330_v63, 0.0 }
  0x4d   : > { %v2699_v32 = vsel %vm563_vm1, %v574_v18, %v575_v22  ;;  %v570_v33 = vrot.slane %v2690_v27, 1  ;;  %v2702_v34 = vld [vmem:[#allocation2 + $0x48] sm:$0xff]  ;;  %438 = vst.msk [vmem:[#allocation2 + $0x81] sm:$0xff] %vm372_vm0, %v349_v15  ;;  %v572_v51 = vrot.slane %v2710_v38, 1  ;;  %v2738_v53 = vsel %vm563_vm1, %v575_v22, %v577_v44 }
  0x4e   : > { %652 = vrot.lane.b32.xlu2 %v2699_v32, %s2426_s20  ;;  %v2707_v36 = vld [vmem:[#allocation2 + $0x50] sm:$0xff]  ;;  %v579_v37 = vrot.slane %v2702_v34, 1  ;;  %441 = vst.msk [vmem:[#allocation2 + $0xa9] sm:$0xff] %vm372_vm0, %v352_v19  ;;  %v2756_v62 = vld [vmem:[#allocation2 + $0x58] sm:$0x3]  ;;  %v363_v12 = vmax.f32 %v331_v0, 0.0  ;;  %v292_v15 = vmul.f32 %v2575_v6, %v256_v3  ;;  %v293_v18 = vmul.f32 %v2575_v6, %v257_v7 }
  0x4f   : > { %v2716_v42 = vsel %vm563_vm1, %v569_v28, %v570_v33  ;;  %v580_v43 = vrot.slane %v2707_v36, 1  ;;  %442 = vst.msk [vmem:[#allocation2 + $0xb1] sm:$0xff] %vm372_vm0, %v353_v24  ;;  %v2745_v58 = vld [vmem:[#allocation2 + $0x60] sm:$0xff]  ;;  %v2751_v61 = vsel %vm563_vm1, %v570_v33, %v572_v51  ;;  %v582_v16 = vrot.slane %v2756_v62, 1 }
  0x50   : > { %648 = vrot.lane.b32.xlu1 %v2716_v42, %s2426_s20  ;;  %v2723_v46 = vld [vmem:[#allocation2 + $0x68] sm:$0xff]  ;;  %v2725_v47 = vld [vmem:[#allocation2 + $0x70] sm:$0x3]  ;;  %445 = vst.msk [vmem:[#allocation2 + $0xd9] sm:$0xff] %vm372_vm0, %v356_v25  ;;  %v584_v5 = vrot.slane %v2745_v58, 1  ;;  %v328_v19 = vadd.f32 %v2592_v11, %v292_v15  ;;  %v329_v25 = vadd.f32 %v2592_v11, %v293_v18  ;;  %v297_v33 = vmul.f32 %v2575_v6, %v261_v26 }
  0x51   : > { %v2730_v50 = vsel %vm563_vm1, %v579_v37, %v580_v43  ;;  %446 = vst.msk [vmem:[#allocation2 + $0xe1] sm:$0xff] %vm372_vm0, %v357_v35  ;;  %v585_v54 = vrot.slane %v2723_v46, 1  ;;  %v587_v55 = vrot.slane %v2725_v47, 1  ;;  %v2768_v8 = vld [vmem:[#allocation2 + $0x90] sm:$0xff]  ;;  %v2795_v35 = vsel %vm563_vm1, %v580_v43, %v582_v16 }
  0x52   : > { %4827 = vst [vmem:[#allocation3_spill] sm:$0xff] %v2730_v50  ;;  %656 = vrot.lane.b32.xlu0 %v2730_v50, %s2426_s20  ;;  %v2770_v9 = vld [vmem:[#allocation2 + $0x98] sm:$0xff]  ;;  %v594_v22 = vrot.slane %v2768_v8, 1  ;;  %v361_v40 = vmax.f32 %v329_v25, 0.0  ;;  %v333_v51 = vadd.f32 %v2592_v11, %v297_v33  ;;  %v300_v3 = vmul.f32 %v2575_v6, %v264_v59  ;;  %v2845_v18 = vld [vmem:[#allocation2 + $0xa0] sm:$0x3] }
  0x53   : > { %443 = vst.msk [vmem:[#allocation2 + $0xc1] sm:$0xff] %vm372_vm0, %v354_v39  ;;  %v2762_v4 = vsel %vm563_vm1, %v585_v54, %v587_v55  ;;  %v2781_v21 = vsel %vm563_vm1, %v584_v5, %v585_v54  ;;  %v595_v24 = vrot.slane %v2770_v9, 1  ;;  %v2799_v37 = vld [vmem:[#allocation2 + $0x78] sm:$0xff]  ;;  %v360_v39 = vmax.f32 %v328_v19, 0.0  ;;  %v262_v19 = vld [vmem:[%s2566_s24 + $0xd0] sm:$0xff] }
  0x54   : > { %444 = vst.msk [vmem:[#allocation2 + $0xc9] sm:$0xff] %vm372_vm0, %v355_v45  ;;  %v2788_v28 = vld [vmem:[#allocation2 + $0x80] sm:$0xff]  ;;  %v2790_v30 = vld [vmem:[#allocation2 + $0x88] sm:$0x3]  ;;  %v589_v54 = vrot.slane %v2799_v37, 1  ;;  %v365_v55 = vmax.f32 %v333_v51, 0.0  ;;  %v301_v5 = vmul.f32 %v2575_v6, %v265_v60  ;;  %v298_v26 = vmul.f32 %v2575_v6, %v262_v19 }
  0x55   : > { %447 = vst.msk [vmem:[#allocation2 + $0xf1] sm:$0xff] %vm372_vm0, %v358_v49  ;;  %v2805_v44 = vsel %vm563_vm1, %v594_v22, %v595_v24  ;;  %v590_v45 = vrot.slane %v2788_v28, 1  ;;  %v592_v43 = vrot.slane %v2790_v30, 1  ;;  %v2829_v0 = vld [vmem:[#allocation2 + $0xa8] sm:$0xff] }
  0x56   : > { %448 = vst.msk [vmem:[#allocation2 + $0xf9] sm:$0xff] %vm372_vm0, %v359_v52  ;;  %654 = vrot.lane.b32.xlu2 %v2738_v53, %s2426_s20  ;;  %v2809_v48 = vld [vmem:[#allocation2 + $0xb0] sm:$0xff]  ;;  %v2811_v49 = vld [vmem:[#allocation2 + $0xb8] sm:$0x3]  ;;  %v364_v52 = vmax.f32 %v332_v41, 0.0  ;;  %v599_v16 = vrot.slane %v2829_v0, 1  ;;  %v334_v41 = vadd.f32 %v2592_v11, %v298_v26 }
  0x57   : > { %4828 = vst [vmem:[#allocation4_spill] sm:$0xff] %v2762_v4  ;;  %v600_v56 = vrot.slane %v2809_v48, 1  ;;  %v602_v57 = vrot.slane %v2811_v49, 1  ;;  %v2827_v63 = vsel %vm563_vm1, %v590_v45, %v592_v43  ;;  %v2835_v7 = vsel %vm563_vm1, %v589_v54, %v590_v45  ;;  %v2853_v33 = vld [vmem:[#allocation2 + $0xd8] sm:$0xff] }
  0x58   : > { %650 = vrot.lane.b32.xlu1 %v2751_v61, %s2426_s20  ;;  %451 = vst.msk [vmem:[#allocation2 + $0x121] sm:$0xff] %vm372_vm0, %v362_v10  ;;  %v336_v10 = vadd.f32 %v2592_v11, %v300_v3  ;;  %v335_v45 = vadd.f32 %v2592_v11, %v299_v31  ;;  %v609_v51 = vrot.slane %v2853_v33, 1  ;;  %v2910_v31 = vld [vmem:[#allocation2 + $0xe8] sm:$0x3] }
  0x59   : > { %4829 = vst [vmem:[#allocation5_spill] sm:$0xff] %v2781_v21  ;;  %v2842_v15 = vsel %vm563_vm1, %v600_v56, %v602_v57  ;;  %v2865_v43 = vsel %vm563_vm1, %v599_v16, %v600_v56  ;;  %v366_v57 = vmax.f32 %v334_v41, 0.0 }
  0x5a   : > { %662 = vrot.lane.b32.xlu0 %v2762_v4, %s2426_s20  ;;  %452 = vst.msk [vmem:[#allocation2 + $0x129] sm:$0xff] %vm372_vm0, %v363_v12  ;;  %v337_v12 = vadd.f32 %v2592_v11, %v301_v5  ;;  %v368_v22 = vmax.f32 %v336_v10, 0.0  ;;  %v367_v59 = vmax.f32 %v335_v45, 0.0  ;;  %v2880_v56 = vld [vmem:[#allocation2 + $0xc0] sm:$0xff] }
  0x5b   : > { %4830 = vst [vmem:[#allocation6_spill] sm:$0xff] %v2795_v35  ;;  %v2869_v54 = vld [vmem:[#allocation2 + $0xc8] sm:$0xff]  ;;  %v604_v16 = vrot.slane %v2880_v56, 1 }
  0x5c   : > { %4831 = vst [vmem:[#allocation7_spill] sm:$0xff] %v2805_v44  ;;  %v369_v25 = vmax.f32 %v337_v12, 0.0  ;;  %v605_v5 = vrot.slane %v2869_v54, 1 }
  0x5d   : > { %449 = vst.msk [vmem:[#allocation2 + $0x109] sm:$0xff] %vm372_vm0, %v360_v39  ;;  %v2855_v39 = vld [vmem:[#allocation2 + $0xe0] sm:$0xff] }
  0x5e   : > { %660 = vrot.lane.b32.xlu2 %v2781_v21, %s2426_s20  ;;  %450 = vst.msk [vmem:[#allocation2 + $0x111] sm:$0xff] %vm372_vm0, %v361_v40  ;;  %v597_v40 = vrot.slane %v2845_v18, 1  ;;  %v2893_v12 = vld [vmem:[#allocation2 + $0x100] sm:$0x3]  ;;  %v2906_v26 = vsel %vm563_vm1, %v604_v16, %v605_v5 }
  0x5f   : > { %453 = vst.msk [vmem:[#allocation2 + $0x139] sm:$0xff] %vm372_vm0, %v364_v52  ;;  %v610_v52 = vrot.slane %v2855_v39, 1  ;;  %v2918_v45 = vld [vmem:[#allocation2 + $0x120] sm:$0xff] }
  0x60   : > { %658 = vrot.lane.b32.xlu1 %v2795_v35, %s2426_s20  ;;  %4832 = vst [vmem:[#allocation8_spill] sm:$0xff] %v2827_v63  ;;  %v2876_v60 = vsel %vm563_vm1, %v595_v24, %v597_v40  ;;  %v2891_v24 = vld [vmem:[#allocation2 + $0xf8] sm:$0xff] }
  0x61   : > { %454 = vst.msk [vmem:[#allocation2 + $0x141] sm:$0xff] %vm372_vm0, %v365_v55  ;;  %v2871_v55 = vld [vmem:[#allocation2 + $0xd0] sm:$0x3]  ;;  %v2884_v3 = vsel %vm563_vm1, %v609_v51, %v610_v52  ;;  %v615_v20 = vrot.slane %v2891_v24, 1  ;;  %v2920_v51 = vld [vmem:[#allocation2 + $0x128] sm:$0xff] }
  0x62   : > { %668 = vrot.lane.b32.xlu0 %v2805_v44, %s2426_s20  ;;  %4833 = vst [vmem:[#allocation9_spill] sm:$0xff] %v2835_v7  ;;  %v607_v10 = vrot.slane %v2871_v55, 1 }
  0x63   : > { %4834 = vst [vmem:[#allocation10_spill] sm:$0xff] %v2842_v15 }
  0x64   : > { %457 = vst.msk [vmem:[#allocation2 + $0x169] sm:$0xff] %vm372_vm0, %v368_v22  ;;  %v2899_v19 = vsel %vm563_vm1, %v605_v5, %v607_v10  ;;  %v617_v22 = vrot.slane %v2893_v12, 1  ;;  %v624_v5 = vrot.slane %v2918_v45, 1  ;;  %v625_v10 = vrot.slane %v2920_v51, 1 }
  0x65   : > { %458 = vst.msk [vmem:[#allocation2 + $0x171] sm:$0xff] %vm372_vm0, %v369_v25  ;;  %v2903_v25 = vld [vmem:[#allocation2 + $0xf0] sm:$0xff] }
  0x66   : > { %666 = vrot.lane.b32.xlu2 %v2827_v63, %s2426_s20  ;;  %4835 = vst [vmem:[#allocation11_spill] sm:$0xff] %v2865_v43  ;;  %v2913_v40 = vsel %vm563_vm1, %v615_v20, %v617_v22  ;;  %v614_v41 = vrot.slane %v2903_v25, 1  ;;  %v2930_v16 = vld [vmem:[#allocation2 + $0x110] sm:$0xff]  ;;  %v2932_v22 = vld [vmem:[#allocation2 + $0x118] sm:$0x3] }
  0x67   : > { %4836 = vst [vmem:[#allocation12_spill] sm:$0xff] %v2876_v60  ;;  %v2960_v44 = vld [vmem:[#allocation2 + $0x138] sm:$0xff] }
  0x68   : > { %664 = vrot.lane.b32.xlu1 %v2835_v7, %s2426_s20  ;;  %455 = vst.msk [vmem:[#allocation2 + $0x151] sm:$0xff] %vm372_vm0, %v366_v57  ;;  %v612_v57 = vrot.slane %v2910_v31, 1 }
  0x69   : > { %4837 = vst [vmem:[#allocation13_spill] sm:$0xff] %v2884_v3 }
  0x6a   : > { %674 = vrot.lane.b32.xlu0 %v2842_v15, %s2426_s20  ;;  %456 = vst.msk [vmem:[#allocation2 + $0x159] sm:$0xff] %vm372_vm0, %v367_v59  ;;  %v2926_v59 = vsel %vm563_vm1, %v614_v41, %v615_v20  ;;  %v2939_v15 = vld [vmem:[#allocation2 + $0x108] sm:$0xff]  ;;  %v620_v20 = vrot.slane %v2930_v16, 1  ;;  %v622_v41 = vrot.slane %v2932_v22, 1 }
  0x6b   : > { %4838 = vst [vmem:[#allocation14_spill] sm:$0xff] %v2899_v19 }
  0x6c   : > { %4839 = vst [vmem:[#allocation15_spill] sm:$0xff] %v2906_v26  ;;  %v2977_v4 = vld [vmem:[#allocation2 + $0x170] sm:$0xff] }
  0x6d   : > { %4840 = vst [vmem:[#allocation16_spill] sm:$0xff] %v2913_v40 }
  0x6e   : > { %672 = vrot.lane.b32.xlu2 %v2865_v43, %s2426_s20  ;;  %4841 = vst [vmem:[#allocation17_spill] sm:$0xff] %v2926_v59 }
  0x6f   : > { %v2996_v50 = vld [vmem:[#allocation2 + $0x150] sm:$0xff] }
  0x70   : > { %670 = vrot.lane.b32.xlu1 %v2876_v60, %s2426_s20  ;;  %v2967_v60 = vld [vmem:[#allocation2 + $0x130] sm:$0x3]  ;;  %v634_v35 = vrot.slane %v2996_v50, 1 }
  0x71   : > { %v2987_v7 = vld [vmem:[#allocation2 + $0x158] sm:$0xff]  ;;  %v2989_v63 = vld [vmem:[#allocation2 + $0x160] sm:$0x3] }
  0x72   : > { %680 = vrot.lane.b32.xlu0 %v2884_v3, %s2426_s20  ;;  %v2935_v3 = vsel %vm563_vm1, %v610_v52, %v612_v57  ;;  %v619_v52 = vrot.slane %v2939_v15, 1  ;;  %v2956_v57 = vsel %vm563_vm1, %v620_v20, %v622_v41  ;;  %v629_v41 = vrot.slane %v2960_v44, 1 }
  0x73   : > { %4842 = vst [vmem:[#allocation18_spill] sm:$0xff] %v2935_v3 }
  0x74   : > { %4845 = vst [vmem:[#allocation21_spill] sm:$0xff] %v2956_v57 }
  0x76   : > { %678 = vrot.lane.b32.xlu2 %v2899_v19, %s2426_s20  ;;  %v2950_v19 = vld [vmem:[#allocation2 + $0x148] sm:$0x3] }
  0x78   : > { %676 = vrot.lane.b32.xlu1 %v2906_v26, %s2426_s20  ;;  %v2948_v26 = vld [vmem:[#allocation2 + $0x140] sm:$0xff] }
  0x79   : > { %4844 = vst [vmem:[#allocation20_spill] sm:$0xff] %v2948_v26 }
  0x7a   : > { %686 = vrot.lane.b32.xlu0 %v2913_v40, %s2426_s20  ;;  %v2942_v40 = vsel %vm563_vm1, %v624_v5, %v625_v10  ;;  %v630_v5 = vrot.slane %v2948_v26, 1 }
  0x7b   : > { %4843 = vst [vmem:[#allocation19_spill] sm:$0xff] %v2942_v40 }
  0x7e   : > { %684 = vrot.lane.b32.xlu2 %v2926_v59, %s2426_s20  ;;  %v632_v59 = vrot.slane %v2950_v19, 1 }
  0x80   : > { %682 = vrot.lane.b32.xlu1 %v2935_v3, %s2426_s20  ;;  %v2963_v3 = vsel %vm563_vm1, %v619_v52, %v620_v20  ;;  %v2970_v43 = vsel %vm563_vm1, %v630_v5, %v632_v59  ;;  %v627_v20 = vrot.slane %v2967_v60, 1  ;;  %v2983_v52 = vsel %vm563_vm1, %v629_v41, %v630_v5 }
  0x81   : > { %4846 = vst [vmem:[#allocation22_spill] sm:$0xff] %v2963_v3  ;;  %v635_v5 = vrot.slane %v2987_v7, 1  ;;  %v637_v41 = vrot.slane %v2989_v63, 1 }
  0x82   : > { %692 = vrot.lane.b32.xlu0 %v2942_v40, %s2426_s20  ;;  %4847 = vst [vmem:[#allocation23_spill] sm:$0xff] %v2970_v43  ;;  %v2975_v40 = vld [vmem:[#allocation2 + $0x168] sm:$0xff] }
  0x83   : > { %4848 = vst [vmem:[#allocation24_spill] sm:$0xff] %v2983_v52  ;;  %v639_v59 = vrot.slane %v2975_v40, 1 }
  0x86   : > { %690 = vrot.lane.b32.xlu2 %v2956_v57, %s2426_s20  ;;  %v640_v57 = vrot.slane %v2977_v4, 1 }
  0x88   : > { %688 = vrot.lane.b32.xlu1 %v2963_v3, %s2426_s20  ;;  %v2992_v3 = vsel %vm563_vm1, %v625_v10, %v627_v20  ;;  %v3009_v10 = vsel %vm563_vm1, %v635_v5, %v637_v41  ;;  %v742_v20 = vrot.slane %v2490_v2, 2 }
  0x89   : > { %4849 = vst [vmem:[#allocation25_spill] sm:$0xff] %v2992_v3 }
  0x8a   : > { %698 = vrot.lane.b32.xlu0 %v2970_v43, %s2426_s20  ;;  %v2999_v43 = vsel %vm563_vm1, %v639_v59, %v640_v57  ;;  %4851 = vst [vmem:[#allocation27_spill] sm:$0xff] %v3009_v10  ;;  %v744_v59 = vrot.slane %v2595_v13, 2 }
  0x8b   : > { %4850 = vst [vmem:[#allocation26_spill] sm:$0xff] %v2999_v43 }
  0x8c   : > { %v745_v21 = vsel %vm740_vm3, %v742_v20, %v744_v59  ;;  %v747_v59 = vrot.slane %v2690_v27, 2 }
  0x8e   : > { %696 = vrot.lane.b32.xlu2 %v2983_v52, %s2426_s20  ;;  %v3014_v52 = vsel %vm563_vm1, %v634_v35, %v635_v5  ;;  %v751_v35 = vrot.slane %v2675_v14, 2  ;;  %v752_v5 = vrot.slane %v2679_v17, 2 }
  0x8f   : > { %4852 = vst [vmem:[#allocation28_spill] sm:$0xff] %v3014_v52 }
  0x90   : > { %694 = vrot.lane.b32.xlu1 %v2992_v3, %s2426_s20  ;;  %v3018_v3 = vld [vmem:[#allocation2 + $0x178] sm:$0x3] }
  0x91   : > { %v642_v2 = vrot.slane %v3018_v3, 1 }
  0x92   : > { %704 = vrot.lane.b32.xlu0 %v2999_v43, %s2426_s20  ;;  %v741_v43 = vrot.slane %v2486_v1, 2  ;;  %v3034_v1 = vsel %vm740_vm3, %v751_v35, %v752_v5  ;;  %v754_v35 = vrot.slane %v2693_v29, 2  ;;  %v762_v29 = vrot.slane %v2723_v46, 2 }
  0x93   : > { %v3030_v41 = vsel %vm563_vm1, %v640_v57, %v642_v2  ;;  %4854 = vst [vmem:[#allocation30_spill] sm:$0xff] %v3034_v1  ;;  %v757_v57 = vrot.slane %v2707_v36, 2 }
  0x94   : > { %v743_v13 = vsel %vm740_vm3, %v741_v43, %v742_v20  ;;  %4853 = vst [vmem:[#allocation29_spill] sm:$0xff] %v3030_v41  ;;  %v759_v20 = vrot.slane %v2756_v62, 2 }
  0x96   : > { %702 = vrot.lane.b32.xlu2 %v3009_v10, %s2426_s20 }
  0x98   : > { %700 = vrot.lane.b32.xlu1 %v3014_v52, %s2426_s20  ;;  %v749_v52 = vrot.slane %v2710_v38, 2  ;;  %v3054_v38 = vsel %vm740_vm3, %v757_v57, %v759_v20  ;;  %v3070_v20 = vsel %vm740_vm3, %v752_v5, %v754_v35  ;;  %v761_v5 = vrot.slane %v2745_v58, 2 }
  0x99   : > { %4855 = vst [vmem:[#allocation31_spill] sm:$0xff] %v3054_v38 }
  0x9a   : > { %823 = vrot.lane.b32.xlu0 %v745_v21, %s2427_s29  ;;  %v746_v21 = vrot.slane %v2686_v23, 2  ;;  %v3044_v43 = vsel %vm740_vm3, %v747_v59, %v749_v52 }
  0x9c   : > { %v3049_v2 = vsel %vm740_vm3, %v746_v21, %v747_v59  ;;  %v766_v59 = vrot.slane %v2799_v37, 2  ;;  %v767_v21 = vrot.slane %v2788_v28, 2 }
  0x9e   : > { %821 = vrot.lane.b32.xlu2 %v743_v13, %s2427_s29  ;;  %v756_v13 = vrot.slane %v2702_v34, 2 }
  0xa0   : > { %706 = vrot.lane.b32.xlu1 %v3030_v41, %s2426_s20  ;;  %v3065_v62 = vsel %vm740_vm3, %v756_v13, %v757_v57  ;;  %v3083_v13 = vpop.permute.xlu0 %644 }
  0xa1   : > { %4859 = vst [vmem:[#allocation35_spill] sm:$0xff] %v3083_v13  ;;  %v771_v13 = vrot.slane %v2768_v8, 2 }
  0xa2   : > { %829 = vrot.lane.b32.xlu0 %v3034_v1, %s2427_s29  ;;  %v774_v1 = vrot.slane %v2845_v18, 2 }
  0xa6   : > { %827 = vrot.lane.b32.xlu2 %v3044_v43, %s2427_s29 }
  0xa8   : > { %825 = vrot.lane.b32.xlu1 %v3049_v2, %s2427_s29  ;;  %v3059_v52 = vpop.permute.xlu2 %652 }
  0xa9   : > { %4856 = vst [vmem:[#allocation32_spill] sm:$0xff] %v3059_v52  ;;  %v3075_v52 = vsel %vm740_vm3, %v766_v59, %v767_v21  ;;  %v772_v59 = vrot.slane %v2770_v9, 2 }
  0xaa   : > { %835 = vrot.lane.b32.xlu0 %v3054_v38, %s2427_s29  ;;  %4857 = vst [vmem:[#allocation33_spill] sm:$0xff] %v3075_v52  ;;  %v764_v38 = vrot.slane %v2725_v47, 2  ;;  %v3094_v47 = vsel %vm740_vm3, %v761_v5, %v762_v29  ;;  %v782_v5 = vrot.slane %v2869_v54, 2 }
  0xac   : > { %v3089_v35 = vsel %vm740_vm3, %v762_v29, %v764_v38  ;;  %v3112_v29 = vsel %vm740_vm3, %v771_v13, %v772_v59 }
  0xad   : > { %4860 = vst [vmem:[#allocation36_spill] sm:$0xff] %v3089_v35  ;;  %v3109_v18 = vpop.permute.xlu0 %646 }
  0xae   : > { %833 = vrot.lane.b32.xlu2 %v3065_v62, %s2427_s29  ;;  %4863 = vst [vmem:[#allocation39_spill] sm:$0xff] %v3109_v18  ;;  %v779_v18 = vrot.slane %v2811_v49, 2 }
  0xb0   : > { %831 = vrot.lane.b32.xlu1 %v3070_v20, %s2427_s29  ;;  %v3081_v57 = vpop.permute.xlu2 %654 }
  0xb1   : > { %4858 = vst [vmem:[#allocation34_spill] sm:$0xff] %v3081_v57  ;;  %v3099_v57 = vsel %vm740_vm3, %v772_v59, %v774_v1  ;;  %v781_v1 = vrot.slane %v2880_v56, 2  ;;  %v776_v59 = vrot.slane %v2829_v0, 2 }
  0xb2   : > { %841 = vrot.lane.b32.xlu0 %v3075_v52, %s2427_s29  ;;  %4861 = vst [vmem:[#allocation37_spill] sm:$0xff] %v3099_v57  ;;  %v769_v52 = vrot.slane %v2790_v30, 2 }
  0xb3   : > { %v3122_v30 = vsel %vm740_vm3, %v781_v1, %v782_v5  ;;  %v789_v1 = vrot.slane %v2910_v31, 2  ;;  %v784_v31 = vrot.slane %v2871_v55, 2 }
  0xb4   : > { %4865 = vst [vmem:[#allocation41_spill] sm:$0xff] %v3122_v30 }
  0xb6   : > { %839 = vrot.lane.b32.xlu2 %v3089_v35, %s2427_s29  ;;  %v3117_v35 = vsel %vm740_vm3, %v767_v21, %v769_v52  ;;  %v787_v21 = vrot.slane %v2855_v39, 2 }
  0xb7   : > { %4864 = vst [vmem:[#allocation40_spill] sm:$0xff] %v3117_v35 }
  0xb8   : > { %837 = vrot.lane.b32.xlu1 %v3094_v47, %s2427_s29  ;;  %v3104_v38 = vpop.permute.xlu2 %660 }
  0xb9   : > { %4862 = vst [vmem:[#allocation38_spill] sm:$0xff] %v3104_v38  ;;  %v777_v38 = vrot.slane %v2809_v48, 2 }
  0xba   : > { %847 = vrot.lane.b32.xlu0 %v3099_v57, %s2427_s29 }
  0xbb   : > { %v3136_v52 = vsel %vm740_vm3, %v777_v38, %v779_v18 }
  0xbc   : > { %4868 = vst [vmem:[#allocation44_spill] sm:$0xff] %v3136_v52 }
  0xbe   : > { %845 = vrot.lane.b32.xlu2 %v3112_v29, %s2427_s29 }
  0xc0   : > { %843 = vrot.lane.b32.xlu1 %v3117_v35, %s2427_s29  ;;  %v3128_v13 = vpop.permute.xlu2 %666  ;;  %v3143_v35 = vsel %vm740_vm3, %v776_v59, %v777_v38  ;;  %v796_v59 = vrot.slane %v2939_v15, 2 }
  0xc1   : > { %4866 = vst [vmem:[#allocation42_spill] sm:$0xff] %v3128_v13  ;;  %v3148_v13 = vsel %vm740_vm3, %v787_v21, %v789_v1  ;;  %v797_v1 = vrot.slane %v2930_v16, 2 }
  0xc2   : > { %v3131_v57 = vpop.permute.xlu1 %648  ;;  %853 = vrot.lane.b32.xlu0 %v3122_v30, %s2427_s29  ;;  %4870 = vst [vmem:[#allocation46_spill] sm:$0xff] %v3143_v35 }
  0xc3   : > { %4867 = vst [vmem:[#allocation43_spill] sm:$0xff] %v3131_v57  ;;  %v786_v57 = vrot.slane %v2853_v33, 2  ;;  %v3173_v55 = vsel %vm740_vm3, %v796_v59, %v797_v1  ;;  %v804_v59 = vrot.slane %v2967_v60, 2  ;;  %v799_v60 = vrot.slane %v2932_v22, 2 }
  0xc4   : > { %v3140_v49 = vpop.permute.xlu0 %656  ;;  %4871 = vst [vmem:[#allocation47_spill] sm:$0xff] %v3148_v13 }
  0xc5   : > { %4869 = vst [vmem:[#allocation45_spill] sm:$0xff] %v3140_v49  ;;  %v3161_v38 = vsel %vm740_vm3, %v786_v57, %v787_v21  ;;  %v794_v57 = vrot.slane %v2893_v12, 2 }
  0xc6   : > { %851 = vrot.lane.b32.xlu2 %v3136_v52, %s2427_s29  ;;  %4874 = vst [vmem:[#allocation50_spill] sm:$0xff] %v3161_v38 }
  0xc7   : > { %4877 = vst [vmem:[#allocation53_spill] sm:$0xff] %v3173_v55 }
  0xc8   : > { %849 = vrot.lane.b32.xlu1 %v3143_v35, %s2427_s29  ;;  %v3153_v18 = vpop.permute.xlu2 %672  ;;  %v3168_v35 = vsel %vm740_vm3, %v782_v5, %v784_v31  ;;  %v802_v31 = vrot.slane %v2920_v51, 2 }
  0xc9   : > { %4872 = vst [vmem:[#allocation48_spill] sm:$0xff] %v3153_v18 }
  0xca   : > { %v3156_v30 = vpop.permute.xlu1 %650  ;;  %859 = vrot.lane.b32.xlu0 %v3148_v13, %s2427_s29  ;;  %4876 = vst [vmem:[#allocation52_spill] sm:$0xff] %v3168_v35 }
  0xcb   : > { %4873 = vst [vmem:[#allocation49_spill] sm:$0xff] %v3156_v30  ;;  %v792_v30 = vrot.slane %v2891_v24, 2 }
  0xcc   : > { %v3165_v49 = vpop.permute.xlu0 %662 }
  0xcd   : > { %4875 = vst [vmem:[#allocation51_spill] sm:$0xff] %v3165_v49  ;;  %v791_v49 = vrot.slane %v2903_v25, 2  ;;  %v3187_v5 = vsel %vm740_vm3, %v792_v30, %v794_v57 }
  0xce   : > { %857 = vrot.lane.b32.xlu2 %v3161_v38, %s2427_s29 }
  0xcf   : > { %v3194_v13 = vsel %vm740_vm3, %v791_v49, %v792_v30  ;;  %v811_v49 = vrot.slane %v2996_v50, 2 }
  0xd0   : > { %855 = vrot.lane.b32.xlu1 %v3168_v35, %s2427_s29  ;;  %v3179_v21 = vpop.permute.xlu2 %678  ;;  %4881 = vst [vmem:[#allocation57_spill] sm:$0xff] %v3194_v13 }
  0xd1   : > { %4878 = vst [vmem:[#allocation54_spill] sm:$0xff] %v3179_v21  ;;  %v801_v21 = vrot.slane %v2918_v45, 2 }
  0xd2   : > { %v3182_v18 = vpop.permute.xlu1 %658  ;;  %865 = vrot.lane.b32.xlu0 %v3173_v55, %s2427_s29 }
  0xd3   : > { %4879 = vst [vmem:[#allocation55_spill] sm:$0xff] %v3182_v18  ;;  %v3199_v18 = vsel %vm740_vm3, %v802_v31, %v804_v59  ;;  %v3212_v30 = vsel %vm740_vm3, %v801_v21, %v802_v31  ;;  %v812_v59 = vrot.slane %v2987_v7, 2  ;;  %v809_v21 = vrot.slane %v2950_v19, 2 }
  0xd4   : > { %v3191_v12 = vpop.permute.xlu0 %668  ;;  %4882 = vst [vmem:[#allocation58_spill] sm:$0xff] %v3199_v18 }
  0xd5   : > { %4880 = vst [vmem:[#allocation56_spill] sm:$0xff] %v3191_v12  ;;  %v3224_v22 = vsel %vm740_vm3, %v811_v49, %v812_v59  ;;  %v819_v49 = vrot.slane %v3018_v3, 2  ;;  %v814_v3 = vrot.slane %v2989_v63, 2 }
  0xd6   : > { %863 = vrot.lane.b32.xlu2 %v3187_v5, %s2427_s29  ;;  %4885 = vst [vmem:[#allocation61_spill] sm:$0xff] %v3212_v30 }
  0xd7   : > { %4888 = vst [vmem:[#allocation64_spill] sm:$0xff] %v3224_v22 }
  0xd8   : > { %861 = vrot.lane.b32.xlu1 %v3194_v13, %s2427_s29  ;;  %v3204_v57 = vpop.permute.xlu2 %684  ;;  %v3219_v13 = vsel %vm740_vm3, %v797_v1, %v799_v60  ;;  %v817_v60 = vrot.slane %v2977_v4, 2 }
  0xd9   : > { %4883 = vst [vmem:[#allocation59_spill] sm:$0xff] %v3204_v57  ;;  %v806_v57 = vrot.slane %v2960_v44, 2 }
  0xda   : > { %v3207_v55 = vpop.permute.xlu1 %664  ;;  %871 = vrot.lane.b32.xlu0 %v3199_v18, %s2427_s29  ;;  %4887 = vst [vmem:[#allocation63_spill] sm:$0xff] %v3219_v13 }
  0xdb   : > { %4884 = vst [vmem:[#allocation60_spill] sm:$0xff] %v3207_v55  ;;  %v807_v55 = vrot.slane %v2948_v26, 2 }
  0xdc   : > { %v3216_v12 = vpop.permute.xlu0 %674 }
  0xdd   : > { %4886 = vst [vmem:[#allocation62_spill] sm:$0xff] %v3216_v12  ;;  %v3238_v1 = vsel %vm740_vm3, %v807_v55, %v809_v21  ;;  %v3245_v18 = vsel %vm740_vm3, %v806_v57, %v807_v55 }
  0xde   : > { %869 = vrot.lane.b32.xlu2 %v3212_v30, %s2427_s29  ;;  %4891 = vst [vmem:[#allocation67_spill] sm:$0xff] %v3238_v1 }
  0xdf   : > { %4892 = vst [vmem:[#allocation68_spill] sm:$0xff] %v3245_v18 }
  0xe0   : > { %867 = vrot.lane.b32.xlu1 %v3219_v13, %s2427_s29  ;;  %v3230_v31 = vpop.permute.xlu2 %690 }
  0xe1   : > { %4889 = vst [vmem:[#allocation65_spill] sm:$0xff] %v3230_v31  ;;  %v3250_v31 = vsel %vm740_vm3, %v817_v60, %v819_v49  ;;  %v3268_v49 = vsel %vm740_vm3, %v812_v59, %v814_v3 }
  0xe2   : > { %v3233_v12 = vpop.permute.xlu1 %670  ;;  %877 = vrot.lane.b32.xlu0 %v3224_v22, %s2427_s29  ;;  %4893 = vst [vmem:[#allocation69_spill] sm:$0xff] %v3250_v31 }
  0xe3   : > { %4890 = vst [vmem:[#allocation66_spill] sm:$0xff] %v3233_v12  ;;  %v816_v12 = vrot.slane %v2975_v40, 2 }
  0xe4   : > { %v3242_v19 = vpop.permute.xlu0 %680  ;;  %4896 = vst [vmem:[#allocation72_spill] sm:$0xff] %v3268_v49 }
  0xe5   : > { %v3263_v55 = vsel %vm740_vm3, %v816_v12, %v817_v60 }
  0xe6   : > { %875 = vrot.lane.b32.xlu2 %v3238_v1, %s2427_s29  ;;  %4895 = vst [vmem:[#allocation71_spill] sm:$0xff] %v3263_v55 }
  0xe8   : > { %873 = vrot.lane.b32.xlu1 %v3245_v18, %s2427_s29  ;;  %v3255_v21 = vpop.permute.xlu2 %696 }
  0xe9   : > { %4894 = vst [vmem:[#allocation70_spill] sm:$0xff] %v3255_v21 }
  0xea   : > { %v3258_v22 = vpop.permute.xlu1 %676  ;;  %883 = vrot.lane.b32.xlu0 %v3250_v31, %s2427_s29 }
  0xec   : > { %v3265_v57 = vpop.permute.xlu0 %686 }
  0xee   : > { %881 = vrot.lane.b32.xlu2 %v3263_v55, %s2427_s29 }
  0xf0   : > { %879 = vrot.lane.b32.xlu1 %v3268_v49, %s2427_s29  ;;  %v3274_v63 = vpop.permute.xlu2 %702 }
  0xf1   : > { %4897 = vst [vmem:[#allocation73_spill] sm:$0xff] %v3274_v63  ;;  %v4932_v63 = vld [vmem:[#allocation9_spill] sm:$0xff] }
  0xf2   : > { %v3276_v21 = vpop.permute.xlu1 %682  ;;  %923 = vrot.lane.b32.xlu0 %v2675_v14, %s2428_s30 }
  0xf4   : > { %v3280_v12 = vpop.permute.xlu0 %692 }
  0xf6   : > { %921 = vrot.lane.b32.xlu2 %v2690_v27, %s2428_s30 }
  0xf8   : > { %919 = vrot.lane.b32.xlu1 %v2686_v23, %s2428_s30  ;;  %v3286_v59 = vpop.permute.xlu2 %821 }
  0xf9   : > { %4898 = vst [vmem:[#allocation74_spill] sm:$0xff] %v3286_v59 }
  0xfa   : > { %v3288_v60 = vpop.permute.xlu1 %688  ;;  %929 = vrot.lane.b32.xlu0 %v2707_v36, %s2428_s30 }
  0xfb   : > { %4899 = vst [vmem:[#allocation75_spill] sm:$0xff] %v3288_v60 }
  0xfc   : > { %v3292_v3 = vpop.permute.xlu0 %698 }
  0xfe   : > { %927 = vrot.lane.b32.xlu2 %v2702_v34, %s2428_s30 }
 0x100   : > { %925 = vrot.lane.b32.xlu1 %v2679_v17, %s2428_s30  ;;  %v3298_v14 = vpop.permute.xlu2 %827 }
 0x101   : > { %4900 = vst [vmem:[#allocation76_spill] sm:$0xff] %v3298_v14 }
 0x102   : > { %v3300_v27 = vpop.permute.xlu1 %694  ;;  %935 = vrot.lane.b32.xlu0 %v2799_v37, %s2428_s30 }
 0x103   : > { %4901 = vst [vmem:[#allocation77_spill] sm:$0xff] %v3300_v27 }
 0x104   : > { %v3304_v23 = vpop.permute.xlu0 %704 }
 0x105   : > { %4902 = vst [vmem:[#allocation78_spill] sm:$0xff] %v3304_v23 }
 0x106   : > { %933 = vrot.lane.b32.xlu2 %v2723_v46, %s2428_s30 }
 0x108   : > { %931 = vrot.lane.b32.xlu1 %v2745_v58, %s2428_s30  ;;  %v3310_v34 = vpop.permute.xlu2 %833 }
 0x109   : > { %4903 = vst [vmem:[#allocation79_spill] sm:$0xff] %v3310_v34  ;;  %v267_v34 = vld [vmem:[%s2566_s24 + $0xf8] sm:$0xff] }
 0x10a   : > { %v3312_v17 = vpop.permute.xlu1 %700  ;;  %941 = vrot.lane.b32.xlu0 %v2770_v9, %s2428_s30  ;;  %v303_v14 = vmul.f32 %v2575_v6, %v267_v34 }
 0x10b   : > { %4904 = vst [vmem:[#allocation80_spill] sm:$0xff] %v3312_v17 }
 0x10c   : > { %v3316_v36 = vpop.permute.xlu0 %823 }
 0x10d   : > { %4905 = vst [vmem:[#allocation81_spill] sm:$0xff] %v3316_v36  ;;  %v339_v36 = vadd.f32 %v2592_v11, %v303_v14 }
 0x10e   : > { %939 = vrot.lane.b32.xlu2 %v2768_v8, %s2428_s30  ;;  %v266_v8 = vld [vmem:[%s2566_s24 + $0xf0] sm:$0xff] }
 0x110   : > { %937 = vrot.lane.b32.xlu1 %v2788_v28, %s2428_s30  ;;  %v3322_v46 = vpop.permute.xlu2 %839 }
 0x111   : > { %4906 = vst [vmem:[#allocation82_spill] sm:$0xff] %v3322_v46  ;;  %v302_v46 = vmul.f32 %v2575_v6, %v266_v8 }
 0x112   : > { %v3324_v37 = vpop.permute.xlu1 %706  ;;  %947 = vrot.lane.b32.xlu0 %v2880_v56, %s2428_s30 }
 0x113   : > { %4907 = vst [vmem:[#allocation83_spill] sm:$0xff] %v3324_v37  ;;  %v4933_v37 = vld [vmem:[#allocation4_spill] sm:$0xff] }
 0x114   : > { %v3328_v58 = vpop.permute.xlu0 %829 }
 0x115   : > { %4908 = vst [vmem:[#allocation84_spill] sm:$0xff] %v3328_v58 }
 0x116   : > { %945 = vrot.lane.b32.xlu2 %v2809_v48, %s2428_s30  ;;  %v338_v48 = vadd.f32 %v2592_v11, %v302_v46 }
 0x118   : > { %943 = vrot.lane.b32.xlu1 %v2829_v0, %s2428_s30  ;;  %v3334_v9 = vpop.permute.xlu2 %845  ;;  %v370_v0 = vmax.f32 %v338_v48, 0.0 }
 0x119   : > { %4909 = vst [vmem:[#allocation85_spill] sm:$0xff] %v3334_v9  ;;  %v371_v9 = vmax.f32 %v339_v36, 0.0 }
 0x11a   : > { %v3338_v28 = vpop.permute.xlu1 %825  ;;  %953 = vrot.lane.b32.xlu0 %v2855_v39, %s2428_s30  ;;  %459 = vst.msk [vmem:[#allocation2 + $0x181] sm:$0xff] %vm372_vm0, %v370_v0 }
 0x11b   : > { %4910 = vst [vmem:[#allocation86_spill] sm:$0xff] %v3338_v28 }
 0x11c   : > { %v3344_v58 = vpop.permute.xlu0 %835  ;;  %460 = vst.msk [vmem:[#allocation2 + $0x189] sm:$0xff] %vm372_vm0, %v371_v9 }
 0x11d   : > { %4911 = vst [vmem:[#allocation87_spill] sm:$0xff] %v3344_v58  ;;  %v4924_v58 = vld [vmem:[#allocation5_spill] sm:$0xff] }
 0x11e   : > { %951 = vrot.lane.b32.xlu2 %v2853_v33, %s2428_s30 }
 0x120   : > { %949 = vrot.lane.b32.xlu1 %v2869_v54, %s2428_s30  ;;  %v3352_v28 = vpop.permute.xlu2 %851 }
 0x122   : > { %v3356_v6 = vpop.permute.xlu1 %831  ;;  %959 = vrot.lane.b32.xlu0 %v2939_v15, %s2428_s30 }
 0x123   : > { %4912 = vst [vmem:[#allocation88_spill] sm:$0xff] %v3356_v6 }
 0x124   : > { %v3360_v11 = vpop.permute.xlu0 %841 }
 0x125   : > { %4913 = vst [vmem:[#allocation89_spill] sm:$0xff] %v3360_v11  ;;  %v4927_v11 = vld [vmem:[#allocation3_spill] sm:$0xff] }
 0x126   : > { %957 = vrot.lane.b32.xlu2 %v2891_v24, %s2428_s30 }
 0x128   : > { %955 = vrot.lane.b32.xlu1 %v2903_v25, %s2428_s30  ;;  %v3366_v39 = vpop.permute.xlu2 %857 }
 0x12a   : > { %v3368_v54 = vpop.permute.xlu1 %837  ;;  %965 = vrot.lane.b32.xlu0 %v2920_v51, %s2428_s30 }
 0x12b   : > { %4914 = vst [vmem:[#allocation90_spill] sm:$0xff] %v3368_v54 }
 0x12c   : > { %v3372_v14 = vpop.permute.xlu0 %847 }
 0x12e   : > { %963 = vrot.lane.b32.xlu2 %v2918_v45, %s2428_s30 }
 0x130   : > { %961 = vrot.lane.b32.xlu1 %v2930_v16, %s2428_s30  ;;  %v3378_v15 = vpop.permute.xlu2 %863 }
 0x132   : > { %v3380_v34 = vpop.permute.xlu1 %843  ;;  %971 = vrot.lane.b32.xlu0 %v2996_v50, %s2428_s30 }
 0x133   : > { %4915 = vst [vmem:[#allocation91_spill] sm:$0xff] %v3380_v34  ;;  %v4926_v34 = vld [vmem:[#allocation6_spill] sm:$0xff] }
 0x134   : > { %v3384_v36 = vpop.permute.xlu0 %853 }
 0x136   : > { %969 = vrot.lane.b32.xlu2 %v2948_v26, %s2428_s30 }
 0x138   : > { %967 = vrot.lane.b32.xlu1 %v2960_v44, %s2428_s30  ;;  %v3390_v51 = vpop.permute.xlu2 %869  ;;  %v3408_v44 = vld [vmem:[#allocation2 + $0x188] sm:$0xff] }
 0x139   : > { %v1017_v60 = vrot.slane %v3408_v44, 1 }
 0x13a   : > { %v3392_v46 = vpop.permute.xlu1 %849  ;;  %977 = vrot.lane.b32.xlu0 %v2977_v4, %s2428_s30  ;;  %v3412_v4 = vld [vmem:[#allocation2 + $0x180] sm:$0xff] }
 0x13c   : > { %v3396_v16 = vpop.permute.xlu0 %859 }
 0x13e   : > { %975 = vrot.lane.b32.xlu2 %v2975_v40, %s2428_s30 }
 0x140   : > { %973 = vrot.lane.b32.xlu1 %v2987_v7, %s2428_s30  ;;  %v3402_v50 = vpop.permute.xlu2 %875 }
 0x141   : > { %4916 = vst [vmem:[#allocation92_spill] sm:$0xff] %v3402_v50 }
 0x142   : > { %v3404_v9 = vpop.permute.xlu1 %855  ;;  %1021 = vrot.lane.b32.xlu0 %v2716_v42, %s2429_s6 }
 0x143   : > { %4917 = vst [vmem:[#allocation93_spill] sm:$0xff] %v3404_v9  ;;  %v4963_v9 = vld [vmem:[#allocation28_spill] sm:$0xff] }
 0x144   : > { %v3410_v8 = vpop.permute.xlu0 %865 }
 0x145   : > { %4918 = vst [vmem:[#allocation94_spill] sm:$0xff] %v3410_v8 }
 0x146   : > { %981 = vrot.lane.b32.xlu2 %v3408_v44, %s2428_s30 }
 0x148   : > { %979 = vrot.lane.b32.xlu1 %v3412_v4, %s2428_s30  ;;  %v3418_v7 = vpop.permute.xlu2 %881 }
 0x149   : > { %4919 = vst [vmem:[#allocation95_spill] sm:$0xff] %v3418_v7  ;;  %v4947_v7 = vld [vmem:[#allocation17_spill] sm:$0xff] }
 0x14a   : > { %v3420_v40 = vpop.permute.xlu1 %861  ;;  %1027 = vrot.lane.b32.xlu0 %v2738_v53, %s2429_s6 }
 0x14b   : > { %4920 = vst [vmem:[#allocation96_spill] sm:$0xff] %v3420_v40 }
 0x14c   : > { %v3424_v42 = vpop.permute.xlu0 %871 }
 0x14d   : > { %4921 = vst [vmem:[#allocation97_spill] sm:$0xff] %v3424_v42  ;;  %v4942_v42 = vld [vmem:[#allocation14_spill] sm:$0xff] }
 0x14e   : > { %1025 = vrot.lane.b32.xlu2 %v2699_v32, %s2429_s6 }
 0x150   : > { %1023 = vrot.lane.b32.xlu1 %v2751_v61, %s2429_s6  ;;  %v3430_v48 = vpop.permute.xlu2 %921  ;;  %v4930_v61 = vld [vmem:[#allocation8_spill] sm:$0xff] }
 0x151   : > { %4922 = vst [vmem:[#allocation98_spill] sm:$0xff] %v3430_v48 }
 0x152   : > { %v3432_v0 = vpop.permute.xlu1 %867  ;;  %1033 = vrot.lane.b32.xlu0 %v4924_v58, %s2429_s6 }
 0x153   : > { %4923 = vst [vmem:[#allocation99_spill] sm:$0xff] %v3432_v0  ;;  %v4936_v0 = vld [vmem:[#allocation11_spill] sm:$0xff] }
 0x154   : > { %v3436_v6 = vpop.permute.xlu0 %877 }
 0x155   : > { %4925 = vst [vmem:[#allocation5_spill] sm:$0xff] %v3436_v6 }
 0x156   : > { %1031 = vrot.lane.b32.xlu2 %v4926_v34, %s2429_s6 }
 0x158   : > { %1029 = vrot.lane.b32.xlu1 %v4927_v11, %s2429_s6  ;;  %v3442_v54 = vpop.permute.xlu2 %927 }
 0x159   : > { %4928 = vst [vmem:[#allocation6_spill] sm:$0xff] %v3442_v54 }
 0x15a   : > { %v3444_v59 = vpop.permute.xlu1 %873  ;;  %1039 = vrot.lane.b32.xlu0 %v4930_v61, %s2429_s6  ;;  %v4939_v61 = vld [vmem:[#allocation7_spill] sm:$0xff] }
 0x15b   : > { %4929 = vst [vmem:[#allocation3_spill] sm:$0xff] %v3444_v59  ;;  %v4938_v59 = vld [vmem:[#allocation12_spill] sm:$0xff] }
 0x15c   : > { %v3448_v48 = vpop.permute.xlu0 %883 }
 0x15d   : > { %4931 = vst [vmem:[#allocation100_spill] sm:$0xff] %v3448_v48 }
 0x15e   : > { %1037 = vrot.lane.b32.xlu2 %v4932_v63, %s2429_s6 }
 0x160   : > { %1035 = vrot.lane.b32.xlu1 %v4933_v37, %s2429_s6  ;;  %v3454_v6 = vpop.permute.xlu2 %933 }
 0x161   : > { %4934 = vst [vmem:[#allocation101_spill] sm:$0xff] %v3454_v6 }
 0x162   : > { %v3456_v17 = vpop.permute.xlu1 %879  ;;  %1045 = vrot.lane.b32.xlu0 %v4936_v0, %s2429_s6 }
 0x163   : > { %4935 = vst [vmem:[#allocation102_spill] sm:$0xff] %v3456_v17  ;;  %v4944_v17 = vld [vmem:[#allocation15_spill] sm:$0xff] }
 0x164   : > { %v3460_v54 = vpop.permute.xlu0 %923 }
 0x165   : > { %4937 = vst [vmem:[#allocation11_spill] sm:$0xff] %v3460_v54  ;;  %v4945_v54 = vld [vmem:[#allocation10_spill] sm:$0xff] }
 0x166   : > { %1043 = vrot.lane.b32.xlu2 %v4938_v59, %s2429_s6 }
 0x168   : > { %1041 = vrot.lane.b32.xlu1 %v4939_v61, %s2429_s6  ;;  %v3466_v48 = vpop.permute.xlu2 %939 }
 0x169   : > { %4940 = vst [vmem:[#allocation12_spill] sm:$0xff] %v3466_v48 }
 0x16a   : > { %v3468_v63 = vpop.permute.xlu1 %919  ;;  %1051 = vrot.lane.b32.xlu0 %v4942_v42, %s2429_s6 }
 0x16b   : > { %4941 = vst [vmem:[#allocation7_spill] sm:$0xff] %v3468_v63  ;;  %v4949_v63 = vld [vmem:[#allocation18_spill] sm:$0xff] }
 0x16c   : > { %v3472_v6 = vpop.permute.xlu0 %929 }
 0x16d   : > { %4943 = vst [vmem:[#allocation103_spill] sm:$0xff] %v3472_v6  ;;  %v4950_v6 = vld [vmem:[#allocation13_spill] sm:$0xff] }
 0x16e   : > { %1049 = vrot.lane.b32.xlu2 %v4944_v17, %s2429_s6 }
 0x170   : > { %1047 = vrot.lane.b32.xlu1 %v4945_v54, %s2429_s6  ;;  %v3478_v27 = vpop.permute.xlu2 %945  ;;  %v4952_v54 = vld [vmem:[#allocation21_spill] sm:$0xff] }
 0x172   : > { %v3480_v40 = vpop.permute.xlu1 %925  ;;  %1057 = vrot.lane.b32.xlu0 %v4947_v7, %s2429_s6 }
 0x173   : > { %4946 = vst [vmem:[#allocation104_spill] sm:$0xff] %v3480_v40  ;;  %v4954_v40 = vld [vmem:[#allocation22_spill] sm:$0xff] }
 0x174   : > { %v3484_v48 = vpop.permute.xlu0 %935 }
 0x175   : > { %4948 = vst [vmem:[#allocation17_spill] sm:$0xff] %v3484_v48  ;;  %v4955_v48 = vld [vmem:[#allocation16_spill] sm:$0xff] }
 0x176   : > { %1055 = vrot.lane.b32.xlu2 %v4949_v63, %s2429_s6 }
 0x178   : > { %1053 = vrot.lane.b32.xlu1 %v4950_v6, %s2429_s6  ;;  %v3490_v42 = vpop.permute.xlu2 %951  ;;  %v4957_v6 = vld [vmem:[#allocation24_spill] sm:$0xff] }
 0x17a   : > { %v3492_v17 = vpop.permute.xlu1 %931  ;;  %1063 = vrot.lane.b32.xlu0 %v4952_v54, %s2429_s6 }
 0x17b   : > { %4951 = vst [vmem:[#allocation105_spill] sm:$0xff] %v3492_v17  ;;  %v4958_v17 = vld [vmem:[#allocation25_spill] sm:$0xff] }
 0x17c   : > { %v3496_v23 = vpop.permute.xlu0 %941 }
 0x17d   : > { %4953 = vst [vmem:[#allocation106_spill] sm:$0xff] %v3496_v23  ;;  %v4959_v23 = vld [vmem:[#allocation19_spill] sm:$0xff] }
 0x17e   : > { %1061 = vrot.lane.b32.xlu2 %v4954_v40, %s2429_s6 }
 0x180   : > { %1059 = vrot.lane.b32.xlu1 %v4955_v48, %s2429_s6  ;;  %v3502_v37 = vpop.permute.xlu2 %957  ;;  %v4982_v48 = vld [vmem:[#allocation40_spill] sm:$0xff] }
 0x182   : > { %v3504_v63 = vpop.permute.xlu1 %937  ;;  %1069 = vrot.lane.b32.xlu0 %v4957_v6, %s2429_s6 }
 0x183   : > { %4956 = vst [vmem:[#allocation107_spill] sm:$0xff] %v3504_v63  ;;  %v1016_v63 = vrot.slane %v3412_v4, 1 }
 0x184   : > { %v3508_v8 = vpop.permute.xlu0 %947 }
 0x186   : > { %1067 = vrot.lane.b32.xlu2 %v4958_v17, %s2429_s6  ;;  %v3527_v17 = vsel %vm563_vm1, %v1016_v63, %v1017_v60  ;;  %v4968_v63 = vld [vmem:[#allocation26_spill] sm:$0xff] }
 0x187   : > { %4964 = vst [vmem:[#allocation111_spill] sm:$0xff] %v3527_v17 }
 0x188   : > { %1065 = vrot.lane.b32.xlu1 %v4959_v23, %s2429_s6  ;;  %v3514_v54 = vpop.permute.xlu2 %963  ;;  %v4965_v23 = vld [vmem:[#allocation23_spill] sm:$0xff] }
 0x189   : > { %4960 = vst [vmem:[#allocation108_spill] sm:$0xff] %v3514_v54 }
 0x18a   : > { %v3516_v40 = vpop.permute.xlu1 %943  ;;  %1075 = vrot.lane.b32.xlu0 %v3009_v10, %s2429_s6 }
 0x18b   : > { %4961 = vst [vmem:[#allocation109_spill] sm:$0xff] %v3516_v40 }
 0x18c   : > { %v3522_v6 = vpop.permute.xlu0 %953 }
 0x18d   : > { %4962 = vst [vmem:[#allocation110_spill] sm:$0xff] %v3522_v6  ;;  %v3541_v6 = vld [vmem:[#allocation2 + $0x190] sm:$0x3] }
 0x18e   : > { %1073 = vrot.lane.b32.xlu2 %v4963_v9, %s2429_s6 }
 0x190   : > { %1071 = vrot.lane.b32.xlu1 %v4965_v23, %s2429_s6  ;;  %v3531_v54 = vpop.permute.xlu2 %969  ;;  %v1019_v23 = vrot.slane %v3541_v6, 1 }
 0x191   : > { %4966 = vst [vmem:[#allocation112_spill] sm:$0xff] %v3531_v54 }
 0x192   : > { %v3533_v40 = vpop.permute.xlu1 %949  ;;  %1081 = vrot.lane.b32.xlu0 %v3527_v17, %s2429_s6 }
 0x194   : > { %v3537_v10 = vpop.permute.xlu0 %959 }
 0x195   : > { %4967 = vst [vmem:[#allocation113_spill] sm:$0xff] %v3537_v10  ;;  %v3555_v10 = vsel %vm563_vm1, %v1017_v60, %v1019_v23  ;;  %v4976_v23 = vld [vmem:[#allocation36_spill] sm:$0xff] }
 0x196   : > { %1079 = vrot.lane.b32.xlu2 %v3030_v41, %s2429_s6  ;;  %4971 = vst [vmem:[#allocation116_spill] sm:$0xff] %v3555_v10 }
 0x198   : > { %1077 = vrot.lane.b32.xlu1 %v4968_v63, %s2429_s6  ;;  %v3545_v9 = vpop.permute.xlu2 %975 }
 0x199   : > { %4969 = vst [vmem:[#allocation114_spill] sm:$0xff] %v3545_v9 }
 0x19a   : > { %v3548_v54 = vpop.permute.xlu1 %955  ;;  %1124 = vrot.lane.b32.xlu0 %v3044_v43, %s2430_s7  ;;  %v4974_v43 = vld [vmem:[#allocation30_spill] sm:$0xff] }
 0x19c   : > { %v3552_v17 = vpop.permute.xlu0 %965 }
 0x19d   : > { %4970 = vst [vmem:[#allocation115_spill] sm:$0xff] %v3552_v17 }
 0x19e   : > { %1122 = vrot.lane.b32.xlu2 %v3049_v2, %s2430_s7 }
 0x1a0   : > { %1083 = vrot.lane.b32.xlu1 %v3555_v10, %s2429_s6  ;;  %v3561_v41 = vpop.permute.xlu2 %981 }
 0x1a1   : > { %4972 = vst [vmem:[#allocation117_spill] sm:$0xff] %v3561_v41  ;;  %v4978_v41 = vld [vmem:[#allocation31_spill] sm:$0xff] }
 0x1a2   : > { %v3563_v63 = vpop.permute.xlu1 %961  ;;  %1130 = vrot.lane.b32.xlu0 %v3065_v62, %s2430_s7 }
 0x1a4   : > { %v3567_v9 = vpop.permute.xlu0 %971 }
 0x1a5   : > { %4973 = vst [vmem:[#allocation118_spill] sm:$0xff] %v3567_v9 }
 0x1a6   : > { %1128 = vrot.lane.b32.xlu2 %v3070_v20, %s2430_s7 }
 0x1a8   : > { %1126 = vrot.lane.b32.xlu1 %v4974_v43, %s2430_s7  ;;  %v3573_v60 = vpop.permute.xlu2 %1025 }
 0x1a9   : > { %4975 = vst [vmem:[#allocation30_spill] sm:$0xff] %v3573_v60 }
 0x1aa   : > { %v3575_v2 = vpop.permute.xlu1 %967  ;;  %1136 = vrot.lane.b32.xlu0 %v4976_v23, %s2430_s7 }
 0x1ac   : > { %v3579_v10 = vpop.permute.xlu0 %977 }
 0x1ad   : > { %4977 = vst [vmem:[#allocation119_spill] sm:$0xff] %v3579_v10  ;;  %v4983_v10 = vld [vmem:[#allocation33_spill] sm:$0xff] }
 0x1ae   : > { %1134 = vrot.lane.b32.xlu2 %v3094_v47, %s2430_s7 }
 0x1b0   : > { %1132 = vrot.lane.b32.xlu1 %v4978_v41, %s2430_s7  ;;  %v3585_v9 = vpop.permute.xlu2 %1031 }
 0x1b1   : > { %4979 = vst [vmem:[#allocation31_spill] sm:$0xff] %v3585_v9 }
 0x1b2   : > { %v3587_v17 = vpop.permute.xlu1 %973  ;;  %1142 = vrot.lane.b32.xlu0 %v3112_v29, %s2430_s7 }
 0x1b3   : > { %4980 = vst [vmem:[#allocation120_spill] sm:$0xff] %v3587_v17  ;;  %v4987_v17 = vld [vmem:[#allocation46_spill] sm:$0xff] }
 0x1b4   : > { %v3591_v60 = vpop.permute.xlu0 %1021 }
 0x1b5   : > { %4981 = vst [vmem:[#allocation121_spill] sm:$0xff] %v3591_v60  ;;  %v4988_v60 = vld [vmem:[#allocation37_spill] sm:$0xff] }
 0x1b6   : > { %1140 = vrot.lane.b32.xlu2 %v4982_v48, %s2430_s7 }
 0x1b8   : > { %1138 = vrot.lane.b32.xlu1 %v4983_v10, %s2430_s7  ;;  %v3597_v23 = vpop.permute.xlu2 %1037 }
 0x1b9   : > { %4984 = vst [vmem:[#allocation122_spill] sm:$0xff] %v3597_v23 }
 0x1ba   : > { %v3599_v50 = vpop.permute.xlu1 %979  ;;  %1148 = vrot.lane.b32.xlu0 %v3136_v52, %s2430_s7 }
 0x1bb   : > { %4985 = vst [vmem:[#allocation123_spill] sm:$0xff] %v3599_v50 }
 0x1bc   : > { %v3603_v9 = vpop.permute.xlu0 %1027 }
 0x1bd   : > { %4986 = vst [vmem:[#allocation124_spill] sm:$0xff] %v3603_v9  ;;  %v4992_v9 = vld [vmem:[#allocation41_spill] sm:$0xff] }
 0x1be   : > { %1146 = vrot.lane.b32.xlu2 %v4987_v17, %s2430_s7 }
 0x1c0   : > { %1144 = vrot.lane.b32.xlu1 %v4988_v60, %s2430_s7  ;;  %v3609_v26 = vpop.permute.xlu2 %1043 }
 0x1c1   : > { %4989 = vst [vmem:[#allocation46_spill] sm:$0xff] %v3609_v26 }
 0x1c2   : > { %v3611_v48 = vpop.permute.xlu1 %1023  ;;  %1154 = vrot.lane.b32.xlu0 %v3161_v38, %s2430_s7 }
 0x1c3   : > { %4990 = vst [vmem:[#allocation37_spill] sm:$0xff] %v3611_v48  ;;  %v4995_v48 = vld [vmem:[#allocation57_spill] sm:$0xff] }
 0x1c4   : > { %v3615_v23 = vpop.permute.xlu0 %1033 }
 0x1c5   : > { %4991 = vst [vmem:[#allocation125_spill] sm:$0xff] %v3615_v23  ;;  %v4996_v23 = vld [vmem:[#allocation47_spill] sm:$0xff] }
 0x1c6   : > { %1152 = vrot.lane.b32.xlu2 %v3168_v35, %s2430_s7 }
 0x1c8   : > { %1150 = vrot.lane.b32.xlu1 %v4992_v9, %s2430_s7  ;;  %v3621_v10 = vpop.permute.xlu2 %1049 }
 0x1ca   : > { %v3623_v52 = vpop.permute.xlu1 %1029  ;;  %1160 = vrot.lane.b32.xlu0 %v3187_v5, %s2430_s7 }
 0x1cb   : > { %4993 = vst [vmem:[#allocation126_spill] sm:$0xff] %v3623_v52  ;;  %v4999_v52 = vld [vmem:[#allocation53_spill] sm:$0xff] }
 0x1cc   : > { %v3627_v26 = vpop.permute.xlu0 %1039 }
 0x1cd   : > { %4994 = vst [vmem:[#allocation127_spill] sm:$0xff] %v3627_v26 }
 0x1ce   : > { %1158 = vrot.lane.b32.xlu2 %v4995_v48, %s2430_s7 }
 0x1d0   : > { %1156 = vrot.lane.b32.xlu1 %v4996_v23, %s2430_s7  ;;  %v3633_v38 = vpop.permute.xlu2 %1055 }
 0x1d2   : > { %v3635_v35 = vpop.permute.xlu1 %1035  ;;  %1166 = vrot.lane.b32.xlu0 %v3212_v30, %s2430_s7 }
 0x1d3   : > { %4997 = vst [vmem:[#allocation57_spill] sm:$0xff] %v3635_v35  ;;  %v5001_v35 = vld [vmem:[#allocation58_spill] sm:$0xff] }
 0x1d4   : > { %v3639_v9 = vpop.permute.xlu0 %1045 }
 0x1d5   : > { %4998 = vst [vmem:[#allocation128_spill] sm:$0xff] %v3639_v9 }
 0x1d6   : > { %1164 = vrot.lane.b32.xlu2 %v3219_v13, %s2430_s7  ;;  %v1120_v13 = vrot.slane %v3541_v6, 2 }
 0x1d8   : > { %1162 = vrot.lane.b32.xlu1 %v4999_v52, %s2430_s7  ;;  %v3645_v26 = vpop.permute.xlu2 %1061  ;;  %v5004_v52 = vld [vmem:[#allocation64_spill] sm:$0xff] }
 0x1da   : > { %v3647_v50 = vpop.permute.xlu1 %1041  ;;  %1172 = vrot.lane.b32.xlu0 %v3238_v1, %s2430_s7 }
 0x1db   : > { %5000 = vst [vmem:[#allocation129_spill] sm:$0xff] %v3647_v50  ;;  %v1118_v50 = vrot.slane %v3408_v44, 2 }
 0x1dc   : > { %v3651_v23 = vpop.permute.xlu0 %1051 }
 0x1de   : > { %1170 = vrot.lane.b32.xlu2 %v3245_v18, %s2430_s7  ;;  %v1117_v18 = vrot.slane %v3412_v4, 2 }
 0x1e0   : > { %1168 = vrot.lane.b32.xlu1 %v5001_v35, %s2430_s7  ;;  %v3657_v9 = vpop.permute.xlu2 %1067  ;;  %v3671_v35 = vsel %vm740_vm3, %v1118_v50, %v1120_v13  ;;  %v3682_v6 = vsel %vm740_vm3, %v1117_v18, %v1118_v50  ;;  %v3700_v18 = vld [vmem:[#allocation2 + $0x30] sm:$0xff] }
 0x1e1   : > { %5002 = vst [vmem:[#allocation130_spill] sm:$0xff] %v3657_v9 }
 0x1e2   : > { %v3659_v30 = vpop.permute.xlu1 %1047  ;;  %1178 = vrot.lane.b32.xlu0 %v3263_v55, %s2430_s7  ;;  %5003 = vst [vmem:[#allocation131_spill] sm:$0xff] %v3671_v35 }
 0x1e3   : > { %5005 = vst [vmem:[#allocation64_spill] sm:$0xff] %v3682_v6 }
 0x1e4   : > { %v3665_v1 = vpop.permute.xlu0 %1057  ;;  %5007 = vst [vmem:[#allocation133_spill] sm:$0xff] %v3700_v18 }
 0x1e6   : > { %1176 = vrot.lane.b32.xlu2 %v3268_v49, %s2430_s7 }
 0x1e8   : > { %1174 = vrot.lane.b32.xlu1 %v5004_v52, %s2430_s7  ;;  %v3675_v9 = vpop.permute.xlu2 %1073 }
 0x1ea   : > { %v3677_v55 = vpop.permute.xlu1 %1053  ;;  %1184 = vrot.lane.b32.xlu0 %v3671_v35, %s2430_s7 }
 0x1ec   : > { %v3684_v44 = vpop.permute.xlu0 %1063 }
 0x1ee   : > { %1182 = vrot.lane.b32.xlu2 %v3682_v6, %s2430_s7 }
 0x1f0   : > { %1180 = vrot.lane.b32.xlu1 %v3250_v31, %s2430_s7  ;;  %v3690_v13 = vpop.permute.xlu2 %1079  ;;  %v3714_v31 = vld [vmem:[#allocation2 + $0x38] sm:$0xff] }
 0x1f1   : > { %5006 = vst [vmem:[#allocation132_spill] sm:$0xff] %v3690_v13 }
 0x1f2   : > { %v3692_v4 = vpop.permute.xlu1 %1059  ;;  %1423 = vrot.lane.b32.xlu0 %v4974_v43, %s2431_s8  ;;  %5009 = vst [vmem:[#allocation135_spill] sm:$0xff] %v3714_v31 }
 0x1f4   : > { %v3696_v35 = vpop.permute.xlu0 %1069 }
 0x1f6   : > { %1322 = vrot.lane.b32.xlu2 %v2699_v32, %s2432_s9 }
 0x1f8   : > { %1220 = vrot.lane.b32.xlu1 %v3700_v18, %s2433_s10  ;;  %v3704_v50 = vpop.permute.xlu2 %1122 }
 0x1f9   : > { %5008 = vst [vmem:[#allocation134_spill] sm:$0xff] %v3704_v50 }
 0x1fa   : > { %v3706_v6 = vpop.permute.xlu1 %1065  ;;  %1425 = vrot.lane.b32.xlu0 %v3070_v20, %s2431_s8  ;;  %v3726_v20 = vld [vmem:[#allocation2 + $0x90] sm:$0xff] }
 0x1fb   : > { %5011 = vst [vmem:[#allocation137_spill] sm:$0xff] %v3726_v20 }
 0x1fc   : > { %v3710_v43 = vpop.permute.xlu0 %1075 }
 0x1fe   : > { %1324 = vrot.lane.b32.xlu2 %v2738_v53, %s2432_s9  ;;  %v3730_v53 = vld [vmem:[#allocation2 + $0x48] sm:$0xff] }
 0x1ff   : > { %5012 = vst [vmem:[#allocation138_spill] sm:$0xff] %v3730_v53 }
 0x200   : > { %1222 = vrot.lane.b32.xlu1 %v3714_v31, %s2433_s10  ;;  %v3718_v32 = vpop.permute.xlu2 %1128 }
 0x201   : > { %5010 = vst [vmem:[#allocation136_spill] sm:$0xff] %v3718_v32 }
 0x202   : > { %v3720_v18 = vpop.permute.xlu1 %1071  ;;  %1326 = vrot.lane.b32.xlu0 %v4927_v11, %s2432_s9 }
 0x204   : > { %v3724_v49 = vpop.permute.xlu0 %1081 }
 0x206   : > { %1236 = vrot.lane.b32.xlu2 %v3726_v20, %s2433_s10 }
 0x208   : > { %1224 = vrot.lane.b32.xlu1 %v3730_v53, %s2433_s10  ;;  %v3734_v31 = vpop.permute.xlu2 %1134  ;;  %v2388_v53 = vld [vmem:[#allocation2 + $0x98] sm:$0xff] }
 0x209   : > { %5013 = vst [vmem:[#allocation139_spill] sm:$0xff] %v3734_v31 }
 0x20a   : > { %v3736_v32 = vpop.permute.xlu1 %1077  ;;  %1439 = vrot.lane.b32.xlu0 %v3112_v29, %s2431_s8  ;;  %v3755_v29 = vld [vmem:[#allocation2 + $0x50] sm:$0xff] }
 0x20b   : > { %5017 = vst [vmem:[#allocation143_spill] sm:$0xff] %v3755_v29 }
 0x20c   : > { %v3740_v11 = vpop.permute.xlu0 %1124 }
 0x20d   : > { %5014 = vst [vmem:[#allocation140_spill] sm:$0xff] %v3740_v11 }
 0x20e   : > { %1427 = vrot.lane.b32.xlu2 %v3065_v62, %s2431_s8 }
 0x210   : > { %1338 = vrot.lane.b32.xlu1 %v4939_v61, %s2432_s9  ;;  %v3746_v20 = vpop.permute.xlu2 %1140 }
 0x211   : > { %5015 = vst [vmem:[#allocation141_spill] sm:$0xff] %v3746_v20 }
 0x212   : > { %v3748_v50 = vpop.permute.xlu1 %1083  ;;  %1328 = vrot.lane.b32.xlu0 %v4926_v34, %s2432_s9  ;;  %v3767_v34 = vld [vmem:[#allocation2 + $0xb0] sm:$0xff] }
 0x214   : > { %v3752_v31 = vpop.permute.xlu0 %1130 }
 0x215   : > { %5016 = vst [vmem:[#allocation142_spill] sm:$0xff] %v3752_v31  ;;  %v5019_v31 = vld [vmem:[#allocation62_spill] sm:$0xff] }
 0x216   : > { %1238 = vrot.lane.b32.xlu2 %v2388_v53, %s2433_s10  ;;  %v1534_v11 = vsel %vm372_vm0, %v3767_v34, %v5019_v31 }
 0x217   : > { %v1567_v13 = vsel %vm1551_vm4, %v1534_v11, %v3352_v28  ;;  %v5020_v11 = vld [vmem:[#allocation66_spill] sm:$0xff] }
 0x218   : > { %1226 = vrot.lane.b32.xlu1 %v3755_v29, %s2433_s10  ;;  %v3759_v62 = vpop.permute.xlu2 %1146  ;;  %v1600_v29 = vsel %vm1584_vm5, %v1567_v13, %v3533_v40  ;;  %v1537_v40 = vsel %vm372_vm0, %v2853_v33, %v3242_v19 }
 0x21a   : > { %v3761_v61 = vpop.permute.xlu1 %1126  ;;  %1429 = vrot.lane.b32.xlu0 %v4978_v41, %s2431_s8  ;;  %v1633_v41 = vsel %vm1617_vm6, %v1600_v29, %v3651_v23  ;;  %v1570_v23 = vsel %vm1551_vm4, %v1537_v40, %v3366_v39  ;;  %v1532_v29 = vsel %vm372_vm0, %v2388_v53, %v5020_v11 }
 0x21b   : > { %v1565_v19 = vsel %vm1551_vm4, %v1532_v29, %v3372_v14 }
 0x21c   : > { %v3765_v20 = vpop.permute.xlu0 %1136 }
 0x21d   : > { %5018 = vst [vmem:[#allocation144_spill] sm:$0xff] %v3765_v20 }
 0x21e   : > { %1252 = vrot.lane.b32.xlu2 %v2903_v25, %s2433_s10 }
 0x220   : > { %1340 = vrot.lane.b32.xlu1 %v4938_v59, %s2432_s9  ;;  %v1153_v31 = vpop.permute.xlu2 %1152  ;;  %v1603_v59 = vsel %vm1584_vm5, %v1570_v23, %v3548_v54 }
 0x221   : > { %v3783_v20 = vsel %vm1650_vm7, %v1633_v41, %v1153_v31  ;;  %v1636_v13 = vsel %vm1617_vm6, %v1603_v59, %v3665_v1  ;;  %v1598_v1 = vsel %vm1584_vm5, %v1565_v19, %v3478_v27  ;;  %v2391_v41 = vld [vmem:[#allocation2 + $0xa8] sm:$0xff]  ;;  %v1535_v31 = vsel %vm372_vm0, %v2880_v56, %v3258_v22 }
 0x222   : > { %v3785_v28 = vpop.permute.xlu1 %1132  ;;  %1455 = vrot.lane.b32.xlu0 %v4995_v48, %s2431_s8  ;;  %v1631_v54 = vsel %vm1617_vm6, %v1598_v1, %v3659_v30  ;;  %v1568_v40 = vsel %vm1551_vm4, %v1535_v31, %v3384_v36  ;;  %v1543_v56 = vsel %vm372_vm0, %v2918_v45, %v3280_v12  ;;  %v5023_v1 = vld [vmem:[#allocation92_spill] sm:$0xff] }
 0x223   : > { %v1576_v36 = vsel %vm1551_vm4, %v1543_v56, %v3390_v51  ;;  %v3872_v51 = vld [vmem:[#allocation2 + $0xe0] sm:$0xff]  ;;  %v5029_v56 = vld [vmem:[#allocation110_spill] sm:$0xff] }
 0x224   : > { %v3789_v25 = vpop.permute.xlu0 %1142 }
 0x226   : > { %1354 = vrot.lane.b32.xlu2 %v4947_v7, %s2432_s9 }
 0x228   : > { %1441 = vrot.lane.b32.xlu1 %v4988_v60, %s2431_s8  ;;  %v1159_v48 = vpop.permute.xlu2 %1158  ;;  %v1540_v60 = vsel %vm372_vm0, %v2891_v24, %v3265_v57 }
 0x229   : > { %v3807_v33 = vsel %vm1650_vm7, %v1636_v13, %v1159_v48  ;;  %v1573_v14 = vsel %vm1551_vm4, %v1540_v60, %v3378_v15  ;;  %v5025_v60 = vld [vmem:[#allocation54_spill] sm:$0xff] }
 0x22a   : > { %v3811_v39 = vpop.permute.xlu1 %1138  ;;  %1330 = vrot.lane.b32.xlu0 %v4924_v58, %s2432_s9  ;;  %v1606_v27 = vsel %vm1584_vm5, %v1573_v14, %v3563_v63  ;;  %v3832_v58 = vld [vmem:[#allocation2 + $0x60] sm:$0xff]  ;;  %v5026_v14 = vld [vmem:[#allocation120_spill] sm:$0xff] }
 0x22b   : > { %v1639_v30 = vsel %vm1617_vm6, %v1606_v27, %v3684_v44  ;;  %v1601_v44 = vsel %vm1584_vm5, %v1568_v40, %v3490_v42  ;;  %v5027_v27 = vld [vmem:[#allocation93_spill] sm:$0xff]  ;;  %v1788_v40 = vld [vmem:[%s4728_s3 + $0x30] sm:$0xff] }
 0x22c   : > { %v1149_v7 = vpop.permute.xlu0 %1148  ;;  %v1634_v23 = vsel %vm1617_vm6, %v1601_v44, %v3677_v55  ;;  %v1609_v55 = vsel %vm1584_vm5, %v1576_v36, %v3575_v2  ;;  %v3927_v44 = vld [vmem:[#allocation2 + $0x108] sm:$0xff] }
 0x22d   : > { %v3823_v53 = vsel %vm1650_vm7, %v1631_v54, %v1149_v7  ;;  %v1642_v45 = vsel %vm1617_vm6, %v1609_v55, %v3696_v35  ;;  %v3911_v7 = vld [vmem:[#allocation2 + $0xc8] sm:$0xff] }
 0x22e   : > { %1240 = vrot.lane.b32.xlu2 %v2391_v41, %s2433_s10 }
 0x230   : > { %1228 = vrot.lane.b32.xlu1 %v3832_v58, %s2433_s10  ;;  %v1165_v57 = vpop.permute.xlu2 %1164 }
 0x231   : > { %v3840_v15 = vsel %vm1650_vm7, %v1639_v30, %v1165_v57 }
 0x232   : > { %v3844_v63 = vpop.permute.xlu1 %1144  ;;  %1431 = vrot.lane.b32.xlu0 %v3094_v47, %s2431_s8  ;;  %v5021_v47 = vld [vmem:[#allocation48_spill] sm:$0xff] }
 0x233   : > { %v1533_v42 = vsel %vm372_vm0, %v2391_v41, %v5021_v47 }
 0x234   : > { %v1155_v59 = vpop.permute.xlu0 %1154  ;;  %v1566_v13 = vsel %vm1551_vm4, %v1533_v42, %v3392_v46 }
 0x235   : > { %v3856_v22 = vsel %vm1650_vm7, %v1634_v23, %v1155_v59  ;;  %v1599_v48 = vsel %vm1584_vm5, %v1566_v13, %v3508_v8  ;;  %v1790_v8 = vld [vmem:[%s4728_s3 + $0x40] sm:$0xff]  ;;  %v5028_v23 = vld [vmem:[#allocation75_spill] sm:$0xff]  ;;  %v5031_v13 = vld [vmem:[#allocation4_spill] sm:$0xff] }
 0x236   : > { %1254 = vrot.lane.b32.xlu2 %v2891_v24, %s2433_s10  ;;  %v1538_v24 = vsel %vm372_vm0, %v3872_v51, %v3276_v21  ;;  %v1632_v35 = vsel %vm1617_vm6, %v1599_v48, %v3621_v10  ;;  %1895 = vmatpush.msra.mxu0 %v1790_v8  ;;  %v5022_v10 = vld [vmem:[#allocation20_spill] sm:$0xff]  ;;  %v1541_v59 = vsel %vm372_vm0, %v3927_v44, %v5028_v23 }
 0x237   : > { %v1571_v46 = vsel %vm1551_vm4, %v1538_v24, %v3396_v16  ;;  %2338 = vmatpush.msra.mxu1 %v1790_v8  ;;  %2339 = vmatpush.msra.mxu2 %v1790_v8 }
 0x238   : > { %1342 = vrot.lane.b32.xlu1 %v4936_v0, %s2432_s9  ;;  %v1171_v12 = vpop.permute.xlu2 %1170  ;;  %v1604_v11 = vsel %vm1584_vm5, %v1571_v46, %v3502_v37  ;;  %v1789_v37 = vld [vmem:[%s4728_s3 + $0x38] sm:$0xff]  ;;  %2340 = vmatpush.msra.mxu3 %v1790_v8  ;;  %v5033_v8 = vld [vmem:[#allocation78_spill] sm:$0xff] }
 0x239   : > { %v3880_v2 = vsel %vm1650_vm7, %v1642_v45, %v1171_v12  ;;  %v1637_v16 = vsel %vm1617_vm6, %v1604_v11, %v3692_v4  ;;  %v5024_v4 = vld [vmem:[#allocation16_spill] sm:$0xff]  ;;  %1896 = vmatpush.msra.mxu0 %v1789_v37  ;;  %2341 = vmatpush.msra.mxu1 %v1789_v37  ;;  %v1787_v45 = vld [vmem:[%s4728_s3 + $0x28] sm:$0xff] }
 0x23a   : > { %v1151_v0 = vpop.permute.xlu1 %1150  ;;  %1457 = vrot.lane.b32.xlu0 %v3187_v5, %s2431_s8  ;;  %v1546_v5 = vsel %vm372_vm0, %v5022_v10, %v3292_v3  ;;  %v1536_v3 = vsel %vm372_vm0, %v3911_v7, %v5025_v60  ;;  %2342 = vmatpush.msra.mxu2 %v1789_v37  ;;  %v5032_v12 = vld [vmem:[#allocation108_spill] sm:$0xff]  ;;  %v3959_v11 = vld [vmem:[#allocation2 + $0x168] sm:$0xff]  ;;  %v5034_v10 = vld [vmem:[#allocation95_spill] sm:$0xff] }
 0x23b   : > { %v3891_v21 = vsel %vm1650_vm7, %v1632_v35, %v1151_v0  ;;  %v1579_v54 = vsel %vm1551_vm4, %v1546_v5, %v5023_v1  ;;  %v1569_v30 = vsel %vm1551_vm4, %v1536_v3, %v5027_v27  ;;  %2343 = vmatpush.msra.mxu3 %v1789_v37  ;;  %1897 = vmatpush.msra.mxu0 %v1788_v40  ;;  %v1785_v0 = vld [vmem:[%s4728_s3 + $0x18] sm:$0xff]  ;;  %v2397_v5 = vld [vmem:[#allocation2 + $0xf0] sm:$0xff] }
 0x23c   : > { %v1161_v29 = vpop.permute.xlu0 %1160  ;;  %v1612_v41 = vsel %vm1584_vm5, %v1579_v54, %v5026_v14  ;;  %v1602_v36 = vsel %vm1584_vm5, %v1569_v30, %v5029_v56  ;;  %2344 = vmatpush.msra.mxu1 %v1788_v40  ;;  %2345 = vmatpush.msra.mxu2 %v1788_v40  ;;  %v5035_v37 = vld [vmem:[#allocation59_spill] sm:$0xff]  ;;  %v5037_v60 = vld [vmem:[#allocation96_spill] sm:$0xff]  ;;  %v3986_v30 = vld [vmem:[#allocation2 + $0x128] sm:$0xff] }
 0x23d   : > { %v3902_v19 = vsel %vm1650_vm7, %v1637_v16, %v1161_v29  ;;  %v1645_v57 = vsel %vm1617_vm6, %v1612_v41, %v3710_v43  ;;  %v1635_v42 = vsel %vm1617_vm6, %v1602_v36, %v3633_v38  ;;  %1898 = vmatpush.msra.mxu0 %v1787_v45  ;;  %v1786_v38 = vld [vmem:[%s4728_s3 + $0x20] sm:$0xff]  ;;  %2346 = vmatpush.msra.mxu3 %v1788_v40  ;;  %v5036_v54 = vld [vmem:[#allocation123_spill] sm:$0xff]  ;;  %v3979_v41 = vld [vmem:[#allocation2 + $0x68] sm:$0xff] }
 0x23e   : > { %1356 = vrot.lane.b32.xlu2 %v5024_v4, %s2432_s9  ;;  %2347 = vmatpush.msra.mxu1 %v1787_v45  ;;  %v1549_v16 = vsel %vm372_vm0, %v3959_v11, %v5033_v8  ;;  %v1539_v1 = vsel %vm372_vm0, %v2397_v5, %v5035_v37  ;;  %v1784_v27 = vld [vmem:[%s4728_s3 + $0x10] sm:$0xff]  ;;  %v5039_v40 = vld [vmem:[#allocation113_spill] sm:$0xff]  ;;  %v5045_v37 = vld [vmem:[#allocation80_spill] sm:$0xff] }
 0x23f   : > { %2348 = vmatpush.msra.mxu2 %v1787_v45  ;;  %1899 = vmatpush.msra.mxu0 %v1786_v38  ;;  %v1572_v3 = vsel %vm1551_vm4, %v1539_v1, %v5037_v60  ;;  %v4019_v8 = vld [vmem:[#allocation2 + $0x110] sm:$0xff] }
 0x240   : > { %1443 = vrot.lane.b32.xlu1 %v4987_v17, %s2431_s8  ;;  %v1177_v31 = vpop.permute.xlu2 %1176  ;;  %v5030_v17 = vld [vmem:[#allocation94_spill] sm:$0xff]  ;;  %2350 = vmatpush.msra.mxu1 %v1786_v38 }
 0x241   : > { %v3935_v43 = vsel %vm1650_vm7, %v1645_v57, %v1177_v31  ;;  %v1574_v47 = vsel %vm1551_vm4, %v1541_v59, %v5030_v17  ;;  %2351 = vmatpush.msra.mxu2 %v1786_v38  ;;  %1900 = vmatpush.msra.mxu0 %v1785_v0  ;;  %v5038_v57 = vld [vmem:[#allocation77_spill] sm:$0xff] }
 0x242   : > { %v1157_v55 = vpop.permute.xlu1 %1156  ;;  %1332 = vrot.lane.b32.xlu0 %v5031_v13, %s2432_s9  ;;  %v1607_v24 = vsel %vm1584_vm5, %v1574_v47, %v5032_v12  ;;  %2353 = vmatpush.msra.mxu1 %v1785_v0  ;;  %v1544_v31 = vsel %vm372_vm0, %v3986_v30, %v5038_v57  ;;  %v5040_v59 = vld [vmem:[#allocation97_spill] sm:$0xff]  ;;  %v2400_v47 = vld [vmem:[#allocation2 + $0x150] sm:$0xff]  ;;  %v5050_v57 = vld [vmem:[#allocation114_spill] sm:$0xff] }
 0x243   : > { %v3949_v48 = vsel %vm1650_vm7, %v1635_v42, %v1157_v55  ;;  %v1640_v46 = vsel %vm1617_vm6, %v1607_v24, %v3706_v6  ;;  %v1582_v6 = vsel %vm1551_vm4, %v1549_v16, %v5034_v10  ;;  %2354 = vmatpush.msra.mxu2 %v1785_v0  ;;  %1901 = vmatpush.msra.mxu0 %v1784_v27  ;;  %v1783_v42 = vld [vmem:[%s4728_s3 + $0x8] sm:$0xff]  ;;  %v5041_v55 = vld [vmem:[#allocation112_spill] sm:$0xff]  ;;  %v5042_v16 = vld [vmem:[#allocation65_spill] sm:$0xff] }
 0x244   : > { %v1167_v35 = vpop.permute.xlu0 %1166  ;;  %v1615_v4 = vsel %vm1584_vm5, %v1582_v6, %v5036_v54  ;;  %2356 = vmatpush.msra.mxu1 %v1784_v27  ;;  %v1577_v56 = vsel %vm1551_vm4, %v1544_v31, %v5040_v59  ;;  %2349 = vmatpush.msra.mxu3 %v1787_v45  ;;  %v1542_v10 = vsel %vm372_vm0, %v4019_v8, %v5042_v16  ;;  %v5044_v45 = vld [vmem:[#allocation10_spill] sm:$0xff] }
 0x245   : > { %v3965_v29 = vsel %vm1650_vm7, %v1640_v46, %v1167_v35  ;;  %v1648_v14 = vsel %vm1617_vm6, %v1615_v4, %v3724_v49  ;;  %v1605_v49 = vsel %vm1584_vm5, %v1572_v3, %v5039_v40  ;;  %2357 = vmatpush.msra.mxu2 %v1784_v27  ;;  %v1610_v13 = vsel %vm1584_vm5, %v1577_v56, %v5041_v55  ;;  %v5047_v4 = vld [vmem:[#allocation5_spill] sm:$0xff]  ;;  %v5048_v3 = vld [vmem:[#allocation130_spill] sm:$0xff]  ;;  %v5051_v56 = vld [vmem:[#allocation44_spill] sm:$0xff] }
 0x246   : > { %1242 = vrot.lane.b32.xlu2 %v3767_v34, %s2433_s10  ;;  %v1638_v36 = vsel %vm1617_vm6, %v1605_v49, %v3645_v26  ;;  %1902 = vmatpush.msra.mxu0 %v1783_v42  ;;  %v1782_v26 = vld [vmem:[%s4728_s3] sm:$0xff]  ;;  %v1643_v24 = vsel %vm1617_vm6, %v1610_v13, %v3720_v18  ;;  %v5043_v18 = vld [vmem:[#allocation99_spill] sm:$0xff]  ;;  %v1547_v1 = vsel %vm372_vm0, %v2400_v47, %v5045_v37  ;;  %v5056_v16 = vld [vmem:[#allocation118_spill] sm:$0xff] }
 0x247   : > { %2359 = vmatpush.msra.mxu1 %v1783_v42  ;;  %2360 = vmatpush.msra.mxu2 %v1783_v42  ;;  %v1575_v6 = vsel %vm1551_vm4, %v1542_v10, %v5043_v18  ;;  %v1580_v60 = vsel %vm1551_vm4, %v1547_v1, %v5047_v4  ;;  %v5053_v55 = vld [vmem:[#allocation3_spill] sm:$0xff]  ;;  %v5057_v18 = vld [vmem:[#allocation100_spill] sm:$0xff]  ;;  %v5058_v37 = vld [vmem:[#allocation117_spill] sm:$0xff] }
 0x248   : > { %1230 = vrot.lane.b32.xlu1 %v3979_v41, %s2433_s10  ;;  %v1183_v34 = vpop.permute.xlu2 %1182  ;;  %1903 = vmatpush.msra.mxu0 %v1782_v26  ;;  %v1613_v31 = vsel %vm1584_vm5, %v1580_v60, %v5050_v57  ;;  %v5062_v57 = vld [vmem:[#allocation28_spill] sm:$0xff] }
 0x249   : > { %v3994_v23 = vsel %vm1650_vm7, %v1648_v14, %v1183_v34  ;;  %2362 = vmatpush.msra.mxu1 %v1782_v26  ;;  %2363 = vmatpush.msra.mxu2 %v1782_v26  ;;  %v5049_v34 = vld [vmem:[#allocation22_spill] sm:$0xff] }
 0x24a   : > { %v1163_v17 = vpop.permute.xlu1 %1162  ;;  %1268 = vrot.lane.b32.xlu0 %v2400_v47, %s2433_s10  ;;  %2352 = vmatpush.msra.mxu3 %v1786_v38 }
 0x24b   : > { %v4007_v12 = vsel %vm1650_vm7, %v1638_v36, %v1163_v17  ;;  %v4052_v36 = vld [vmem:[#allocation2 + $0x138] sm:$0xff]  ;;  %v5052_v17 = vld [vmem:[#allocation70_spill] sm:$0xff] }
 0x24c   : > { %v1173_v46 = vpop.permute.xlu0 %1172  ;;  %2355 = vmatpush.msra.mxu3 %v1785_v0  ;;  %v1646_v0 = vsel %vm1617_vm6, %v1613_v31, %v3736_v32  ;;  %v1545_v47 = vsel %vm372_vm0, %v4052_v36, %v5052_v17  ;;  %v5054_v32 = vld [vmem:[#allocation36_spill] sm:$0xff] }
 0x24d   : > { %v4015_v35 = vsel %vm1650_vm7, %v1643_v24, %v1173_v46  ;;  %v4061_v24 = vld [vmem:[#allocation2 + $0x170] sm:$0xff] }
 0x24e   : > { %1256 = vrot.lane.b32.xlu2 %v3927_v44, %s2433_s10  ;;  %v5046_v44 = vld [vmem:[#allocation115_spill] sm:$0xff]  ;;  %2358 = vmatpush.msra.mxu3 %v1784_v27  ;;  %v1578_v27 = vsel %vm1551_vm4, %v1545_v47, %v5053_v55  ;;  %v5065_v47 = vld [vmem:[#allocation9_spill] sm:$0xff] }
 0x24f   : > { %v1608_v54 = vsel %vm1584_vm5, %v1575_v6, %v5046_v44  ;;  %v1611_v10 = vsel %vm1584_vm5, %v1578_v27, %v5056_v16  ;;  %v2406_v16 = vld [vmem:[#allocation2 + $0xc0] sm:$0xff] }
 0x250   : > { %1344 = vrot.lane.b32.xlu1 %v5044_v45, %s2432_s9  ;;  %v4028_v5 = vpop.permute.xlu2 %1322  ;;  %v1641_v38 = vsel %vm1617_vm6, %v1608_v54, %v5048_v3  ;;  %2361 = vmatpush.msra.mxu3 %v1783_v42  ;;  %v5055_v42 = vld [vmem:[#allocation83_spill] sm:$0xff]  ;;  %v5059_v3 = vld [vmem:[#allocation53_spill] sm:$0xff] }
 0x251   : > { %v1550_v46 = vsel %vm372_vm0, %v4061_v24, %v5055_v42  ;;  %v5066_v42 = vld [vmem:[#allocation35_spill] sm:$0xff] }
 0x252   : > { %v1169_v14 = vpop.permute.xlu1 %1168  ;;  %1358 = vrot.lane.b32.xlu0 %v5049_v34, %s2432_s9  ;;  %2364 = vmatpush.msra.mxu3 %v1782_v26  ;;  %v1583_v6 = vsel %vm1551_vm4, %v1550_v46, %v5057_v18  ;;  %v1644_v26 = vsel %vm1617_vm6, %v1611_v10, %v3675_v9  ;;  %v2404_v9 = vld [vmem:[#allocation2 + $0x158] sm:$0xff]  ;;  %v5067_v10 = vld [vmem:[#allocation74_spill] sm:$0xff] }
 0x253   : > { %v4043_v40 = vsel %vm1650_vm7, %v1641_v38, %v1169_v14  ;;  %v1616_v1 = vsel %vm1584_vm5, %v1583_v6, %v5058_v37  ;;  %v5060_v38 = vld [vmem:[#allocation73_spill] sm:$0xff]  ;;  %v5061_v14 = vld [vmem:[#allocation102_spill] sm:$0xff]  ;;  %v5068_v6 = vld [vmem:[#allocation7_spill] sm:$0xff] }
 0x254   : > { %v1179_v49 = vpop.permute.xlu0 %1178  ;;  %v1649_v54 = vsel %vm1617_vm6, %v1616_v1, %v3748_v50  ;;  %v5063_v50 = vld [vmem:[#allocation119_spill] sm:$0xff]  ;;  %v5069_v1 = vld [vmem:[#allocation121_spill] sm:$0xff] }
 0x255   : > { %v4048_v59 = vsel %vm1650_vm7, %v1646_v0, %v1179_v49  ;;  %v5064_v49 = vld [vmem:[#allocation132_spill] sm:$0xff] }
 0x256   : > { %1445 = vrot.lane.b32.xlu2 %v5051_v56, %s2431_s8 }
 0x258   : > { %1433 = vrot.lane.b32.xlu1 %v5054_v32, %s2431_s8  ;;  %v1325_v13 = vpop.permute.xlu2 %1324  ;;  %v2405_v32 = vld [vmem:[#allocation2] sm:$0xff] }
 0x259   : > { %v1519_v46 = vsel %vm372_vm0, %v2405_v32, %v5066_v42  ;;  %v5074_v32 = vld [vmem:[#allocation15_spill] sm:$0xff] }
 0x25a   : > { %v1175_v45 = vpop.permute.xlu1 %1174  ;;  %1471 = vrot.lane.b32.xlu0 %v5004_v52, %s2431_s8  ;;  %v1548_v52 = vsel %vm372_vm0, %v2404_v9, %v5060_v38  ;;  %v1552_v18 = vsel %vm1551_vm4, %v1519_v46, %v5067_v10  ;;  %v5076_v46 = vld [vmem:[#allocation140_spill] sm:$0xff] }
 0x25b   : > { %v4077_v44 = vsel %vm1650_vm7, %v1644_v26, %v1175_v45  ;;  %v1581_v34 = vsel %vm1551_vm4, %v1548_v52, %v5061_v14  ;;  %v1585_v26 = vsel %vm1584_vm5, %v1552_v18, %v5068_v6  ;;  %v4110_v45 = vld [vmem:[#allocation2 + $0x78] sm:$0xff] }
 0x25c   : > { %v1185_v4 = vpop.permute.xlu0 %1184  ;;  %v1614_v0 = vsel %vm1584_vm5, %v1581_v34, %v5063_v50  ;;  %v2408_v50 = vld [vmem:[#allocation2 + $0x8] sm:$0xff] }
 0x25d   : > { %v4082_v60 = vsel %vm1650_vm7, %v1649_v54, %v1185_v4  ;;  %v1647_v56 = vsel %vm1617_vm6, %v1614_v0, %v5064_v49  ;;  %v1618_v54 = vsel %vm1617_vm6, %v1585_v26, %v5069_v1  ;;  %v5070_v4 = vld [vmem:[#allocation134_spill] sm:$0xff]  ;;  %v5071_v0 = vld [vmem:[#allocation39_spill] sm:$0xff] }
 0x25e   : > { %1459 = vrot.lane.b32.xlu2 %v5059_v3, %s2431_s8  ;;  %v1651_v3 = vsel %vm1650_vm7, %v1618_v54, %v5070_v4  ;;  %v1520_v49 = vsel %vm372_vm0, %v2408_v50, %v5071_v0  ;;  %v2409_v54 = vld [vmem:[#allocation2 + $0x18] sm:$0xff]  ;;  %v5078_v4 = vld [vmem:[#allocation43_spill] sm:$0xff]  ;;  %v5082_v0 = vld [vmem:[#allocation33_spill] sm:$0xff] }
 0x260   : > { %1370 = vrot.lane.b32.xlu1 %v5062_v57, %s2432_s9  ;;  %v4092_v31 = vpop.permute.xlu2 %1236 }
 0x262   : > { %v1181_v17 = vpop.permute.xlu1 %1180  ;;  %1334 = vrot.lane.b32.xlu0 %v5065_v47, %s2432_s9 }
 0x263   : > { %v4101_v55 = vsel %vm1650_vm7, %v1647_v56, %v1181_v17  ;;  %v5073_v17 = vld [vmem:[#allocation98_spill] sm:$0xff] }
 0x264   : > { %v1424_v27 = vpop.permute.xlu0 %1423 }
 0x266   : > { %1244 = vrot.lane.b32.xlu2 %v2406_v16, %s2433_s10 }
 0x268   : > { %1232 = vrot.lane.b32.xlu1 %v4110_v45, %s2433_s10  ;;  %v1428_v37 = vpop.permute.xlu2 %1427 }
 0x26a   : > { %v1221_v38 = vpop.permute.xlu1 %1220  ;;  %1270 = vrot.lane.b32.xlu0 %v2404_v9, %s2433_s10  ;;  %v5072_v9 = vld [vmem:[#allocation81_spill] sm:$0xff] }
 0x26b   : > { %v1684_v52 = vsel %vm1683_vm9, %v1651_v3, %v1221_v38  ;;  %v1553_v56 = vsel %vm1551_vm4, %v1520_v49, %v5072_v9  ;;  %v1521_v3 = vsel %vm372_vm0, %v2409_v54, %v5078_v4  ;;  %v5079_v38 = vld [vmem:[#allocation41_spill] sm:$0xff]  ;;  %v5090_v54 = vld [vmem:[#allocation27_spill] sm:$0xff] }
 0x26c   : > { %v1426_v14 = vpop.permute.xlu0 %1425  ;;  %v1717_v34 = vsel %vm1716_vm8, %v1684_v52, %v4028_v5  ;;  %v1586_v47 = vsel %vm1584_vm5, %v1553_v56, %v5073_v17  ;;  %v5080_v52 = vld [vmem:[#allocation86_spill] sm:$0xff]  ;;  %v5084_v17 = vld [vmem:[#allocation72_spill] sm:$0xff] }
 0x26d   : > { %v1750_v57 = vsel %vm1749_vm10, %v1717_v34, %v1424_v27  ;;  %v5075_v27 = vld [vmem:[#allocation37_spill] sm:$0xff]  ;;  %v1554_v34 = vsel %vm1551_vm4, %v1521_v3, %v5080_v52 }
 0x26e   : > { %2302 = vmatmul.msk.f32.vlgmr.msra.gmra.mxu0 %vm1791_vm11, %v1750_v57  ;;  %1258 = vrot.lane.b32.xlu2 %v4019_v8, %s2433_s10  ;;  %v1619_v42 = vsel %vm1617_vm6, %v1586_v47, %v5075_v27  ;;  %v5077_v8 = vld [vmem:[#allocation21_spill] sm:$0xff]  ;;  %v5081_v57 = vld [vmem:[#allocation11_spill] sm:$0xff] }
 0x26f   : > { %v1652_v16 = vsel %vm1650_vm7, %v1619_v42, %v5076_v46  ;;  %v1587_v50 = vsel %vm1584_vm5, %v1554_v34, %v5081_v57  ;;  %v5085_v42 = vld [vmem:[#allocation38_spill] sm:$0xff] }
 0x270   : > { %1346 = vrot.lane.b32.xlu1 %v5074_v32, %s2432_s9  ;;  %v4134_v5 = vpop.permute.xlu2 %1238  ;;  %v1527_v46 = vsel %vm372_vm0, %v3832_v58, %v5085_v42 }
 0x272   : > { %v1223_v10 = vpop.permute.xlu1 %1222  ;;  %1360 = vrot.lane.b32.xlu0 %v5077_v8, %s2432_s9 }
 0x273   : > { %v1685_v18 = vsel %vm1683_vm9, %v1652_v16, %v1223_v10  ;;  %v5086_v10 = vld [vmem:[#allocation90_spill] sm:$0xff] }
 0x274   : > { %v1327_v6 = vpop.permute.xlu0 %1326  ;;  %v1718_v26 = vsel %vm1716_vm8, %v1685_v18, %v1325_v13  ;;  %v1560_v8 = vsel %vm1551_vm4, %v1527_v46, %v5086_v10  ;;  %v5088_v18 = vld [vmem:[#allocation17_spill] sm:$0xff] }
 0x275   : > { %v1751_v1 = vsel %vm1749_vm10, %v1718_v26, %v1426_v14  ;;  %v5083_v14 = vld [vmem:[#allocation30_spill] sm:$0xff]  ;;  %v1593_v26 = vsel %vm1584_vm5, %v1560_v8, %v5088_v18 }
 0x276   : > { %2303 = vmatmul.msk.f32.gmra.mxu0 %vm1791_vm11, %v1751_v1  ;;  %1447 = vrot.lane.b32.xlu2 %v5079_v38, %s2431_s8  ;;  %v1620_v49 = vsel %vm1617_vm6, %v1587_v50, %v5083_v14  ;;  %v5089_v1 = vld [vmem:[#allocation122_spill] sm:$0xff]  ;;  %v5091_v38 = vld [vmem:[#allocation8_spill] sm:$0xff]  ;;  %v2410_v50 = vld [vmem:[#allocation2 + $0x20] sm:$0xff] }
 0x277   : > { %v1653_v9 = vsel %vm1650_vm7, %v1620_v49, %v3761_v61  ;;  %v5087_v61 = vld [vmem:[#allocation63_spill] sm:$0xff]  ;;  %v5094_v49 = vld [vmem:[#allocation104_spill] sm:$0xff]  ;;  %v5097_v18 = vld [vmem:[#allocation14_spill] sm:$0xff] }
 0x278   : > { %1435 = vrot.lane.b32.xlu1 %v5082_v0, %s2431_s8  ;;  %v1253_v13 = vpop.permute.xlu2 %1252  ;;  %v5092_v0 = vld [vmem:[#allocation49_spill] sm:$0xff] }
 0x279   : > { %v1522_v14 = vsel %vm372_vm0, %v2410_v50, %v5092_v0  ;;  %v5102_v0 = vld [vmem:[#allocation52_spill] sm:$0xff] }
 0x27a   : > { %v1225_v56 = vpop.permute.xlu1 %1224  ;;  %1473 = vrot.lane.b32.xlu0 %v5084_v17, %s2431_s8 }
 0x27b   : > { %v1686_v47 = vsel %vm1683_vm9, %v1653_v9, %v1225_v56  ;;  %v4196_v56 = vld [vmem:[#allocation2 + $0x80] sm:$0xff] }
 0x27c   : > { %v1440_v32 = vpop.permute.xlu0 %1439  ;;  %v1719_v27 = vsel %vm1716_vm8, %v1686_v47, %v1327_v6  ;;  %v1626_v6 = vsel %vm1617_vm6, %v1593_v26, %v5089_v1  ;;  %v5095_v47 = vld [vmem:[#allocation124_spill] sm:$0xff] }
 0x27d   : > { %v1752_v16 = vsel %vm1749_vm10, %v1719_v27, %v1428_v37  ;;  %v1659_v37 = vsel %vm1650_vm7, %v1626_v6, %v3811_v39  ;;  %v5093_v39 = vld [vmem:[#allocation76_spill] sm:$0xff]  ;;  %v5098_v6 = vld [vmem:[#allocation19_spill] sm:$0xff] }
 0x27e   : > { %2304 = vmatmul.msk.f32.gmra.mxu0 %vm1791_vm11, %v1752_v16  ;;  %1461 = vrot.lane.b32.xlu2 %v5087_v61, %s2431_s8  ;;  %v1692_v4 = vsel %vm1683_vm9, %v1659_v37, %v4092_v31  ;;  %v1555_v31 = vsel %vm1551_vm4, %v1522_v14, %v5093_v39  ;;  %v5096_v27 = vld [vmem:[#allocation136_spill] sm:$0xff]  ;;  %v2412_v61 = vld [vmem:[#allocation2 + $0x120] sm:$0xff] }
 0x27f   : > { %v1588_v9 = vsel %vm1584_vm5, %v1555_v31, %v5094_v49  ;;  %v5105_v14 = vld [vmem:[#allocation40_spill] sm:$0xff] }
 0x280   : > { %1372 = vrot.lane.b32.xlu1 %v5090_v54, %s2432_s9  ;;  %v1355_v58 = vpop.permute.xlu2 %1354  ;;  %v5099_v54 = vld [vmem:[#allocation51_spill] sm:$0xff] }
 0x281   : > { %v1528_v37 = vsel %vm372_vm0, %v3979_v41, %v5099_v54  ;;  %v5104_v41 = vld [vmem:[#allocation141_spill] sm:$0xff]  ;;  %v5114_v54 = vld [vmem:[#allocation142_spill] sm:$0xff] }
 0x282   : > { %v1339_v3 = vpop.permute.xlu1 %1338  ;;  %1336 = vrot.lane.b32.xlu0 %v5091_v38, %s2432_s9  ;;  %v5100_v38 = vld [vmem:[#allocation82_spill] sm:$0xff] }
 0x283   : > { %v1725_v52 = vsel %vm1716_vm8, %v1692_v4, %v1339_v3 }
 0x284   : > { %v1758_v34 = vsel %vm1749_vm10, %v1725_v52, %v1440_v32  ;;  %v1329_v57 = vpop.permute.xlu0 %1328  ;;  %v1621_v32 = vsel %vm1617_vm6, %v1588_v9, %v5095_v47  ;;  %v1561_v52 = vsel %vm1551_vm4, %v1528_v37, %v5100_v38  ;;  %v5106_v47 = vld [vmem:[#allocation71_spill] sm:$0xff] }
 0x285   : > { %2310 = vmatmul.msk.f32.vlgmr.msra.gmra.mxu1 %vm1791_vm11, %v1758_v34  ;;  %v1654_v42 = vsel %vm1650_vm7, %v1621_v32, %v5096_v27 }
 0x286   : > { %1246 = vrot.lane.b32.xlu2 %v3911_v7, %s2433_s10 }
 0x288   : > { %1234 = vrot.lane.b32.xlu1 %v4196_v56, %s2433_s10  ;;  %v4200_v17 = vpop.permute.xlu2 %1240 }
 0x28a   : > { %v1227_v7 = vpop.permute.xlu1 %1226  ;;  %1272 = vrot.lane.b32.xlu0 %v3959_v11, %s2433_s10  ;;  %v1700_v11 = vsel %vm1683_vm9, %v3856_v22, %v1253_v13  ;;  %v5103_v22 = vld [vmem:[#allocation127_spill] sm:$0xff] }
 0x28b   : > { %v1687_v46 = vsel %vm1683_vm9, %v1654_v42, %v1227_v7  ;;  %v1733_v4 = vsel %vm1716_vm8, %v1700_v11, %v1355_v58  ;;  %v5107_v42 = vld [vmem:[#allocation32_spill] sm:$0xff]  ;;  %v5108_v7 = vld [vmem:[#allocation133_spill] sm:$0xff] }
 0x28c   : > { %v1430_v16 = vpop.permute.xlu0 %1429  ;;  %v1720_v10 = vsel %vm1716_vm8, %v1687_v46, %v1329_v57  ;;  %v5101_v57 = vld [vmem:[#allocation107_spill] sm:$0xff]  ;;  %v1523_v46 = vsel %vm372_vm0, %v5108_v7, %v5107_v42  ;;  %v5120_v42 = vld [vmem:[#allocation50_spill] sm:$0xff] }
 0x28d   : > { %v1753_v8 = vsel %vm1749_vm10, %v1720_v10, %v1430_v16  ;;  %v1594_v50 = vsel %vm1584_vm5, %v1561_v52, %v5101_v57  ;;  %v5109_v16 = vld [vmem:[#allocation61_spill] sm:$0xff]  ;;  %v5110_v10 = vld [vmem:[#allocation84_spill] sm:$0xff] }
 0x28e   : > { %1260 = vrot.lane.b32.xlu2 %v2412_v61, %s2433_s10  ;;  %2305 = vmatmul.msk.f32.gmra.mxu0 %vm1791_vm11, %v1753_v8  ;;  %v1627_v13 = vsel %vm1617_vm6, %v1594_v50, %v5103_v22  ;;  %v5111_v8 = vld [vmem:[#allocation6_spill] sm:$0xff]  ;;  %v5115_v57 = vld [vmem:[#allocation13_spill] sm:$0xff]  ;;  %v2413_v50 = vld [vmem:[#allocation2 + $0xd8] sm:$0xff] }
 0x28f   : > { %v1660_v58 = vsel %vm1650_vm7, %v1627_v13, %v5104_v41  ;;  %v5116_v13 = vld [vmem:[#allocation25_spill] sm:$0xff]  ;;  %v5117_v41 = vld [vmem:[#allocation60_spill] sm:$0xff] }
 0x290   : > { %1348 = vrot.lane.b32.xlu1 %v5097_v18, %s2432_s9  ;;  %v1255_v26 = vpop.permute.xlu2 %1254  ;;  %v1693_v31 = vsel %vm1683_vm9, %v1660_v58, %v4134_v5  ;;  %v1556_v5 = vsel %vm1551_vm4, %v1523_v46, %v5110_v10  ;;  %v5112_v18 = vld [vmem:[#allocation26_spill] sm:$0xff]  ;;  %v1529_v58 = vsel %vm372_vm0, %v4110_v45, %v5117_v41  ;;  %v5122_v10 = vld [vmem:[#allocation69_spill] sm:$0xff]  ;;  %v5132_v41 = vld [vmem:[#allocation24_spill] sm:$0xff] }
 0x291   : > { %v1589_v61 = vsel %vm1584_vm5, %v1556_v5, %v5111_v8 }
 0x292   : > { %v1341_v1 = vpop.permute.xlu1 %1340  ;;  %1362 = vrot.lane.b32.xlu0 %v5098_v6, %s2432_s9  ;;  %v5113_v6 = vld [vmem:[#allocation126_spill] sm:$0xff] }
 0x293   : > { %v1726_v49 = vsel %vm1716_vm8, %v1693_v31, %v1341_v1  ;;  %v1622_v11 = vsel %vm1617_vm6, %v1589_v61, %v5113_v6  ;;  %v5125_v6 = vld [vmem:[#allocation42_spill] sm:$0xff] }
 0x294   : > { %v1456_v3 = vpop.permute.xlu0 %1455  ;;  %v1655_v37 = vsel %vm1650_vm7, %v1622_v11, %v5114_v54  ;;  %v1530_v11 = vsel %vm372_vm0, %v4196_v56, %v5125_v6  ;;  %v5126_v54 = vld [vmem:[#allocation91_spill] sm:$0xff] }
 0x295   : > { %v1766_v34 = vsel %vm1749_vm10, %v1733_v4, %v1456_v3 }
 0x296   : > { %1449 = vrot.lane.b32.xlu2 %v5102_v0, %s2431_s8  ;;  %2318 = vmatmul.msk.f32.vlgmr.msra.gmra.mxu2 %vm1791_vm11, %v1766_v34 }
 0x298   : > { %1437 = vrot.lane.b32.xlu1 %v5105_v14, %s2431_s8  ;;  %v1357_v39 = vpop.permute.xlu2 %1356 }
 0x29a   : > { %v1442_v9 = vpop.permute.xlu1 %1441  ;;  %1475 = vrot.lane.b32.xlu0 %v5106_v47, %s2431_s8 }
 0x29b   : > { %v1759_v32 = vsel %vm1749_vm10, %v1726_v49, %v1442_v9  ;;  %v5118_v49 = vld [vmem:[#allocation89_spill] sm:$0xff] }
 0x29c   : > { %2311 = vmatmul.msk.f32.gmra.mxu1 %vm1791_vm11, %v1759_v32  ;;  %v1331_v27 = vpop.permute.xlu0 %1330  ;;  %v1562_v9 = vsel %vm1551_vm4, %v1529_v58, %v5118_v49  ;;  %v5119_v32 = vld [vmem:[#allocation12_spill] sm:$0xff] }
 0x29d   : > { %v5133_v58 = vld [vmem:[#allocation88_spill] sm:$0xff] }
 0x29e   : > { %1463 = vrot.lane.b32.xlu2 %v5109_v16, %s2431_s8 }
 0x2a0   : > { %1374 = vrot.lane.b32.xlu1 %v5112_v18, %s2432_s9  ;;  %v1243_v1 = vpop.permute.xlu2 %1242 }
 0x2a2   : > { %v1229_v4 = vpop.permute.xlu1 %1228  ;;  %1262 = vrot.lane.b32.xlu0 %v3986_v30, %s2433_s10  ;;  %v1701_v30 = vsel %vm1683_vm9, %v3949_v48, %v1255_v26  ;;  %v5121_v48 = vld [vmem:[#allocation129_spill] sm:$0xff] }
 0x2a3   : > { %v1688_v3 = vsel %vm1683_vm9, %v1655_v37, %v1229_v4  ;;  %v1734_v14 = vsel %vm1716_vm8, %v1701_v30, %v1357_v39  ;;  %v1563_v37 = vsel %vm1551_vm4, %v1530_v11, %v5126_v54  ;;  %v5127_v4 = vld [vmem:[#allocation18_spill] sm:$0xff] }
 0x2a4   : > { %v1432_v38 = vpop.permute.xlu0 %1431  ;;  %v1721_v52 = vsel %vm1716_vm8, %v1688_v3, %v1331_v27  ;;  %v1595_v27 = vsel %vm1584_vm5, %v1562_v9, %v5119_v32  ;;  %v5128_v3 = vld [vmem:[#allocation106_spill] sm:$0xff]  ;;  %v5135_v32 = vld [vmem:[#allocation31_spill] sm:$0xff] }
 0x2a5   : > { %v1754_v34 = vsel %vm1749_vm10, %v1721_v52, %v1432_v38  ;;  %v1628_v26 = vsel %vm1617_vm6, %v1595_v27, %v5121_v48  ;;  %v1596_v38 = vsel %vm1584_vm5, %v1563_v37, %v5128_v3  ;;  %v5129_v52 = vld [vmem:[#allocation46_spill] sm:$0xff]  ;;  %v5136_v48 = vld [vmem:[#allocation47_spill] sm:$0xff]  ;;  %v2416_v37 = vld [vmem:[#allocation2 + $0x140] sm:$0xff] }
 0x2a6   : > { %1350 = vrot.lane.b32.xlu2 %v5115_v57, %s2432_s9  ;;  %2306 = vmatmul.msk.f32.gmra.mxu0 %vm1791_vm11, %v1754_v34  ;;  %v1661_v45 = vsel %vm1650_vm7, %v1628_v26, %v3789_v25  ;;  %v5123_v25 = vld [vmem:[#allocation58_spill] sm:$0xff]  ;;  %v1629_v34 = vsel %vm1617_vm6, %v1596_v38, %v5129_v52  ;;  %v512_v3 = vld [vmem:[#allocation2 + $0x198] sm:$0xff]  ;;  %v5141_v38 = vld [vmem:[#allocation131_spill] sm:$0xff] }
 0x2a7   : > { %v1694_v7 = vsel %vm1683_vm9, %v1661_v45, %v4200_v17  ;;  %v1662_v56 = vsel %vm1650_vm7, %v1629_v34, %v3844_v63  ;;  %v5130_v57 = vld [vmem:[#allocation34_spill] sm:$0xff]  ;;  %v1418_v52 = vrot.slane %v512_v3, 2 }
 0x2a8   : > { %1248 = vrot.lane.b32.xlu1 %v2413_v50, %s2433_s10  ;;  %v1257_v0 = vpop.permute.xlu2 %1256  ;;  %v5131_v50 = vld [vmem:[#allocation135_spill] sm:$0xff]  ;;  %v2415_v54 = vld [vmem:[#allocation2 + $0x188] sm:$0xff] }
 0x2a9   : > { %v1702_v63 = vsel %vm1683_vm9, %v3807_v33, %v1257_v0  ;;  %v2414_v0 = vld [vmem:[#allocation2 + $0x180] sm:$0xff] }
 0x2aa   : > { %v1343_v22 = vpop.permute.xlu1 %1342  ;;  %1364 = vrot.lane.b32.xlu0 %v5116_v13, %s2432_s9  ;;  %v1695_v13 = vsel %vm1683_vm9, %v1662_v56, %v1243_v1 }
 0x2ab   : > { %v1727_v46 = vsel %vm1716_vm8, %v1694_v7, %v1343_v22  ;;  %v1524_v22 = vsel %vm372_vm0, %v5131_v50, %v5130_v57  ;;  %v5142_v57 = vld [vmem:[#allocation56_spill] sm:$0xff]  ;;  %v5143_v50 = vld [vmem:[#allocation137_spill] sm:$0xff] }
 0x2ac   : > { %v1458_v31 = vpop.permute.xlu0 %1457 }
 0x2ad   : > { %v1767_v47 = vsel %vm1749_vm10, %v1734_v14, %v1458_v31  ;;  %v1557_v14 = vsel %vm1551_vm4, %v1524_v22, %v5133_v58  ;;  %v5134_v31 = vld [vmem:[#allocation103_spill] sm:$0xff]  ;;  %v1531_v22 = vsel %vm372_vm0, %v5143_v50, %v5142_v57  ;;  %v5146_v58 = vld [vmem:[#allocation109_spill] sm:$0xff] }
 0x2ae   : > { %1451 = vrot.lane.b32.xlu2 %v5120_v42, %s2431_s8  ;;  %2319 = vmatmul.msk.f32.gmra.mxu2 %vm1791_vm11, %v1767_v47  ;;  %v1590_v49 = vsel %vm1584_vm5, %v1557_v14, %v5134_v31 }
 0x2af   : > { %v1623_v1 = vsel %vm1617_vm6, %v1590_v49, %v5135_v32 }
 0x2b0   : > { %1274 = vrot.lane.b32.xlu1 %v4061_v24, %s2433_s10  ;;  %v1446_v39 = vpop.permute.xlu2 %1445  ;;  %v5124_v24 = vld [vmem:[#allocation29_spill] sm:$0xff]  ;;  %v1656_v42 = vsel %vm1650_vm7, %v1623_v1, %v3785_v28  ;;  %v514_v1 = vld [vmem:[#allocation2 + $0x1a8] sm:$0x3] }
 0x2b2   : > { %v1444_v16 = vpop.permute.xlu1 %1443  ;;  %1477 = vrot.lane.b32.xlu0 %v5122_v10, %s2431_s8  ;;  %v5138_v10 = vld [vmem:[#allocation68_spill] sm:$0xff] }
 0x2b3   : > { %v1760_v5 = vsel %vm1749_vm10, %v1727_v46, %v1444_v16  ;;  %v5137_v46 = vld [vmem:[#allocation64_spill] sm:$0xff] }
 0x2b4   : > { %2312 = vmatmul.msk.f32.gmra.mxu1 %vm1791_vm11, %v1760_v5  ;;  %v1333_v8 = vpop.permute.xlu0 %1332  ;;  %v5139_v5 = vld [vmem:[#allocation111_spill] sm:$0xff] }
 0x2b6   : > { %1465 = vrot.lane.b32.xlu2 %v5123_v25, %s2431_s8 }
 0x2b8   : > { %1376 = vrot.lane.b32.xlu1 %v5124_v24, %s2432_s9  ;;  %v1460_v61 = vpop.permute.xlu2 %1459 }
 0x2ba   : > { %v1231_v18 = vpop.permute.xlu1 %1230  ;;  %1264 = vrot.lane.b32.xlu0 %v4052_v36, %s2433_s10 }
 0x2bb   : > { %v1689_v33 = vsel %vm1683_vm9, %v1656_v42, %v1231_v18  ;;  %v5149_v42 = vld [vmem:[#allocation45_spill] sm:$0xff] }
 0x2bc   : > { %v1269_v17 = vpop.permute.xlu0 %1268  ;;  %v1722_v7 = vsel %vm1716_vm8, %v1689_v33, %v1333_v8  ;;  %v5140_v8 = vld [vmem:[#allocation23_spill] sm:$0xff] }
 0x2bd   : > { %v1708_v24 = vsel %vm1683_vm9, %v3880_v2, %v1269_v17  ;;  %v513_v2 = vld [vmem:[#allocation2 + $0x1a0] sm:$0xff] }
 0x2be   : > { %1352 = vrot.lane.b32.xlu2 %v5127_v4, %s2432_s9  ;;  %v1419_v34 = vrot.slane %v513_v2, 2  ;;  %v1318_v49 = vrot.slane %v513_v2, 1 }
 0x2c0   : > { %1250 = vrot.lane.b32.xlu1 %v3872_v51, %s2433_s10  ;;  %v4316_v36 = vpop.permute.xlu2 %1244  ;;  %v1420_v31 = vsel %vm740_vm3, %v1418_v52, %v1419_v34 }
 0x2c2   : > { %v1345_v30 = vpop.permute.xlu1 %1344  ;;  %1366 = vrot.lane.b32.xlu0 %v5132_v41, %s2432_s9  ;;  %v5145_v41 = vld [vmem:[#allocation67_spill] sm:$0xff] }
 0x2c3   : > { %v1728_v51 = vsel %vm1716_vm8, %v1695_v13, %v1345_v30  ;;  %v5144_v13 = vld [vmem:[#allocation85_spill] sm:$0xff] }
 0x2c4   : > { %v1761_v9 = vsel %vm1749_vm10, %v1728_v51, %v1446_v39  ;;  %v1359_v47 = vpop.permute.xlu0 %1358  ;;  %v1564_v30 = vsel %vm1551_vm4, %v1531_v22, %v5144_v13  ;;  %v1317_v51 = vrot.slane %v512_v3, 1 }
 0x2c5   : > { %2313 = vmatmul.msk.f32.gmra.mxu1 %vm1791_vm11, %v1761_v9  ;;  %v1735_v27 = vsel %vm1716_vm8, %v1702_v63, %v1359_v47  ;;  %v1597_v14 = vsel %vm1584_vm5, %v1564_v30, %v5146_v58  ;;  %v5147_v63 = vld [vmem:[#allocation128_spill] sm:$0xff] }
 0x2c6   : > { %1453 = vrot.lane.b32.xlu2 %v5136_v48, %s2431_s8  ;;  %v1768_v26 = vsel %vm1749_vm10, %v1735_v27, %v1460_v61  ;;  %v1630_v9 = vsel %vm1617_vm6, %v1597_v14, %v5147_v63  ;;  %v5148_v47 = vld [vmem:[#allocation116_spill] sm:$0xff]  ;;  %v5150_v48 = vld [vmem:[#allocation138_spill] sm:$0xff] }
 0x2c7   : > { %2320 = vmatmul.msk.f32.gmra.mxu2 %vm1791_vm11, %v1768_v26  ;;  %v1663_v27 = vsel %vm1650_vm7, %v1630_v9, %v3759_v62  ;;  %v1525_v26 = vsel %vm372_vm0, %v5150_v48, %v5149_v42 }
 0x2c8   : > { %1276 = vrot.lane.b32.xlu1 %v2414_v0, %s2433_s10  ;;  %v1259_v45 = vpop.permute.xlu2 %1258  ;;  %v1696_v33 = vsel %vm1683_vm9, %v1663_v27, %v4316_v36 }
 0x2ca   : > { %v1434_v39 = vpop.permute.xlu1 %1433  ;;  %1479 = vrot.lane.b32.xlu0 %v5137_v46, %s2431_s8 }
 0x2cb   : > { %v1755_v28 = vsel %vm1749_vm10, %v1722_v7, %v1434_v39  ;;  %v5151_v39 = vld [vmem:[#allocation79_spill] sm:$0xff] }
 0x2cc   : > { %2307 = vmatmul.msk.f32.gmra.mxu0 %vm1791_vm11, %v1755_v28  ;;  %v1472_v16 = vpop.permute.xlu0 %1471  ;;  %v1558_v7 = vsel %vm1551_vm4, %v1525_v26, %v5151_v39  ;;  %v1421_v28 = vrot.slane %v514_v1, 2  ;;  %v5155_v39 = vld [vmem:[#allocation55_spill] sm:$0xff] }
 0x2ce   : > { %1467 = vrot.lane.b32.xlu2 %v5138_v10, %s2431_s8  ;;  %v5152_v10 = vld [vmem:[#allocation105_spill] sm:$0xff] }
 0x2cf   : > { %v1591_v62 = vsel %vm1584_vm5, %v1558_v7, %v5152_v10  ;;  %v5156_v7 = vld [vmem:[#allocation143_spill] sm:$0xff] }
 0x2d0   : > { %1378 = vrot.lane.b32.xlu1 %v5139_v5, %s2432_s9  ;;  %v1448_v25 = vpop.permute.xlu2 %1447  ;;  %v1703_v5 = vsel %vm1683_vm9, %v3902_v19, %v1259_v45  ;;  %v1422_v19 = vsel %vm740_vm3, %v1419_v34, %v1421_v28  ;;  %v1320_v45 = vrot.slane %v514_v1, 1 }
 0x2d2   : > { %v1371_v61 = vpop.permute.xlu1 %1370  ;;  %1368 = vrot.lane.b32.xlu0 %v5140_v8, %s2432_s9  ;;  %v1321_v57 = vsel %vm563_vm1, %v1318_v49, %v1320_v45 }
 0x2d3   : > { %v1741_v18 = vsel %vm1716_vm8, %v1708_v24, %v1371_v61  ;;  %v5153_v61 = vld [vmem:[#allocation125_spill] sm:$0xff] }
 0x2d4   : > { %v1774_v6 = vsel %vm1749_vm10, %v1741_v18, %v1472_v16  ;;  %v1335_v11 = vpop.permute.xlu0 %1334  ;;  %v1319_v16 = vsel %vm563_vm1, %v1317_v51, %v1318_v49  ;;  %v1624_v8 = vsel %vm1617_vm6, %v1591_v62, %v5153_v61  ;;  %v5157_v62 = vld [vmem:[#allocation87_spill] sm:$0xff]  ;;  %v5158_v61 = vld [vmem:[#allocation101_spill] sm:$0xff] }
 0x2d5   : > { %2326 = vmatmul.msk.f32.vlgmr.msra.gmra.mxu3 %vm1791_vm11, %v1774_v6  ;;  %v5154_v6 = vld [vmem:[#allocation139_spill] sm:$0xff] }
 0x2d6   : > { %1278 = vrot.lane.b32.xlu2 %v2415_v54, %s2433_s10  ;;  %v1657_v54 = vsel %vm1650_vm7, %v1624_v8, %v5154_v6  ;;  %v5159_v6 = vld [vmem:[#allocation57_spill] sm:$0xff] }
 0x2d8   : > { %1266 = vrot.lane.b32.xlu1 %v2416_v37, %s2433_s10  ;;  %v1462_v4 = vpop.permute.xlu2 %1461 }
 0x2da   : > { %v1233_v17 = vpop.permute.xlu1 %1232  ;;  %1481 = vrot.lane.b32.xlu0 %v5141_v38, %s2431_s8 }
 0x2db   : > { %v1690_v38 = vsel %vm1683_vm9, %v1657_v54, %v1233_v17 }
 0x2dc   : > { %v1271_v56 = vpop.permute.xlu0 %1270  ;;  %v1723_v52 = vsel %vm1716_vm8, %v1690_v38, %v1335_v11  ;;  %v5160_v38 = vld [vmem:[#allocation144_spill] sm:$0xff] }
 0x2dd   : > { %v1709_v11 = vsel %vm1683_vm9, %v4015_v35, %v1271_v56 }
 0x2de   : > { %1469 = vrot.lane.b32.xlu2 %v5145_v41, %s2431_s8 }
 0x2e0   : > { %1380 = vrot.lane.b32.xlu1 %v5148_v47, %s2432_s9  ;;  %v4380_v32 = vpop.permute.xlu2 %1246 }
 0x2e1   : > { %v1697_v28 = vsel %vm1683_vm9, %v3823_v53, %v4380_v32 }
 0x2e2   : > { %v1347_v0 = vpop.permute.xlu1 %1346  ;;  %1483 = vrot.lane.b32.xlu0 %v1420_v31, %s2431_s8 }
 0x2e3   : > { %v1729_v46 = vsel %vm1716_vm8, %v1696_v33, %v1347_v0 }
 0x2e4   : > { %v1762_v36 = vsel %vm1749_vm10, %v1729_v46, %v1448_v25  ;;  %v1361_v24 = vpop.permute.xlu0 %1360  ;;  %v1526_v46 = vsel %vm372_vm0, %v5156_v7, %v5155_v39 }
 0x2e5   : > { %2314 = vmatmul.msk.f32.gmra.mxu1 %vm1791_vm11, %v1762_v36  ;;  %v1736_v18 = vsel %vm1716_vm8, %v1703_v5, %v1361_v24  ;;  %v1559_v5 = vsel %vm1551_vm4, %v1526_v46, %v5157_v62 }
 0x2e6   : > { %v1769_v37 = vsel %vm1749_vm10, %v1736_v18, %v1462_v4  ;;  %1382 = vrot.lane.b32.xlu2 %v1319_v16, %s2432_s9  ;;  %v1592_v8 = vsel %vm1584_vm5, %v1559_v5, %v5158_v61 }
 0x2e7   : > { %2321 = vmatmul.msk.f32.gmra.mxu2 %vm1791_vm11, %v1769_v37  ;;  %v1625_v54 = vsel %vm1617_vm6, %v1592_v8, %v5159_v6 }
 0x2e8   : > { %1280 = vrot.lane.b32.xlu1 %v512_v3, %s2433_s10  ;;  %v1261_v25 = vpop.permute.xlu2 %1260 }
 0x2e9   : > { %v1704_v18 = vsel %vm1683_vm9, %v4007_v12, %v1261_v25 }
 0x2ea   : > { %v1436_v4 = vpop.permute.xlu1 %1435  ;;  %1485 = vrot.lane.b32.xlu0 %v1422_v19, %s2431_s8  ;;  %v1658_v19 = vsel %vm1650_vm7, %v1625_v54, %v5160_v38 }
 0x2eb   : > { %v1905_v17 = vpop.f32.mrf.mxu0  ;;  %v1756_v34 = vsel %vm1749_vm10, %v1723_v52, %v1436_v4 }
 0x2ec   : > { %2001 = vst.msk [vmem:[%s4416_s12] sm:$0xff] %vm372_vm0, %v1905_v17  ;;  %2308 = vmatmul.msk.f32.gmra.mxu0 %vm1791_vm11, %v1756_v34  ;;  %v1474_v3 = vpop.permute.xlu0 %1473  ;;  %v2102_v22 = vmul.f32 %v1905_v17, %v1905_v17  ;;  %v2033_v58 = vsel %vm372_vm0, %v1905_v17, 0.0 }
 0x2ee   : > { %1384 = vrot.lane.b32.xlu2 %v1321_v57, %s2432_s9  ;;  %v2134_v35 = vsel %vm372_vm0, %v2102_v22, 0.0 }
 0x2f0   : > { %1282 = vrot.lane.b32.xlu1 %v513_v2, %s2433_s10  ;;  %v1450_v50 = vpop.permute.xlu2 %1449  ;;  %s235_s10 = scalar_lea.vmem %s4730_s5, %s2301_s21 }
 0x2f2   : > { %v1373_v13 = vpop.permute.xlu1 %1372 }
 0x2f3   : > { %v1742_v30 = vsel %vm1716_vm8, %v1709_v11, %v1373_v13  ;;  %v1908_v41 = vpop.f32.mrf.mxu0 }
 0x2f4   : > { %2002 = vst.msk [vmem:[%s4416_s12 + $0x8] sm:$0xff] %vm372_vm0, %v1908_v41  ;;  %v2034_v14 = vsel %vm372_vm0, %v1908_v41, 0.0  ;;  %v2103_v51 = vmul.f32 %v1908_v41, %v1908_v41  ;;  %v1775_v31 = vsel %vm1749_vm10, %v1742_v30, %v1474_v3  ;;  %v1337_v2 = vpop.permute.xlu0 %1336 }
 0x2f5   : > { %v2035_v49 = vadd.f32 %v2034_v14, %v2033_v58  ;;  %2327 = vmatmul.msk.f32.gmra.mxu3 %vm1791_vm11, %v1775_v31 }
 0x2f6   : > { %v2135_v56 = vsel %vm372_vm0, %v2103_v51, 0.0 }
 0x2f7   : > { %v2136_v63 = vadd.f32 %v2135_v56, %v2134_v35 }
 0x2f8   : > { %v1464_v9 = vpop.permute.xlu2 %1463 }
 0x2fa   : > { %v1235_v47 = vpop.permute.xlu1 %1234 }
 0x2fb   : > { %v1911_v1 = vpop.f32.mrf.mxu0  ;;  %v1691_v4 = vsel %vm1683_vm9, %v1658_v19, %v1235_v47 }
 0x2fc   : > { %2003 = vst.msk [vmem:[%s4416_s12 + $0x10] sm:$0xff] %vm372_vm0, %v1911_v1  ;;  %v2036_v27 = vsel %vm372_vm0, %v1911_v1, 0.0  ;;  %v2104_v42 = vmul.f32 %v1911_v1, %v1911_v1  ;;  %v1273_v48 = vpop.permute.xlu0 %1272  ;;  %v1724_v25 = vsel %vm1716_vm8, %v1691_v4, %v1337_v2 }
 0x2fd   : > { %v2037_v26 = vadd.f32 %v2036_v27, %v2035_v49  ;;  %v1710_v30 = vsel %vm1683_vm9, %v4077_v44, %v1273_v48 }
 0x2fe   : > { %v2137_v33 = vsel %vm372_vm0, %v2104_v42, 0.0 }
 0x2ff   : > { %v2138_v0 = vadd.f32 %v2137_v33, %v2136_v63 }
 0x300   : > { %v1351_v36 = vpop.permute.xlu2 %1350 }
 0x302   : > { %v4448_v16 = vpop.f32.mrf.mxu1  ;;  %v1349_v10 = vpop.permute.xlu1 %1348 }
 0x303   : > { %2009 = vst.msk [vmem:[%s4416_s12 + $0x40] sm:$0xff] %vm372_vm0, %v4448_v16  ;;  %v1730_v24 = vsel %vm1716_vm8, %v1697_v28, %v1349_v10 }
 0x304   : > { %v1763_v53 = vsel %vm1749_vm10, %v1730_v24, %v1450_v50  ;;  %v1363_v32 = vpop.permute.xlu0 %1362 }
 0x305   : > { %2315 = vmatmul.msk.f32.gmra.mxu1 %vm1791_vm11, %v1763_v53  ;;  %v1737_v37 = vsel %vm1716_vm8, %v1704_v18, %v1363_v32 }
 0x306   : > { %v1770_v45 = vsel %vm1749_vm10, %v1737_v37, %v1464_v9 }
 0x307   : > { %2322 = vmatmul.msk.f32.gmra.mxu2 %vm1791_vm11, %v1770_v45 }
 0x308   : > { %v1452_v50 = vpop.permute.xlu2 %1451 }
 0x30a   : > { %v1438_v12 = vpop.permute.xlu1 %1437 }
 0x30b   : > { %v1757_v52 = vsel %vm1749_vm10, %v1724_v25, %v1438_v12  ;;  %v1914_v17 = vpop.f32.mrf.mxu0 }
 0x30c   : > { %2309 = vmatmul.msk.f32.gmra.mxu0 %vm1791_vm11, %v1757_v52  ;;  %2004 = vst.msk [vmem:[%s4416_s12 + $0x18] sm:$0xff] %vm372_vm0, %v1914_v17  ;;  %v2038_v34 = vsel %vm372_vm0, %v1914_v17, 0.0  ;;  %v2105_v57 = vmul.f32 %v1914_v17, %v1914_v17  ;;  %v1476_v3 = vpop.permute.xlu0 %1475 }
 0x30d   : > { %v2039_v11 = vadd.f32 %v2038_v34, %v2037_v26 }
 0x30e   : > { %v2139_v22 = vsel %vm372_vm0, %v2105_v57, 0.0 }
 0x30f   : > { %v2140_v13 = vadd.f32 %v2139_v22, %v2138_v0 }
 0x310   : > { %v1466_v31 = vpop.permute.xlu2 %1465 }
 0x312   : > { %v1375_v41 = vpop.permute.xlu1 %1374 }
 0x313   : > { %v1743_v58 = vsel %vm1716_vm8, %v1710_v30, %v1375_v41 }
 0x314   : > { %v1776_v14 = vsel %vm1749_vm10, %v1743_v58, %v1476_v3  ;;  %v1263_v51 = vpop.permute.xlu0 %1262 }
 0x315   : > { %2328 = vmatmul.msk.f32.gmra.mxu3 %vm1791_vm11, %v1776_v14  ;;  %v1705_v56 = vsel %vm1683_vm9, %v3840_v15, %v1263_v51 }
 0x319   : > { %v4482_v2 = vpop.f32.mrf.mxu1  ;;  %v4484_v49 = vpop.f32.mrf.mxu2 }
 0x31a   : > { %2010 = vst.msk [vmem:[%s4416_s12 + $0x48] sm:$0xff] %vm372_vm0, %v4482_v2  ;;  %v1249_v35 = vpop.permute.xlu1 %1248 }
 0x31b   : > { %v1698_v44 = vsel %vm1683_vm9, %v3891_v21, %v1249_v35  ;;  %2017 = vst.msk [vmem:[%s4416_s12 + $0x80] sm:$0xff] %vm372_vm0, %v4484_v49  ;;  %v1353_v21 = vpop.permute.xlu2 %1352 }
 0x31c   : > { %v1365_v63 = vpop.permute.xlu0 %1364  ;;  %v1731_v9 = vsel %vm1716_vm8, %v1698_v44, %v1351_v36 }
 0x31d   : > { %v1738_v47 = vsel %vm1716_vm8, %v1705_v56, %v1365_v63  ;;  %v1764_v1 = vsel %vm1749_vm10, %v1731_v9, %v1452_v50 }
 0x31e   : > { %2316 = vmatmul.msk.f32.gmra.mxu1 %vm1791_vm11, %v1764_v1  ;;  %v1771_v27 = vsel %vm1749_vm10, %v1738_v47, %v1466_v31 }
 0x31f   : > { %2323 = vmatmul.msk.f32.gmra.mxu2 %vm1791_vm11, %v1771_v27 }
 0x322   : > { %v1275_v42 = vpop.permute.xlu1 %1274 }
 0x323   : > { %v1917_v48 = vpop.f32.mrf.mxu0  ;;  %v1711_v46 = vsel %vm1683_vm9, %v3935_v43, %v1275_v42  ;;  %v1454_v10 = vpop.permute.xlu2 %1453 }
 0x324   : > { %2005 = vst.msk [vmem:[%s4416_s12 + $0x20] sm:$0xff] %vm372_vm0, %v1917_v48  ;;  %v2040_v15 = vsel %vm372_vm0, %v1917_v48, 0.0  ;;  %v2106_v26 = vmul.f32 %v1917_v48, %v1917_v48  ;;  %v1478_v33 = vpop.permute.xlu0 %1477 }
 0x325   : > { %v2041_v0 = vadd.f32 %v2040_v15, %v2039_v11 }
 0x326   : > { %v2141_v39 = vsel %vm372_vm0, %v2106_v26, 0.0 }
 0x327   : > { %v2142_v7 = vadd.f32 %v2141_v39, %v2140_v13 }
 0x32a   : > { %v1377_v28 = vpop.permute.xlu1 %1376 }
 0x32b   : > { %v1744_v62 = vsel %vm1716_vm8, %v1711_v46, %v1377_v28  ;;  %v1468_v6 = vpop.permute.xlu2 %1467 }
 0x32c   : > { %v1777_v5 = vsel %vm1749_vm10, %v1744_v62, %v1478_v33  ;;  %v1265_v36 = vpop.permute.xlu0 %1264 }
 0x32d   : > { %2329 = vmatmul.msk.f32.gmra.mxu3 %vm1791_vm11, %v1777_v5  ;;  %v1706_v18 = vsel %vm1683_vm9, %v3965_v29, %v1265_v36 }
 0x331   : > { %v4511_v24 = vpop.f32.mrf.mxu1  ;;  %v4513_v61 = vpop.f32.mrf.mxu2 }
 0x332   : > { %2011 = vst.msk [vmem:[%s4416_s12 + $0x50] sm:$0xff] %vm372_vm0, %v4511_v24  ;;  %v1251_v8 = vpop.permute.xlu1 %1250 }
 0x333   : > { %v1699_v43 = vsel %vm1683_vm9, %v3783_v20, %v1251_v8  ;;  %2018 = vst.msk [vmem:[%s4416_s12 + $0x88] sm:$0xff] %vm372_vm0, %v4513_v61  ;;  %v1279_v45 = vpop.permute.xlu2 %1278  ;;  %v2110_v8 = vmul.f32 %v4448_v16, %v4448_v16 }
 0x334   : > { %v1367_v53 = vpop.permute.xlu0 %1366  ;;  %v1732_v32 = vsel %vm1716_vm8, %v1699_v43, %v1353_v21  ;;  %v1713_v31 = vsel %vm1683_vm9, %v4101_v55, %v1279_v45  ;;  %v2050_v45 = vsel %vm372_vm0, %v4482_v2, 0.0 }
 0x335   : > { %v1739_v54 = vsel %vm1716_vm8, %v1706_v18, %v1367_v53  ;;  %v1765_v37 = vsel %vm1749_vm10, %v1732_v32, %v1454_v10 }
 0x336   : > { %2317 = vmatmul.msk.f32.gmra.mxu1 %vm1791_vm11, %v1765_v37  ;;  %v1772_v20 = vsel %vm1749_vm10, %v1739_v54, %v1468_v6  ;;  %v2048_v6 = vsel %vm372_vm0, %v4448_v16, 0.0  ;;  %v2111_v54 = vmul.f32 %v4482_v2, %v4482_v2  ;;  %v2052_v16 = vsel %vm372_vm0, %v4511_v24, 0.0 }
 0x337   : > { %2324 = vmatmul.msk.f32.gmra.mxu2 %vm1791_vm11, %v1772_v20 }
 0x33a   : > { %v1277_v38 = vpop.permute.xlu1 %1276 }
 0x33b   : > { %v1712_v29 = vsel %vm1683_vm9, %v4048_v59, %v1277_v38  ;;  %v1470_v57 = vpop.permute.xlu2 %1469 }
 0x33c   : > { %v1480_v19 = vpop.permute.xlu0 %1479 }
 0x342   : > { %v4533_v4 = vpop.f32.mrf.mxu1  ;;  %v1379_v12 = vpop.permute.xlu1 %1378 }
 0x343   : > { %2012 = vst.msk [vmem:[%s4416_s12 + $0x58] sm:$0xff] %vm372_vm0, %v4533_v4  ;;  %v1745_v25 = vsel %vm1716_vm8, %v1712_v29, %v1379_v12  ;;  %v1383_v56 = vpop.permute.xlu2 %1382  ;;  %v2112_v29 = vmul.f32 %v4511_v24, %v4511_v24  ;;  %v2054_v2 = vsel %vm372_vm0, %v4533_v4, 0.0 }
 0x344   : > { %v1778_v52 = vsel %vm1749_vm10, %v1745_v25, %v1480_v19  ;;  %v1369_v17 = vpop.permute.xlu0 %1368  ;;  %v2149_v19 = vsel %vm372_vm0, %v2110_v8, 0.0 }
 0x345   : > { %2330 = vmatmul.msk.f32.gmra.mxu3 %vm1791_vm11, %v1778_v52  ;;  %v2151_v52 = vsel %vm372_vm0, %v2111_v54, 0.0 }
 0x349   : > { %v1920_v34 = vpop.f32.mrf.mxu0 }
 0x34a   : > { %2006 = vst.msk [vmem:[%s4416_s12 + $0x28] sm:$0xff] %vm372_vm0, %v1920_v34  ;;  %v2042_v59 = vsel %vm372_vm0, %v1920_v34, 0.0  ;;  %v2107_v3 = vmul.f32 %v1920_v34, %v1920_v34  ;;  %v1267_v50 = vpop.permute.xlu1 %1266  ;;  %v4544_v11 = vpop.f32.mrf.mxu2 }
 0x34b   : > { %v2043_v22 = vadd.f32 %v2042_v59, %v2041_v0  ;;  %v1707_v13 = vsel %vm1683_vm9, %v4043_v40, %v1267_v50  ;;  %2019 = vst.msk [vmem:[%s4416_s12 + $0x90] sm:$0xff] %vm372_vm0, %v4544_v11  ;;  %v1385_v21 = vpop.permute.xlu2 %1384  ;;  %v2153_v59 = vsel %vm372_vm0, %v2112_v29, 0.0 }
 0x34c   : > { %v2143_v30 = vsel %vm372_vm0, %v2107_v3, 0.0  ;;  %v1740_v41 = vsel %vm1716_vm8, %v1707_v13, %v1369_v17  ;;  %v1482_v51 = vpop.permute.xlu0 %1481  ;;  %v2113_v17 = vmul.f32 %v4533_v4, %v4533_v4 }
 0x34d   : > { %v2144_v58 = vadd.f32 %v2143_v30, %v2142_v7  ;;  %v1773_v14 = vsel %vm1749_vm10, %v1740_v41, %v1470_v57 }
 0x34e   : > { %2325 = vmatmul.msk.f32.gmra.mxu2 %vm1791_vm11, %v1773_v14  ;;  %v2155_v13 = vsel %vm372_vm0, %v2113_v17, 0.0 }
 0x352   : > { %v1381_v35 = vpop.permute.xlu1 %1380 }
 0x353   : > { %v1746_v40 = vsel %vm1716_vm8, %v1713_v31, %v1381_v35 }
 0x354   : > { %v1779_v44 = vsel %vm1749_vm10, %v1746_v40, %v1482_v51  ;;  %v1484_v63 = vpop.permute.xlu0 %1483 }
 0x355   : > { %2331 = vmatmul.msk.f32.gmra.mxu3 %vm1791_vm11, %v1779_v44 }
 0x358   : > { %v4560_v9 = vpop.f32.mrf.mxu3 }
 0x359   : > { %2025 = vst.msk [vmem:[%s4416_s12 + $0xc0] sm:$0xff] %vm372_vm0, %v4560_v9 }
 0x35a   : > { %v1281_v47 = vpop.permute.xlu1 %1280 }
 0x35b   : > { %v1714_v55 = vsel %vm1683_vm9, %v3994_v23, %v1281_v47 }
 0x35c   : > { %v1747_v1 = vsel %vm1716_vm8, %v1714_v55, %v1383_v56  ;;  %v1486_v42 = vpop.permute.xlu0 %1485 }
 0x35d   : > { %v1780_v27 = vsel %vm1749_vm10, %v1747_v1, %v1484_v63 }
 0x35e   : > { %2332 = vmatmul.msk.f32.gmra.mxu3 %vm1791_vm11, %v1780_v27 }
 0x362   : > { %v1941_v48 = vpop.f32.mrf.mxu1  ;;  %v1283_v15 = vpop.permute.xlu1 %1282 }
 0x363   : > { %2013 = vst.msk [vmem:[%s4416_s12 + $0x60] sm:$0xff] %vm372_vm0, %v1941_v48  ;;  %v1715_v26 = vsel %vm1683_vm9, %v4082_v60, %v1283_v15  ;;  %v2114_v3 = vmul.f32 %v1941_v48, %v1941_v48  ;;  %v2056_v24 = vsel %vm372_vm0, %v1941_v48, 0.0  ;;  %v2118_v48 = vmul.f32 %v4484_v49, %v4484_v49 }
 0x364   : > { %v1748_v23 = vsel %vm1716_vm8, %v1715_v26, %v1385_v21 }
 0x365   : > { %v1781_v33 = vsel %vm1749_vm10, %v1748_v23, %v1486_v42  ;;  %v2157_v14 = vsel %vm372_vm0, %v2114_v3, 0.0 }
 0x366   : > { %2333 = vmatmul.msk.f32.gmra.mxu3 %vm1791_vm11, %v1781_v33 }
 0x369   : > { %v1923_v0 = vpop.f32.mrf.mxu0 }
 0x36a   : > { %2007 = vst.msk [vmem:[%s4416_s12 + $0x30] sm:$0xff] %vm372_vm0, %v1923_v0  ;;  %v2044_v39 = vsel %vm372_vm0, %v1923_v0, 0.0  ;;  %v2108_v7 = vmul.f32 %v1923_v0, %v1923_v0  ;;  %v4580_v46 = vpop.f32.mrf.mxu2  ;;  %v2064_v0 = vsel %vm372_vm0, %v4484_v49, 0.0 }
 0x36b   : > { %v2045_v28 = vadd.f32 %v2044_v39, %v2043_v22  ;;  %2020 = vst.msk [vmem:[%s4416_s12 + $0x98] sm:$0xff] %vm372_vm0, %v4580_v46  ;;  %v2119_v39 = vmul.f32 %v4513_v61, %v4513_v61 }
 0x36c   : > { %v2145_v60 = vsel %vm372_vm0, %v2108_v7, 0.0 }
 0x36d   : > { %v2146_v10 = vadd.f32 %v2145_v60, %v2144_v58  ;;  %v2167_v49 = vsel %vm372_vm0, %v2119_v39, 0.0 }
 0x378   : > { %v4586_v62 = vpop.f32.mrf.mxu3 }
 0x379   : > { %2026 = vst.msk [vmem:[%s4416_s12 + $0xc8] sm:$0xff] %vm372_vm0, %v4586_v62 }
 0x382   : > { %v1944_v5 = vpop.f32.mrf.mxu1 }
 0x383   : > { %2014 = vst.msk [vmem:[%s4416_s12 + $0x68] sm:$0xff] %vm372_vm0, %v1944_v5  ;;  %v2115_v30 = vmul.f32 %v1944_v5, %v1944_v5  ;;  %v2058_v51 = vsel %vm372_vm0, %v1944_v5, 0.0  ;;  %v2066_v5 = vsel %vm372_vm0, %v4513_v61, 0.0 }
 0x385   : > { %v2159_v4 = vsel %vm372_vm0, %v2115_v30, 0.0 }
 0x389   : > { %v1926_v36 = vpop.f32.mrf.mxu0 }
 0x38a   : > { %2008 = vst.msk [vmem:[%s4416_s12 + $0x38] sm:$0xff] %vm372_vm0, %v1926_v36  ;;  %v2046_v43 = vsel %vm372_vm0, %v1926_v36, 0.0  ;;  %v2109_v18 = vmul.f32 %v1926_v36, %v1926_v36  ;;  %v4598_v53 = vpop.f32.mrf.mxu2  ;;  %v2120_v36 = vmul.f32 %v4544_v11, %v4544_v11 }
 0x38b   : > { %v2047_v32 = vadd.f32 %v2046_v43, %v2045_v28  ;;  %2021 = vst.msk [vmem:[%s4416_s12 + $0xa0] sm:$0xff] %vm372_vm0, %v4598_v53  ;;  %v2072_v29 = vsel %vm372_vm0, %v4598_v53, 0.0 }
 0x38c   : > { %v2147_v37 = vsel %vm372_vm0, %v2109_v18, 0.0  ;;  %v2068_v18 = vsel %vm372_vm0, %v4544_v11, 0.0  ;;  %v2169_v61 = vsel %vm372_vm0, %v2120_v36, 0.0 }
 0x38d   : > { %v2049_v20 = vadd.f32 %v2048_v6, %v2047_v32  ;;  %v2148_v38 = vadd.f32 %v2147_v37, %v2146_v10  ;;  %v2165_v10 = vsel %vm372_vm0, %v2118_v48, 0.0  ;;  %v2121_v32 = vmul.f32 %v4580_v46, %v4580_v46 }
 0x38f   : > { %v2051_v12 = vadd.f32 %v2050_v45, %v2049_v20  ;;  %v2150_v25 = vadd.f32 %v2149_v19, %v2148_v38  ;;  %v2070_v20 = vsel %vm372_vm0, %v4580_v46, 0.0  ;;  %v2122_v38 = vmul.f32 %v4598_v53, %v4598_v53 }
 0x390   : > { %v2171_v11 = vsel %vm372_vm0, %v2121_v32, 0.0 }
 0x391   : > { %v2053_v34 = vadd.f32 %v2052_v16, %v2051_v12  ;;  %v2152_v57 = vadd.f32 %v2151_v52, %v2150_v25  ;;  %v2173_v52 = vsel %vm372_vm0, %v2122_v38, 0.0 }
 0x393   : > { %v2154_v50 = vadd.f32 %v2153_v59, %v2152_v57  ;;  %v2055_v22 = vadd.f32 %v2054_v2, %v2053_v34 }
 0x395   : > { %v2057_v41 = vadd.f32 %v2056_v24, %v2055_v22  ;;  %v2156_v58 = vadd.f32 %v2155_v13, %v2154_v50  ;;  %v2126_v13 = vmul.f32 %v4560_v9, %v4560_v9 }
 0x397   : > { %v2059_v31 = vadd.f32 %v2058_v51, %v2057_v41  ;;  %v2158_v35 = vadd.f32 %v2157_v14, %v2156_v58  ;;  %v2080_v51 = vsel %vm372_vm0, %v4560_v9, 0.0 }
 0x398   : > { %v4626_v40 = vpop.f32.mrf.mxu3 }
 0x399   : > { %2027 = vst.msk [vmem:[%s4416_s12 + $0xd0] sm:$0xff] %vm372_vm0, %v4626_v40  ;;  %v2160_v44 = vadd.f32 %v2159_v4, %v2158_v35  ;;  %v2084_v9 = vsel %vm372_vm0, %v4626_v40, 0.0 }
 0x39b   : > { %v1947_v56 = vpop.f32.mrf.mxu1 }
 0x39c   : > { %2015 = vst.msk [vmem:[%s4416_s12 + $0x70] sm:$0xff] %vm372_vm0, %v1947_v56  ;;  %v2116_v47 = vmul.f32 %v1947_v56, %v1947_v56  ;;  %v2060_v55 = vsel %vm372_vm0, %v1947_v56, 0.0  ;;  %v2181_v56 = vsel %vm372_vm0, %v2126_v13, 0.0 }
 0x39d   : > { %v2061_v21 = vadd.f32 %v2060_v55, %v2059_v31  ;;  %v2127_v31 = vmul.f32 %v4586_v62, %v4586_v62 }
 0x39e   : > { %v2161_v27 = vsel %vm372_vm0, %v2116_v47, 0.0  ;;  %v2128_v47 = vmul.f32 %v4626_v40, %v4626_v40 }
 0x39f   : > { %v2162_v23 = vadd.f32 %v2161_v27, %v2160_v44 }
 0x3a2   : > { %v1968_v63 = vpop.f32.mrf.mxu2 }
 0x3a3   : > { %2022 = vst.msk [vmem:[%s4416_s12 + $0xa8] sm:$0xff] %vm372_vm0, %v1968_v63  ;;  %v2123_v46 = vmul.f32 %v1968_v63, %v1968_v63  ;;  %v2074_v34 = vsel %vm372_vm0, %v1968_v63, 0.0  ;;  %v2082_v63 = vsel %vm372_vm0, %v4586_v62, 0.0 }
 0x3a5   : > { %v2175_v59 = vsel %vm372_vm0, %v2123_v46, 0.0 }
 0x3b0   : > { %v4636_v1 = vpop.f32.mrf.mxu3 }
 0x3b1   : > { %2028 = vst.msk [vmem:[%s4416_s12 + $0xd8] sm:$0xff] %vm372_vm0, %v4636_v1  ;;  %v2129_v62 = vmul.f32 %v4636_v1, %v4636_v1 }
 0x3b3   : > { %v1950_v42 = vpop.f32.mrf.mxu1  ;;  %v2187_v39 = vsel %vm372_vm0, %v2129_v62, 0.0 }
 0x3b4   : > { %2016 = vst.msk [vmem:[%s4416_s12 + $0x78] sm:$0xff] %vm372_vm0, %v1950_v42  ;;  %v2062_v15 = vsel %vm372_vm0, %v1950_v42, 0.0  ;;  %v2117_v26 = vmul.f32 %v1950_v42, %v1950_v42 }
 0x3b5   : > { %v2063_v33 = vadd.f32 %v2062_v15, %v2061_v21  ;;  %v2183_v21 = vsel %vm372_vm0, %v2127_v31, 0.0 }
 0x3b6   : > { %v2163_v7 = vsel %vm372_vm0, %v2117_v26, 0.0  ;;  %v2185_v26 = vsel %vm372_vm0, %v2128_v47, 0.0 }
 0x3b7   : > { %v2065_v28 = vadd.f32 %v2064_v0, %v2063_v33  ;;  %v2164_v60 = vadd.f32 %v2163_v7, %v2162_v23  ;;  %v2086_v33 = vsel %vm372_vm0, %v4636_v1, 0.0 }
 0x3b9   : > { %v2067_v8 = vadd.f32 %v2066_v5, %v2065_v28  ;;  %v2166_v43 = vadd.f32 %v2165_v10, %v2164_v60 }
 0x3ba   : > { %v1971_v6 = vpop.f32.mrf.mxu2 }
 0x3bb   : > { %v2069_v54 = vadd.f32 %v2068_v18, %v2067_v8  ;;  %v2168_v37 = vadd.f32 %v2167_v49, %v2166_v43  ;;  %2023 = vst.msk [vmem:[%s4416_s12 + $0xb0] sm:$0xff] %vm372_vm0, %v1971_v6  ;;  %v2124_v2 = vmul.f32 %v1971_v6, %v1971_v6  ;;  %v2076_v50 = vsel %vm372_vm0, %v1971_v6, 0.0 }
 0x3bd   : > { %v2170_v19 = vadd.f32 %v2169_v61, %v2168_v37  ;;  %v2071_v45 = vadd.f32 %v2070_v20, %v2069_v54  ;;  %v2177_v24 = vsel %vm372_vm0, %v2124_v2, 0.0 }
 0x3bf   : > { %v2073_v12 = vadd.f32 %v2072_v29, %v2071_v45  ;;  %v2172_v25 = vadd.f32 %v2171_v11, %v2170_v19 }
 0x3c1   : > { %v2174_v16 = vadd.f32 %v2173_v52, %v2172_v25  ;;  %v2075_v57 = vadd.f32 %v2074_v34, %v2073_v12 }
 0x3c3   : > { %v2176_v3 = vadd.f32 %v2175_v59, %v2174_v16  ;;  %v2077_v53 = vadd.f32 %v2076_v50, %v2075_v57 }
 0x3c5   : > { %v2178_v58 = vadd.f32 %v2177_v24, %v2176_v3 }
 0x3c8   : > { %v1989_v17 = vpop.f32.mrf.mxu3 }
 0x3c9   : > { %2029 = vst.msk [vmem:[%s4416_s12 + $0xe0] sm:$0xff] %vm372_vm0, %v1989_v17  ;;  %v2130_v7 = vmul.f32 %v1989_v17, %v1989_v17  ;;  %v2088_v60 = vsel %vm372_vm0, %v1989_v17, 0.0 }
 0x3cb   : > { %v2189_v5 = vsel %vm372_vm0, %v2130_v7, 0.0 }
 0x3d1   : > { %v1974_v22 = vpop.f32.mrf.mxu2 }
 0x3d2   : > { %2024 = vst.msk [vmem:[%s4416_s12 + $0xb8] sm:$0xff] %vm372_vm0, %v1974_v22  ;;  %v2078_v30 = vsel %vm372_vm0, %v1974_v22, 0.0  ;;  %v2125_v41 = vmul.f32 %v1974_v22, %v1974_v22 }
 0x3d3   : > { %v2079_v14 = vadd.f32 %v2078_v30, %v2077_v53 }
 0x3d4   : > { %v2179_v35 = vsel %vm372_vm0, %v2125_v41, 0.0 }
 0x3d5   : > { %v2081_v4 = vadd.f32 %v2080_v51, %v2079_v14  ;;  %v2180_v44 = vadd.f32 %v2179_v35, %v2178_v58 }
 0x3d7   : > { %v2083_v55 = vadd.f32 %v2082_v63, %v2081_v4  ;;  %v2182_v27 = vadd.f32 %v2181_v56, %v2180_v44 }
 0x3d8   : > { %v1992_v42 = vpop.f32.mrf.mxu3 }
 0x3d9   : > { %v2085_v48 = vadd.f32 %v2084_v9, %v2083_v55  ;;  %v2184_v15 = vadd.f32 %v2183_v21, %v2182_v27  ;;  %2030 = vst.msk [vmem:[%s4416_s12 + $0xe8] sm:$0xff] %vm372_vm0, %v1992_v42  ;;  %v2131_v36 = vmul.f32 %v1992_v42, %v1992_v42  ;;  %v2090_v49 = vsel %vm372_vm0, %v1992_v42, 0.0 }
 0x3db   : > { %v2186_v23 = vadd.f32 %v2185_v26, %v2184_v15  ;;  %v2087_v0 = vadd.f32 %v2086_v33, %v2085_v48  ;;  %v2191_v32 = vsel %vm372_vm0, %v2131_v36, 0.0 }
 0x3dd   : > { %v2188_v28 = vadd.f32 %v2187_v39, %v2186_v23  ;;  %v2089_v10 = vadd.f32 %v2088_v60, %v2087_v0 }
 0x3df   : > { %v2190_v43 = vadd.f32 %v2189_v5, %v2188_v28  ;;  %v2091_v18 = vadd.f32 %v2090_v49, %v2089_v10 }
 0x3e1   : > { %v1995_v40 = vpop.f32.mrf.mxu3  ;;  %v2192_v54 = vadd.f32 %v2191_v32, %v2190_v43 }
 0x3e2   : > { %2031 = vst.msk [vmem:[%s4416_s12 + $0xf0] sm:$0xff] %vm372_vm0, %v1995_v40  ;;  %v2132_v8 = vmul.f32 %v1995_v40, %v1995_v40  ;;  %v2092_v1 = vsel %vm372_vm0, %v1995_v40, 0.0 }
 0x3e3   : > { %v2093_v37 = vadd.f32 %v2092_v1, %v2091_v18 }
 0x3e4   : > { %v2193_v6 = vsel %vm372_vm0, %v2132_v8, 0.0 }
 0x3e5   : > { %v2194_v19 = vadd.f32 %v2193_v6, %v2192_v54 }
 0x3e9   : > { %v1998_v61 = vpop.f32.mrf.mxu3 }
 0x3ea   : > { %2032 = vst.msk [vmem:[%s4416_s12 + $0xf8] sm:$0xff] %vm372_vm0, %v1998_v61  ;;  %v2094_v20 = vsel %vm372_vm0, %v1998_v61, 0.0  ;;  %v2133_v38 = vmul.f32 %v1998_v61, %v1998_v61 }
 0x3eb   : > { %v2095_v45 = vadd.f32 %v2094_v20, %v2093_v37 }
 0x3ec   : > { %v2195_v11 = vsel %vm372_vm0, %v2133_v38, 0.0 }
 0x3ed   : > { %v2096_v29 = vrot.slane %v2095_v45, 4  ;;  %v2196_v12 = vadd.f32 %v2195_v11, %v2194_v19 }
 0x3ef   : > { %v2097_v25 = vadd.f32 %v2096_v29, %v2095_v45  ;;  %v2197_v52 = vrot.slane %v2196_v12, 4 }
 0x3f1   : > { %v2098_v16 = vrot.slane %v2097_v25, 2  ;;  %v2198_v17 = vadd.f32 %v2197_v52, %v2196_v12 }
 0x3f3   : > { %v2099_v46 = vadd.f32 %v2098_v16, %v2097_v25  ;;  %v2199_v34 = vrot.slane %v2198_v17, 2 }
 0x3f5   : > { %v2100_v57 = vrot.slane %v2099_v46, 1  ;;  %v2200_v59 = vadd.f32 %v2199_v34, %v2198_v17 }
 0x3f7   : > { %v2201_v2 = vrot.slane %v2200_v59, 1  ;;  %v2101_v3 = vadd.f32 %v2100_v57, %v2099_v46 }
 0x3f9   : > { %v2202_v50 = vadd.f32 %v2201_v2, %v2200_v59 }
 0x3fb   : > { %v2204_v53 = vsel %vm2203_vm12, %v2101_v3, %v2202_v50 }
 0x3fc   : > { %2205 = vst.msk [vmem:[%s235_s10] sm:$0x3] %vm375_vm2, %v2204_v53 }
 0x3fd PF: > { %s16_s18 = sadd.s32 1, %s2423_s18  }
 0x3fe   : > { %p13_p4 = scmp.ge.s32.totalorder %s16_s18, 4  }
 0x400   :  { %15 = sbr.rel (!%p13_p4) target bundleno = 1 (0x1), region = 79 }

// kernel: basic_block_forward_nhwc.3
= control target key start
LH: loop header
LB: loop body
LE: loop exit
PB: predicated region body
PF: predicated region fallthrough
CT: control target
= control target key end

     0   :  { %s2835_s18 = smov 0   ;;  %s5254_s0 = inlined_call_operand.vmem [shape: f32[2,16,16,4], index: 0, kind: input, shape index: {}]   ;;  %s5255_s1 = inlined_call_operand.vmem [shape: f32[36,8], index: 1, kind: input, shape index: {}]   ;;  %s5256_s2 = inlined_call_operand.vmem [shape: f32[4,8], index: 2, kind: input, shape index: {}]   ;;  %s5257_s3 = inlined_call_operand.vmem [shape: f32[2,16,16,8], index: 3, kind: output, shape index: {0}]   ;;  %s5258_s4 = inlined_call_operand.vmem [shape: f32[2,2,8], index: 4, kind: output, shape index: {1}]   ;;  %s5259_s5 = inlined_call_operand.vmem [shape: f32[2,2,8], index: 5, kind: output, shape index: {2}]  }
   0x1 LB: > { %s2647_s19 = sadd.s32 4294967295, %s2794_s18   ;;  %p2651_p0 = scmp.ge.s32.totalorder %s2794_s18, 1  ;;  %s2794_s18 = sphi %s2835_s18, %s16_s18  }
   0x2   : > { %p192_p1 = scmp.lt.s32.totalorder %s2794_s18, 3 }
   0x4   : > { %p193_p2 = pnand %p2651_p0, %p192_p1 }
   0x6   : > { %196 = sbr.rel (%p193_p2) target bundleno = 1021 (0x3fd), region = 32 }
   0xb   : > { %vm246_vm0 = vcmask 31744   ;;  %v2796_v0 = vmov 0.0   ;;  %vm469_vm1 = vcmask 1046528   ;;  %s2797_s20 = smov 4   ;;  %p228_p3 = scmp.lt.s32.totalorder %s2647_s19, 1  ;;  %vm249_vm2 = vcmask 25600  }
   0xc   : > { %247 = vst.msk [vmem:[#allocation2] sm:$0xff] %vm246_vm0, %v2796_v0  ;;  %vm646_vm3 = vcmask 1045504   ;;  %s2798_s25 = smov 8   ;;  %s2799_s26 = smov 12   ;;  %vm1457_vm4 = vcmask 64512   ;;  %vm1490_vm5 = vcmask 97280  }
   0xd   : > { %248 = vst.msk [vmem:[#allocation2 + $0x8] sm:$0xff] %vm246_vm0, %v2796_v0  ;;  %s5660_s19 = smov (!%p228_p3, %s2647_s19), 1  ;;  %s2800_s27 = smov 16   ;;  %vm1523_vm6 = vcmask 130048   ;;  %vm1556_vm7 = vcmask 162816   ;;  %vm1790_vm8 = vcmask 1043456  }
   0xe   : > { %251 = vst.msk [vmem:[#allocation2 + $0x18] sm:$0xff] %vm246_vm0, %v2796_v0  ;;  %s2726_s21 = sshll.u32 %s5660_s19, 8  ;;  %s2801_s28 = smov 20   ;;  %vm1589_vm9 = vcmask 195584   ;;  %vm1622_vm10 = vcmask 228352   ;;  %vm1655_vm11 = vcmask 261120  }
   0xf   : > { %252 = vst.msk [vmem:[#allocation2 + $0x20] sm:$0xff] %vm246_vm0, %v2796_v0  ;;  %s2927_s24 = scalar_lea.vmem %s5254_s0, %s2726_s21  ;;  %s2802_s29 = smov 24   ;;  %vm1693_vm12 = vcmask 293888   ;;  %vm2109_vm13 = vcmask 1040384   ;;  %vm2111_vm14 = vcmask 58368  }
  0x10   : > { %254 = vst.msk [vmem:[#allocation2 + $0x30] sm:$0xff] %vm246_vm0, %v2796_v0  ;;  %v304_v6 = vld [vmem:[%s2927_s24 + $0x10] sm:$0xff]  ;;  %v305_v7 = vld [vmem:[%s2927_s24 + $0x18] sm:$0xff]  ;;  %v302_v18 = vld [vmem:[%s2927_s24] sm:$0xff]  ;;  %s2803_s30 = smov 32   ;;  %s2804_s6 = smov 28  }
  0x11   : > { %255 = vst.msk [vmem:[#allocation2 + $0x38] sm:$0xff] %vm246_vm0, %v2796_v0  ;;  %v303_v19 = vld [vmem:[%s2927_s24 + $0x8] sm:$0xff]  ;;  %v306_v21 = vld [vmem:[%s2927_s24 + $0x20] sm:$0xff]  ;;  %v308_v23 = vld [vmem:[%s2927_s24 + $0x30] sm:$0xff] }
  0x12   : > { %257 = vst.msk [vmem:[#allocation2 + $0x48] sm:$0xff] %vm246_vm0, %v2796_v0  ;;  %v307_v22 = vld [vmem:[%s2927_s24 + $0x28] sm:$0xff]  ;;  %v309_v24 = vld [vmem:[%s2927_s24 + $0x38] sm:$0xff]  ;;  %v310_v25 = vld [vmem:[%s2927_s24 + $0x40] sm:$0xff] }
  0x13   : > { %v2857_v1 = vld [vmem:[#allocation2] sm:$0xff]  ;;  %258 = vst.msk [vmem:[#allocation2 + $0x50] sm:$0xff] %vm246_vm0, %v2796_v0  ;;  %v311_v26 = vld [vmem:[%s2927_s24 + $0x48] sm:$0xff]  ;;  %v312_v27 = vld [vmem:[%s2927_s24 + $0x50] sm:$0xff] }
  0x14   : > { %v2861_v2 = vld [vmem:[#allocation2 + $0x8] sm:$0xff]  ;;  %v470_v3 = vrot.slane %v2857_v1, 1  ;;  %260 = vst.msk [vmem:[#allocation2 + $0x60] sm:$0xff] %vm246_vm0, %v2796_v0  ;;  %v313_v28 = vld [vmem:[%s2927_s24 + $0x58] sm:$0xff]  ;;  %v314_v30 = vld [vmem:[%s2927_s24 + $0x60] sm:$0xff] }
  0x15   : > { %v471_v4 = vrot.slane %v2861_v2, 1  ;;  %261 = vst.msk [vmem:[#allocation2 + $0x68] sm:$0xff] %vm246_vm0, %v2796_v0  ;;  %v315_v33 = vld [vmem:[%s2927_s24 + $0x68] sm:$0xff]  ;;  %v316_v36 = vld [vmem:[%s2927_s24 + $0x70] sm:$0xff]  ;;  %v317_v40 = vld [vmem:[%s2927_s24 + $0x78] sm:$0xff] }
  0x16   : > { %263 = vst.msk [vmem:[#allocation2 + $0x78] sm:$0xff] %vm246_vm0, %v2796_v0  ;;  %v318_v44 = vld [vmem:[%s2927_s24 + $0x80] sm:$0xff]  ;;  %v319_v48 = vld [vmem:[%s2927_s24 + $0x88] sm:$0xff]  ;;  %v320_v56 = vld [vmem:[%s2927_s24 + $0x90] sm:$0xff] }
  0x17   : > { %v472_v5 = vsel %vm469_vm1, %v470_v3, %v471_v4  ;;  %264 = vst.msk [vmem:[#allocation2 + $0x80] sm:$0xff] %vm246_vm0, %v2796_v0  ;;  %v321_v60 = vld [vmem:[%s2927_s24 + $0x98] sm:$0xff] }
  0x18   : > { %550 = vrot.lane.b32.xlu0 %v472_v5, %s2797_s20  ;;  %266 = vst.msk [vmem:[#allocation2 + $0x90] sm:$0xff] %vm246_vm0, %v2796_v0 }
  0x19   : > { %267 = vst.msk [vmem:[#allocation2 + $0x98] sm:$0xff] %vm246_vm0, %v2796_v0 }
  0x1a   : > { %269 = vst.msk [vmem:[#allocation2 + $0xa8] sm:$0xff] %vm246_vm0, %v2796_v0 }
  0x1b   : > { %270 = vst.msk [vmem:[#allocation2 + $0xb0] sm:$0xff] %vm246_vm0, %v2796_v0 }
  0x1c   : > { %272 = vst.msk [vmem:[#allocation2 + $0xc0] sm:$0xff] %vm246_vm0, %v2796_v0 }
  0x1d   : > { %273 = vst.msk [vmem:[#allocation2 + $0xc8] sm:$0xff] %vm246_vm0, %v2796_v0 }
  0x1e   : > { %275 = vst.msk [vmem:[#allocation2 + $0xd8] sm:$0xff] %vm246_vm0, %v2796_v0 }
  0x1f   : > { %276 = vst.msk [vmem:[#allocation2 + $0xe0] sm:$0xff] %vm246_vm0, %v2796_v0 }
  0x20   : > { %278 = vst.msk [vmem:[#allocation2 + $0xf0] sm:$0xff] %vm246_vm0, %v2796_v0 }
  0x21   : > { %279 = vst.msk [vmem:[#allocation2 + $0xf8] sm:$0xff] %vm246_vm0, %v2796_v0 }
  0x22   : > { %281 = vst.msk [vmem:[#allocation2 + $0x108] sm:$0xff] %vm246_vm0, %v2796_v0 }
  0x23   : > { %282 = vst.msk [vmem:[#allocation2 + $0x110] sm:$0xff] %vm246_vm0, %v2796_v0 }
  0x24   : > { %284 = vst.msk [vmem:[#allocation2 + $0x120] sm:$0xff] %vm246_vm0, %v2796_v0 }
  0x25   : > { %285 = vst.msk [vmem:[#allocation2 + $0x128] sm:$0xff] %vm246_vm0, %v2796_v0 }
  0x26   : > { %287 = vst.msk [vmem:[#allocation2 + $0x138] sm:$0xff] %vm246_vm0, %v2796_v0 }
  0x27   : > { %288 = vst.msk [vmem:[#allocation2 + $0x140] sm:$0xff] %vm246_vm0, %v2796_v0 }
  0x28   : > { %290 = vst.msk [vmem:[#allocation2 + $0x150] sm:$0xff] %vm246_vm0, %v2796_v0 }
  0x29   : > { %291 = vst.msk [vmem:[#allocation2 + $0x158] sm:$0xff] %vm246_vm0, %v2796_v0 }
  0x2a   : > { %293 = vst.msk [vmem:[#allocation2 + $0x168] sm:$0xff] %vm246_vm0, %v2796_v0 }
  0x2b   : > { %294 = vst.msk [vmem:[#allocation2 + $0x170] sm:$0xff] %vm246_vm0, %v2796_v0 }
  0x2c   : > { %296 = vst.msk [vmem:[#allocation2 + $0x180] sm:$0xff] %vm246_vm0, %v2796_v0 }
  0x2d   : > { %297 = vst.msk [vmem:[#allocation2 + $0x188] sm:$0xff] %vm246_vm0, %v2796_v0 }
  0x2e   : > { %299 = vst.msk [vmem:[#allocation2 + $0x198] sm:$0xff] %vm246_vm0, %v2796_v0 }
  0x2f   : > { %300 = vst.msk [vmem:[#allocation2 + $0x1a0] sm:$0xff] %vm246_vm0, %v2796_v0 }
  0x30   : > { %256 = vst.msk [vmem:[#allocation2 + $0x40] sm:$0x3] %vm249_vm2, %v2796_v0 }
  0x31   : > { %337 = vst.msk [vmem:[#allocation2 + $0x31] sm:$0xff] %vm246_vm0, %v304_v6 }
  0x32   : > { %338 = vst.msk [vmem:[#allocation2 + $0x39] sm:$0xff] %vm246_vm0, %v305_v7 }
  0x33   : > { %250 = vst.msk [vmem:[#allocation2 + $0x10] sm:$0x3] %vm249_vm2, %v2796_v0 }
  0x34   : > { %253 = vst.msk [vmem:[#allocation2 + $0x28] sm:$0x3] %vm249_vm2, %v2796_v0 }
  0x35   : > { %259 = vst.msk [vmem:[#allocation2 + $0x58] sm:$0x3] %vm249_vm2, %v2796_v0 }
  0x36   : > { %262 = vst.msk [vmem:[#allocation2 + $0x70] sm:$0x3] %vm249_vm2, %v2796_v0 }
  0x37   : > { %265 = vst.msk [vmem:[#allocation2 + $0x88] sm:$0x3] %vm249_vm2, %v2796_v0 }
  0x38   : > { %v2953_v8 = vld [vmem:[#allocation2 + $0x30] sm:$0xff]  ;;  %268 = vst.msk [vmem:[#allocation2 + $0xa0] sm:$0x3] %vm249_vm2, %v2796_v0 }
  0x39   : > { %v2957_v9 = vld [vmem:[#allocation2 + $0x38] sm:$0xff]  ;;  %v480_v10 = vrot.slane %v2953_v8, 1  ;;  %271 = vst.msk [vmem:[#allocation2 + $0xb8] sm:$0x3] %vm249_vm2, %v2796_v0  ;;  %v2970_v14 = vld [vmem:[#allocation2 + $0x40] sm:$0x3] }
  0x3a   : > { %v481_v11 = vrot.slane %v2957_v9, 1  ;;  %274 = vst.msk [vmem:[#allocation2 + $0xd0] sm:$0x3] %vm249_vm2, %v2796_v0  ;;  %v2965_v12 = vld [vmem:[#allocation2 + $0x10] sm:$0x3]  ;;  %v483_v17 = vrot.slane %v2970_v14, 1 }
  0x3b   : > { %277 = vst.msk [vmem:[#allocation2 + $0xe8] sm:$0x3] %vm249_vm2, %v2796_v0  ;;  %v473_v13 = vrot.slane %v2965_v12, 1 }
  0x3c   : > { %v2973_v15 = vsel %vm469_vm1, %v480_v10, %v481_v11  ;;  %280 = vst.msk [vmem:[#allocation2 + $0x100] sm:$0x3] %vm249_vm2, %v2796_v0  ;;  %v2997_v20 = vsel %vm469_vm1, %v481_v11, %v483_v17  ;;  %v322_v11 = vld [vmem:[%s2927_s24 + $0xa0] sm:$0xff] }
  0x3d   : > { %558 = vrot.lane.b32.xlu2 %v2973_v15, %s2797_s20  ;;  %283 = vst.msk [vmem:[#allocation2 + $0x118] sm:$0x3] %vm249_vm2, %v2796_v0  ;;  %v474_v16 = vsel %vm469_vm1, %v471_v4, %v473_v13  ;;  %v323_v13 = vld [vmem:[%s2927_s24 + $0xa8] sm:$0xff] }
  0x3e   : > { %286 = vst.msk [vmem:[#allocation2 + $0x130] sm:$0x3] %vm249_vm2, %v2796_v0  ;;  %552 = vrot.lane.b32.xlu0 %v474_v16, %s2797_s20 }
  0x3f   : > { %289 = vst.msk [vmem:[#allocation2 + $0x148] sm:$0x3] %vm249_vm2, %v2796_v0 }
  0x40   : > { %292 = vst.msk [vmem:[#allocation2 + $0x160] sm:$0x3] %vm249_vm2, %v2796_v0 }
  0x41   : > { %295 = vst.msk [vmem:[#allocation2 + $0x178] sm:$0x3] %vm249_vm2, %v2796_v0 }
  0x42   : > { %298 = vst.msk [vmem:[#allocation2 + $0x190] sm:$0x3] %vm249_vm2, %v2796_v0 }
  0x43   : > { %301 = vst.msk [vmem:[#allocation2 + $0x1a8] sm:$0x3] %vm249_vm2, %v2796_v0 }
  0x44   : > { %335 = vst.msk [vmem:[#allocation2 + $0x19] sm:$0xff] %vm246_vm0, %v302_v18 }
  0x45   : > { %336 = vst.msk [vmem:[#allocation2 + $0x21] sm:$0xff] %vm246_vm0, %v303_v19  ;;  %560 = vrot.lane.b32.xlu2 %v2997_v20, %s2797_s20 }
  0x46   : > { %339 = vst.msk [vmem:[#allocation2 + $0x49] sm:$0xff] %vm246_vm0, %v306_v21  ;;  %v324_v21 = vld [vmem:[%s2927_s24 + $0xb0] sm:$0xff] }
  0x47   : > { %340 = vst.msk [vmem:[#allocation2 + $0x51] sm:$0xff] %vm246_vm0, %v307_v22  ;;  %v325_v22 = vld [vmem:[%s2927_s24 + $0xb8] sm:$0xff] }
  0x48   : > { %341 = vst.msk [vmem:[#allocation2 + $0x61] sm:$0xff] %vm246_vm0, %v308_v23 }
  0x49   : > { %342 = vst.msk [vmem:[#allocation2 + $0x69] sm:$0xff] %vm246_vm0, %v309_v24 }
  0x4a   : > { %343 = vst.msk [vmem:[#allocation2 + $0x79] sm:$0xff] %vm246_vm0, %v310_v25 }
  0x4b   : > { %v3018_v29 = vld [vmem:[#allocation2 + $0x18] sm:$0xff]  ;;  %344 = vst.msk [vmem:[#allocation2 + $0x81] sm:$0xff] %vm246_vm0, %v311_v26 }
  0x4c   : > { %v3022_v31 = vld [vmem:[#allocation2 + $0x20] sm:$0xff]  ;;  %v475_v32 = vrot.slane %v3018_v29, 1  ;;  %345 = vst.msk [vmem:[#allocation2 + $0x91] sm:$0xff] %vm246_vm0, %v312_v27  ;;  %v3032_v37 = vld [vmem:[#allocation2 + $0x28] sm:$0x3] }
  0x4d   : > { %v476_v34 = vrot.slane %v3022_v31, 1  ;;  %v3028_v35 = vld [vmem:[#allocation2 + $0x48] sm:$0xff]  ;;  %346 = vst.msk [vmem:[#allocation2 + $0x99] sm:$0xff] %vm246_vm0, %v313_v28  ;;  %v478_v49 = vrot.slane %v3032_v37, 1 }
  0x4e   : > { %v3034_v38 = vld [vmem:[#allocation2 + $0x50] sm:$0xff]  ;;  %v485_v39 = vrot.slane %v3028_v35, 1  ;;  %347 = vst.msk [vmem:[#allocation2 + $0xa9] sm:$0xff] %vm246_vm0, %v314_v30  ;;  %v3084_v61 = vld [vmem:[#allocation2 + $0x58] sm:$0x3] }
  0x4f   : > { %v3040_v41 = vsel %vm469_vm1, %v475_v32, %v476_v34  ;;  %v486_v42 = vrot.slane %v3034_v38, 1  ;;  %v3043_v43 = vld [vmem:[#allocation2 + $0x60] sm:$0xff]  ;;  %348 = vst.msk [vmem:[#allocation2 + $0xb1] sm:$0xff] %vm246_vm0, %v315_v33  ;;  %v3078_v57 = vsel %vm469_vm1, %v476_v34, %v478_v49  ;;  %v488_v3 = vrot.slane %v3084_v61, 1  ;;  %v327_v33 = vld [vmem:[%s2927_s24 + $0xc8] sm:$0xff] }
  0x50   : > { %554 = vrot.lane.b32.xlu1 %v3040_v41, %s2797_s20  ;;  %v3049_v45 = vld [vmem:[#allocation2 + $0x68] sm:$0xff]  ;;  %v490_v46 = vrot.slane %v3043_v43, 1  ;;  %v3052_v47 = vld [vmem:[#allocation2 + $0x70] sm:$0x3]  ;;  %349 = vst.msk [vmem:[#allocation2 + $0xc1] sm:$0xff] %vm246_vm0, %v316_v36  ;;  %v326_v32 = vld [vmem:[%s2927_s24 + $0xc0] sm:$0xff] }
  0x51   : > { %v3058_v50 = vsel %vm469_vm1, %v485_v39, %v486_v42  ;;  %v491_v51 = vrot.slane %v3049_v45, 1  ;;  %350 = vst.msk [vmem:[#allocation2 + $0xc9] sm:$0xff] %vm246_vm0, %v317_v40  ;;  %v493_v55 = vrot.slane %v3052_v47, 1  ;;  %v3113_v16 = vsel %vm469_vm1, %v486_v42, %v488_v3  ;;  %v3118_v19 = vld [vmem:[#allocation2 + $0x78] sm:$0xff] }
  0x52   : > { %5349 = vst [vmem:[#allocation3_spill] sm:$0xff] %v3058_v50  ;;  %562 = vrot.lane.b32.xlu0 %v3058_v50, %s2797_s20  ;;  %v3064_v52 = vld [vmem:[#allocation2 + $0x80] sm:$0xff]  ;;  %v3066_v53 = vld [vmem:[#allocation2 + $0x88] sm:$0x3]  ;;  %v495_v25 = vrot.slane %v3118_v19, 1  ;;  %v648_v50 = vrot.slane %v2861_v2, 2 }
  0x53   : > { %351 = vst.msk [vmem:[#allocation2 + $0xd9] sm:$0xff] %vm246_vm0, %v318_v44  ;;  %v3070_v54 = vsel %vm469_vm1, %v490_v46, %v491_v51  ;;  %v496_v58 = vrot.slane %v3064_v52, 1  ;;  %v498_v59 = vrot.slane %v3066_v53, 1  ;;  %v3088_v62 = vsel %vm469_vm1, %v491_v51, %v493_v55  ;;  %v3092_v63 = vld [vmem:[#allocation2 + $0x90] sm:$0xff] }
  0x54   : > { %352 = vst.msk [vmem:[#allocation2 + $0xe1] sm:$0xff] %vm246_vm0, %v319_v48  ;;  %566 = vrot.lane.b32.xlu2 %v3070_v54, %s2797_s20  ;;  %v3094_v0 = vld [vmem:[#allocation2 + $0x98] sm:$0xff]  ;;  %v500_v7 = vrot.slane %v3092_v63, 1  ;;  %v3153_v40 = vld [vmem:[#allocation2 + $0xa0] sm:$0x3] }
  0x55   : > { %353 = vst.msk [vmem:[#allocation2 + $0xf1] sm:$0xff] %vm246_vm0, %v320_v56  ;;  %v3098_v4 = vsel %vm469_vm1, %v496_v58, %v498_v59  ;;  %v3102_v5 = vld [vmem:[#allocation2 + $0xa8] sm:$0xff]  ;;  %v501_v10 = vrot.slane %v3094_v0, 1  ;;  %v3148_v34 = vsel %vm469_vm1, %v495_v25, %v496_v58  ;;  %v503_v48 = vrot.slane %v3153_v40, 1  ;;  %v328_v59 = vld [vmem:[%s2927_s24 + $0xd0] sm:$0xff] }
  0x56   : > { %354 = vst.msk [vmem:[#allocation2 + $0xf9] sm:$0xff] %vm246_vm0, %v321_v60  ;;  %v3104_v6 = vld [vmem:[#allocation2 + $0xb0] sm:$0xff]  ;;  %v505_v17 = vrot.slane %v3102_v5, 1  ;;  %v3129_v24 = vld [vmem:[#allocation2 + $0xb8] sm:$0x3] }
  0x57   : > { %5350 = vst [vmem:[#allocation4_spill] sm:$0xff] %v3088_v62  ;;  %v506_v18 = vrot.slane %v3104_v6, 1  ;;  %v3124_v23 = vsel %vm469_vm1, %v500_v7, %v501_v10  ;;  %v508_v30 = vrot.slane %v3129_v24, 1  ;;  %v329_v60 = vld [vmem:[%s2927_s24 + $0xd8] sm:$0xff]  ;;  %v3182_v3 = vsel %vm469_vm1, %v501_v10, %v503_v48 }
  0x58   : > { %556 = vrot.lane.b32.xlu1 %v3078_v57, %s2797_s20  ;;  %5351 = vst [vmem:[#allocation5_spill] sm:$0xff] %v3098_v4  ;;  %v3138_v27 = vld [vmem:[#allocation2 + $0xc8] sm:$0xff]  ;;  %v3140_v28 = vld [vmem:[#allocation2 + $0xd0] sm:$0x3] }
  0x59   : > { %355 = vst.msk [vmem:[#allocation2 + $0x109] sm:$0xff] %vm246_vm0, %v322_v11  ;;  %v3134_v26 = vsel %vm469_vm1, %v505_v17, %v506_v18  ;;  %v511_v36 = vrot.slane %v3138_v27, 1  ;;  %v513_v39 = vrot.slane %v3140_v28, 1  ;;  %v3157_v42 = vsel %vm469_vm1, %v506_v18, %v508_v30  ;;  %v330_v17 = vld [vmem:[%s2927_s24 + $0xe0] sm:$0xff]  ;;  %v331_v18 = vld [vmem:[%s2927_s24 + $0xe8] sm:$0xff] }
  0x5a   : > { %568 = vrot.lane.b32.xlu0 %v3088_v62, %s2797_s20  ;;  %356 = vst.msk [vmem:[#allocation2 + $0x111] sm:$0xff] %vm246_vm0, %v323_v13  ;;  %v3161_v44 = vld [vmem:[#allocation2 + $0xd8] sm:$0xff]  ;;  %v3187_v13 = vld [vmem:[#allocation2 + $0xc0] sm:$0xff] }
  0x5b   : > { %5352 = vst [vmem:[#allocation6_spill] sm:$0xff] %v3124_v23  ;;  %v3163_v46 = vld [vmem:[#allocation2 + $0xe0] sm:$0xff]  ;;  %v3167_v49 = vsel %vm469_vm1, %v511_v36, %v513_v39  ;;  %v515_v56 = vrot.slane %v3161_v44, 1 }
  0x5c   : > { %572 = vrot.lane.b32.xlu2 %v3098_v4, %s2797_s20  ;;  %357 = vst.msk [vmem:[#allocation2 + $0x121] sm:$0xff] %vm246_vm0, %v324_v21  ;;  %v3171_v51 = vld [vmem:[#allocation2 + $0xf0] sm:$0xff]  ;;  %v516_v58 = vrot.slane %v3163_v46, 1 }
  0x5d   : > { %358 = vst.msk [vmem:[#allocation2 + $0x129] sm:$0xff] %vm246_vm0, %v325_v22  ;;  %v3173_v55 = vld [vmem:[#allocation2 + $0xf8] sm:$0xff]  ;;  %v520_v7 = vrot.slane %v3171_v51, 1  ;;  %v3198_v10 = vld [vmem:[#allocation2 + $0x100] sm:$0x3]  ;;  %v510_v22 = vrot.slane %v3187_v13, 1 }
  0x5e   : > { %5353 = vst [vmem:[#allocation7_spill] sm:$0xff] %v3134_v26  ;;  %v521_v11 = vrot.slane %v3173_v55, 1  ;;  %v3193_v21 = vsel %vm469_vm1, %v515_v56, %v516_v58 }
  0x5f   : > { %5354 = vst [vmem:[#allocation8_spill] sm:$0xff] %v3148_v34  ;;  %v3215_v39 = vsel %vm469_vm1, %v510_v22, %v511_v36 }
  0x60   : > { %564 = vrot.lane.b32.xlu1 %v3113_v16, %s2797_s20  ;;  %359 = vst.msk [vmem:[#allocation2 + $0x139] sm:$0xff] %vm246_vm0, %v326_v32  ;;  %v3203_v25 = vsel %vm469_vm1, %v520_v7, %v521_v11 }
  0x61   : > { %360 = vst.msk [vmem:[#allocation2 + $0x141] sm:$0xff] %vm246_vm0, %v327_v33  ;;  %v3207_v30 = vld [vmem:[#allocation2 + $0x110] sm:$0xff]  ;;  %v3209_v32 = vld [vmem:[#allocation2 + $0x118] sm:$0x3]  ;;  %v523_v33 = vrot.slane %v3198_v10, 1 }
  0x62   : > { %574 = vrot.lane.b32.xlu0 %v3124_v23, %s2797_s20  ;;  %5355 = vst [vmem:[#allocation9_spill] sm:$0xff] %v3157_v42  ;;  %v526_v48 = vrot.slane %v3207_v30, 1  ;;  %v528_v56 = vrot.slane %v3209_v32, 1 }
  0x63   : > { %5356 = vst [vmem:[#allocation10_spill] sm:$0xff] %v3167_v49  ;;  %v3226_v7 = vld [vmem:[#allocation2 + $0x120] sm:$0xff] }
  0x64   : > { %578 = vrot.lane.b32.xlu2 %v3134_v26, %s2797_s20  ;;  %5357 = vst [vmem:[#allocation11_spill] sm:$0xff] %v3182_v3  ;;  %v3232_v36 = vsel %vm469_vm1, %v526_v48, %v528_v56  ;;  %v3276_v62 = vld [vmem:[#allocation2 + $0x130] sm:$0x3] }
  0x65   : > { %361 = vst.msk [vmem:[#allocation2 + $0x151] sm:$0xff] %vm246_vm0, %v328_v59  ;;  %v3219_v59 = vld [vmem:[#allocation2 + $0xe8] sm:$0x3] }
  0x66   : > { %362 = vst.msk [vmem:[#allocation2 + $0x159] sm:$0xff] %vm246_vm0, %v329_v60  ;;  %v3222_v60 = vsel %vm469_vm1, %v521_v11, %v523_v33  ;;  %v530_v11 = vrot.slane %v3226_v7, 1 }
  0x67   : > { %5358 = vst [vmem:[#allocation12_spill] sm:$0xff] %v3193_v21  ;;  %v3236_v22 = vld [vmem:[#allocation2 + $0x138] sm:$0xff] }
  0x68   : > { %570 = vrot.lane.b32.xlu1 %v3148_v34, %s2797_s20  ;;  %363 = vst.msk [vmem:[#allocation2 + $0x169] sm:$0xff] %vm246_vm0, %v330_v17  ;;  %v3228_v17 = vld [vmem:[#allocation2 + $0x128] sm:$0xff]  ;;  %v535_v56 = vrot.slane %v3236_v22, 1 }
  0x69   : > { %364 = vst.msk [vmem:[#allocation2 + $0x171] sm:$0xff] %vm246_vm0, %v331_v18  ;;  %v518_v18 = vrot.slane %v3219_v59, 1  ;;  %v531_v33 = vrot.slane %v3228_v17, 1  ;;  %v3256_v23 = vld [vmem:[#allocation2 + $0x148] sm:$0x3] }
  0x6a   : > { %580 = vrot.lane.b32.xlu0 %v3157_v42, %s2797_s20  ;;  %5359 = vst [vmem:[#allocation13_spill] sm:$0xff] %v3203_v25 }
  0x6b   : > { %5360 = vst [vmem:[#allocation14_spill] sm:$0xff] %v3215_v39 }
  0x6c   : > { %584 = vrot.lane.b32.xlu2 %v3167_v49, %s2797_s20  ;;  %5361 = vst [vmem:[#allocation15_spill] sm:$0xff] %v3222_v60  ;;  %v3249_v49 = vld [vmem:[#allocation2 + $0x108] sm:$0xff]  ;;  %v3302_v34 = vld [vmem:[#allocation2 + $0x150] sm:$0xff] }
  0x6d   : > { %5362 = vst [vmem:[#allocation16_spill] sm:$0xff] %v3232_v36 }
  0x70   : > { %576 = vrot.lane.b32.xlu1 %v3182_v3, %s2797_s20  ;;  %v3283_v3 = vld [vmem:[#allocation2 + $0x168] sm:$0xff]  ;;  %v3285_v4 = vld [vmem:[#allocation2 + $0x170] sm:$0xff] }
  0x72   : > { %586 = vrot.lane.b32.xlu0 %v3193_v21, %s2797_s20  ;;  %v3238_v21 = vld [vmem:[#allocation2 + $0x140] sm:$0xff] }
  0x73   : > { %v536_v42 = vrot.slane %v3238_v21, 1 }
  0x74   : > { %590 = vrot.lane.b32.xlu2 %v3203_v25, %s2797_s20  ;;  %v3245_v25 = vsel %vm469_vm1, %v516_v58, %v518_v18  ;;  %v3264_v58 = vld [vmem:[#allocation2 + $0x158] sm:$0xff]  ;;  %v3266_v18 = vld [vmem:[#allocation2 + $0x160] sm:$0x3] }
  0x75   : > { %5363 = vst [vmem:[#allocation17_spill] sm:$0xff] %v3245_v25  ;;  %v541_v26 = vrot.slane %v3264_v58, 1 }
  0x78   : > { %582 = vrot.lane.b32.xlu1 %v3215_v39, %s2797_s20  ;;  %v525_v39 = vrot.slane %v3249_v49, 1 }
  0x7a   : > { %592 = vrot.lane.b32.xlu0 %v3222_v60, %s2797_s20  ;;  %v3252_v60 = vsel %vm469_vm1, %v530_v11, %v531_v33  ;;  %v538_v11 = vrot.slane %v3256_v23, 1 }
  0x7b   : > { %5364 = vst [vmem:[#allocation18_spill] sm:$0xff] %v3252_v60 }
  0x7c   : > { %596 = vrot.lane.b32.xlu2 %v3232_v36, %s2797_s20  ;;  %v3260_v36 = vsel %vm469_vm1, %v535_v56, %v536_v42  ;;  %v543_v56 = vrot.slane %v3266_v18, 1 }
  0x7d   : > { %5365 = vst [vmem:[#allocation19_spill] sm:$0xff] %v3260_v36 }
  0x80   : > { %588 = vrot.lane.b32.xlu1 %v3245_v25, %s2797_s20  ;;  %v3272_v25 = vsel %vm469_vm1, %v525_v39, %v526_v48  ;;  %v3289_v39 = vsel %vm469_vm1, %v541_v26, %v543_v56  ;;  %v545_v48 = vrot.slane %v3283_v3, 1 }
  0x81   : > { %5366 = vst [vmem:[#allocation20_spill] sm:$0xff] %v3272_v25 }
  0x82   : > { %598 = vrot.lane.b32.xlu0 %v3252_v60, %s2797_s20  ;;  %v3279_v60 = vsel %vm469_vm1, %v536_v42, %v538_v11  ;;  %5368 = vst [vmem:[#allocation22_spill] sm:$0xff] %v3289_v39  ;;  %v546_v42 = vrot.slane %v3285_v4, 1 }
  0x83   : > { %5367 = vst [vmem:[#allocation21_spill] sm:$0xff] %v3279_v60 }
  0x84   : > { %602 = vrot.lane.b32.xlu2 %v3260_v36, %s2797_s20  ;;  %v533_v36 = vrot.slane %v3276_v62, 1  ;;  %v3305_v56 = vsel %vm469_vm1, %v545_v48, %v546_v42  ;;  %v3320_v48 = vld [vmem:[#allocation2 + $0x178] sm:$0x3] }
  0x85   : > { %5370 = vst [vmem:[#allocation24_spill] sm:$0xff] %v3305_v56 }
  0x86   : > { %v3298_v11 = vsel %vm469_vm1, %v531_v33, %v533_v36  ;;  %v653_v36 = vrot.slane %v3022_v31, 2  ;;  %v655_v33 = vrot.slane %v3032_v37, 2  ;;  %v658_v37 = vrot.slane %v2957_v9, 2 }
  0x87   : > { %5369 = vst [vmem:[#allocation23_spill] sm:$0xff] %v3298_v11 }
  0x88   : > { %594 = vrot.lane.b32.xlu1 %v3272_v25, %s2797_s20  ;;  %v647_v25 = vrot.slane %v2857_v1, 2  ;;  %v650_v1 = vrot.slane %v2965_v12, 2  ;;  %v3327_v12 = vsel %vm646_vm3, %v653_v36, %v655_v33 }
  0x89   : > { %5372 = vst [vmem:[#allocation26_spill] sm:$0xff] %v3327_v12 }
  0x8a   : > { %604 = vrot.lane.b32.xlu0 %v3279_v60, %s2797_s20  ;;  %v540_v60 = vrot.slane %v3302_v34, 1 }
  0x8c   : > { %608 = vrot.lane.b32.xlu2 %v3289_v39, %s2797_s20  ;;  %v649_v39 = vsel %vm646_vm3, %v647_v25, %v648_v50  ;;  %v3316_v2 = vsel %vm469_vm1, %v540_v60, %v541_v26  ;;  %v548_v25 = vrot.slane %v3320_v48, 1  ;;  %v657_v60 = vrot.slane %v2953_v8, 2 }
  0x8d   : > { %5371 = vst [vmem:[#allocation25_spill] sm:$0xff] %v3316_v2 }
  0x8e   : > { %v3342_v33 = vsel %vm646_vm3, %v657_v60, %v658_v37 }
  0x8f   : > { %5375 = vst [vmem:[#allocation29_spill] sm:$0xff] %v3342_v33 }
  0x90   : > { %600 = vrot.lane.b32.xlu1 %v3298_v11, %s2797_s20  ;;  %v651_v11 = vsel %vm646_vm3, %v648_v50, %v650_v1  ;;  %v3337_v50 = vsel %vm469_vm1, %v546_v42, %v548_v25  ;;  %v663_v1 = vrot.slane %v3034_v38, 2  ;;  %v665_v42 = vrot.slane %v3084_v61, 2 }
  0x91   : > { %5374 = vst [vmem:[#allocation28_spill] sm:$0xff] %v3337_v50  ;;  %v660_v61 = vrot.slane %v2970_v14, 2  ;;  %v678_v14 = vrot.slane %v3094_v0, 2 }
  0x92   : > { %610 = vrot.lane.b32.xlu0 %v3305_v56, %s2797_s20  ;;  %v670_v56 = vrot.slane %v3052_v47, 2 }
  0x93   : > { %v3378_v47 = vsel %vm646_vm3, %v658_v37, %v660_v61  ;;  %v680_v37 = vrot.slane %v3153_v40, 2  ;;  %v675_v40 = vrot.slane %v3066_v53, 2  ;;  %v692_v53 = vrot.slane %v3161_v44, 2 }
  0x94   : > { %727 = vrot.lane.b32.xlu2 %v649_v39, %s2798_s25  ;;  %v662_v39 = vrot.slane %v3028_v35, 2 }
  0x97   : > { %v3330_v26 = vpop.permute.xlu2 %558 }
  0x98   : > { %606 = vrot.lane.b32.xlu1 %v3316_v2, %s2797_s20  ;;  %5373 = vst [vmem:[#allocation27_spill] sm:$0xff] %v3330_v26  ;;  %v3348_v26 = vsel %vm646_vm3, %v662_v39, %v663_v1  ;;  %v3363_v39 = vsel %vm646_vm3, %v663_v1, %v665_v42  ;;  %v677_v1 = vrot.slane %v3092_v63, 2 }
  0x99   : > { %5377 = vst [vmem:[#allocation31_spill] sm:$0xff] %v3363_v39 }
  0x9a   : > { %729 = vrot.lane.b32.xlu0 %v651_v11, %s2798_s25  ;;  %v652_v11 = vrot.slane %v3018_v29, 2 }
  0x9c   : > { %733 = vrot.lane.b32.xlu2 %v3327_v12, %s2798_s25  ;;  %v3358_v60 = vsel %vm646_vm3, %v652_v11, %v653_v36  ;;  %v668_v12 = vrot.slane %v3049_v45, 2  ;;  %v672_v36 = vrot.slane %v3118_v19, 2  ;;  %v673_v11 = vrot.slane %v3064_v52, 2 }
  0x9f   : > { %v3355_v25 = vpop.permute.xlu2 %560 }
  0xa0   : > { %612 = vrot.lane.b32.xlu1 %v3337_v50, %s2797_s20  ;;  %5376 = vst [vmem:[#allocation30_spill] sm:$0xff] %v3355_v25  ;;  %v3389_v25 = vpop.permute.xlu0 %550 }
  0xa1   : > { %5381 = vst [vmem:[#allocation35_spill] sm:$0xff] %v3389_v25 }
  0xa2   : > { %735 = vrot.lane.b32.xlu0 %v3342_v33, %s2798_s25  ;;  %v3369_v33 = vsel %vm646_vm3, %v668_v12, %v670_v56  ;;  %v3385_v56 = vsel %vm646_vm3, %v672_v36, %v673_v11  ;;  %v683_v36 = vrot.slane %v3104_v6, 2 }
  0xa3   : > { %5378 = vst [vmem:[#allocation32_spill] sm:$0xff] %v3369_v33 }
  0xa4   : > { %739 = vrot.lane.b32.xlu2 %v3348_v26, %s2798_s25  ;;  %5380 = vst [vmem:[#allocation34_spill] sm:$0xff] %v3385_v56 }
  0xa8   : > { %731 = vrot.lane.b32.xlu1 %v3358_v60, %s2798_s25 }
  0xaa   : > { %741 = vrot.lane.b32.xlu0 %v3363_v39, %s2798_s25  ;;  %v667_v39 = vrot.slane %v3043_v43, 2 }
  0xac   : > { %745 = vrot.lane.b32.xlu2 %v3369_v33, %s2798_s25  ;;  %v3393_v33 = vsel %vm646_vm3, %v677_v1, %v678_v14  ;;  %v3401_v61 = vsel %vm646_vm3, %v667_v39, %v668_v12  ;;  %v3408_v1 = vsel %vm646_vm3, %v678_v14, %v680_v37  ;;  %v688_v39 = vrot.slane %v3138_v27, 2 }
  0xad   : > { %5382 = vst [vmem:[#allocation36_spill] sm:$0xff] %v3393_v33  ;;  %v3425_v14 = vsel %vm646_vm3, %v673_v11, %v675_v40  ;;  %v695_v11 = vrot.slane %v3219_v59, 2  ;;  %v690_v59 = vrot.slane %v3140_v28, 2  ;;  %v707_v28 = vrot.slane %v3226_v7, 2 }
  0xae   : > { %v3382_v42 = vpop.permute.xlu2 %566  ;;  %5384 = vst [vmem:[#allocation38_spill] sm:$0xff] %v3408_v1 }
  0xaf   : > { %5379 = vst [vmem:[#allocation33_spill] sm:$0xff] %v3382_v42  ;;  %v685_v42 = vrot.slane %v3129_v24, 2  ;;  %v687_v24 = vrot.slane %v3187_v13, 2 }
  0xb0   : > { %737 = vrot.lane.b32.xlu1 %v3378_v47, %s2798_s25  ;;  %v3418_v12 = vpop.permute.xlu0 %552 }
  0xb1   : > { %5386 = vst [vmem:[#allocation40_spill] sm:$0xff] %v3418_v12  ;;  %v682_v12 = vrot.slane %v3102_v5, 2 }
  0xb2   : > { %747 = vrot.lane.b32.xlu0 %v3385_v56, %s2798_s25  ;;  %v3414_v56 = vsel %vm646_vm3, %v683_v36, %v685_v42  ;;  %v693_v42 = vrot.slane %v3163_v46, 2 }
  0xb3   : > { %5385 = vst [vmem:[#allocation39_spill] sm:$0xff] %v3414_v56 }
  0xb4   : > { %751 = vrot.lane.b32.xlu2 %v3393_v33, %s2798_s25 }
  0xb6   : > { %v3405_v25 = vpop.permute.xlu2 %572 }
  0xb7   : > { %5383 = vst [vmem:[#allocation37_spill] sm:$0xff] %v3405_v25  ;;  %v3432_v25 = vsel %vm646_vm3, %v687_v24, %v688_v39  ;;  %v3450_v24 = vsel %vm646_vm3, %v682_v12, %v683_v36  ;;  %v703_v36 = vrot.slane %v3207_v30, 2 }
  0xb8   : > { %743 = vrot.lane.b32.xlu1 %v3401_v61, %s2798_s25  ;;  %5388 = vst [vmem:[#allocation42_spill] sm:$0xff] %v3432_v25 }
  0xb9   : > { %5392 = vst [vmem:[#allocation46_spill] sm:$0xff] %v3450_v24 }
  0xba   : > { %753 = vrot.lane.b32.xlu0 %v3408_v1, %s2798_s25  ;;  %v3438_v1 = vsel %vm646_vm3, %v692_v53, %v693_v42  ;;  %v700_v53 = vrot.slane %v3198_v10, 2  ;;  %v702_v10 = vrot.slane %v3249_v49, 2 }
  0xbb   : > { %5389 = vst [vmem:[#allocation43_spill] sm:$0xff] %v3438_v1 }
  0xbc   : > { %757 = vrot.lane.b32.xlu2 %v3414_v56, %s2798_s25 }
  0xbe   : > { %v3429_v37 = vpop.permute.xlu2 %578 }
  0xbf   : > { %5387 = vst [vmem:[#allocation41_spill] sm:$0xff] %v3429_v37  ;;  %v698_v37 = vrot.slane %v3173_v55, 2 }
  0xc0   : > { %749 = vrot.lane.b32.xlu1 %v3425_v14, %s2798_s25 }
  0xc2   : > { %v3440_v56 = vpop.permute.xlu1 %554  ;;  %759 = vrot.lane.b32.xlu0 %v3432_v25, %s2798_s25 }
  0xc3   : > { %5390 = vst [vmem:[#allocation44_spill] sm:$0xff] %v3440_v56  ;;  %v3457_v56 = vsel %vm646_vm3, %v693_v42, %v695_v11  ;;  %v3476_v42 = vsel %vm646_vm3, %v688_v39, %v690_v59  ;;  %v708_v11 = vrot.slane %v3228_v17, 2  ;;  %v710_v39 = vrot.slane %v3276_v62, 2 }
  0xc4   : > { %v3445_v40 = vpop.permute.xlu0 %562  ;;  %763 = vrot.lane.b32.xlu2 %v3438_v1, %s2798_s25  ;;  %5394 = vst [vmem:[#allocation48_spill] sm:$0xff] %v3457_v56  ;;  %v705_v62 = vrot.slane %v3209_v32, 2  ;;  %v722_v32 = vrot.slane %v3283_v3, 2 }
  0xc5   : > { %5391 = vst [vmem:[#allocation45_spill] sm:$0xff] %v3445_v40  ;;  %v3463_v40 = vsel %vm646_vm3, %v698_v37, %v700_v53 }
  0xc6   : > { %v3454_v33 = vpop.permute.xlu2 %584  ;;  %5395 = vst [vmem:[#allocation49_spill] sm:$0xff] %v3463_v40 }
  0xc7   : > { %5393 = vst [vmem:[#allocation47_spill] sm:$0xff] %v3454_v33  ;;  %v3483_v33 = vsel %vm646_vm3, %v702_v10, %v703_v36 }
  0xc8   : > { %755 = vrot.lane.b32.xlu1 %v3450_v24, %s2798_s25  ;;  %5398 = vst [vmem:[#allocation52_spill] sm:$0xff] %v3476_v42 }
  0xca   : > { %v3465_v1 = vpop.permute.xlu1 %556  ;;  %765 = vrot.lane.b32.xlu0 %v3457_v56, %s2798_s25 }
  0xcb   : > { %5396 = vst [vmem:[#allocation50_spill] sm:$0xff] %v3465_v1  ;;  %v3489_v1 = vsel %vm646_vm3, %v707_v28, %v708_v11  ;;  %v715_v28 = vrot.slane %v3256_v23, 2  ;;  %v717_v23 = vrot.slane %v3302_v34, 2 }
  0xcc   : > { %v3471_v12 = vpop.permute.xlu0 %568  ;;  %769 = vrot.lane.b32.xlu2 %v3463_v40, %s2798_s25  ;;  %5400 = vst [vmem:[#allocation54_spill] sm:$0xff] %v3489_v1 }
  0xcd   : > { %5397 = vst [vmem:[#allocation51_spill] sm:$0xff] %v3471_v12  ;;  %v697_v12 = vrot.slane %v3171_v51, 2 }
  0xce   : > { %v3480_v53 = vpop.permute.xlu2 %590 }
  0xcf   : > { %5399 = vst [vmem:[#allocation53_spill] sm:$0xff] %v3480_v53  ;;  %v3501_v10 = vsel %vm646_vm3, %v697_v12, %v698_v37  ;;  %v713_v53 = vrot.slane %v3238_v21, 2  ;;  %v718_v37 = vrot.slane %v3264_v58, 2 }
  0xd0   : > { %761 = vrot.lane.b32.xlu1 %v3476_v42, %s2798_s25 }
  0xd2   : > { %v3491_v40 = vpop.permute.xlu1 %564  ;;  %771 = vrot.lane.b32.xlu0 %v3483_v33, %s2798_s25 }
  0xd3   : > { %5401 = vst [vmem:[#allocation55_spill] sm:$0xff] %v3491_v40  ;;  %v3508_v40 = vsel %vm646_vm3, %v708_v11, %v710_v39  ;;  %v3527_v11 = vsel %vm646_vm3, %v703_v36, %v705_v62  ;;  %v723_v39 = vrot.slane %v3285_v4, 2  ;;  %v725_v36 = vrot.slane %v3320_v48, 2 }
  0xd4   : > { %v3496_v59 = vpop.permute.xlu0 %574  ;;  %775 = vrot.lane.b32.xlu2 %v3489_v1, %s2798_s25  ;;  %5404 = vst [vmem:[#allocation58_spill] sm:$0xff] %v3508_v40 }
  0xd5   : > { %5402 = vst [vmem:[#allocation56_spill] sm:$0xff] %v3496_v59  ;;  %v3514_v59 = vsel %vm646_vm3, %v713_v53, %v715_v28 }
  0xd6   : > { %v3505_v56 = vpop.permute.xlu2 %596  ;;  %5405 = vst [vmem:[#allocation59_spill] sm:$0xff] %v3514_v59 }
  0xd7   : > { %5403 = vst [vmem:[#allocation57_spill] sm:$0xff] %v3505_v56  ;;  %v3534_v56 = vsel %vm646_vm3, %v717_v23, %v718_v37 }
  0xd8   : > { %767 = vrot.lane.b32.xlu1 %v3501_v10, %s2798_s25  ;;  %5408 = vst [vmem:[#allocation62_spill] sm:$0xff] %v3534_v56 }
  0xda   : > { %v3516_v1 = vpop.permute.xlu1 %570  ;;  %777 = vrot.lane.b32.xlu0 %v3508_v40, %s2798_s25  ;;  %v3540_v40 = vsel %vm646_vm3, %v722_v32, %v723_v39  ;;  %v3557_v32 = vsel %vm646_vm3, %v723_v39, %v725_v36 }
  0xdb   : > { %5406 = vst [vmem:[#allocation60_spill] sm:$0xff] %v3516_v1  ;;  %v712_v1 = vrot.slane %v3236_v22, 2 }
  0xdc   : > { %v3522_v12 = vpop.permute.xlu0 %580  ;;  %781 = vrot.lane.b32.xlu2 %v3514_v59, %s2798_s25  ;;  %5409 = vst [vmem:[#allocation63_spill] sm:$0xff] %v3540_v40 }
  0xdd   : > { %v3552_v23 = vsel %vm646_vm3, %v712_v1, %v713_v53  ;;  %5414 = vst [vmem:[#allocation68_spill] sm:$0xff] %v3557_v32 }
  0xde   : > { %v3531_v28 = vpop.permute.xlu2 %602  ;;  %5412 = vst [vmem:[#allocation66_spill] sm:$0xff] %v3552_v23 }
  0xdf   : > { %5407 = vst [vmem:[#allocation61_spill] sm:$0xff] %v3531_v28 }
  0xe0   : > { %773 = vrot.lane.b32.xlu1 %v3527_v11, %s2798_s25 }
  0xe2   : > { %v3542_v59 = vpop.permute.xlu1 %576  ;;  %783 = vrot.lane.b32.xlu0 %v3534_v56, %s2798_s25  ;;  %v720_v56 = vrot.slane %v3266_v18, 2 }
  0xe3   : > { %5410 = vst [vmem:[#allocation64_spill] sm:$0xff] %v3542_v59 }
  0xe4   : > { %v3547_v62 = vpop.permute.xlu0 %586  ;;  %787 = vrot.lane.b32.xlu2 %v3540_v40, %s2798_s25  ;;  %v3571_v1 = vsel %vm646_vm3, %v718_v37, %v720_v56  ;;  %v5459_v40 = vld [vmem:[#allocation7_spill] sm:$0xff] }
  0xe5   : > { %5411 = vst [vmem:[#allocation65_spill] sm:$0xff] %v3547_v62  ;;  %v5470_v62 = vld [vmem:[#allocation20_spill] sm:$0xff] }
  0xe6   : > { %v3554_v28 = vpop.permute.xlu2 %608  ;;  %5416 = vst [vmem:[#allocation70_spill] sm:$0xff] %v3571_v1 }
  0xe7   : > { %5413 = vst [vmem:[#allocation67_spill] sm:$0xff] %v3554_v28 }
  0xe8   : > { %779 = vrot.lane.b32.xlu1 %v3552_v23, %s2798_s25 }
  0xea   : > { %v3562_v59 = vpop.permute.xlu1 %582  ;;  %789 = vrot.lane.b32.xlu0 %v3557_v32, %s2798_s25 }
  0xec   : > { %v3566_v48 = vpop.permute.xlu0 %592  ;;  %827 = vrot.lane.b32.xlu2 %v3022_v31, %s2799_s26 }
  0xed   : > { %5415 = vst [vmem:[#allocation69_spill] sm:$0xff] %v3566_v48  ;;  %v5453_v48 = vld [vmem:[#allocation5_spill] sm:$0xff] }
  0xee   : > { %v3573_v53 = vpop.permute.xlu2 %727 }
  0xf0   : > { %785 = vrot.lane.b32.xlu1 %v3571_v1, %s2798_s25  ;;  %s4576_s25 = scalar_lea.vmem %s5257_s3, %s2726_s21  ;;  %s2656_s21 = sshll.u32 %s5660_s19, 1 }
  0xf2   : > { %v3577_v18 = vpop.permute.xlu1 %588  ;;  %829 = vrot.lane.b32.xlu0 %v2953_v8, %s2799_s26 }
  0xf3   : > { %5417 = vst [vmem:[#allocation71_spill] sm:$0xff] %v3577_v18 }
  0xf4   : > { %v3581_v39 = vpop.permute.xlu0 %598  ;;  %833 = vrot.lane.b32.xlu2 %v3028_v35, %s2799_s26 }
  0xf5   : > { %5418 = vst [vmem:[#allocation72_spill] sm:$0xff] %v3581_v39 }
  0xf6   : > { %v3585_v36 = vpop.permute.xlu2 %733 }
  0xf7   : > { %5419 = vst [vmem:[#allocation73_spill] sm:$0xff] %v3585_v36 }
  0xf8   : > { %825 = vrot.lane.b32.xlu1 %v3018_v29, %s2799_s26 }
  0xfa   : > { %v3589_v31 = vpop.permute.xlu1 %594  ;;  %835 = vrot.lane.b32.xlu0 %v3034_v38, %s2799_s26 }
  0xfb   : > { %5420 = vst [vmem:[#allocation74_spill] sm:$0xff] %v3589_v31 }
  0xfc   : > { %v3593_v56 = vpop.permute.xlu0 %604  ;;  %839 = vrot.lane.b32.xlu2 %v3049_v45, %s2799_s26 }
  0xfd   : > { %5421 = vst [vmem:[#allocation75_spill] sm:$0xff] %v3593_v56  ;;  %v333_v56 = vld [vmem:[%s2927_s24 + $0xf8] sm:$0xff] }
  0xfe   : > { %v3597_v8 = vpop.permute.xlu2 %739  ;;  %366 = vst.msk [vmem:[#allocation2 + $0x189] sm:$0xff] %vm246_vm0, %v333_v56 }
  0xff   : > { %5422 = vst [vmem:[#allocation76_spill] sm:$0xff] %v3597_v8 }
 0x100   : > { %831 = vrot.lane.b32.xlu1 %v2957_v9, %s2799_s26 }
 0x102   : > { %v3601_v37 = vpop.permute.xlu1 %600  ;;  %841 = vrot.lane.b32.xlu0 %v3118_v19, %s2799_s26 }
 0x103   : > { %5423 = vst [vmem:[#allocation77_spill] sm:$0xff] %v3601_v37 }
 0x104   : > { %v3605_v29 = vpop.permute.xlu0 %610  ;;  %845 = vrot.lane.b32.xlu2 %v3092_v63, %s2799_s26 }
 0x105   : > { %5424 = vst [vmem:[#allocation78_spill] sm:$0xff] %v3605_v29 }
 0x106   : > { %v3609_v28 = vpop.permute.xlu2 %745 }
 0x107   : > { %5425 = vst [vmem:[#allocation79_spill] sm:$0xff] %v3609_v28 }
 0x108   : > { %837 = vrot.lane.b32.xlu1 %v3043_v43, %s2799_s26 }
 0x10a   : > { %v3613_v45 = vpop.permute.xlu1 %606  ;;  %847 = vrot.lane.b32.xlu0 %v3094_v0, %s2799_s26 }
 0x10b   : > { %5426 = vst [vmem:[#allocation80_spill] sm:$0xff] %v3613_v45 }
 0x10c   : > { %v3617_v9 = vpop.permute.xlu0 %729  ;;  %851 = vrot.lane.b32.xlu2 %v3104_v6, %s2799_s26 }
 0x10e   : > { %v3621_v29 = vpop.permute.xlu2 %751 }
 0x10f   : > { %5427 = vst [vmem:[#allocation81_spill] sm:$0xff] %v3621_v29 }
 0x110   : > { %843 = vrot.lane.b32.xlu1 %v3064_v52, %s2799_s26 }
 0x112   : > { %v3625_v63 = vpop.permute.xlu1 %612  ;;  %853 = vrot.lane.b32.xlu0 %v3187_v13, %s2799_s26 }
 0x113   : > { %5428 = vst [vmem:[#allocation82_spill] sm:$0xff] %v3625_v63  ;;  %v332_v63 = vld [vmem:[%s2927_s24 + $0xf0] sm:$0xff] }
 0x114   : > { %v3629_v43 = vpop.permute.xlu0 %735  ;;  %857 = vrot.lane.b32.xlu2 %v3161_v44, %s2799_s26  ;;  %365 = vst.msk [vmem:[#allocation2 + $0x181] sm:$0xff] %vm246_vm0, %v332_v63 }
 0x115   : > { %5429 = vst [vmem:[#allocation83_spill] sm:$0xff] %v3629_v43 }
 0x116   : > { %v3633_v0 = vpop.permute.xlu2 %757 }
 0x118   : > { %849 = vrot.lane.b32.xlu1 %v3102_v5, %s2799_s26 }
 0x11a   : > { %v3637_v45 = vpop.permute.xlu1 %731  ;;  %859 = vrot.lane.b32.xlu0 %v3163_v46, %s2799_s26 }
 0x11c   : > { %v3641_v52 = vpop.permute.xlu0 %741  ;;  %863 = vrot.lane.b32.xlu2 %v3173_v55, %s2799_s26 }
 0x11d   : > { %5430 = vst [vmem:[#allocation84_spill] sm:$0xff] %v3641_v52 }
 0x11e   : > { %v3645_v13 = vpop.permute.xlu2 %763 }
 0x11f   : > { %5431 = vst [vmem:[#allocation85_spill] sm:$0xff] %v3645_v13 }
 0x120   : > { %855 = vrot.lane.b32.xlu1 %v3138_v27, %s2799_s26 }
 0x122   : > { %v3653_v5 = vpop.permute.xlu1 %737  ;;  %865 = vrot.lane.b32.xlu0 %v3249_v49, %s2799_s26 }
 0x123   : > { %5432 = vst [vmem:[#allocation86_spill] sm:$0xff] %v3653_v5  ;;  %v5474_v5 = vld [vmem:[#allocation16_spill] sm:$0xff] }
 0x124   : > { %v3657_v44 = vpop.permute.xlu0 %747  ;;  %869 = vrot.lane.b32.xlu2 %v3226_v7, %s2799_s26 }
 0x125   : > { %5433 = vst [vmem:[#allocation87_spill] sm:$0xff] %v3657_v44 }
 0x126   : > { %v3661_v46 = vpop.permute.xlu2 %769 }
 0x127   : > { %5434 = vst [vmem:[#allocation88_spill] sm:$0xff] %v3661_v46 }
 0x128   : > { %861 = vrot.lane.b32.xlu1 %v3171_v51, %s2799_s26 }
 0x12a   : > { %v3665_v27 = vpop.permute.xlu1 %743  ;;  %871 = vrot.lane.b32.xlu0 %v3228_v17, %s2799_s26 }
 0x12b   : > { %5435 = vst [vmem:[#allocation89_spill] sm:$0xff] %v3665_v27 }
 0x12c   : > { %v3669_v56 = vpop.permute.xlu0 %753  ;;  %875 = vrot.lane.b32.xlu2 %v3238_v21, %s2799_s26  ;;  %v3689_v21 = vld [vmem:[#allocation2 + $0x188] sm:$0xff] }
 0x12e   : > { %v3673_v63 = vpop.permute.xlu2 %775 }
 0x12f   : > { %5436 = vst [vmem:[#allocation90_spill] sm:$0xff] %v3673_v63 }
 0x130   : > { %867 = vrot.lane.b32.xlu1 %v3207_v30, %s2799_s26 }
 0x132   : > { %v3677_v29 = vpop.permute.xlu1 %749  ;;  %877 = vrot.lane.b32.xlu0 %v3302_v34, %s2799_s26 }
 0x133   : > { %5437 = vst [vmem:[#allocation91_spill] sm:$0xff] %v3677_v29 }
 0x134   : > { %v3681_v37 = vpop.permute.xlu0 %759  ;;  %881 = vrot.lane.b32.xlu2 %v3283_v3, %s2799_s26 }
 0x135   : > { %5438 = vst [vmem:[#allocation92_spill] sm:$0xff] %v3681_v37  ;;  %v5512_v37 = vld [vmem:[#allocation38_spill] sm:$0xff] }
 0x136   : > { %v3685_v39 = vpop.permute.xlu2 %781 }
 0x137   : > { %5439 = vst [vmem:[#allocation93_spill] sm:$0xff] %v3685_v39 }
 0x138   : > { %873 = vrot.lane.b32.xlu1 %v3236_v22, %s2799_s26 }
 0x13a   : > { %v3691_v63 = vpop.permute.xlu1 %755  ;;  %883 = vrot.lane.b32.xlu0 %v3285_v4, %s2799_s26  ;;  %v415_v4 = vld [vmem:[#allocation2 + $0x180] sm:$0xff] }
 0x13c   : > { %v3695_v29 = vpop.permute.xlu0 %765  ;;  %887 = vrot.lane.b32.xlu2 %v3689_v21, %s2799_s26 }
 0x13d   : > { %5440 = vst [vmem:[#allocation94_spill] sm:$0xff] %v3695_v29  ;;  %v5466_v29 = vld [vmem:[#allocation9_spill] sm:$0xff] }
 0x13e   : > { %v3699_v34 = vpop.permute.xlu2 %787 }
 0x13f   : > { %5441 = vst [vmem:[#allocation95_spill] sm:$0xff] %v3699_v34 }
 0x140   : > { %879 = vrot.lane.b32.xlu1 %v3264_v58, %s2799_s26 }
 0x142   : > { %v3703_v3 = vpop.permute.xlu1 %761  ;;  %927 = vrot.lane.b32.xlu0 %v3040_v41, %s2800_s27 }
 0x143   : > { %5442 = vst [vmem:[#allocation96_spill] sm:$0xff] %v3703_v3  ;;  %v5476_v3 = vld [vmem:[#allocation23_spill] sm:$0xff] }
 0x144   : > { %v3707_v22 = vpop.permute.xlu0 %771  ;;  %931 = vrot.lane.b32.xlu2 %v2973_v15, %s2800_s27 }
 0x145   : > { %5443 = vst [vmem:[#allocation97_spill] sm:$0xff] %v3707_v22  ;;  %v5449_v22 = vld [vmem:[#allocation8_spill] sm:$0xff] }
 0x146   : > { %v3711_v39 = vpop.permute.xlu2 %827 }
 0x148   : > { %885 = vrot.lane.b32.xlu1 %v415_v4, %s2799_s26 }
 0x14a   : > { %v3714_v34 = vpop.permute.xlu1 %767  ;;  %933 = vrot.lane.b32.xlu0 %v2997_v20, %s2800_s27 }
 0x14b   : > { %5444 = vst [vmem:[#allocation98_spill] sm:$0xff] %v3714_v34 }
 0x14c   : > { %v3718_v58 = vpop.permute.xlu0 %777  ;;  %937 = vrot.lane.b32.xlu2 %v3113_v16, %s2800_s27 }
 0x14d   : > { %5445 = vst [vmem:[#allocation99_spill] sm:$0xff] %v3718_v58  ;;  %v5451_v58 = vld [vmem:[#allocation3_spill] sm:$0xff] }
 0x14e   : > { %v3722_v41 = vpop.permute.xlu2 %833 }
 0x14f   : > { %5446 = vst [vmem:[#allocation100_spill] sm:$0xff] %v3722_v41 }
 0x150   : > { %929 = vrot.lane.b32.xlu1 %v3078_v57, %s2800_s27 }
 0x152   : > { %v3726_v44 = vpop.permute.xlu1 %773  ;;  %939 = vrot.lane.b32.xlu0 %v3070_v54, %s2800_s27 }
 0x153   : > { %5447 = vst [vmem:[#allocation101_spill] sm:$0xff] %v3726_v44  ;;  %v5455_v44 = vld [vmem:[#allocation11_spill] sm:$0xff] }
 0x154   : > { %v3730_v28 = vpop.permute.xlu0 %783  ;;  %943 = vrot.lane.b32.xlu2 %v5449_v22, %s2800_s27 }
 0x155   : > { %5448 = vst [vmem:[#allocation102_spill] sm:$0xff] %v3730_v28  ;;  %v5457_v28 = vld [vmem:[#allocation4_spill] sm:$0xff] }
 0x156   : > { %v3734_v31 = vpop.permute.xlu2 %839 }
 0x157   : > { %5450 = vst [vmem:[#allocation8_spill] sm:$0xff] %v3734_v31 }
 0x158   : > { %935 = vrot.lane.b32.xlu1 %v5451_v58, %s2800_s27 }
 0x15a   : > { %v3738_v46 = vpop.permute.xlu1 %779  ;;  %945 = vrot.lane.b32.xlu0 %v5453_v48, %s2800_s27 }
 0x15b   : > { %5452 = vst [vmem:[#allocation3_spill] sm:$0xff] %v3738_v46  ;;  %v5460_v46 = vld [vmem:[#allocation14_spill] sm:$0xff] }
 0x15c   : > { %v3742_v57 = vpop.permute.xlu0 %789  ;;  %949 = vrot.lane.b32.xlu2 %v5455_v44, %s2800_s27 }
 0x15d   : > { %5454 = vst [vmem:[#allocation5_spill] sm:$0xff] %v3742_v57  ;;  %v5461_v57 = vld [vmem:[#allocation6_spill] sm:$0xff] }
 0x15e   : > { %v3746_v27 = vpop.permute.xlu2 %845 }
 0x15f   : > { %5456 = vst [vmem:[#allocation11_spill] sm:$0xff] %v3746_v27  ;;  %v5462_v27 = vld [vmem:[#allocation10_spill] sm:$0xff] }
 0x160   : > { %941 = vrot.lane.b32.xlu1 %v5457_v28, %s2800_s27 }
 0x162   : > { %v3750_v32 = vpop.permute.xlu1 %785  ;;  %951 = vrot.lane.b32.xlu0 %v5459_v40, %s2800_s27 }
 0x163   : > { %5458 = vst [vmem:[#allocation4_spill] sm:$0xff] %v3750_v32  ;;  %v5464_v32 = vld [vmem:[#allocation17_spill] sm:$0xff] }
 0x164   : > { %v3754_v34 = vpop.permute.xlu0 %829  ;;  %955 = vrot.lane.b32.xlu2 %v5460_v46, %s2800_s27  ;;  %v5468_v46 = vld [vmem:[#allocation13_spill] sm:$0xff] }
 0x166   : > { %v3758_v31 = vpop.permute.xlu2 %851 }
 0x168   : > { %947 = vrot.lane.b32.xlu1 %v5461_v57, %s2800_s27 }
 0x16a   : > { %v3762_v52 = vpop.permute.xlu1 %825  ;;  %957 = vrot.lane.b32.xlu0 %v5462_v27, %s2800_s27 }
 0x16c   : > { %v3766_v8 = vpop.permute.xlu0 %835  ;;  %961 = vrot.lane.b32.xlu2 %v5464_v32, %s2800_s27 }
 0x16d   : > { %5463 = vst [vmem:[#allocation6_spill] sm:$0xff] %v3766_v8  ;;  %v5472_v8 = vld [vmem:[#allocation12_spill] sm:$0xff] }
 0x16e   : > { %v3770_v1 = vpop.permute.xlu2 %857 }
 0x16f   : > { %5465 = vst [vmem:[#allocation103_spill] sm:$0xff] %v3770_v1 }
 0x170   : > { %953 = vrot.lane.b32.xlu1 %v5466_v29, %s2800_s27 }
 0x172   : > { %v3774_v18 = vpop.permute.xlu1 %831  ;;  %963 = vrot.lane.b32.xlu0 %v5468_v46, %s2800_s27 }
 0x173   : > { %5467 = vst [vmem:[#allocation104_spill] sm:$0xff] %v3774_v18  ;;  %v922_v18 = vrot.slane %v415_v4, 1 }
 0x174   : > { %v3778_v13 = vpop.permute.xlu0 %841  ;;  %967 = vrot.lane.b32.xlu2 %v5470_v62, %s2800_s27 }
 0x175   : > { %5469 = vst [vmem:[#allocation13_spill] sm:$0xff] %v3778_v13  ;;  %v5478_v13 = vld [vmem:[#allocation15_spill] sm:$0xff] }
 0x176   : > { %v3782_v27 = vpop.permute.xlu2 %863 }
 0x177   : > { %5471 = vst [vmem:[#allocation20_spill] sm:$0xff] %v3782_v27  ;;  %v5480_v27 = vld [vmem:[#allocation19_spill] sm:$0xff] }
 0x178   : > { %959 = vrot.lane.b32.xlu1 %v5472_v8, %s2800_s27 }
 0x17a   : > { %v3786_v32 = vpop.permute.xlu1 %837  ;;  %969 = vrot.lane.b32.xlu0 %v5474_v5, %s2800_s27 }
 0x17b   : > { %5473 = vst [vmem:[#allocation105_spill] sm:$0xff] %v3786_v32 }
 0x17c   : > { %v3790_v29 = vpop.permute.xlu0 %847  ;;  %973 = vrot.lane.b32.xlu2 %v5476_v3, %s2800_s27 }
 0x17d   : > { %5475 = vst [vmem:[#allocation16_spill] sm:$0xff] %v3790_v29  ;;  %v5482_v29 = vld [vmem:[#allocation18_spill] sm:$0xff] }
 0x17e   : > { %v3794_v41 = vpop.permute.xlu2 %869 }
 0x17f   : > { %5477 = vst [vmem:[#allocation23_spill] sm:$0xff] %v3794_v41  ;;  %v5484_v41 = vld [vmem:[#allocation22_spill] sm:$0xff] }
 0x180   : > { %965 = vrot.lane.b32.xlu1 %v5478_v13, %s2800_s27 }
 0x182   : > { %v3798_v43 = vpop.permute.xlu1 %843  ;;  %975 = vrot.lane.b32.xlu0 %v5480_v27, %s2800_s27 }
 0x183   : > { %5479 = vst [vmem:[#allocation15_spill] sm:$0xff] %v3798_v43  ;;  %v923_v43 = vrot.slane %v3689_v21, 1  ;;  %v417_v21 = vld [vmem:[#allocation2 + $0x190] sm:$0x3] }
 0x184   : > { %v3802_v8 = vpop.permute.xlu0 %853  ;;  %979 = vrot.lane.b32.xlu2 %v3316_v2, %s2800_s27  ;;  %v5488_v2 = vld [vmem:[#allocation21_spill] sm:$0xff] }
 0x186   : > { %v3806_v32 = vpop.permute.xlu2 %875 }
 0x187   : > { %5481 = vst [vmem:[#allocation19_spill] sm:$0xff] %v3806_v32  ;;  %v3822_v32 = vsel %vm469_vm1, %v922_v18, %v923_v43  ;;  %v5491_v18 = vld [vmem:[#allocation24_spill] sm:$0xff] }
 0x188   : > { %971 = vrot.lane.b32.xlu1 %v5482_v29, %s2800_s27  ;;  %5487 = vst [vmem:[#allocation108_spill] sm:$0xff] %v3822_v32 }
 0x18a   : > { %v3810_v40 = vpop.permute.xlu1 %849  ;;  %981 = vrot.lane.b32.xlu0 %v5484_v41, %s2800_s27 }
 0x18b   : > { %5483 = vst [vmem:[#allocation18_spill] sm:$0xff] %v3810_v40 }
 0x18c   : > { %v3815_v36 = vpop.permute.xlu0 %859  ;;  %985 = vrot.lane.b32.xlu2 %v3337_v50, %s2800_s27 }
 0x18d   : > { %5485 = vst [vmem:[#allocation106_spill] sm:$0xff] %v3815_v36  ;;  %v5493_v36 = vld [vmem:[#allocation26_spill] sm:$0xff] }
 0x18e   : > { %v3819_v23 = vpop.permute.xlu2 %881 }
 0x18f   : > { %5486 = vst [vmem:[#allocation107_spill] sm:$0xff] %v3819_v23  ;;  %v925_v23 = vrot.slane %v417_v21, 1 }
 0x190   : > { %977 = vrot.lane.b32.xlu1 %v5488_v2, %s2800_s27 }
 0x192   : > { %v3826_v40 = vpop.permute.xlu1 %855  ;;  %987 = vrot.lane.b32.xlu0 %v3822_v32, %s2800_s27  ;;  %v3847_v32 = vsel %vm469_vm1, %v923_v43, %v925_v23  ;;  %v5499_v23 = vld [vmem:[#allocation29_spill] sm:$0xff] }
 0x193   : > { %5495 = vst [vmem:[#allocation112_spill] sm:$0xff] %v3847_v32 }
 0x194   : > { %v3830_v4 = vpop.permute.xlu0 %865  ;;  %1028 = vrot.lane.b32.xlu2 %v3358_v60, %s2801_s28 }
 0x195   : > { %5489 = vst [vmem:[#allocation109_spill] sm:$0xff] %v3830_v4 }
 0x196   : > { %v3834_v50 = vpop.permute.xlu2 %887 }
 0x197   : > { %5490 = vst [vmem:[#allocation110_spill] sm:$0xff] %v3834_v50 }
 0x198   : > { %983 = vrot.lane.b32.xlu1 %v5491_v18, %s2800_s27  ;;  %v5506_v18 = vld [vmem:[#allocation36_spill] sm:$0xff] }
 0x19a   : > { %v3838_v41 = vpop.permute.xlu1 %861  ;;  %1030 = vrot.lane.b32.xlu0 %v5493_v36, %s2801_s28 }
 0x19b   : > { %5492 = vst [vmem:[#allocation111_spill] sm:$0xff] %v3838_v41 }
 0x19c   : > { %v3842_v2 = vpop.permute.xlu0 %871  ;;  %1034 = vrot.lane.b32.xlu2 %v3378_v47, %s2801_s28 }
 0x19d   : > { %5494 = vst [vmem:[#allocation26_spill] sm:$0xff] %v3842_v2  ;;  %v5501_v2 = vld [vmem:[#allocation32_spill] sm:$0xff] }
 0x19e   : > { %v3849_v60 = vpop.permute.xlu2 %931 }
 0x1a0   : > { %989 = vrot.lane.b32.xlu1 %v3847_v32, %s2800_s27  ;;  %s245_s27 = scalar_lea.vmem %s5259_s5, %s2656_s21 }
 0x1a2   : > { %v3853_v50 = vpop.permute.xlu1 %867  ;;  %1036 = vrot.lane.b32.xlu0 %v3348_v26, %s2801_s28 }
 0x1a3   : > { %5496 = vst [vmem:[#allocation113_spill] sm:$0xff] %v3853_v50 }
 0x1a4   : > { %v3857_v21 = vpop.permute.xlu0 %877  ;;  %1040 = vrot.lane.b32.xlu2 %v3401_v61, %s2801_s28 }
 0x1a5   : > { %5497 = vst [vmem:[#allocation114_spill] sm:$0xff] %v3857_v21  ;;  %v5504_v21 = vld [vmem:[#allocation31_spill] sm:$0xff] }
 0x1a6   : > { %v3861_v36 = vpop.permute.xlu2 %937 }
 0x1a7   : > { %5498 = vst [vmem:[#allocation115_spill] sm:$0xff] %v3861_v36 }
 0x1a8   : > { %1032 = vrot.lane.b32.xlu1 %v5499_v23, %s2801_s28 }
 0x1aa   : > { %v3865_v43 = vpop.permute.xlu1 %873  ;;  %1042 = vrot.lane.b32.xlu0 %v5501_v2, %s2801_s28 }
 0x1ab   : > { %5500 = vst [vmem:[#allocation29_spill] sm:$0xff] %v3865_v43 }
 0x1ac   : > { %v3869_v32 = vpop.permute.xlu0 %883  ;;  %1046 = vrot.lane.b32.xlu2 %v3425_v14, %s2801_s28 }
 0x1ad   : > { %5502 = vst [vmem:[#allocation32_spill] sm:$0xff] %v3869_v32  ;;  %v5508_v32 = vld [vmem:[#allocation34_spill] sm:$0xff] }
 0x1ae   : > { %v3873_v50 = vpop.permute.xlu2 %943 }
 0x1af   : > { %5503 = vst [vmem:[#allocation116_spill] sm:$0xff] %v3873_v50  ;;  %v5510_v50 = vld [vmem:[#allocation39_spill] sm:$0xff] }
 0x1b0   : > { %1038 = vrot.lane.b32.xlu1 %v5504_v21, %s2801_s28 }
 0x1b2   : > { %v3877_v4 = vpop.permute.xlu1 %879  ;;  %1048 = vrot.lane.b32.xlu0 %v5506_v18, %s2801_s28 }
 0x1b3   : > { %5505 = vst [vmem:[#allocation31_spill] sm:$0xff] %v3877_v4 }
 0x1b4   : > { %v3881_v41 = vpop.permute.xlu0 %927  ;;  %1052 = vrot.lane.b32.xlu2 %v3450_v24, %s2801_s28 }
 0x1b6   : > { %v3885_v43 = vpop.permute.xlu2 %949 }
 0x1b7   : > { %5507 = vst [vmem:[#allocation36_spill] sm:$0xff] %v3885_v43  ;;  %v3903_v43 = vld [vmem:[#allocation2 + $0x30] sm:$0xff] }
 0x1b8   : > { %1044 = vrot.lane.b32.xlu1 %v5508_v32, %s2801_s28 }
 0x1ba   : > { %v3889_v36 = vpop.permute.xlu1 %885  ;;  %1054 = vrot.lane.b32.xlu0 %v5510_v50, %s2801_s28 }
 0x1bb   : > { %5509 = vst [vmem:[#allocation34_spill] sm:$0xff] %v3889_v36 }
 0x1bc   : > { %v3893_v1 = vpop.permute.xlu0 %933  ;;  %1058 = vrot.lane.b32.xlu2 %v3476_v42, %s2801_s28 }
 0x1bd   : > { %5511 = vst [vmem:[#allocation117_spill] sm:$0xff] %v3893_v1 }
 0x1be   : > { %v3897_v4 = vpop.permute.xlu2 %955 }
 0x1c0   : > { %1050 = vrot.lane.b32.xlu1 %v5512_v37, %s2801_s28  ;;  %v3917_v37 = vld [vmem:[#allocation2 + $0x38] sm:$0xff] }
 0x1c2   : > { %v3901_v24 = vpop.permute.xlu1 %929  ;;  %1126 = vrot.lane.b32.xlu0 %v3903_v43, %s2802_s29 }
 0x1c4   : > { %v3907_v36 = vpop.permute.xlu0 %939  ;;  %1329 = vrot.lane.b32.xlu2 %v5499_v23, %s2803_s30 }
 0x1c5   : > { %5513 = vst [vmem:[#allocation118_spill] sm:$0xff] %v3907_v36 }
 0x1c6   : > { %v3911_v42 = vpop.permute.xlu2 %961 }
 0x1c8   : > { %1056 = vrot.lane.b32.xlu1 %v3432_v25, %s2801_s28 }
 0x1ca   : > { %v3915_v50 = vpop.permute.xlu1 %935  ;;  %1128 = vrot.lane.b32.xlu0 %v3917_v37, %s2802_s29 }
 0x1cc   : > { %v3921_v1 = vpop.permute.xlu0 %945  ;;  %1331 = vrot.lane.b32.xlu2 %v3378_v47, %s2803_s30 }
 0x1cd   : > { %5514 = vst [vmem:[#allocation119_spill] sm:$0xff] %v3921_v1 }
 0x1ce   : > { %v3925_v36 = vpop.permute.xlu2 %967 }
 0x1d0   : > { %1228 = vrot.lane.b32.xlu1 %v2973_v15, %s2804_s6 }
 0x1d2   : > { %v3929_v23 = vpop.permute.xlu1 %941  ;;  %1130 = vrot.lane.b32.xlu0 %v3028_v35, %s2802_s29 }
 0x1d4   : > { %v3933_v25 = vpop.permute.xlu0 %951  ;;  %1333 = vrot.lane.b32.xlu2 %v3348_v26, %s2803_s30 }
 0x1d5   : > { %5515 = vst [vmem:[#allocation120_spill] sm:$0xff] %v3933_v25  ;;  %v5520_v25 = vld [vmem:[#allocation43_spill] sm:$0xff] }
 0x1d6   : > { %v3937_v1 = vpop.permute.xlu2 %973 }
 0x1d7   : > { %5516 = vst [vmem:[#allocation121_spill] sm:$0xff] %v3937_v1 }
 0x1d8   : > { %1230 = vrot.lane.b32.xlu1 %v2997_v20, %s2804_s6 }
 0x1da   : > { %v3941_v47 = vpop.permute.xlu1 %947  ;;  %1132 = vrot.lane.b32.xlu0 %v3034_v38, %s2802_s29 }
 0x1db   : > { %5517 = vst [vmem:[#allocation122_spill] sm:$0xff] %v3941_v47  ;;  %v3985_v47 = vld [vmem:[#allocation2 + $0x60] sm:$0xff] }
 0x1dc   : > { %v958_v15 = vpop.permute.xlu0 %957  ;;  %1234 = vrot.lane.b32.xlu2 %v3113_v16, %s2804_s6 }
 0x1de   : > { %v3947_v35 = vpop.permute.xlu2 %979 }
 0x1df   : > { %5518 = vst [vmem:[#allocation123_spill] sm:$0xff] %v3947_v35  ;;  %v5521_v35 = vld [vmem:[#allocation48_spill] sm:$0xff] }
 0x1e0   : > { %1232 = vrot.lane.b32.xlu1 %v5451_v58, %s2804_s6 }
 0x1e2   : > { %v3951_v26 = vpop.permute.xlu1 %953  ;;  %1158 = vrot.lane.b32.xlu0 %v3171_v51, %s2802_s29 }
 0x1e4   : > { %v3955_v20 = vpop.permute.xlu0 %963  ;;  %1260 = vrot.lane.b32.xlu2 %v5468_v46, %s2804_s6 }
 0x1e6   : > { %v3959_v38 = vpop.permute.xlu2 %985 }
 0x1e7   : > { %5519 = vst [vmem:[#allocation124_spill] sm:$0xff] %v3959_v38 }
 0x1e8   : > { %1060 = vrot.lane.b32.xlu1 %v5520_v25, %s2801_s28 }
 0x1ea   : > { %v3963_v16 = vpop.permute.xlu1 %959  ;;  %1361 = vrot.lane.b32.xlu0 %v3501_v10, %s2803_s30 }
 0x1ec   : > { %v3967_v58 = vpop.permute.xlu0 %969  ;;  %1062 = vrot.lane.b32.xlu2 %v5521_v35, %s2801_s28 }
 0x1ee   : > { %v3971_v51 = vpop.permute.xlu2 %1028 }
 0x1f0   : > { %1335 = vrot.lane.b32.xlu1 %v5504_v21, %s2803_s30 }
 0x1f2   : > { %v3975_v46 = vpop.permute.xlu1 %965  ;;  %1236 = vrot.lane.b32.xlu0 %v3070_v54, %s2804_s6  ;;  %v3995_v54 = vld [vmem:[#allocation2 + $0x68] sm:$0xff] }
 0x1f3   : > { %5525 = vst [vmem:[#allocation127_spill] sm:$0xff] %v3995_v54 }
 0x1f4   : > { %v3979_v38 = vpop.permute.xlu0 %975  ;;  %1337 = vrot.lane.b32.xlu2 %v3401_v61, %s2803_s30 }
 0x1f5   : > { %5522 = vst [vmem:[#allocation43_spill] sm:$0xff] %v3979_v38 }
 0x1f6   : > { %v3983_v1 = vpop.permute.xlu2 %1034 }
 0x1f8   : > { %1134 = vrot.lane.b32.xlu1 %v3985_v47, %s2802_s29 }
 0x1fa   : > { %v3989_v35 = vpop.permute.xlu1 %971  ;;  %1262 = vrot.lane.b32.xlu0 %v5478_v13, %s2804_s6 }
 0x1fb   : > { %5523 = vst [vmem:[#allocation125_spill] sm:$0xff] %v3989_v35 }
 0x1fc   : > { %v3993_v21 = vpop.permute.xlu0 %981  ;;  %1136 = vrot.lane.b32.xlu2 %v3995_v54, %s2802_s29 }
 0x1fd   : > { %5524 = vst [vmem:[#allocation126_spill] sm:$0xff] %v3993_v21  ;;  %v5527_v21 = vld [vmem:[#allocation49_spill] sm:$0xff] }
 0x1fe   : > { %v3999_v61 = vpop.permute.xlu2 %1040 }
 0x200   : > { %1160 = vrot.lane.b32.xlu1 %v3173_v55, %s2802_s29 }
 0x202   : > { %v4003_v38 = vpop.permute.xlu1 %977  ;;  %1064 = vrot.lane.b32.xlu0 %v3501_v10, %s2801_s28 }
 0x204   : > { %v4007_v35 = vpop.permute.xlu0 %987  ;;  %1162 = vrot.lane.b32.xlu2 %v3249_v49, %s2802_s29 }
 0x205   : > { %5526 = vst [vmem:[#allocation128_spill] sm:$0xff] %v4007_v35  ;;  %v1440_v35 = vsel %vm246_vm0, %v3104_v6, %v3522_v12 }
 0x206   : > { %v4011_v13 = vpop.permute.xlu2 %1046 }
 0x208   : > { %1363 = vrot.lane.b32.xlu1 %v5527_v21, %s2803_s30 }
 0x20a   : > { %v4015_v54 = vpop.permute.xlu1 %983  ;;  %1339 = vrot.lane.b32.xlu0 %v5501_v2, %s2803_s30  ;;  %v1473_v2 = vsel %vm1457_vm4, %v1440_v35, %v3633_v0  ;;  %v1691_v0 = vld [vmem:[%s5255_s1 + $0x18] sm:$0xff]  ;;  %v1688_v35 = vld [vmem:[%s5255_s1] sm:$0xff] }
 0x20b   : > { %5528 = vst [vmem:[#allocation49_spill] sm:$0xff] %v4015_v54 }
 0x20c   : > { %v4019_v55 = vpop.permute.xlu0 %1030  ;;  %1365 = vrot.lane.b32.xlu2 %v3483_v33, %s2803_s30 }
 0x20e   : > { %v4023_v10 = vpop.permute.xlu2 %1052 }
 0x210   : > { %1238 = vrot.lane.b32.xlu1 %v5457_v28, %s2804_s6  ;;  %v1506_v28 = vsel %vm1490_vm5, %v1473_v2, %v3826_v40  ;;  %v1692_v40 = vld [vmem:[%s5255_s1 + $0x20] sm:$0xf]  ;;  %v4089_v2 = vld [vmem:[#allocation2 + $0x98] sm:$0xff] }
 0x211   : > { %2658 = vmatpush.msk.msra.mxu0 %vm1790_vm8, %v1692_v40  ;;  %2728 = vmatpush.msk.msra.mxu2 %vm1790_vm8, %v1692_v40 }
 0x212   : > { %v4027_v49 = vpop.permute.xlu1 %989  ;;  %1138 = vrot.lane.b32.xlu0 %v3118_v19, %s2802_s29  ;;  %v1539_v19 = vsel %vm1523_vm6, %v1506_v28, %v958_v15  ;;  %v5531_v28 = vld [vmem:[#allocation64_spill] sm:$0xff] }
 0x213   : > { %5529 = vst [vmem:[#allocation129_spill] sm:$0xff] %v4027_v49  ;;  %1806 = vmatpush.msra.mxu0 %v1691_v0  ;;  %2729 = vmatpush.msra.mxu2 %v1691_v0 }
 0x214   : > { %v4036_v54 = vpop.permute.xlu0 %1036  ;;  %1240 = vrot.lane.b32.xlu2 %v5449_v22, %s2804_s6 }
 0x216   : > { %v1059_v49 = vpop.permute.xlu2 %1058 }
 0x217   : > { %v4044_v6 = vsel %vm1556_vm7, %v1539_v19, %v1059_v49  ;;  %v1438_v19 = vsel %vm246_vm0, %v4089_v2, %v5531_v28  ;;  %v4125_v28 = vld [vmem:[#allocation2 + $0xa8] sm:$0xff] }
 0x218   : > { %5530 = vst [vmem:[#allocation130_spill] sm:$0xff] %v4044_v6  ;;  %1264 = vrot.lane.b32.xlu1 %v5470_v62, %s2804_s6  ;;  %v1471_v40 = vsel %vm1457_vm4, %v1438_v19, %v3669_v56  ;;  %v4111_v56 = vld [vmem:[#allocation2 + $0x80] sm:$0xff] }
 0x219   : > { %v5532_v19 = vld [vmem:[#allocation41_spill] sm:$0xff] }
 0x21a   : > { %v4048_v12 = vpop.permute.xlu1 %1032  ;;  %1164 = vrot.lane.b32.xlu0 %v3207_v30, %s2802_s29  ;;  %v1690_v30 = vld [vmem:[%s5255_s1 + $0x10] sm:$0xff] }
 0x21b   : > { %1807 = vmatpush.msra.mxu0 %v1690_v30  ;;  %2730 = vmatpush.msra.mxu2 %v1690_v30 }
 0x21c   : > { %v4058_v22 = vpop.permute.xlu0 %1042  ;;  %1266 = vrot.lane.b32.xlu2 %v5474_v5, %s2804_s6  ;;  %v1689_v5 = vld [vmem:[%s5255_s1 + $0x8] sm:$0xff] }
 0x21d   : > { %1808 = vmatpush.msra.mxu0 %v1689_v5  ;;  %2731 = vmatpush.msra.mxu2 %v1689_v5 }
 0x21e   : > { %v4067_v62 = vpop.permute.xlu2 %1329 }
 0x21f   : > { %1809 = vmatpush.msra.mxu0 %v1688_v35  ;;  %2732 = vmatpush.msra.mxu2 %v1688_v35 }
 0x220   : > { %1066 = vrot.lane.b32.xlu1 %v5527_v21, %s2801_s28 }
 0x222   : > { %v4074_v15 = vpop.permute.xlu1 %1038  ;;  %1367 = vrot.lane.b32.xlu0 %v3527_v11, %s2803_s30 }
 0x224   : > { %v4081_v49 = vpop.permute.xlu0 %1048  ;;  %1068 = vrot.lane.b32.xlu2 %v3483_v33, %s2801_s28  ;;  %v1504_v33 = vsel %vm1490_vm5, %v1471_v40, %v3758_v31  ;;  %v1439_v40 = vsel %vm246_vm0, %v4125_v28, %v5532_v19 }
 0x226   : > { %v4085_v21 = vpop.permute.xlu2 %1331 }
 0x228   : > { %1341 = vrot.lane.b32.xlu1 %v5508_v32, %s2803_s30  ;;  %v1537_v32 = vsel %vm1523_vm6, %v1504_v33, %v3951_v26  ;;  %v4119_v26 = vld [vmem:[#allocation2 + $0x90] sm:$0xff]  ;;  %v1472_v33 = vsel %vm1457_vm4, %v1439_v40, %v3691_v63  ;;  %v2759_v63 = vld [vmem:[#allocation2] sm:$0xff] }
 0x229   : > { %v5533_v40 = vld [vmem:[#allocation35_spill] sm:$0xff] }
 0x22a   : > { %v4096_v0 = vpop.permute.xlu1 %1044  ;;  %1242 = vrot.lane.b32.xlu0 %v5453_v48, %s2804_s6 }
 0x22c   : > { %v1055_v30 = vpop.permute.xlu0 %1054  ;;  %1343 = vrot.lane.b32.xlu2 %v3425_v14, %s2803_s30 }
 0x22d   : > { %v4107_v5 = vsel %vm1556_vm7, %v1537_v32, %v1055_v30 }
 0x22e   : > { %v4109_v35 = vpop.permute.xlu2 %1333 }
 0x230   : > { %1140 = vrot.lane.b32.xlu1 %v4111_v56, %s2802_s29 }
 0x232   : > { %v4115_v48 = vpop.permute.xlu1 %1050  ;;  %1268 = vrot.lane.b32.xlu0 %v5482_v29, %s2804_s6  ;;  %v1505_v29 = vsel %vm1490_vm5, %v1472_v33, %v3802_v8 }
 0x233   : > { %v1538_v32 = vsel %vm1523_vm6, %v1505_v29, %v3897_v4  ;;  %v5534_v29 = vld [vmem:[#allocation54_spill] sm:$0xff] }
 0x234   : > { %v1127_v31 = vpop.permute.xlu0 %1126  ;;  %1142 = vrot.lane.b32.xlu2 %v4119_v26, %s2802_s29 }
 0x236   : > { %v4123_v14 = vpop.permute.xlu2 %1234 }
 0x238   : > { %1166 = vrot.lane.b32.xlu1 %v3226_v7, %s2802_s29  ;;  %v1425_v7 = vsel %vm246_vm0, %v2759_v63, %v5533_v40  ;;  %v5535_v63 = vld [vmem:[#allocation58_spill] sm:$0xff]  ;;  %v5536_v40 = vld [vmem:[#allocation40_spill] sm:$0xff] }
 0x239   : > { %v1458_v8 = vsel %vm1457_vm4, %v1425_v7, %v3573_v53 }
 0x23a   : > { %v1057_v30 = vpop.permute.xlu1 %1056  ;;  %1070 = vrot.lane.b32.xlu0 %v3527_v11, %s2801_s28  ;;  %v1491_v11 = vsel %vm1490_vm5, %v1458_v8, %v3762_v52  ;;  %v2145_v52 = vld [vmem:[%s5256_s2] sm:$0xf] }
 0x23b   : > { %v4141_v6 = vsel %vm1556_vm7, %v1538_v32, %v1057_v30  ;;  %v1524_v33 = vsel %vm1523_vm6, %v1491_v11, %v3881_v41  ;;  %v2113_v41 = vld [vmem:[%s2927_s24] sm:$0xff]  ;;  %2691 = vmatpush.msk.msra.mxu1 %vm1790_vm8, %v2145_v52  ;;  %2733 = vmatpush.msk.msra.mxu3 %vm1790_vm8, %v2145_v52  ;;  %v2114_v52 = vld [vmem:[%s2927_s24 + $0x8] sm:$0xff] }
 0x23c   : > { %v1129_v19 = vpop.permute.xlu0 %1128  ;;  %1168 = vrot.lane.b32.xlu2 %v3228_v17, %s2802_s29  ;;  %v1557_v17 = vsel %vm1556_vm7, %v1524_v33, %v3971_v51  ;;  %2692 = vmatmul.msk.f32.vlgmr.msra.gmra.mxu1 %vm246_vm0, %v2113_v41 }
 0x23d   : > { %v1590_v32 = vsel %vm1589_vm9, %v1557_v17, %v1127_v31 }
 0x23e   : > { %v4149_v4 = vpop.permute.xlu2 %1260 }
 0x240   : > { %1369 = vrot.lane.b32.xlu1 %v5534_v29, %s2803_s30 }
 0x242   : > { %v1229_v53 = vpop.permute.xlu1 %1228  ;;  %1345 = vrot.lane.b32.xlu0 %v5506_v18, %s2803_s30  ;;  %v2760_v18 = vld [vmem:[#allocation2 + $0x8] sm:$0xff] }
 0x243   : > { %v1623_v30 = vsel %vm1622_vm10, %v1590_v32, %v1229_v53  ;;  %v1426_v7 = vsel %vm246_vm0, %v2760_v18, %v5536_v40  ;;  %v4215_v40 = vld [vmem:[#allocation2 + $0x138] sm:$0xff] }
 0x244   : > { %v1656_v51 = vsel %vm1655_vm11, %v1623_v30, %v4067_v62  ;;  %v1131_v31 = vpop.permute.xlu0 %1130  ;;  %1371 = vrot.lane.b32.xlu2 %v5535_v63, %s2803_s30  ;;  %v1459_v8 = vsel %vm1457_vm4, %v1426_v7, %v3617_v9  ;;  %2693 = vmatmul.msk.f32.gmra.mxu1 %vm246_vm0, %v2114_v52  ;;  %v5541_v52 = vld [vmem:[#allocation66_spill] sm:$0xff] }
 0x245   : > { %2659 = vmatmul.msk.f32.vlgmr.msra.gmra.mxu0 %vm1693_vm12, %v1656_v51  ;;  %v1492_v62 = vsel %vm1490_vm5, %v1459_v8, %v3711_v39  ;;  %v5538_v8 = vld [vmem:[#allocation92_spill] sm:$0xff] }
 0x246   : > { %v4179_v11 = vpop.permute.xlu2 %1062  ;;  %v1525_v33 = vsel %vm1523_vm6, %v1492_v62, %v3901_v24  ;;  %v2761_v24 = vld [vmem:[#allocation2 + $0x18] sm:$0xff]  ;;  %v5539_v62 = vld [vmem:[#allocation103_spill] sm:$0xff] }
 0x247   : > { %v1558_v17 = vsel %vm1556_vm7, %v1525_v33, %v4019_v55  ;;  %v2764_v33 = vld [vmem:[#allocation2 + $0x20] sm:$0xff] }
 0x248   : > { %1244 = vrot.lane.b32.xlu1 %v5461_v57, %s2804_s6  ;;  %v1591_v32 = vsel %vm1589_vm9, %v1558_v17, %v1129_v19  ;;  %v5537_v57 = vld [vmem:[#allocation44_spill] sm:$0xff]  ;;  %v5540_v17 = vld [vmem:[#allocation50_spill] sm:$0xff] }
 0x249   : > { %v1427_v55 = vsel %vm246_vm0, %v2761_v24, %v5537_v57  ;;  %v5543_v57 = vld [vmem:[#allocation104_spill] sm:$0xff] }
 0x24a   : > { %v1231_v53 = vpop.permute.xlu1 %1230  ;;  %1144 = vrot.lane.b32.xlu0 %v4089_v2, %s2802_s29  ;;  %v1460_v2 = vsel %vm1457_vm4, %v1427_v55, %v3637_v45 }
 0x24b   : > { %v1624_v9 = vsel %vm1622_vm10, %v1591_v32, %v1231_v53  ;;  %v1428_v32 = vsel %vm246_vm0, %v2764_v33, %v5540_v17  ;;  %v5550_v17 = vld [vmem:[#allocation100_spill] sm:$0xff] }
 0x24c   : > { %v1657_v39 = vsel %vm1655_vm11, %v1624_v9, %v4085_v21  ;;  %v1133_v41 = vpop.permute.xlu0 %1132  ;;  %1246 = vrot.lane.b32.xlu2 %v5455_v44, %s2804_s6  ;;  %v1493_v21 = vsel %vm1490_vm5, %v1460_v2, %v3754_v34  ;;  %v2115_v34 = vld [vmem:[%s2927_s24 + $0x10] sm:$0xff] }
 0x24d   : > { %2660 = vmatmul.msk.f32.gmra.mxu0 %vm1693_vm12, %v1657_v39  ;;  %v1526_v44 = vsel %vm1523_vm6, %v1493_v21, %v3849_v60  ;;  %2694 = vmatmul.msk.f32.gmra.mxu1 %vm246_vm0, %v2115_v34  ;;  %v5542_v39 = vld [vmem:[#allocation73_spill] sm:$0xff] }
 0x24e   : > { %v4204_v19 = vpop.permute.xlu2 %1337  ;;  %v1559_v30 = vsel %vm1556_vm7, %v1526_v44, %v4048_v12  ;;  %v4229_v12 = vld [vmem:[#allocation2 + $0xc0] sm:$0xff]  ;;  %v1461_v24 = vsel %vm1457_vm4, %v1428_v32, %v5542_v39 }
 0x24f   : > { %v1592_v51 = vsel %vm1589_vm9, %v1559_v30, %v1131_v31  ;;  %v1441_v31 = vsel %vm246_vm0, %v4229_v12, %v3562_v59  ;;  %v2116_v59 = vld [vmem:[%s2927_s24 + $0x18] sm:$0xff]  ;;  %v1494_v55 = vsel %vm1490_vm5, %v1461_v24, %v5543_v57  ;;  %v2118_v24 = vld [vmem:[%s2927_s24 + $0x28] sm:$0xff] }
 0x250   : > { %1270 = vrot.lane.b32.xlu1 %v5476_v3, %s2804_s6 }
 0x252   : > { %v1233_v18 = vpop.permute.xlu1 %1232  ;;  %1170 = vrot.lane.b32.xlu0 %v4215_v40, %s2802_s29 }
 0x253   : > { %v1625_v45 = vsel %vm1622_vm10, %v1592_v51, %v1233_v18 }
 0x254   : > { %v1658_v60 = vsel %vm1655_vm11, %v1625_v45, %v4109_v35  ;;  %v1159_v7 = vpop.permute.xlu0 %1158  ;;  %1272 = vrot.lane.b32.xlu2 %v5480_v27, %s2804_s6  ;;  %v1474_v35 = vsel %vm1457_vm4, %v1441_v31, %v5538_v8  ;;  %v2117_v31 = vld [vmem:[%s2927_s24 + $0x20] sm:$0xff]  ;;  %v5547_v8 = vld [vmem:[#allocation46_spill] sm:$0xff] }
 0x255   : > { %2661 = vmatmul.msk.f32.gmra.mxu0 %vm1693_vm12, %v1658_v60  ;;  %v1507_v27 = vsel %vm1490_vm5, %v1474_v35, %v5539_v62  ;;  %2695 = vmatmul.msk.f32.gmra.mxu1 %vm246_vm0, %v2116_v59  ;;  %v5548_v35 = vld [vmem:[#allocation27_spill] sm:$0xff] }
 0x256   : > { %v4227_v3 = vpop.permute.xlu2 %1136  ;;  %v1540_v53 = vsel %vm1523_vm6, %v1507_v27, %v3963_v16  ;;  %v5544_v16 = vld [vmem:[#allocation117_spill] sm:$0xff]  ;;  %v5549_v27 = vld [vmem:[#allocation83_spill] sm:$0xff] }
 0x257   : > { %v1527_v44 = vsel %vm1523_vm6, %v1494_v55, %v5544_v16  ;;  %v5552_v16 = vld [vmem:[#allocation47_spill] sm:$0xff] }
 0x258   : > { %1072 = vrot.lane.b32.xlu1 %v5534_v29, %s2801_s28  ;;  %v1560_v51 = vsel %vm1556_vm7, %v1527_v44, %v3983_v1 }
 0x259   : > { %v1593_v34 = vsel %vm1589_vm9, %v1560_v51, %v1133_v41 }
 0x25a   : > { %v1061_v9 = vpop.permute.xlu1 %1060  ;;  %1373 = vrot.lane.b32.xlu0 %v5541_v52, %s2803_s30 }
 0x25b   : > { %v1573_v29 = vsel %vm1556_vm7, %v1540_v53, %v1061_v9 }
 0x25c   : > { %v1606_v2 = vsel %vm1589_vm9, %v1573_v29, %v1159_v7  ;;  %v1362_v21 = vpop.permute.xlu0 %1361  ;;  %1074 = vrot.lane.b32.xlu2 %v5535_v63, %s2801_s28  ;;  %v5545_v63 = vld [vmem:[#allocation38_spill] sm:$0xff]  ;;  %v1626_v7 = vsel %vm1622_vm10, %v1593_v34, %v4123_v14  ;;  %v1429_v14 = vsel %vm246_vm0, %v3903_v43, %v5548_v35  ;;  %v5551_v43 = vld [vmem:[#allocation21_spill] sm:$0xff]  ;;  %v2131_v34 = vld [vmem:[%s2927_s24 + $0x90] sm:$0xff] }
 0x25d   : > { %v1639_v30 = vsel %vm1622_vm10, %v1606_v2, %v4149_v4  ;;  %v5546_v4 = vld [vmem:[#allocation7_spill] sm:$0xff]  ;;  %2696 = vmatmul.msk.f32.gmra.mxu1 %vm246_vm0, %v2117_v31  ;;  %v1462_v33 = vsel %vm1457_vm4, %v1429_v14, %v5549_v27  ;;  %v2130_v29 = vld [vmem:[%s2927_s24 + $0x88] sm:$0xff]  ;;  %v4308_v2 = vld [vmem:[#allocation2 + $0x140] sm:$0xff] }
 0x25e   : > { %v1672_v18 = vsel %vm1655_vm11, %v1639_v30, %v1362_v21  ;;  %v4263_v45 = vpop.permute.xlu2 %1162  ;;  %v1495_v32 = vsel %vm1490_vm5, %v1462_v33, %v5550_v17  ;;  %2709 = vmatmul.msk.f32.vlgmr.msra.gmra.mxu3 %vm246_vm0, %v2130_v29  ;;  %v4312_v21 = vld [vmem:[#allocation2 + $0xc8] sm:$0xff]  ;;  %v5556_v27 = vld [vmem:[#allocation39_spill] sm:$0xff]  ;;  %v2120_v33 = vld [vmem:[%s2927_s24 + $0x38] sm:$0xff] }
 0x25f   : > { %2675 = vmatmul.msk.f32.vlgmr.msra.gmra.mxu2 %vm1693_vm12, %v1672_v18  ;;  %v1528_v53 = vsel %vm1523_vm6, %v1495_v32, %v3915_v50  ;;  %v1442_v44 = vsel %vm246_vm0, %v4312_v21, %v5552_v16  ;;  %v2119_v18 = vld [vmem:[%s2927_s24 + $0x30] sm:$0xff]  ;;  %v5557_v32 = vld [vmem:[#allocation62_spill] sm:$0xff] }
 0x260   : > { %1347 = vrot.lane.b32.xlu1 %v5545_v63, %s2803_s30  ;;  %v1561_v9 = vsel %vm1556_vm7, %v1528_v53, %v4036_v54  ;;  %v5554_v63 = vld [vmem:[#allocation106_spill] sm:$0xff] }
 0x261   : > { %v5558_v53 = vld [vmem:[#allocation30_spill] sm:$0xff] }
 0x262   : > { %v1336_v60 = vpop.permute.xlu1 %1335  ;;  %1248 = vrot.lane.b32.xlu0 %v5546_v4, %s2804_s6  ;;  %v4325_v4 = vld [vmem:[#allocation2 + $0x150] sm:$0xff] }
 0x263   : > { %v1659_v1 = vsel %vm1655_vm11, %v1626_v7, %v1336_v60 }
 0x264   : > { %2662 = vmatmul.msk.f32.gmra.mxu0 %vm1693_vm12, %v1659_v1  ;;  %v1237_v41 = vpop.permute.xlu0 %1236  ;;  %1349 = vrot.lane.b32.xlu2 %v5547_v8, %s2803_s30  ;;  %v5555_v8 = vld [vmem:[#allocation59_spill] sm:$0xff] }
 0x265   : > { %2697 = vmatmul.msk.f32.gmra.mxu1 %vm246_vm0, %v2118_v24  ;;  %v5560_v24 = vld [vmem:[#allocation6_spill] sm:$0xff] }
 0x266   : > { %v4282_v62 = vpop.permute.xlu2 %1365  ;;  %2710 = vmatmul.msk.f32.gmra.mxu3 %vm246_vm0, %v2131_v34  ;;  %v2133_v34 = vld [vmem:[%s2927_s24 + $0xa0] sm:$0xff] }
 0x268   : > { %1146 = vrot.lane.b32.xlu1 %v4125_v28, %s2802_s29  ;;  %v2765_v28 = vld [vmem:[#allocation2 + $0xb0] sm:$0xff] }
 0x26a   : > { %v1135_v59 = vpop.permute.xlu1 %1134  ;;  %1274 = vrot.lane.b32.xlu0 %v5551_v43, %s2804_s6 }
 0x26b   : > { %v1594_v39 = vsel %vm1589_vm9, %v1561_v9, %v1135_v59  ;;  %v1430_v9 = vsel %vm246_vm0, %v3917_v37, %v5558_v53  ;;  %v5559_v59 = vld [vmem:[#allocation86_spill] sm:$0xff] }
 0x26c   : > { %v1627_v57 = vsel %vm1622_vm10, %v1594_v39, %v1237_v41  ;;  %v1263_v55 = vpop.permute.xlu0 %1262  ;;  %1148 = vrot.lane.b32.xlu2 %v2765_v28, %s2802_s29  ;;  %v1463_v43 = vsel %vm1457_vm4, %v1430_v9, %v5559_v59  ;;  %v5562_v28 = vld [vmem:[#allocation9_spill] sm:$0xff]  ;;  %v2122_v53 = vld [vmem:[%s2927_s24 + $0x48] sm:$0xff] }
 0x26d   : > { %v1660_v50 = vsel %vm1655_vm11, %v1627_v57, %v4204_v19  ;;  %v5553_v19 = vld [vmem:[#allocation96_spill] sm:$0xff]  ;;  %2698 = vmatmul.msk.f32.gmra.mxu1 %vm246_vm0, %v2119_v18  ;;  %v1496_v29 = vsel %vm1490_vm5, %v1463_v43, %v5560_v24  ;;  %v5561_v57 = vld [vmem:[#allocation115_spill] sm:$0xff]  ;;  %v2121_v18 = vld [vmem:[%s2927_s24 + $0x40] sm:$0xff] }
 0x26e   : > { %2663 = vmatmul.msk.f32.gmra.mxu0 %vm1693_vm12, %v1660_v50  ;;  %v4306_v54 = vpop.permute.xlu2 %1240  ;;  %v1475_v51 = vsel %vm1457_vm4, %v1442_v44, %v5553_v19  ;;  %v4370_v44 = vld [vmem:[#allocation2 + $0xd8] sm:$0xff]  ;;  %v4410_v43 = vld [vmem:[#allocation2 + $0xe0] sm:$0xff]  ;;  %v5569_v24 = vld [vmem:[#allocation71_spill] sm:$0xff] }
 0x26f   : > { %v1508_v60 = vsel %vm1490_vm5, %v1475_v51, %v5554_v63  ;;  %v5564_v63 = vld [vmem:[#allocation85_spill] sm:$0xff] }
 0x270   : > { %1172 = vrot.lane.b32.xlu1 %v4308_v2, %s2802_s29 }
 0x272   : > { %v1161_v30 = vpop.permute.xlu1 %1160  ;;  %1076 = vrot.lane.b32.xlu0 %v5541_v52, %s2801_s28  ;;  %v1541_v52 = vsel %vm1523_vm6, %v1508_v60, %v3911_v42  ;;  %v2132_v42 = vld [vmem:[%s2927_s24 + $0x98] sm:$0xff] }
 0x273   : > { %v1574_v1 = vsel %vm1556_vm7, %v1541_v52, %v4179_v11  ;;  %2711 = vmatmul.msk.f32.gmra.mxu3 %vm246_vm0, %v2132_v42  ;;  %v5565_v52 = vld [vmem:[#allocation14_spill] sm:$0xff] }
 0x274   : > { %v1065_v7 = vpop.permute.xlu0 %1064  ;;  %1174 = vrot.lane.b32.xlu2 %v4325_v4, %s2802_s29  ;;  %v1607_v41 = vsel %vm1589_vm9, %v1574_v1, %v1161_v30  ;;  %v5563_v30 = vld [vmem:[#allocation65_spill] sm:$0xff] }
 0x275   : > { %v1640_v35 = vsel %vm1622_vm10, %v1607_v41, %v1263_v55  ;;  %2699 = vmatmul.msk.f32.gmra.mxu1 %vm246_vm0, %v2120_v33  ;;  %v1529_v55 = vsel %vm1523_vm6, %v1496_v29, %v5561_v57  ;;  %v1443_v19 = vsel %vm246_vm0, %v4370_v44, %v5563_v30  ;;  %v5570_v29 = vld [vmem:[#allocation94_spill] sm:$0xff] }
 0x276   : > { %v4335_v31 = vpop.permute.xlu2 %1266  ;;  %v1562_v37 = vsel %vm1556_vm7, %v1529_v55, %v4074_v15  ;;  %v1476_v15 = vsel %vm1457_vm4, %v1443_v19, %v5564_v63  ;;  %v5571_v55 = vld [vmem:[#allocation20_spill] sm:$0xff] }
 0x277   : > { %v1595_v50 = vsel %vm1589_vm9, %v1562_v37, %v4227_v3  ;;  %v2772_v37 = vld [vmem:[#allocation2 + $0x48] sm:$0xff] }
 0x278   : > { %1375 = vrot.lane.b32.xlu1 %v5555_v8, %s2803_s30 }
 0x27a   : > { %v1364_v14 = vpop.permute.xlu1 %1363  ;;  %1351 = vrot.lane.b32.xlu0 %v5556_v27, %s2803_s30  ;;  %v5567_v27 = vld [vmem:[#allocation25_spill] sm:$0xff] }
 0x27b   : > { %v1673_v17 = vsel %vm1655_vm11, %v1640_v35, %v1364_v14  ;;  %2712 = vmatmul.msk.f32.gmra.mxu3 %vm246_vm0, %v2133_v34  ;;  %v5574_v34 = vld [vmem:[#allocation76_spill] sm:$0xff] }
 0x27c   : > { %2676 = vmatmul.msk.f32.gmra.mxu2 %vm1693_vm12, %v1673_v17  ;;  %v1340_v11 = vpop.permute.xlu0 %1339  ;;  %1377 = vrot.lane.b32.xlu2 %v5557_v32, %s2803_s30  ;;  %v2770_v17 = vld [vmem:[#allocation2 + $0x158] sm:$0xff] }
 0x27d   : > { %2700 = vmatmul.msk.f32.gmra.mxu1 %vm246_vm0, %v2121_v18  ;;  %v2123_v18 = vld [vmem:[%s2927_s24 + $0x50] sm:$0xff] }
 0x27e   : > { %v4356_v39 = vpop.permute.xlu2 %1068 }
 0x280   : > { %1250 = vrot.lane.b32.xlu1 %v5562_v28, %s2804_s6 }
 0x282   : > { %v1239_v16 = vpop.permute.xlu1 %1238  ;;  %1150 = vrot.lane.b32.xlu0 %v4229_v12, %s2802_s29  ;;  %v5566_v12 = vld [vmem:[#allocation111_spill] sm:$0xff] }
 0x283   : > { %v1628_v51 = vsel %vm1622_vm10, %v1595_v50, %v1239_v16  ;;  %v1509_v1 = vsel %vm1490_vm5, %v1476_v15, %v5566_v12  ;;  %v5572_v50 = vld [vmem:[#allocation45_spill] sm:$0xff]  ;;  %v2135_v15 = vld [vmem:[%s2927_s24 + $0xb0] sm:$0xff] }
 0x284   : > { %v1661_v60 = vsel %vm1655_vm11, %v1628_v51, %v1340_v11  ;;  %v1139_v3 = vpop.permute.xlu0 %1138  ;;  %1252 = vrot.lane.b32.xlu2 %v5565_v52, %s2804_s6  ;;  %v1542_v41 = vsel %vm1523_vm6, %v1509_v1, %v3955_v20  ;;  %v2134_v20 = vld [vmem:[%s2927_s24 + $0xa8] sm:$0xff]  ;;  %v1431_v16 = vsel %vm246_vm0, %v2772_v37, %v5572_v50 }
 0x285   : > { %2664 = vmatmul.msk.f32.gmra.mxu0 %vm1693_vm12, %v1661_v60  ;;  %v1575_v14 = vsel %vm1556_vm7, %v1542_v41, %v1065_v7  ;;  %v5568_v7 = vld [vmem:[#allocation22_spill] sm:$0xff]  ;;  %2701 = vmatmul.msk.f32.gmra.mxu1 %vm246_vm0, %v2122_v53  ;;  %v1464_v63 = vsel %vm1457_vm4, %v1431_v16, %v5574_v34  ;;  %v5575_v60 = vld [vmem:[#allocation105_spill] sm:$0xff] }
 0x286   : > { %v4389_v35 = vpop.permute.xlu2 %1343  ;;  %v1608_v33 = vsel %vm1589_vm9, %v1575_v14, %v4263_v45  ;;  %2713 = vmatmul.msk.f32.gmra.mxu3 %vm246_vm0, %v2134_v20  ;;  %v5573_v51 = vld [vmem:[#allocation70_spill] sm:$0xff]  ;;  %v1497_v52 = vsel %vm1490_vm5, %v1464_v63, %v5575_v60  ;;  %v2124_v20 = vld [vmem:[%s2927_s24 + $0x58] sm:$0xff]  ;;  %v2137_v34 = vld [vmem:[%s2927_s24 + $0xc0] sm:$0xff] }
 0x287   : > { %v5578_v53 = vld [vmem:[#allocation10_spill] sm:$0xff]  ;;  %v5584_v60 = vld [vmem:[#allocation53_spill] sm:$0xff] }
 0x288   : > { %1276 = vrot.lane.b32.xlu1 %v5567_v27, %s2804_s6 }
 0x28a   : > { %v1265_v42 = vpop.permute.xlu1 %1264  ;;  %1176 = vrot.lane.b32.xlu0 %v2770_v17, %s2802_s29  ;;  %v5577_v17 = vld [vmem:[#allocation42_spill] sm:$0xff] }
 0x28b   : > { %v1641_v11 = vsel %vm1622_vm10, %v1608_v33, %v1265_v42 }
 0x28c   : > { %v1674_v9 = vsel %vm1655_vm11, %v1641_v11, %v4282_v62  ;;  %v1165_v59 = vpop.permute.xlu0 %1164  ;;  %1278 = vrot.lane.b32.xlu2 %v5568_v7, %s2804_s6  ;;  %v1444_v62 = vsel %vm246_vm0, %v4410_v43, %v5569_v24  ;;  %v2773_v7 = vld [vmem:[#allocation2 + $0x50] sm:$0xff] }
 0x28d   : > { %2677 = vmatmul.msk.f32.gmra.mxu2 %vm1693_vm12, %v1674_v9  ;;  %v1477_v57 = vsel %vm1457_vm4, %v1444_v62, %v5570_v29  ;;  %2702 = vmatmul.msk.f32.gmra.mxu1 %vm246_vm0, %v2123_v18  ;;  %v2136_v9 = vld [vmem:[%s2927_s24 + $0xb8] sm:$0xff]  ;;  %v5580_v24 = vld [vmem:[#allocation55_spill] sm:$0xff]  ;;  %v2125_v18 = vld [vmem:[%s2927_s24 + $0x60] sm:$0xff] }
 0x28e   : > { %v4407_v45 = vpop.permute.xlu2 %1142  ;;  %v1510_v28 = vsel %vm1490_vm5, %v1477_v57, %v5571_v55  ;;  %2714 = vmatmul.msk.f32.gmra.mxu3 %vm246_vm0, %v2135_v15  ;;  %v5581_v29 = vld [vmem:[#allocation84_spill] sm:$0xff]  ;;  %v2775_v15 = vld [vmem:[#allocation2 + $0xf0] sm:$0xff] }
 0x28f   : > { %v1543_v30 = vsel %vm1523_vm6, %v1510_v28, %v3975_v46  ;;  %v5576_v46 = vld [vmem:[#allocation118_spill] sm:$0xff]  ;;  %v5582_v55 = vld [vmem:[#allocation8_spill] sm:$0xff] }
 0x290   : > { %1078 = vrot.lane.b32.xlu1 %v5555_v8, %s2801_s28  ;;  %v1530_v41 = vsel %vm1523_vm6, %v1497_v52, %v5576_v46  ;;  %v2138_v46 = vld [vmem:[%s2927_s24 + $0xc8] sm:$0xff] }
 0x291   : > { %v1563_v27 = vsel %vm1556_vm7, %v1530_v41, %v3999_v61  ;;  %v5586_v41 = vld [vmem:[#allocation109_spill] sm:$0xff] }
 0x292   : > { %v1067_v19 = vpop.permute.xlu1 %1066  ;;  %1379 = vrot.lane.b32.xlu0 %v5573_v51, %s2803_s30 }
 0x293   : > { %v1576_v8 = vsel %vm1556_vm7, %v1543_v30, %v1067_v19  ;;  %v5583_v30 = vld [vmem:[#allocation24_spill] sm:$0xff] }
 0x294   : > { %v1609_v12 = vsel %vm1589_vm9, %v1576_v8, %v1165_v59  ;;  %v1368_v1 = vpop.permute.xlu0 %1367  ;;  %1080 = vrot.lane.b32.xlu2 %v5557_v32, %s2801_s28  ;;  %v1596_v32 = vsel %vm1589_vm9, %v1563_v27, %v1139_v3  ;;  %v5579_v59 = vld [vmem:[#allocation52_spill] sm:$0xff] }
 0x295   : > { %v1642_v14 = vsel %vm1622_vm10, %v1609_v12, %v4335_v31  ;;  %v1629_v31 = vsel %vm1622_vm10, %v1596_v32, %v4306_v54  ;;  %2703 = vmatmul.msk.f32.gmra.mxu1 %vm246_vm0, %v2124_v20  ;;  %v1432_v54 = vsel %vm246_vm0, %v2773_v7, %v5580_v24  ;;  %v2127_v20 = vld [vmem:[%s2927_s24 + $0x70] sm:$0xff]  ;;  %v5590_v24 = vld [vmem:[#allocation89_spill] sm:$0xff] }
 0x296   : > { %v1675_v33 = vsel %vm1655_vm11, %v1642_v14, %v1368_v1  ;;  %v4445_v42 = vpop.permute.xlu2 %1168  ;;  %2715 = vmatmul.msk.f32.gmra.mxu3 %vm246_vm0, %v2136_v9  ;;  %v1465_v57 = vsel %vm1457_vm4, %v1432_v54, %v5581_v29  ;;  %v2126_v1 = vld [vmem:[%s2927_s24 + $0x68] sm:$0xff]  ;;  %v2139_v9 = vld [vmem:[%s2927_s24 + $0xd0] sm:$0xff]  ;;  %v5591_v54 = vld [vmem:[#allocation13_spill] sm:$0xff] }
 0x297   : > { %2678 = vmatmul.msk.f32.gmra.mxu2 %vm1693_vm12, %v1675_v33  ;;  %v1498_v28 = vsel %vm1490_vm5, %v1465_v57, %v5582_v55  ;;  %v2776_v33 = vld [vmem:[#allocation2 + $0x170] sm:$0xff]  ;;  %v5592_v55 = vld [vmem:[#allocation116_spill] sm:$0xff] }
 0x298   : > { %1353 = vrot.lane.b32.xlu1 %v5577_v17, %s2803_s30  ;;  %v1531_v37 = vsel %vm1523_vm6, %v1498_v28, %v3929_v23 }
 0x299   : > { %v1564_v50 = vsel %vm1556_vm7, %v1531_v37, %v4058_v22  ;;  %v5593_v37 = vld [vmem:[#allocation12_spill] sm:$0xff] }
 0x29a   : > { %v1342_v11 = vpop.permute.xlu1 %1341  ;;  %1254 = vrot.lane.b32.xlu0 %v5578_v53, %s2804_s6 }
 0x29b   : > { %v1662_v61 = vsel %vm1655_vm11, %v1629_v31, %v1342_v11  ;;  %v5587_v31 = vld [vmem:[#allocation63_spill] sm:$0xff] }
 0x29c   : > { %2665 = vmatmul.msk.f32.gmra.mxu0 %vm1693_vm12, %v1662_v61  ;;  %v1243_v3 = vpop.permute.xlu0 %1242  ;;  %1355 = vrot.lane.b32.xlu2 %v5579_v59, %s2803_s30  ;;  %v5589_v59 = vld [vmem:[#allocation33_spill] sm:$0xff] }
 0x29d   : > { %2704 = vmatmul.msk.f32.gmra.mxu1 %vm246_vm0, %v2125_v18  ;;  %v1433_v7 = vsel %vm246_vm0, %v3985_v47, %v5589_v59 }
 0x29e   : > { %v4465_v62 = vpop.permute.xlu2 %1371  ;;  %2716 = vmatmul.msk.f32.gmra.mxu3 %vm246_vm0, %v2137_v34 }
 0x2a0   : > { %1152 = vrot.lane.b32.xlu1 %v4312_v21, %s2802_s29  ;;  %v4493_v21 = vld [vmem:[#allocation2 + $0x168] sm:$0xff] }
 0x2a2   : > { %v1141_v16 = vpop.permute.xlu1 %1140  ;;  %1280 = vrot.lane.b32.xlu0 %v5583_v30, %s2804_s6  ;;  %v2777_v30 = vld [vmem:[#allocation2 + $0xf8] sm:$0xff] }
 0x2a3   : > { %v1597_v19 = vsel %vm1589_vm9, %v1564_v50, %v1141_v16 }
 0x2a4   : > { %v1630_v63 = vsel %vm1622_vm10, %v1597_v19, %v1243_v3  ;;  %v1269_v8 = vpop.permute.xlu0 %1268  ;;  %1154 = vrot.lane.b32.xlu2 %v4370_v44, %s2802_s29  ;;  %v1445_v44 = vsel %vm246_vm0, %v2775_v15, %v5584_v60  ;;  %v5588_v3 = vld [vmem:[#allocation68_spill] sm:$0xff]  ;;  %v5594_v19 = vld [vmem:[#allocation69_spill] sm:$0xff] }
 0x2a5   : > { %v1663_v23 = vsel %vm1655_vm11, %v1630_v63, %v4389_v35  ;;  %v5585_v35 = vld [vmem:[#allocation98_spill] sm:$0xff]  ;;  %2705 = vmatmul.msk.f32.gmra.mxu1 %vm246_vm0, %v2126_v1  ;;  %v1446_v18 = vsel %vm246_vm0, %v2777_v30, %v5594_v19  ;;  %v2128_v63 = vld [vmem:[%s2927_s24 + $0x78] sm:$0xff]  ;;  %v5606_v30 = vld [vmem:[#allocation15_spill] sm:$0xff] }
 0x2a6   : > { %2666 = vmatmul.msk.f32.gmra.mxu0 %vm1693_vm12, %v1663_v23  ;;  %v4490_v22 = vpop.permute.xlu2 %1246  ;;  %v1478_v12 = vsel %vm1457_vm4, %v1445_v44, %v5585_v35  ;;  %2717 = vmatmul.msk.f32.gmra.mxu3 %vm246_vm0, %v2138_v46  ;;  %v5595_v23 = vld [vmem:[#allocation88_spill] sm:$0xff] }
 0x2a7   : > { %v1511_v14 = vsel %vm1490_vm5, %v1478_v12, %v5586_v41  ;;  %v1479_v15 = vsel %vm1457_vm4, %v1446_v18, %v5595_v23  ;;  %v5598_v12 = vld [vmem:[#allocation28_spill] sm:$0xff]  ;;  %v5607_v18 = vld [vmem:[#allocation125_spill] sm:$0xff] }
 0x2a8   : > { %1178 = vrot.lane.b32.xlu1 %v4493_v21, %s2802_s29  ;;  %v1544_v32 = vsel %vm1523_vm6, %v1511_v14, %v3925_v36 }
 0x2aa   : > { %v1167_v52 = vpop.permute.xlu1 %1166  ;;  %1082 = vrot.lane.b32.xlu0 %v5573_v51, %s2801_s28  ;;  %v1577_v51 = vsel %vm1556_vm7, %v1544_v32, %v4356_v39 }
 0x2ab   : > { %v1610_v11 = vsel %vm1589_vm9, %v1577_v51, %v1167_v52 }
 0x2ac   : > { %v1071_v27 = vpop.permute.xlu0 %1070  ;;  %1180 = vrot.lane.b32.xlu2 %v2776_v33, %s2802_s29  ;;  %v1643_v53 = vsel %vm1622_vm10, %v1610_v11, %v1269_v8  ;;  %v2140_v8 = vld [vmem:[%s2927_s24 + $0xd8] sm:$0xff]  ;;  %v4583_v33 = vld [vmem:[#allocation2 + $0x188] sm:$0xff] }
 0x2ad   : > { %2706 = vmatmul.msk.f32.gmra.mxu1 %vm246_vm0, %v2127_v20  ;;  %v1024_v32 = vrot.slane %v4583_v33, 2 }
 0x2ae   : > { %v4513_v17 = vpop.permute.xlu2 %1272  ;;  %2718 = vmatmul.msk.f32.gmra.mxu3 %vm246_vm0, %v2139_v9  ;;  %v2780_v9 = vld [vmem:[#allocation2 + $0x108] sm:$0xff] }
 0x2b0   : > { %1381 = vrot.lane.b32.xlu1 %v5587_v31, %s2803_s30 }
 0x2b2   : > { %v1370_v61 = vpop.permute.xlu1 %1369  ;;  %1357 = vrot.lane.b32.xlu0 %v5520_v25, %s2803_s30  ;;  %v1466_v25 = vsel %vm1457_vm4, %v1433_v7, %v5590_v24  ;;  %v5601_v24 = vld [vmem:[#allocation51_spill] sm:$0xff] }
 0x2b3   : > { %v1676_v36 = vsel %vm1655_vm11, %v1643_v53, %v1370_v61  ;;  %v1499_v29 = vsel %vm1490_vm5, %v1466_v25, %v5591_v54  ;;  %v2129_v53 = vld [vmem:[%s2927_s24 + $0x80] sm:$0xff]  ;;  %v5602_v25 = vld [vmem:[#allocation127_spill] sm:$0xff] }
 0x2b4   : > { %2679 = vmatmul.msk.f32.gmra.mxu2 %vm1693_vm12, %v1676_v36  ;;  %v1346_v39 = vpop.permute.xlu0 %1345  ;;  %1383 = vrot.lane.b32.xlu2 %v5588_v3, %s2803_s30  ;;  %v1532_v28 = vsel %vm1523_vm6, %v1499_v29, %v5592_v55  ;;  %v2141_v61 = vld [vmem:[%s2927_s24 + $0xe0] sm:$0xff]  ;;  %v1434_v54 = vsel %vm246_vm0, %v5602_v25, %v5601_v24  ;;  %v5609_v24 = vld [vmem:[#allocation48_spill] sm:$0xff] }
 0x2b5   : > { %v1565_v47 = vsel %vm1556_vm7, %v1532_v28, %v4096_v0  ;;  %2707 = vmatmul.msk.f32.gmra.mxu1 %vm246_vm0, %v2128_v63  ;;  %v5604_v28 = vld [vmem:[#allocation79_spill] sm:$0xff] }
 0x2b6   : > { %v4537_v57 = vpop.permute.xlu2 %1074  ;;  %v1598_v50 = vsel %vm1589_vm9, %v1565_v47, %v4407_v45  ;;  %v5596_v45 = vld [vmem:[#allocation17_spill] sm:$0xff]  ;;  %2719 = vmatmul.msk.f32.gmra.mxu3 %vm246_vm0, %v2140_v8  ;;  %v5605_v47 = vld [vmem:[#allocation23_spill] sm:$0xff] }
 0x2b8   : > { %1256 = vrot.lane.b32.xlu1 %v5593_v37, %s2804_s6  ;;  %v1467_v37 = vsel %vm1457_vm4, %v1434_v54, %v5604_v28 }
 0x2b9   : > { %v2262_v46 = vpop.f32.mrf.mxu1  ;;  %v1500_v19 = vsel %vm1490_vm5, %v1467_v37, %v5606_v30 }
 0x2ba   : > { %v1245_v16 = vpop.permute.xlu1 %1244  ;;  %1156 = vrot.lane.b32.xlu0 %v4410_v43, %s2802_s29  ;;  %v5597_v43 = vld [vmem:[#allocation113_spill] sm:$0xff]  ;;  %v2427_v7 = vmul.f32 %v2262_v46, %v2262_v46 }
 0x2bb   : > { %v1631_v34 = vsel %vm1622_vm10, %v1598_v50, %v1245_v16  ;;  %v1512_v44 = vsel %vm1490_vm5, %v1479_v15, %v5597_v43  ;;  %v2358_v16 = vsel %vm1457_vm4, %v2262_v46, 0.0  ;;  %v2142_v46 = vld [vmem:[%s2927_s24 + $0xe8] sm:$0xff] }
 0x2bc   : > { %v1664_v0 = vsel %vm1655_vm11, %v1631_v34, %v1346_v39  ;;  %v4557_v60 = vpop.permute.xlu0 %1144  ;;  %1258 = vrot.lane.b32.xlu2 %v5596_v45, %s2804_s6  ;;  %v1545_v52 = vsel %vm1523_vm6, %v1512_v44, %v3967_v58  ;;  %v5600_v39 = vld [vmem:[#allocation74_spill] sm:$0xff]  ;;  %v2459_v45 = vsel %vm1457_vm4, %v2427_v7, 0.0 }
 0x2bd   : > { %2667 = vmatmul.msk.f32.gmra.mxu0 %vm1693_vm12, %v1664_v0  ;;  %v1578_v35 = vsel %vm1556_vm7, %v1545_v52, %v1071_v27  ;;  %v2778_v27 = vld [vmem:[#allocation2 + $0x180] sm:$0xff]  ;;  %2708 = vmatmul.msk.f32.gmra.mxu1 %vm246_vm0, %v2129_v53  ;;  %v1447_v59 = vsel %vm246_vm0, %v2780_v9, %v5600_v39 }
 0x2be   : > { %v4578_v1 = vpop.permute.xlu2 %1349  ;;  %v1611_v41 = vsel %vm1589_vm9, %v1578_v35, %v4445_v42  ;;  %v1023_v51 = vrot.slane %v2778_v27, 2  ;;  %v5599_v42 = vld [vmem:[#allocation108_spill] sm:$0xff]  ;;  %2720 = vmatmul.msk.f32.gmra.mxu3 %vm246_vm0, %v2141_v61 }
 0x2c0   : > { %1282 = vrot.lane.b32.xlu1 %v5598_v12, %s2804_s6  ;;  %v1025_v55 = vsel %vm646_vm3, %v1023_v51, %v1024_v32 }
 0x2c1   : > { %v2265_v8 = vpop.f32.mrf.mxu1 }
 0x2c2   : > { %v1811_v58 = vpop.f32.mrf.mxu0  ;;  %v1271_v14 = vpop.permute.xlu1 %1270  ;;  %1182 = vrot.lane.b32.xlu0 %v2778_v27, %s2802_s29  ;;  %v2428_v43 = vmul.f32 %v2265_v8, %v2265_v8 }
 0x2c3   : > { %1907 = vst.msk [vmem:[%s4576_s25] sm:$0xff] %vm1457_vm4, %v1811_v58  ;;  %v1644_v11 = vsel %vm1622_vm10, %v1611_v41, %v1271_v14  ;;  %v2008_v63 = vmul.f32 %v1811_v58, %v1811_v58  ;;  %v1939_v23 = vsel %vm1457_vm4, %v1811_v58, 0.0  ;;  %v5608_v41 = vld [vmem:[#allocation119_spill] sm:$0xff] }
 0x2c4   : > { %v1677_v36 = vsel %vm1655_vm11, %v1644_v11, %v4465_v62  ;;  %v1171_v20 = vpop.permute.xlu0 %1170  ;;  %1284 = vrot.lane.b32.xlu2 %v5599_v42, %s2804_s6  ;;  %v5603_v62 = vld [vmem:[#allocation97_spill] sm:$0xff]  ;;  %v1533_v58 = vsel %vm1523_vm6, %v1500_v19, %v5608_v41  ;;  %v2460_v53 = vsel %vm1457_vm4, %v2428_v43, 0.0  ;;  %v418_v43 = vld [vmem:[#allocation2 + $0x198] sm:$0xff] }
 0x2c5   : > { %2680 = vmatmul.msk.f32.gmra.mxu2 %vm1693_vm12, %v1677_v36  ;;  %v1480_v29 = vsel %vm1457_vm4, %v1447_v59, %v5603_v62  ;;  %v2040_v61 = vsel %vm1457_vm4, %v2008_v63, 0.0  ;;  %v2461_v9 = vadd.f32 %v2460_v53, %v2459_v45  ;;  %v5610_v62 = vld [vmem:[#allocation112_spill] sm:$0xff]  ;;  %v5612_v45 = vld [vmem:[#allocation87_spill] sm:$0xff] }
 0x2c6   : > { %v1513_v50 = vsel %vm1490_vm5, %v1480_v29, %v5605_v47  ;;  %v4631_v51 = vpop.permute.xlu2 %1148  ;;  %2721 = vmatmul.msk.f32.gmra.mxu3 %vm246_vm0, %v2142_v46  ;;  %v2781_v63 = vld [vmem:[#allocation2 + $0x78] sm:$0xff] }
 0x2c7   : > { %v1546_v34 = vsel %vm1523_vm6, %v1513_v50, %v5607_v18 }
 0x2c8   : > { %1084 = vrot.lane.b32.xlu1 %v5587_v31, %s2801_s28  ;;  %v2359_v31 = vsel %vm1457_vm4, %v2265_v8, 0.0  ;;  %v5611_v8 = vld [vmem:[#allocation60_spill] sm:$0xff] }
 0x2c9   : > { %v2360_v12 = vadd.f32 %v2359_v31, %v2358_v16  ;;  %v2143_v16 = vld [vmem:[%s2927_s24 + $0xf0] sm:$0xff] }
 0x2ca   : > { %v1814_v15 = vpop.f32.mrf.mxu0  ;;  %v1073_v0 = vpop.permute.xlu1 %1072  ;;  %1385 = vrot.lane.b32.xlu0 %v1025_v55, %s2803_s30 }
 0x2cb   : > { %1908 = vst.msk [vmem:[%s4576_s25 + $0x8] sm:$0xff] %vm1457_vm4, %v1814_v15  ;;  %v1940_v44 = vsel %vm1457_vm4, %v1814_v15, 0.0  ;;  %v2009_v52 = vmul.f32 %v1814_v15, %v1814_v15  ;;  %v1579_v35 = vsel %vm1556_vm7, %v1546_v34, %v1073_v0 }
 0x2cc   : > { %v1941_v14 = vadd.f32 %v1940_v44, %v1939_v23  ;;  %v1612_v27 = vsel %vm1589_vm9, %v1579_v35, %v1171_v20  ;;  %v1374_v11 = vpop.permute.xlu0 %1373  ;;  %1184 = vrot.lane.b32.xlu2 %v4583_v33, %s2802_s29  ;;  %v1566_v20 = vsel %vm1556_vm7, %v1533_v58, %v4011_v13  ;;  %v1435_v23 = vsel %vm246_vm0, %v2781_v63, %v5611_v8 }
 0x2cd   : > { %v2041_v36 = vsel %vm1457_vm4, %v2009_v52, 0.0  ;;  %v1645_v42 = vsel %vm1622_vm10, %v1612_v27, %v4513_v17  ;;  %v1599_v7 = vsel %vm1589_vm9, %v1566_v20, %v4557_v60  ;;  %v2268_v17 = vpop.f32.mrf.mxu1  ;;  %v1468_v31 = vsel %vm1457_vm4, %v1435_v23, %v5612_v45  ;;  %v5614_v52 = vld [vmem:[#allocation122_spill] sm:$0xff] }
 0x2ce   : > { %v2042_v39 = vadd.f32 %v2041_v36, %v2040_v61  ;;  %v1678_v59 = vsel %vm1655_vm11, %v1645_v42, %v1374_v11  ;;  %v1632_v13 = vsel %vm1622_vm10, %v1599_v7, %v4490_v22  ;;  %v2361_v29 = vsel %vm1457_vm4, %v2268_v17, 0.0  ;;  %v4665_v0 = vpop.permute.xlu2 %1174  ;;  %2722 = vmatmul.msk.f32.gmra.mxu3 %vm246_vm0, %v2143_v16  ;;  %v2144_v36 = vld [vmem:[%s2927_s24 + $0xf8] sm:$0xff] }
 0x2cf   : > { %2681 = vmatmul.msk.f32.gmra.mxu2 %vm1693_vm12, %v1678_v59  ;;  %v2429_v28 = vmul.f32 %v2268_v17, %v2268_v17  ;;  %v2362_v50 = vadd.f32 %v2361_v29, %v2360_v12  ;;  %v2782_v12 = vld [vmem:[#allocation2 + $0x190] sm:$0x3]  ;;  %v1324_v42 = vrot.slane %v418_v43, 2  ;;  %v4689_v59 = vld [vmem:[#allocation2 + $0x1a0] sm:$0xff] }
 0x2d0   : > { %1359 = vrot.lane.b32.xlu1 %v5609_v24, %s2803_s30  ;;  %v1026_v46 = vrot.slane %v2782_v12, 2  ;;  %v1325_v24 = vrot.slane %v4689_v59, 2 }
 0x2d1   : > { %v2462_v22 = vsel %vm1457_vm4, %v2429_v28, 0.0 }
 0x2d2   : > { %v1817_v25 = vpop.f32.mrf.mxu0  ;;  %v1348_v54 = vpop.permute.xlu1 %1347  ;;  %1286 = vrot.lane.b32.xlu0 %v5610_v62, %s2804_s6  ;;  %v2463_v34 = vadd.f32 %v2462_v22, %v2461_v9  ;;  %v5615_v62 = vld [vmem:[#allocation57_spill] sm:$0xff] }
 0x2d3   : > { %1909 = vst.msk [vmem:[%s4576_s25 + $0x10] sm:$0xff] %vm1457_vm4, %v1817_v25  ;;  %v1942_v60 = vsel %vm1457_vm4, %v1817_v25, 0.0  ;;  %v2010_v37 = vmul.f32 %v1817_v25, %v1817_v25  ;;  %v1665_v47 = vsel %vm1655_vm11, %v1632_v13, %v1348_v54  ;;  %v420_v25 = vld [vmem:[#allocation2 + $0x1a8] sm:$0x3]  ;;  %v1224_v54 = vrot.slane %v4689_v59, 1  ;;  %v2783_v13 = vld [vmem:[#allocation2 + $0x110] sm:$0xff] }
 0x2d4   : > { %v1943_v30 = vadd.f32 %v1942_v60, %v1941_v14  ;;  %2668 = vmatmul.msk.f32.gmra.mxu0 %vm1693_vm12, %v1665_v47  ;;  %v1249_v19 = vpop.permute.xlu0 %1248  ;;  %1088 = vrot.lane.b32.xlu2 %v1025_v55, %s2801_s28  ;;  %v5613_v55 = vld [vmem:[#allocation11_spill] sm:$0xff]  ;;  %v1448_v29 = vsel %vm246_vm0, %v2783_v13, %v5615_v62  ;;  %v1327_v22 = vrot.slane %v420_v25, 2  ;;  %v5621_v13 = vld [vmem:[#allocation16_spill] sm:$0xff] }
 0x2d5   : > { %v2043_v18 = vsel %vm1457_vm4, %v2010_v37, 0.0  ;;  %v1501_v44 = vsel %vm1490_vm5, %v1468_v31, %v5613_v55  ;;  %v2271_v41 = vpop.f32.mrf.mxu1 }
 0x2d6   : > { %v2044_v15 = vadd.f32 %v2043_v18, %v2042_v39  ;;  %v1534_v35 = vsel %vm1523_vm6, %v1501_v44, %v5614_v52  ;;  %v2363_v27 = vsel %vm1457_vm4, %v2271_v41, 0.0  ;;  %v2430_v11 = vmul.f32 %v2271_v41, %v2271_v41  ;;  %2723 = vmatmul.msk.f32.gmra.mxu3 %vm246_vm0, %v2144_v36  ;;  %v4695_v17 = vpop.permute.xlu2 %1377 }
 0x2d7   : > { %v1567_v58 = vsel %vm1556_vm7, %v1534_v35, %v4081_v49  ;;  %v2364_v61 = vadd.f32 %v2363_v27, %v2362_v50  ;;  %v1027_v49 = vsel %vm646_vm3, %v1024_v32, %v1026_v46  ;;  %v1223_v32 = vrot.slane %v418_v43, 1  ;;  %v5616_v50 = vld [vmem:[#allocation101_spill] sm:$0xff] }
 0x2d8   : > { %1086 = vrot.lane.b32.xlu1 %v5588_v3, %s2801_s28  ;;  %v2464_v20 = vsel %vm1457_vm4, %v2430_v11, 0.0  ;;  %v1481_v16 = vsel %vm1457_vm4, %v1448_v29, %v5616_v50  ;;  %v1226_v46 = vrot.slane %v420_v25, 1 }
 0x2d9   : > { %v2465_v7 = vadd.f32 %v2464_v20, %v2463_v34  ;;  %v5617_v34 = vld [vmem:[#allocation26_spill] sm:$0xff] }
 0x2da   : > { %v1147_v14 = vpop.permute.xlu1 %1146  ;;  %1186 = vrot.lane.b32.xlu0 %v418_v43, %s2802_s29  ;;  %v1514_v63 = vsel %vm1490_vm5, %v1481_v16, %v5617_v34  ;;  %v5618_v43 = vld [vmem:[#allocation121_spill] sm:$0xff]  ;;  %v1227_v27 = vsel %vm469_vm1, %v1224_v54, %v1226_v46 }
 0x2db   : > { %v1600_v53 = vsel %vm1589_vm9, %v1567_v58, %v1147_v14  ;;  %v1547_v55 = vsel %vm1523_vm6, %v1514_v63, %v5618_v43  ;;  %v1328_v58 = vsel %vm646_vm3, %v1325_v24, %v1327_v22  ;;  %v2784_v22 = vld [vmem:[#allocation2 + $0x120] sm:$0xff] }
 0x2dc   : > { %v1633_v3 = vsel %vm1622_vm10, %v1600_v53, %v1249_v19  ;;  %v1275_v9 = vpop.permute.xlu0 %1274  ;;  %v1580_v35 = vsel %vm1556_vm7, %v1547_v55, %v4537_v57  ;;  %v5625_v55 = vld [vmem:[#allocation29_spill] sm:$0xff] }
 0x2dd   : > { %v1666_v39 = vsel %vm1655_vm11, %v1633_v3, %v4578_v1  ;;  %v1326_v1 = vsel %vm646_vm3, %v1324_v42, %v1325_v24  ;;  %v2274_v18 = vpop.f32.mrf.mxu1 }
 0x2de   : > { %2669 = vmatmul.msk.f32.gmra.mxu0 %vm1693_vm12, %v1666_v39  ;;  %1389 = vrot.lane.b32.xlu2 %v1326_v1, %s2803_s30  ;;  %v2365_v45 = vsel %vm1457_vm4, %v2274_v18, 0.0  ;;  %v2431_v31 = vmul.f32 %v2274_v18, %v2274_v18  ;;  %v4729_v11 = vpop.permute.xlu2 %1252  ;;  %v5620_v1 = vld [vmem:[#allocation91_spill] sm:$0xff]  ;;  %v5623_v18 = vld [vmem:[#allocation72_spill] sm:$0xff] }
 0x2df   : > { %v2366_v52 = vadd.f32 %v2365_v45, %v2364_v61  ;;  %v1449_v34 = vsel %vm246_vm0, %v2784_v22, %v5623_v18  ;;  %v5624_v45 = vld [vmem:[#allocation90_spill] sm:$0xff] }
 0x2e0   : > { %1387 = vrot.lane.b32.xlu1 %v1027_v49, %s2803_s30  ;;  %v2466_v12 = vsel %vm1457_vm4, %v2431_v31, 0.0  ;;  %v1482_v31 = vsel %vm1457_vm4, %v1449_v34, %v5624_v45 }
 0x2e1   : > { %v1820_v33 = vpop.f32.mrf.mxu0  ;;  %v2467_v14 = vadd.f32 %v2466_v12, %v2465_v7 }
 0x2e2   : > { %1910 = vst.msk [vmem:[%s4576_s25 + $0x18] sm:$0xff] %vm1457_vm4, %v1820_v33  ;;  %v1944_v28 = vsel %vm1457_vm4, %v1820_v33, 0.0  ;;  %v2011_v60 = vmul.f32 %v1820_v33, %v1820_v33  ;;  %v1173_v37 = vpop.permute.xlu1 %1172  ;;  %v4705_v47 = vpop.f32.mrf.mxu2  ;;  %1090 = vrot.lane.b32.xlu0 %v1027_v49, %s2801_s28  ;;  %v5619_v49 = vld [vmem:[#allocation37_spill] sm:$0xff] }
 0x2e3   : > { %v1945_v19 = vadd.f32 %v1944_v28, %v1943_v30  ;;  %1923 = vst.msk [vmem:[%s4576_s25 + $0x80] sm:$0xff] %vm1457_vm4, %v4705_v47  ;;  %v1225_v30 = vsel %vm469_vm1, %v1223_v32, %v1224_v54  ;;  %v1613_v41 = vsel %vm1589_vm9, %v1580_v35, %v1173_v37  ;;  %v1436_v7 = vsel %vm246_vm0, %v4111_v56, %v5619_v49  ;;  %v5622_v37 = vld [vmem:[#allocation36_spill] sm:$0xff] }
 0x2e4   : > { %v2045_v8 = vsel %vm1457_vm4, %v2011_v60, 0.0  ;;  %v1077_v23 = vpop.permute.xlu0 %1076  ;;  %v1469_v33 = vsel %vm1457_vm4, %v1436_v7, %v5620_v1  ;;  %v4751_v60 = vpop.f32.mrf.mxu3  ;;  %v5631_v1 = vld [vmem:[#allocation81_spill] sm:$0xff] }
 0x2e5   : > { %v2046_v44 = vadd.f32 %v2045_v8, %v2044_v15  ;;  %v1646_v15 = vsel %vm1622_vm10, %v1613_v41, %v1275_v9  ;;  %v2277_v36 = vpop.f32.mrf.mxu1  ;;  %v1502_v62 = vsel %vm1490_vm5, %v1469_v33, %v5621_v13 }
 0x2e6   : > { %1290 = vrot.lane.b32.xlu2 %v1227_v27, %s2804_s6  ;;  %v2367_v39 = vsel %vm1457_vm4, %v2277_v36, 0.0  ;;  %v2432_v9 = vmul.f32 %v2277_v36, %v2277_v36  ;;  %v1535_v56 = vsel %vm1523_vm6, %v1502_v62, %v5622_v37  ;;  %v5632_v37 = vld [vmem:[#allocation18_spill] sm:$0xff] }
 0x2e7   : > { %v4741_v25 = vadd.f32 %v2367_v39, %v2366_v52  ;;  %v1568_v50 = vsel %vm1556_vm7, %v1535_v56, %v4115_v48  ;;  %v1515_v48 = vsel %vm1490_vm5, %v1482_v31, %v5625_v55 }
 0x2e8   : > { %1288 = vrot.lane.b32.xlu1 %v1225_v30, %s2804_s6  ;;  %v2468_v54 = vsel %vm1457_vm4, %v2432_v9, 0.0  ;;  %v1601_v16 = vsel %vm1589_vm9, %v1568_v50, %v4631_v51  ;;  %v5626_v51 = vld [vmem:[#allocation43_spill] sm:$0xff] }
 0x2e9   : > { %v4749_v28 = vadd.f32 %v2468_v54, %v2467_v14  ;;  %v1548_v30 = vsel %vm1523_vm6, %v1515_v48, %v5626_v51 }
 0x2ea   : > { %v1376_v57 = vpop.permute.xlu1 %1375  ;;  %1391 = vrot.lane.b32.xlu0 %v1328_v58, %s2803_s30  ;;  %v1581_v52 = vsel %vm1556_vm7, %v1548_v30, %v1077_v23  ;;  %s241_s30 = scalar_lea.vmem %s5258_s4, %s2656_s21 }
 0x2eb   : > { %v1823_v53 = vpop.f32.mrf.mxu0  ;;  %v1679_v61 = vsel %vm1655_vm11, %v1646_v15, %v1376_v57  ;;  %v1614_v12 = vsel %vm1589_vm9, %v1581_v52, %v4665_v0  ;;  %v2785_v15 = vld [vmem:[#allocation2 + $0x128] sm:$0xff]  ;;  %v5627_v57 = vld [vmem:[#allocation77_spill] sm:$0xff]  ;;  %v5628_v0 = vld [vmem:[#allocation99_spill] sm:$0xff] }
 0x2ec   : > { %1911 = vst.msk [vmem:[%s4576_s25 + $0x20] sm:$0xff] %vm1457_vm4, %v1823_v53  ;;  %v1946_v3 = vsel %vm1457_vm4, %v1823_v53, 0.0  ;;  %v2012_v42 = vmul.f32 %v1823_v53, %v1823_v53  ;;  %2682 = vmatmul.msk.f32.gmra.mxu2 %vm1693_vm12, %v1679_v61  ;;  %v1352_v20 = vpop.permute.xlu0 %1351  ;;  %v4775_v35 = vpop.f32.mrf.mxu3  ;;  %v1450_v23 = vsel %vm246_vm0, %v2785_v15, %v5627_v57 }
 0x2ed   : > { %v1947_v24 = vadd.f32 %v1946_v3, %v1945_v19  ;;  %v4764_v8 = vpop.f32.mrf.mxu1  ;;  %v1483_v36 = vsel %vm1457_vm4, %v1450_v23, %v5628_v0  ;;  %v5634_v23 = vld [vmem:[#allocation61_spill] sm:$0xff] }
 0x2ee   : > { %v2047_v32 = vsel %vm1457_vm4, %v2012_v42, 0.0  ;;  %v2369_v0 = vsel %vm1457_vm4, %v4764_v8, 0.0 }
 0x2ef   : > { %v2048_v29 = vadd.f32 %v2047_v32, %v2046_v44  ;;  %v1279_v44 = vpop.permute.xlu2 %1278 }
 0x2f0   : > { %1188 = vrot.lane.b32.xlu1 %v4689_v59, %s2802_s29 }
 0x2f2   : > { %v1251_v19 = vpop.permute.xlu1 %1250 }
 0x2f3   : > { %v1634_v63 = vsel %vm1622_vm10, %v1601_v16, %v1251_v19  ;;  %v5633_v16 = vld [vmem:[#allocation120_spill] sm:$0xff] }
 0x2f4   : > { %v1667_v59 = vsel %vm1655_vm11, %v1634_v63, %v1352_v20  ;;  %v1151_v43 = vpop.permute.xlu0 %1150  ;;  %v5630_v20 = vld [vmem:[#allocation56_spill] sm:$0xff] }
 0x2f5   : > { %2670 = vmatmul.msk.f32.gmra.mxu0 %vm1693_vm12, %v1667_v59  ;;  %v4780_v58 = vpop.f32.mrf.mxu1  ;;  %v1437_v39 = vsel %vm246_vm0, %v4119_v26, %v5630_v20 }
 0x2f6   : > { %v4796_v3 = vpop.f32.mrf.mxu3  ;;  %v1470_v33 = vsel %vm1457_vm4, %v1437_v39, %v5631_v1  ;;  %v5635_v39 = vld [vmem:[#allocation3_spill] sm:$0xff] }
 0x2f7   : > { %v4787_v53 = vpop.permute.xlu2 %1080  ;;  %v1503_v26 = vsel %vm1490_vm5, %v1470_v33, %v5632_v37 }
 0x2f8   : > { %v1536_v19 = vsel %vm1523_vm6, %v1503_v26, %v5633_v16  ;;  %v2370_v26 = vadd.f32 %v2369_v0, %v4741_v25  ;;  %v2371_v16 = vsel %vm1457_vm4, %v4780_v58, 0.0 }
 0x2f9   : > { %v1569_v34 = vsel %vm1556_vm7, %v1536_v19, %v4023_v10 }
 0x2fa   : > { %v1277_v46 = vpop.permute.xlu1 %1276  ;;  %v1602_v31 = vsel %vm1589_vm9, %v1569_v34, %v1151_v43 }
 0x2fb   : > { %v1647_v41 = vsel %vm1622_vm10, %v1614_v12, %v1277_v46  ;;  %v1635_v48 = vsel %vm1622_vm10, %v1602_v31, %v4729_v11 }
 0x2fc   : > { %v1680_v14 = vsel %vm1655_vm11, %v1647_v41, %v4695_v17  ;;  %v1177_v27 = vpop.permute.xlu0 %1176  ;;  %v5629_v17 = vld [vmem:[#allocation19_spill] sm:$0xff] }
 0x2fd   : > { %2683 = vmatmul.msk.f32.gmra.mxu2 %vm1693_vm12, %v1680_v14  ;;  %v1516_v42 = vsel %vm1490_vm5, %v1483_v36, %v5629_v17  ;;  %v4811_v62 = vpop.f32.mrf.mxu1 }
 0x2fe   : > { %v1549_v9 = vsel %vm1523_vm6, %v1516_v42, %v4003_v38  ;;  %v4825_v59 = vpop.f32.mrf.mxu3  ;;  %v2435_v34 = vmul.f32 %v4811_v62, %v4811_v62 }
 0x2ff   : > { %v4789_v61 = vpop.f32.mrf.mxu2 }
 0x300   : > { %1924 = vst.msk [vmem:[%s4576_s25 + $0x88] sm:$0xff] %vm1457_vm4, %v4789_v61 }
 0x302   : > { %v1079_v49 = vpop.permute.xlu1 %1078  ;;  %v1826_v7 = vpop.f32.mrf.mxu0 }
 0x303   : > { %v1582_v32 = vsel %vm1556_vm7, %v1549_v9, %v1079_v49  ;;  %1912 = vst.msk [vmem:[%s4576_s25 + $0x28] sm:$0xff] %vm1457_vm4, %v1826_v7  ;;  %v1948_v54 = vsel %vm1457_vm4, %v1826_v7, 0.0  ;;  %v2013_v13 = vmul.f32 %v1826_v7, %v1826_v7 }
 0x304   : > { %v1949_v56 = vadd.f32 %v1948_v54, %v1947_v24  ;;  %v1615_v38 = vsel %vm1589_vm9, %v1582_v32, %v1177_v27  ;;  %v1380_v50 = vpop.permute.xlu0 %1379  ;;  %v1356_v24 = vpop.permute.xlu2 %1355  ;;  %v2433_v27 = vmul.f32 %v4764_v8, %v4764_v8  ;;  %v2434_v32 = vmul.f32 %v4780_v58, %v4780_v58 }
 0x305   : > { %v2049_v22 = vsel %vm1457_vm4, %v2013_v13, 0.0  ;;  %v1648_v18 = vsel %vm1622_vm10, %v1615_v38, %v1279_v44  ;;  %v2289_v44 = vpop.f32.mrf.mxu1  ;;  %v5637_v13 = vld [vmem:[#allocation123_spill] sm:$0xff] }
 0x306   : > { %v2050_v63 = vadd.f32 %v2049_v22, %v2048_v29  ;;  %v1681_v45 = vsel %vm1655_vm11, %v1648_v18, %v1380_v50  ;;  %v2470_v8 = vsel %vm1457_vm4, %v2433_v27, 0.0  ;;  %v2472_v18 = vsel %vm1457_vm4, %v2434_v32, 0.0 }
 0x307   : > { %2684 = vmatmul.msk.f32.gmra.mxu2 %vm1693_vm12, %v1681_v45  ;;  %v2471_v19 = vadd.f32 %v2470_v8, %v4749_v28  ;;  %v2372_v45 = vadd.f32 %v2371_v16, %v2370_v26  ;;  %v5640_v26 = vld [vmem:[#allocation31_spill] sm:$0xff] }
 0x309   : > { %v4836_v43 = vpop.f32.mrf.mxu3 }
 0x30a   : > { %v1354_v55 = vpop.permute.xlu1 %1353 }
 0x30b   : > { %v1668_v51 = vsel %vm1655_vm11, %v1635_v48, %v1354_v55  ;;  %v2474_v48 = vsel %vm1457_vm4, %v2435_v34, 0.0 }
 0x30c   : > { %2671 = vmatmul.msk.f32.gmra.mxu0 %vm1693_vm12, %v1668_v51  ;;  %v1255_v10 = vpop.permute.xlu0 %1254  ;;  %v4838_v52 = vpop.permute.xlu2 %1154 }
 0x30d   : > { %v4842_v12 = vpop.f32.mrf.mxu1 }
 0x30e   : > { %v2437_v0 = vmul.f32 %v4842_v12, %v4842_v12 }
 0x310   : > { %v4831_v29 = vpop.f32.mrf.mxu2 }
 0x311   : > { %1925 = vst.msk [vmem:[%s4576_s25 + $0x90] sm:$0xff] %vm1457_vm4, %v4831_v29  ;;  %v4849_v57 = vpop.f32.mrf.mxu3 }
 0x312   : > { %v1153_v30 = vpop.permute.xlu1 %1152 }
 0x313   : > { %v1603_v11 = vsel %vm1589_vm9, %v4107_v5, %v1153_v30  ;;  %v1451_v5 = vsel %vm246_vm0, %v4215_v40, %v5634_v23  ;;  %v5636_v40 = vld [vmem:[#allocation114_spill] sm:$0xff]  ;;  %v2436_v30 = vmul.f32 %v2289_v44, %v2289_v44 }
 0x314   : > { %v1636_v46 = vsel %vm1622_vm10, %v1603_v11, %v1255_v10  ;;  %v1281_v41 = vpop.permute.xlu0 %1280  ;;  %v1484_v9 = vsel %vm1457_vm4, %v1451_v5, %v5635_v39 }
 0x315   : > { %v1669_v14 = vsel %vm1655_vm11, %v1636_v46, %v1356_v24  ;;  %v2295_v7 = vpop.f32.mrf.mxu1  ;;  %v1517_v1 = vsel %vm1490_vm5, %v1484_v9, %v5636_v40  ;;  %v2473_v24 = vadd.f32 %v2472_v18, %v2471_v19  ;;  %v2476_v5 = vsel %vm1457_vm4, %v2436_v30, 0.0  ;;  %v5638_v9 = vld [vmem:[#allocation75_spill] sm:$0xff] }
 0x316   : > { %2672 = vmatmul.msk.f32.gmra.mxu0 %vm1693_vm12, %v1669_v14  ;;  %v1550_v37 = vsel %vm1523_vm6, %v1517_v1, %v5637_v13  ;;  %v2375_v14 = vsel %vm1457_vm4, %v2289_v44, 0.0  ;;  %v2377_v44 = vsel %vm1457_vm4, %v4842_v12, 0.0  ;;  %v2379_v16 = vsel %vm1457_vm4, %v2295_v7, 0.0 }
 0x317   : > { %v1583_v50 = vsel %vm1556_vm7, %v1550_v37, %v4787_v53  ;;  %v2373_v53 = vsel %vm1457_vm4, %v4811_v62, 0.0  ;;  %v2478_v37 = vsel %vm1457_vm4, %v2437_v0, 0.0 }
 0x318   : > { %v2374_v46 = vadd.f32 %v2373_v53, %v2372_v45 }
 0x319   : > { %v1829_v15 = vpop.f32.mrf.mxu0  ;;  %v4884_v25 = vpop.f32.mrf.mxu3 }
 0x31a   : > { %1913 = vst.msk [vmem:[%s4576_s25 + $0x30] sm:$0xff] %vm1457_vm4, %v1829_v15  ;;  %v1950_v36 = vsel %vm1457_vm4, %v1829_v15, 0.0  ;;  %v2014_v17 = vmul.f32 %v1829_v15, %v1829_v15  ;;  %v1179_v42 = vpop.permute.xlu1 %1178  ;;  %v4859_v20 = vpop.f32.mrf.mxu2  ;;  %v2475_v15 = vadd.f32 %v2474_v48, %v2473_v24 }
 0x31b   : > { %v1951_v49 = vadd.f32 %v1950_v36, %v1949_v56  ;;  %1926 = vst.msk [vmem:[%s4576_s25 + $0x98] sm:$0xff] %vm1457_vm4, %v4859_v20  ;;  %v1181_v56 = vpop.permute.xlu2 %1180  ;;  %v1616_v22 = vsel %vm1589_vm9, %v1583_v50, %v1179_v42  ;;  %v2376_v36 = vadd.f32 %v2375_v14, %v2374_v46  ;;  %v1604_v42 = vsel %vm1589_vm9, %v4141_v6, %v4838_v52 }
 0x31c   : > { %v2051_v33 = vsel %vm1457_vm4, %v2014_v17, 0.0  ;;  %v1083_v54 = vpop.permute.xlu0 %1082  ;;  %v2477_v40 = vadd.f32 %v2476_v5, %v2475_v15  ;;  %v2438_v52 = vmul.f32 %v2295_v7, %v2295_v7  ;;  %v5643_v15 = vld [vmem:[#allocation102_spill] sm:$0xff] }
 0x31d   : > { %v2052_v38 = vadd.f32 %v2051_v33, %v2050_v63  ;;  %v1649_v63 = vsel %vm1622_vm10, %v1616_v22, %v1281_v41  ;;  %v2298_v55 = vpop.f32.mrf.mxu1  ;;  %v5639_v33 = vld [vmem:[#allocation93_spill] sm:$0xff] }
 0x31e   : > { %v2479_v22 = vadd.f32 %v2478_v37, %v2477_v40  ;;  %v2480_v18 = vsel %vm1457_vm4, %v2438_v52, 0.0  ;;  %v2439_v34 = vmul.f32 %v2298_v55, %v2298_v55 }
 0x320   : > { %v2481_v48 = vadd.f32 %v2480_v18, %v2479_v22 }
 0x321   : > { %v4904_v17 = vpop.f32.mrf.mxu3 }
 0x322   : > { %v1382_v31 = vpop.permute.xlu1 %1381 }
 0x323   : > { %v1832_v58 = vpop.f32.mrf.mxu0  ;;  %v1682_v28 = vsel %vm1655_vm11, %v1649_v63, %v1382_v31  ;;  %v1384_v27 = vpop.permute.xlu2 %1383 }
 0x324   : > { %1914 = vst.msk [vmem:[%s4576_s25 + $0x38] sm:$0xff] %vm1457_vm4, %v1832_v58  ;;  %v1952_v51 = vsel %vm1457_vm4, %v1832_v58, 0.0  ;;  %v2015_v10 = vmul.f32 %v1832_v58, %v1832_v58  ;;  %2685 = vmatmul.msk.f32.gmra.mxu2 %vm1693_vm12, %v1682_v28  ;;  %v1358_v11 = vpop.permute.xlu0 %1357  ;;  %v2381_v58 = vsel %vm1457_vm4, %v2298_v55, 0.0 }
 0x325   : > { %v4895_v41 = vadd.f32 %v1952_v51, %v1951_v49  ;;  %v1452_v49 = vsel %vm246_vm0, %v4308_v2, %v5638_v9  ;;  %v2301_v8 = vpop.f32.mrf.mxu1  ;;  %v5641_v2 = vld [vmem:[#allocation126_spill] sm:$0xff] }
 0x326   : > { %v2053_v62 = vsel %vm1457_vm4, %v2015_v10, 0.0  ;;  %v1485_v32 = vsel %vm1457_vm4, %v1452_v49, %v5639_v33  ;;  %v2482_v10 = vsel %vm1457_vm4, %v2439_v34, 0.0  ;;  %v2440_v30 = vmul.f32 %v2301_v8, %v2301_v8 }
 0x327   : > { %v4899_v23 = vadd.f32 %v2053_v62, %v2052_v38  ;;  %v1518_v12 = vsel %vm1490_vm5, %v1485_v32, %v5640_v26  ;;  %v2378_v38 = vadd.f32 %v2377_v44, %v2376_v36  ;;  %v2383_v46 = vsel %vm1457_vm4, %v2301_v8, 0.0  ;;  %v5644_v36 = vld [vmem:[#allocation107_spill] sm:$0xff] }
 0x328   : > { %v1551_v50 = vsel %vm1523_vm6, %v1518_v12, %v5641_v2  ;;  %v2483_v14 = vadd.f32 %v2482_v10, %v2481_v48  ;;  %v2484_v5 = vsel %vm1457_vm4, %v2440_v30, 0.0 }
 0x329   : > { %v1584_v19 = vsel %vm1556_vm7, %v1551_v50, %v1083_v54  ;;  %v2380_v63 = vadd.f32 %v2379_v16, %v2378_v38  ;;  %v4927_v53 = vpop.f32.mrf.mxu3 }
 0x32a   : > { %v1257_v39 = vpop.permute.xlu1 %1256  ;;  %v1617_v31 = vsel %vm1589_vm9, %v1584_v19, %v1181_v56  ;;  %v5642_v56 = vld [vmem:[#allocation80_spill] sm:$0xff]  ;;  %v2485_v37 = vadd.f32 %v2484_v5, %v2483_v14 }
 0x32b   : > { %v1637_v1 = vsel %vm1622_vm10, %v1604_v42, %v1257_v39  ;;  %v1259_v45 = vpop.permute.xlu2 %1258  ;;  %v1453_v62 = vsel %vm246_vm0, %v4325_v4, %v5642_v56  ;;  %v5645_v4 = vld [vmem:[#allocation49_spill] sm:$0xff] }
 0x32c   : > { %v1670_v13 = vsel %vm1655_vm11, %v1637_v1, %v1358_v11  ;;  %v1157_v6 = vpop.permute.xlu0 %1156  ;;  %v2382_v11 = vadd.f32 %v2381_v58, %v2380_v63 }
 0x32d   : > { %2673 = vmatmul.msk.f32.gmra.mxu0 %vm1693_vm12, %v1670_v13  ;;  %v2304_v7 = vpop.f32.mrf.mxu1 }
 0x32e   : > { %v2441_v0 = vmul.f32 %v2304_v7, %v2304_v7  ;;  %v2384_v39 = vadd.f32 %v2383_v46, %v2382_v11  ;;  %v2385_v1 = vsel %vm1457_vm4, %v2304_v7, 0.0  ;;  %v2444_v7 = vmul.f32 %v4751_v60, %v4751_v60 }
 0x32f   : > { %v2445_v11 = vmul.f32 %v4775_v35, %v4775_v35 }
 0x330   : > { %v2486_v2 = vsel %vm1457_vm4, %v2441_v0, 0.0  ;;  %v2386_v19 = vadd.f32 %v2385_v1, %v2384_v39  ;;  %v5647_v39 = vld [vmem:[#allocation67_spill] sm:$0xff]  ;;  %v5648_v1 = vld [vmem:[#allocation4_spill] sm:$0xff] }
 0x331   : > { %v4949_v44 = vpop.f32.mrf.mxu3 }
 0x332   : > { %v1283_v24 = vpop.permute.xlu1 %1282 }
 0x333   : > { %v1650_v28 = vsel %vm1622_vm10, %v1617_v31, %v1283_v24  ;;  %v1285_v8 = vpop.permute.xlu2 %1284  ;;  %v2487_v24 = vadd.f32 %v2486_v2, %v2485_v37  ;;  %v5649_v37 = vld [vmem:[#allocation32_spill] sm:$0xff] }
 0x334   : > { %v1683_v54 = vsel %vm1655_vm11, %v1650_v28, %v1384_v27  ;;  %v1183_v51 = vpop.permute.xlu0 %1182  ;;  %v1486_v27 = vsel %vm1457_vm4, %v1453_v62, %v5643_v15 }
 0x335   : > { %2686 = vmatmul.msk.f32.gmra.mxu2 %vm1693_vm12, %v1683_v54  ;;  %v1519_v42 = vsel %vm1490_vm5, %v1486_v27, %v5644_v36  ;;  %v2307_v52 = vpop.f32.mrf.mxu1  ;;  %v2393_v27 = vsel %vm1457_vm4, %v4775_v35, 0.0 }
 0x336   : > { %v1552_v9 = vsel %vm1523_vm6, %v1519_v42, %v5645_v4  ;;  %v2442_v22 = vmul.f32 %v2307_v52, %v2307_v52  ;;  %v2387_v63 = vsel %vm1457_vm4, %v2307_v52, 0.0  ;;  %v2786_v42 = vld [vmem:[#allocation2 + $0x158] sm:$0xff] }
 0x337   : > { %v4939_v55 = vpop.f32.mrf.mxu2  ;;  %v2388_v28 = vadd.f32 %v2387_v63, %v2386_v19  ;;  %v1454_v4 = vsel %vm246_vm0, %v2786_v42, %v5647_v39  ;;  %v2399_v63 = vsel %vm1457_vm4, %v4836_v43, 0.0 }
 0x338   : > { %1927 = vst.msk [vmem:[%s4576_s25 + $0xa0] sm:$0xff] %vm1457_vm4, %v4939_v55  ;;  %v2488_v58 = vsel %vm1457_vm4, %v2442_v22, 0.0 }
 0x339   : > { %v4974_v48 = vpop.f32.mrf.mxu3  ;;  %v2489_v10 = vadd.f32 %v2488_v58, %v2487_v24 }
 0x33a   : > { %v1085_v49 = vpop.permute.xlu1 %1084  ;;  %v1835_v40 = vpop.f32.mrf.mxu0 }
 0x33b   : > { %v1585_v33 = vsel %vm1556_vm7, %v1552_v9, %v1085_v49  ;;  %1915 = vst.msk [vmem:[%s4576_s25 + $0x40] sm:$0xff] %vm1457_vm4, %v1835_v40  ;;  %v1954_v32 = vsel %vm1457_vm4, %v1835_v40, 0.0  ;;  %v2016_v13 = vmul.f32 %v1835_v40, %v1835_v40  ;;  %v1185_v14 = vpop.permute.xlu2 %1184  ;;  %v2494_v9 = vsel %vm1457_vm4, %v2445_v11, 0.0 }
 0x33c   : > { %v4959_v26 = vadd.f32 %v1954_v32, %v4895_v41  ;;  %v1618_v12 = vsel %vm1589_vm9, %v1585_v33, %v1183_v51  ;;  %v1386_v38 = vpop.permute.xlu0 %1385  ;;  %v5646_v41 = vld [vmem:[#allocation130_spill] sm:$0xff]  ;;  %v2395_v49 = vsel %vm1457_vm4, %v4796_v3, 0.0  ;;  %v2447_v40 = vmul.f32 %v4825_v59, %v4825_v59 }
 0x33d   : > { %v2055_v50 = vsel %vm1457_vm4, %v2016_v13, 0.0  ;;  %v1651_v16 = vsel %vm1622_vm10, %v1618_v12, %v1285_v8  ;;  %v1605_v31 = vsel %vm1589_vm9, %v5646_v41, %v1157_v6  ;;  %v2310_v30 = vpop.f32.mrf.mxu1  ;;  %v2391_v6 = vsel %vm1457_vm4, %v4751_v60, 0.0 }
 0x33e   : > { %v4966_v18 = vadd.f32 %v2055_v50, %v4899_v23  ;;  %v1684_v34 = vsel %vm1655_vm11, %v1651_v16, %v1386_v38  ;;  %v1638_v54 = vsel %vm1622_vm10, %v1605_v31, %v1259_v45  ;;  %v2389_v56 = vsel %vm1457_vm4, %v2310_v30, 0.0  ;;  %v5650_v50 = vld [vmem:[#allocation124_spill] sm:$0xff] }
 0x33f   : > { %2687 = vmatmul.msk.f32.gmra.mxu2 %vm1693_vm12, %v1684_v34  ;;  %v2443_v62 = vmul.f32 %v2310_v30, %v2310_v30  ;;  %v2390_v15 = vadd.f32 %v2389_v56, %v2388_v28  ;;  %v2492_v45 = vsel %vm1457_vm4, %v2444_v7, 0.0  ;;  %v2446_v60 = vmul.f32 %v4796_v3, %v4796_v3 }
 0x340   : > { %v1487_v8 = vsel %vm1457_vm4, %v1454_v4, %v5648_v1  ;;  %v2397_v12 = vsel %vm1457_vm4, %v4825_v59, 0.0  ;;  %v2448_v38 = vmul.f32 %v4836_v43, %v4836_v43  ;;  %v2498_v34 = vsel %vm1457_vm4, %v2447_v40, 0.0 }
 0x341   : > { %v2490_v5 = vsel %vm1457_vm4, %v2443_v62, 0.0  ;;  %v2392_v0 = vadd.f32 %v2391_v6, %v2390_v15  ;;  %v5006_v13 = vpop.f32.mrf.mxu3  ;;  %v1520_v52 = vsel %vm1490_vm5, %v1487_v8, %v5649_v37  ;;  %v2496_v3 = vsel %vm1457_vm4, %v2446_v60, 0.0 }
 0x342   : > { %v1360_v23 = vpop.permute.xlu1 %1359  ;;  %v2491_v36 = vadd.f32 %v2490_v5, %v2489_v10  ;;  %v1553_v16 = vsel %vm1523_vm6, %v1520_v52, %v5650_v50  ;;  %v2449_v41 = vmul.f32 %v4849_v57, %v4849_v57  ;;  %v2500_v58 = vsel %vm1457_vm4, %v2448_v38, 0.0  ;;  %v5653_v52 = vld [vmem:[#allocation34_spill] sm:$0xff] }
 0x343   : > { %v1671_v51 = vsel %vm1655_vm11, %v1638_v54, %v1360_v23  ;;  %v2394_v33 = vadd.f32 %v2393_v27, %v2392_v0  ;;  %v2401_v28 = vsel %vm1457_vm4, %v4849_v57, 0.0  ;;  %v2450_v7 = vmul.f32 %v4884_v25, %v4884_v25  ;;  %v1089_v54 = vpop.permute.xlu2 %1088 }
 0x344   : > { %2674 = vmatmul.msk.f32.gmra.mxu0 %vm1693_vm12, %v1671_v51  ;;  %v1287_v46 = vpop.permute.xlu0 %1286  ;;  %v2493_v32 = vadd.f32 %v2492_v45, %v2491_v36  ;;  %v2502_v30 = vsel %vm1457_vm4, %v2449_v41, 0.0  ;;  %v2403_v6 = vsel %vm1457_vm4, %v4884_v25, 0.0  ;;  %v2451_v11 = vmul.f32 %v4904_v17, %v4904_v17 }
 0x345   : > { %v2396_v19 = vadd.f32 %v2395_v49, %v2394_v33  ;;  %v2504_v45 = vsel %vm1457_vm4, %v2450_v7, 0.0  ;;  %v2405_v25 = vsel %vm1457_vm4, %v4904_v17, 0.0  ;;  %v2452_v36 = vmul.f32 %v4927_v53, %v4927_v53  ;;  %v5652_v33 = vld [vmem:[#allocation95_spill] sm:$0xff] }
 0x346   : > { %v2495_v22 = vadd.f32 %v2494_v9, %v2493_v32  ;;  %v2506_v40 = vsel %vm1457_vm4, %v2451_v11, 0.0  ;;  %v2453_v8 = vmul.f32 %v4949_v44, %v4949_v44  ;;  %v2409_v38 = vsel %vm1457_vm4, %v4949_v44, 0.0 }
 0x347   : > { %v2398_v59 = vadd.f32 %v2397_v12, %v2396_v19  ;;  %v2508_v12 = vsel %vm1457_vm4, %v2452_v36, 0.0  ;;  %v2411_v44 = vsel %vm1457_vm4, %v4974_v48, 0.0 }
 0x348   : > { %v4999_v35 = vpop.f32.mrf.mxu2  ;;  %v2497_v24 = vadd.f32 %v2496_v3, %v2495_v22 }
 0x349   : > { %1928 = vst.msk [vmem:[%s4576_s25 + $0xa8] sm:$0xff] %vm1457_vm4, %v4999_v35  ;;  %v2400_v51 = vadd.f32 %v2399_v63, %v2398_v59  ;;  %v2349_v15 = vpop.f32.mrf.mxu3  ;;  %v5655_v63 = vld [vmem:[#allocation82_spill] sm:$0xff]  ;;  %v2510_v59 = vsel %vm1457_vm4, %v2453_v8, 0.0 }
 0x34a   : > { %v1087_v2 = vpop.permute.xlu1 %1086  ;;  %v2499_v10 = vadd.f32 %v2498_v34, %v2497_v24  ;;  %v2787_v34 = vld [vmem:[#allocation2 + $0x170] sm:$0xff]  ;;  %v2456_v11 = vmul.f32 %v2349_v15, %v2349_v15 }
 0x34b   : > { %v1586_v31 = vsel %vm1556_vm7, %v1553_v16, %v1087_v2  ;;  %v2402_v56 = vadd.f32 %v2401_v28, %v2400_v51  ;;  %v1390_v2 = vpop.permute.xlu2 %1389  ;;  %v1456_v41 = vsel %vm246_vm0, %v2787_v34, %v5655_v63 }
 0x34c   : > { %v1187_v23 = vpop.permute.xlu0 %1186  ;;  %v1619_v43 = vsel %vm1589_vm9, %v1586_v31, %v1185_v14  ;;  %v2501_v62 = vadd.f32 %v2500_v58, %v2499_v10 }
 0x34d   : > { %v1652_v27 = vsel %vm1622_vm10, %v1619_v43, %v1287_v46  ;;  %v5651_v46 = vld [vmem:[#allocation78_spill] sm:$0xff]  ;;  %v2404_v17 = vadd.f32 %v2403_v6, %v2402_v56  ;;  %v2455_v43 = vmul.f32 %v5006_v13, %v5006_v13 }
 0x34e   : > { %v1455_v4 = vsel %vm246_vm0, %v4493_v21, %v5651_v46  ;;  %v2503_v49 = vadd.f32 %v2502_v30, %v2501_v62  ;;  %v5656_v62 = vld [vmem:[#allocation5_spill] sm:$0xff] }
 0x34f   : > { %v1488_v32 = vsel %vm1457_vm4, %v1455_v4, %v5652_v33  ;;  %v2406_v21 = vadd.f32 %v2405_v25, %v2404_v17  ;;  %v2514_v25 = vsel %vm1457_vm4, %v2455_v43, 0.0  ;;  %v5658_v17 = vld [vmem:[#allocation129_spill] sm:$0xff] }
 0x350   : > { %v2505_v37 = vadd.f32 %v2504_v45, %v2503_v49  ;;  %v1521_v3 = vsel %vm1490_vm5, %v1488_v32, %v5653_v52  ;;  %v1489_v45 = vsel %vm1457_vm4, %v1456_v41, %v5656_v62 }
 0x351   : > { %v1838_v57 = vpop.f32.mrf.mxu0  ;;  %v2352_v24 = vpop.f32.mrf.mxu3 }
 0x352   : > { %1916 = vst.msk [vmem:[%s4576_s25 + $0x48] sm:$0xff] %vm1457_vm4, %v1838_v57  ;;  %v1956_v14 = vsel %vm1457_vm4, %v1838_v57, 0.0  ;;  %v2017_v60 = vmul.f32 %v1838_v57, %v1838_v57  ;;  %v1388_v5 = vpop.permute.xlu1 %1387  ;;  %v5039_v0 = vpop.f32.mrf.mxu2  ;;  %v2507_v22 = vadd.f32 %v2506_v40, %v2505_v37  ;;  %v2457_v36 = vmul.f32 %v2352_v24, %v2352_v24 }
 0x353   : > { %v1957_v42 = vadd.f32 %v1956_v14, %v4959_v26  ;;  %v1685_v39 = vsel %vm1655_vm11, %v1652_v27, %v1388_v5  ;;  %1929 = vst.msk [vmem:[%s4576_s25 + $0xb0] sm:$0xff] %vm1457_vm4, %v5039_v0  ;;  %v2407_v26 = vsel %vm1457_vm4, %v4927_v53, 0.0  ;;  %v2454_v53 = vmul.f32 %v4974_v48, %v4974_v48  ;;  %v1291_v8 = vpop.permute.xlu2 %1290 }
 0x354   : > { %v2057_v9 = vsel %vm1457_vm4, %v2017_v60, 0.0  ;;  %2688 = vmatmul.msk.f32.gmra.mxu2 %vm1693_vm12, %v1685_v39  ;;  %v1091_v16 = vpop.permute.xlu0 %1090  ;;  %v2408_v19 = vadd.f32 %v2407_v26, %v2406_v21  ;;  %v2509_v51 = vadd.f32 %v2508_v12, %v2507_v22  ;;  %v2415_v60 = vsel %vm1457_vm4, %v2349_v15, 0.0  ;;  %v5657_v39 = vld [vmem:[#allocation110_spill] sm:$0xff] }
 0x355   : > { %v2058_v1 = vadd.f32 %v2057_v9, %v4966_v18  ;;  %v5654_v18 = vld [vmem:[#allocation128_spill] sm:$0xff]  ;;  %v2512_v6 = vsel %vm1457_vm4, %v2454_v53, 0.0  ;;  %v1522_v46 = vsel %vm1490_vm5, %v1489_v45, %v5657_v39  ;;  %v2417_v49 = vsel %vm1457_vm4, %v2352_v24, 0.0 }
 0x356   : > { %v1554_v50 = vsel %vm1523_vm6, %v1521_v3, %v5654_v18  ;;  %v2410_v7 = vadd.f32 %v2409_v38, %v2408_v19  ;;  %v2511_v14 = vadd.f32 %v2510_v59, %v2509_v51  ;;  %v2516_v26 = vsel %vm1457_vm4, %v2456_v11, 0.0 }
 0x357   : > { %v1587_v31 = vsel %vm1556_vm7, %v1554_v50, %v1089_v54  ;;  %v2413_v54 = vsel %vm1457_vm4, %v5006_v13, 0.0  ;;  %v2518_v3 = vsel %vm1457_vm4, %v2457_v36, 0.0 }
 0x358   : > { %v1620_v58 = vsel %vm1589_vm9, %v1587_v31, %v1187_v23  ;;  %v2412_v56 = vadd.f32 %v2411_v44, %v2410_v7  ;;  %v2513_v9 = vadd.f32 %v2512_v6, %v2511_v14 }
 0x359   : > { %v2355_v32 = vpop.f32.mrf.mxu3 }
 0x35a   : > { %v1289_v28 = vpop.permute.xlu1 %1288  ;;  %v2414_v5 = vadd.f32 %v2413_v54, %v2412_v56  ;;  %v2515_v33 = vadd.f32 %v2514_v25, %v2513_v9  ;;  %v2458_v12 = vmul.f32 %v2355_v32, %v2355_v32 }
 0x35b   : > { %v1653_v10 = vsel %vm1622_vm10, %v1620_v58, %v1289_v28  ;;  %v1841_v30 = vpop.f32.mrf.mxu0 }
 0x35c   : > { %1917 = vst.msk [vmem:[%s4576_s25 + $0x50] sm:$0xff] %vm1457_vm4, %v1841_v30  ;;  %v1958_v48 = vsel %vm1457_vm4, %v1841_v30, 0.0  ;;  %v2018_v23 = vmul.f32 %v1841_v30, %v1841_v30  ;;  %v1686_v57 = vsel %vm1655_vm11, %v1653_v10, %v1390_v2  ;;  %v2416_v40 = vadd.f32 %v2415_v60, %v2414_v5  ;;  %v1392_v37 = vpop.permute.xlu0 %1391 }
 0x35d   : > { %v1959_v27 = vadd.f32 %v1958_v48, %v1957_v42  ;;  %2689 = vmatmul.msk.f32.gmra.mxu2 %vm1693_vm12, %v1686_v57  ;;  %v1555_v42 = vsel %vm1523_vm6, %v1522_v46, %v5658_v17  ;;  %v2517_v2 = vadd.f32 %v2516_v26, %v2515_v33  ;;  %v2520_v50 = vsel %vm1457_vm4, %v2458_v12, 0.0 }
 0x35e   : > { %v2059_v13 = vsel %vm1457_vm4, %v2018_v23, 0.0  ;;  %v1588_v15 = vsel %vm1556_vm7, %v1555_v42, %v1091_v16  ;;  %v2418_v52 = vadd.f32 %v2417_v49, %v2416_v40  ;;  %v1970_v12 = vsel %vm1457_vm4, %v4705_v47, 0.0 }
 0x35f   : > { %v2060_v4 = vadd.f32 %v2059_v13, %v2058_v1  ;;  %v2419_v1 = vsel %vm1457_vm4, %v2355_v32, 0.0  ;;  %v2519_v19 = vadd.f32 %v2518_v3, %v2517_v2  ;;  %v2024_v32 = vmul.f32 %v4705_v47, %v4705_v47 }
 0x360   : > { %v2420_v18 = vadd.f32 %v2419_v1, %v2418_v52  ;;  %v1974_v47 = vsel %vm1457_vm4, %v4831_v29, 0.0 }
 0x361   : > { %v2521_v34 = vadd.f32 %v2520_v50, %v2519_v19  ;;  %v2071_v50 = vsel %vm1457_vm4, %v2024_v32, 0.0  ;;  %v2026_v19 = vmul.f32 %v4831_v29, %v4831_v29  ;;  %v1978_v29 = vsel %vm1457_vm4, %v4939_v55, 0.0 }
 0x362   : > { %v1189_v21 = vpop.permute.xlu1 %1188  ;;  %v2421_v22 = vrot.slane %v2420_v18, 4 }
 0x363   : > { %v1621_v38 = vsel %vm1589_vm9, %v1588_v15, %v1189_v21  ;;  %v2522_v41 = vrot.slane %v2521_v34, 4 }
 0x364   : > { %v1654_v53 = vsel %vm1622_vm10, %v1621_v38, %v1291_v8  ;;  %v2422_v63 = vadd.f32 %v2421_v22, %v2420_v18  ;;  %v2025_v38 = vmul.f32 %v4789_v61, %v4789_v61 }
 0x365   : > { %v1687_v16 = vsel %vm1655_vm11, %v1654_v53, %v1392_v37  ;;  %v2523_v59 = vadd.f32 %v2522_v41, %v2521_v34  ;;  %v2027_v41 = vmul.f32 %v4859_v20, %v4859_v20 }
 0x366   : > { %2690 = vmatmul.msk.f32.gmra.mxu2 %vm1693_vm12, %v1687_v16  ;;  %v2423_v31 = vrot.slane %v2422_v63, 2  ;;  %v1972_v16 = vsel %vm1457_vm4, %v4789_v61, 0.0  ;;  %v1976_v61 = vsel %vm1457_vm4, %v4859_v20, 0.0  ;;  %v1980_v20 = vsel %vm1457_vm4, %v4999_v35, 0.0 }
 0x367   : > { %v2524_v24 = vrot.slane %v2523_v59, 2 }
 0x368   : > { %v2424_v44 = vadd.f32 %v2423_v31, %v2422_v63  ;;  %v2073_v63 = vsel %vm1457_vm4, %v2025_v38, 0.0 }
 0x369   : > { %v2525_v7 = vadd.f32 %v2524_v24, %v2523_v59  ;;  %v2028_v24 = vmul.f32 %v4939_v55, %v4939_v55  ;;  %v1982_v55 = vsel %vm1457_vm4, %v5039_v0, 0.0 }
 0x36a   : > { %v2425_v58 = vrot.slane %v2424_v44, 1 }
 0x36b   : > { %v2526_v51 = vrot.slane %v2525_v7, 1 }
 0x36c   : > { %v2426_v43 = vadd.f32 %v2425_v58, %v2424_v44  ;;  %v2075_v44 = vsel %vm1457_vm4, %v2026_v19, 0.0 }
 0x36d   : > { %v2527_v54 = vadd.f32 %v2526_v51, %v2525_v7  ;;  %v2029_v51 = vmul.f32 %v4999_v35, %v4999_v35 }
 0x36f   : > { %v5109_v28 = vpop.f32.mrf.mxu2  ;;  %v2528_v23 = vsel %vm2109_vm13, %v2426_v43, %v2527_v54  ;;  %v2077_v43 = vsel %vm1457_vm4, %v2027_v41, 0.0  ;;  %v2030_v54 = vmul.f32 %v5039_v0, %v5039_v0 }
 0x370   : > { %1930 = vst.msk [vmem:[%s4576_s25 + $0xb8] sm:$0xff] %vm1457_vm4, %v5109_v28  ;;  %v1984_v35 = vsel %vm1457_vm4, %v5109_v28, 0.0 }
 0x371   : > { %2529 = vst.msk [vmem:[%s245_s27] sm:$0x3] %vm2111_vm14, %v2528_v23  ;;  %v2081_v23 = vsel %vm1457_vm4, %v2029_v51, 0.0 }
 0x372   : > { %v1844_v10 = vpop.f32.mrf.mxu0 }
 0x373   : > { %1918 = vst.msk [vmem:[%s4576_s25 + $0x58] sm:$0xff] %vm1457_vm4, %v1844_v10  ;;  %v1960_v30 = vsel %vm1457_vm4, %v1844_v10, 0.0  ;;  %v2019_v6 = vmul.f32 %v1844_v10, %v1844_v10 }
 0x374   : > { %v1961_v11 = vadd.f32 %v1960_v30, %v1959_v27 }
 0x375   : > { %v2061_v48 = vsel %vm1457_vm4, %v2019_v6, 0.0  ;;  %v2079_v6 = vsel %vm1457_vm4, %v2028_v24, 0.0 }
 0x376   : > { %v2062_v57 = vadd.f32 %v2061_v48, %v2060_v4 }
 0x380   : > { %v5126_v56 = vpop.f32.mrf.mxu2 }
 0x381   : > { %1931 = vst.msk [vmem:[%s4576_s25 + $0xc0] sm:$0xff] %vm1457_vm4, %v5126_v56  ;;  %v1986_v0 = vsel %vm1457_vm4, %v5126_v56, 0.0 }
 0x389   : > { %v1847_v62 = vpop.f32.mrf.mxu0 }
 0x38a   : > { %1919 = vst.msk [vmem:[%s4576_s25 + $0x60] sm:$0xff] %vm1457_vm4, %v1847_v62  ;;  %v5133_v45 = vpop.f32.mrf.mxu2  ;;  %v2020_v13 = vmul.f32 %v1847_v62, %v1847_v62  ;;  %v1962_v25 = vsel %vm1457_vm4, %v1847_v62, 0.0 }
 0x38b   : > { %1932 = vst.msk [vmem:[%s4576_s25 + $0xc8] sm:$0xff] %vm1457_vm4, %v5133_v45  ;;  %v1963_v9 = vadd.f32 %v1962_v25, %v1961_v11 }
 0x38c   : > { %v2063_v39 = vsel %vm1457_vm4, %v2020_v13, 0.0  ;;  %v2032_v13 = vmul.f32 %v5126_v56, %v5126_v56 }
 0x38d   : > { %v2064_v42 = vadd.f32 %v2063_v39, %v2062_v57  ;;  %v2031_v57 = vmul.f32 %v5109_v28, %v5109_v28  ;;  %v1988_v28 = vsel %vm1457_vm4, %v5133_v45, 0.0 }
 0x38f   : > { %v2085_v39 = vsel %vm1457_vm4, %v2031_v57, 0.0 }
 0x393   : > { %v1850_v27 = vpop.f32.mrf.mxu0 }
 0x394   : > { %1920 = vst.msk [vmem:[%s4576_s25 + $0x68] sm:$0xff] %vm1457_vm4, %v1850_v27  ;;  %v2021_v36 = vmul.f32 %v1850_v27, %v1850_v27  ;;  %v1964_v46 = vsel %vm1457_vm4, %v1850_v27, 0.0 }
 0x395   : > { %v1965_v40 = vadd.f32 %v1964_v46, %v1963_v9  ;;  %v2033_v46 = vmul.f32 %v5133_v45, %v5133_v45 }
 0x396   : > { %v2065_v49 = vsel %vm1457_vm4, %v2021_v36, 0.0 }
 0x397   : > { %v2066_v15 = vadd.f32 %v2065_v49, %v2064_v42  ;;  %v2087_v49 = vsel %vm1457_vm4, %v2032_v13, 0.0 }
 0x3a7   : > { %v5140_v14 = vpop.f32.mrf.mxu2 }
 0x3a8   : > { %1933 = vst.msk [vmem:[%s4576_s25 + $0xd0] sm:$0xff] %vm1457_vm4, %v5140_v14  ;;  %v1990_v56 = vsel %vm1457_vm4, %v5140_v14, 0.0 }
 0x3aa   : > { %v1853_v60 = vpop.f32.mrf.mxu0 }
 0x3ab   : > { %1921 = vst.msk [vmem:[%s4576_s25 + $0x70] sm:$0xff] %vm1457_vm4, %v1853_v60  ;;  %v2022_v4 = vmul.f32 %v1853_v60, %v1853_v60  ;;  %v1966_v17 = vsel %vm1457_vm4, %v1853_v60, 0.0  ;;  %v2083_v60 = vsel %vm1457_vm4, %v2030_v54, 0.0 }
 0x3ac   : > { %v1967_v8 = vadd.f32 %v1966_v17, %v1965_v40  ;;  %v2034_v17 = vmul.f32 %v5140_v14, %v5140_v14 }
 0x3ad   : > { %v2067_v26 = vsel %vm1457_vm4, %v2022_v4, 0.0 }
 0x3ae   : > { %v2068_v3 = vadd.f32 %v2067_v26, %v2066_v15  ;;  %v2089_v15 = vsel %vm1457_vm4, %v2033_v46, 0.0  ;;  %v2091_v32 = vsel %vm1457_vm4, %v2034_v17, 0.0 }
 0x3b8   : > { %v5147_v5 = vpop.f32.mrf.mxu2 }
 0x3b9   : > { %1934 = vst.msk [vmem:[%s4576_s25 + $0xd8] sm:$0xff] %vm1457_vm4, %v5147_v5  ;;  %v2035_v45 = vmul.f32 %v5147_v5, %v5147_v5 }
 0x3c1   : > { %v1856_v33 = vpop.f32.mrf.mxu0 }
 0x3c2   : > { %1922 = vst.msk [vmem:[%s4576_s25 + $0x78] sm:$0xff] %vm1457_vm4, %v1856_v33  ;;  %v1968_v21 = vsel %vm1457_vm4, %v1856_v33, 0.0  ;;  %v2023_v37 = vmul.f32 %v1856_v33, %v1856_v33  ;;  %v5163_v52 = vpop.f32.mrf.mxu2 }
 0x3c3   : > { %v1969_v1 = vadd.f32 %v1968_v21, %v1967_v8  ;;  %1935 = vst.msk [vmem:[%s4576_s25 + $0xe0] sm:$0xff] %vm1457_vm4, %v5163_v52  ;;  %v1994_v38 = vsel %vm1457_vm4, %v5163_v52, 0.0 }
 0x3c4   : > { %v2069_v2 = vsel %vm1457_vm4, %v2023_v37, 0.0  ;;  %v1992_v37 = vsel %vm1457_vm4, %v5147_v5, 0.0 }
 0x3c5   : > { %v1971_v53 = vadd.f32 %v1970_v12, %v1969_v1  ;;  %v2070_v18 = vadd.f32 %v2069_v2, %v2068_v3  ;;  %v2093_v1 = vsel %vm1457_vm4, %v2035_v45, 0.0  ;;  %v2036_v12 = vmul.f32 %v5163_v52, %v5163_v52 }
 0x3c7   : > { %v1973_v22 = vadd.f32 %v1972_v16, %v1971_v53  ;;  %v2072_v34 = vadd.f32 %v2071_v50, %v2070_v18  ;;  %v2095_v18 = vsel %vm1457_vm4, %v2036_v12, 0.0 }
 0x3c9   : > { %v1975_v31 = vadd.f32 %v1974_v47, %v1973_v22  ;;  %v2074_v59 = vadd.f32 %v2073_v63, %v2072_v34 }
 0x3cb   : > { %v1977_v58 = vadd.f32 %v1976_v61, %v1975_v31  ;;  %v2076_v7 = vadd.f32 %v2075_v44, %v2074_v59 }
 0x3cd   : > { %v1979_v10 = vadd.f32 %v1978_v29, %v1977_v58  ;;  %v2078_v30 = vadd.f32 %v2077_v43, %v2076_v7 }
 0x3cf   : > { %v1981_v11 = vadd.f32 %v1980_v20, %v1979_v10  ;;  %v2080_v48 = vadd.f32 %v2079_v6, %v2078_v30 }
 0x3d1   : > { %v2082_v62 = vadd.f32 %v2081_v23, %v2080_v48  ;;  %v1983_v27 = vadd.f32 %v1982_v55, %v1981_v11 }
 0x3d3   : > { %v1985_v25 = vadd.f32 %v1984_v35, %v1983_v27  ;;  %v2084_v36 = vadd.f32 %v2083_v60, %v2082_v62 }
 0x3d5   : > { %v1987_v4 = vadd.f32 %v1986_v0, %v1985_v25  ;;  %v2086_v9 = vadd.f32 %v2085_v39, %v2084_v36 }
 0x3d7   : > { %v1989_v42 = vadd.f32 %v1988_v28, %v1987_v4  ;;  %v2088_v40 = vadd.f32 %v2087_v49, %v2086_v9  ;;  %v1898_v26 = vpop.f32.mrf.mxu2 }
 0x3d8   : > { %1936 = vst.msk [vmem:[%s4576_s25 + $0xe8] sm:$0xff] %vm1457_vm4, %v1898_v26  ;;  %v2037_v50 = vmul.f32 %v1898_v26, %v1898_v26  ;;  %v1996_v5 = vsel %vm1457_vm4, %v1898_v26, 0.0 }
 0x3d9   : > { %v1991_v8 = vadd.f32 %v1990_v56, %v1989_v42  ;;  %v2090_v33 = vadd.f32 %v2089_v15, %v2088_v40 }
 0x3da   : > { %v2097_v34 = vsel %vm1457_vm4, %v2037_v50, 0.0 }
 0x3db   : > { %v2092_v21 = vadd.f32 %v2091_v32, %v2090_v33  ;;  %v1993_v3 = vadd.f32 %v1992_v37, %v1991_v8 }
 0x3dd   : > { %v2094_v14 = vadd.f32 %v2093_v1, %v2092_v21  ;;  %v1995_v53 = vadd.f32 %v1994_v38, %v1993_v3 }
 0x3df   : > { %v2096_v16 = vadd.f32 %v2095_v18, %v2094_v14  ;;  %v1997_v22 = vadd.f32 %v1996_v5, %v1995_v53 }
 0x3e0   : > { %v1901_v2 = vpop.f32.mrf.mxu2 }
 0x3e1   : > { %1937 = vst.msk [vmem:[%s4576_s25 + $0xf0] sm:$0xff] %vm1457_vm4, %v1901_v2  ;;  %v2038_v19 = vmul.f32 %v1901_v2, %v1901_v2  ;;  %v1998_v63 = vsel %vm1457_vm4, %v1901_v2, 0.0  ;;  %v2098_v47 = vadd.f32 %v2097_v34, %v2096_v16 }
 0x3e2   : > { %v1999_v41 = vadd.f32 %v1998_v63, %v1997_v22 }
 0x3e3   : > { %v2099_v52 = vsel %vm1457_vm4, %v2038_v19, 0.0 }
 0x3e4   : > { %v2100_v61 = vadd.f32 %v2099_v52, %v2098_v47 }
 0x3e9   : > { %v1904_v31 = vpop.f32.mrf.mxu2 }
 0x3ea   : > { %1938 = vst.msk [vmem:[%s4576_s25 + $0xf8] sm:$0xff] %vm1457_vm4, %v1904_v31  ;;  %v2000_v59 = vsel %vm1457_vm4, %v1904_v31, 0.0  ;;  %v2039_v44 = vmul.f32 %v1904_v31, %v1904_v31 }
 0x3eb   : > { %v2001_v24 = vadd.f32 %v2000_v59, %v1999_v41 }
 0x3ec   : > { %v2101_v58 = vsel %vm1457_vm4, %v2039_v44, 0.0 }
 0x3ed   : > { %v2002_v7 = vrot.slane %v2001_v24, 4  ;;  %v2102_v43 = vadd.f32 %v2101_v58, %v2100_v61 }
 0x3ef   : > { %v2003_v29 = vadd.f32 %v2002_v7, %v2001_v24  ;;  %v2103_v51 = vrot.slane %v2102_v43, 4 }
 0x3f1   : > { %v2004_v10 = vrot.slane %v2003_v29, 2  ;;  %v2104_v30 = vadd.f32 %v2103_v51, %v2102_v43 }
 0x3f3   : > { %v2005_v6 = vadd.f32 %v2004_v10, %v2003_v29  ;;  %v2105_v20 = vrot.slane %v2104_v30, 2 }
 0x3f5   : > { %v2006_v54 = vrot.slane %v2005_v6, 1  ;;  %v2106_v11 = vadd.f32 %v2105_v20, %v2104_v30 }
 0x3f7   : > { %v2107_v48 = vrot.slane %v2106_v11, 1  ;;  %v2007_v23 = vadd.f32 %v2006_v54, %v2005_v6 }
 0x3f9   : > { %v2108_v55 = vadd.f32 %v2107_v48, %v2106_v11 }
 0x3fb   : > { %v2110_v57 = vsel %vm2109_vm13, %v2007_v23, %v2108_v55 }
 0x3fc   : > { %2112 = vst.msk [vmem:[%s241_s30] sm:$0x3] %vm2111_vm14, %v2110_v57 }
 0x3fd PF: > { %s16_s18 = sadd.s32 1, %s2794_s18  }
 0x3fe   : > { %p13_p4 = scmp.ge.s32.totalorder %s16_s18, 4  }
 0x400   :  { %15 = sbr.rel (!%p13_p4) target bundleno = 1 (0x1), region = 87 }

</bundles_post_ra>
